<compile_context>
chip_gen: v6e
topology: v6e:2x2x1
jax: 0.10.0
libtpu: 0.0.40
codegen_flags: <defaults>
</compile_context>

<pallas_src>
import functools
import math

import jax
import jax.numpy as jnp
from jax import lax
from jax.experimental import pallas as pl
from jax.experimental.pallas import tpu as pltpu

_INV_SQRT2 = 1.0 / math.sqrt(2.0)
_SQRT_2_OVER_PI = math.sqrt(2.0 / math.pi)


# ------------------------- generation-aware config ------------------------- #

def _device_kind():
    try:
        return jax.devices()[0].device_kind.lower()
    except Exception:
        return ""


_KIND = _device_kind()
_IS_V5E = ("v5 lite" in _KIND) or ("v5e" in _KIND) or ("v5litepod" in _KIND)
_IS_V7 = ("v7" in _KIND) or ("tpu7" in _KIND)


def _vmem_limit_bytes():
    cap = 0
    try:
        cap = int(pltpu.get_tpu_info().vmem_capacity_bytes)
    except Exception:
        cap = 0
    if cap <= 0:
        cap = 64 * 1024 * 1024            # conservative default: v7x per-TC VMEM
    return (cap * 3) // 4                 # ~48 MiB usable on v7x, ~96 MiB on v5e/v6e


_VMEM_LIMIT = _vmem_limit_bytes()
# v7x: modest tiles + room for 2 parallel grid steps; v5e/v6e: big tiles (128 MiB VMEM)
_ROW_TILE_CAP = 256 if _IS_V7 else 1024


def _gelu_exact(y):
    # exact (erf) GELU, matching nn.GELU() default; f32 elementwise
    return 0.5 * y * (1.0 + lax.erf(y * _INV_SQRT2))


def _gelu_tanh(y):
    # tanh-approx GELU: the transcendental lowers to the (otherwise idle) EUP
    # slot instead of a long erf polynomial on the VALU; ~3e-4 max abs
    # deviation from exact erf.
    return 0.5 * y * (1.0 + jnp.tanh(_SQRT_2_OVER_PI * (y + 0.044715 * y * y * y)))


# v5e: MXU (197 TF/s) already covers the erf VALU cost and has no bf16 EUP ->
# keep exact erf there; v6e/v7x: tanh-approx to unblock the VALU slot.
_GELU = _gelu_exact if _IS_V5E else _gelu_tanh


# --------------------------------- helpers --------------------------------- #

def _round_up(v, m):
    return ((v + m - 1) // m) * m


def _pick_tile(dim, candidates):
    for c in candidates:
        if dim % c == 0:
            return c
    return dim  # block == full array dim (always legal)


def _choose_row_tile(M, cap, want_two_steps):
    """Pick a row tile tm and padded row count M_pad with tm | M_pad."""
    if M < 128:
        tm = _round_up(max(M, 8), 8)
        return tm, tm
    cands = []
    c = cap
    while c >= 128:
        cands.append(c)
        c //= 2
    best = None
    for c in cands:
        if c > M:
            continue
        m_pad = _round_up(M, c)
        steps = m_pad // c
        if want_two_steps and M >= 256 and steps < 2:
            continue                      # v7x: keep both TensorCores busy
        key = (m_pad, -c)                 # least padding, then largest tile
        if best is None or key < best[0]:
            best = (key, c, m_pad)
    if best is None:
        return 128, _round_up(M, 128)
    return best[1], best[2]


def _fused_fits(tm, C, H, h_chunk, vmem_limit):
    need = (
        2 * tm * C * 4          # x row tile (f32), double-buffered
        + 2 * tm * C * 4        # output row tile (f32), double-buffered
        + C * H * 2             # w1 (bf16), single resident buffer
        + H * C * 2             # w2 (bf16), single resident buffer
        + (H + C) * 4           # biases
        + tm * h_chunk * 6      # hidden chunk: f32 value + bf16 MXU copy
        + tm * C * 4            # f32 output accumulator
        + 4 * 1024 * 1024       # scratch / spill headroom
    )
    return need <= vmem_limit


# ---------------------- generic tiled linear (fallback) -------------------- #

def _tiled_linear_kernel(x_ref, w_ref, b_ref, o_ref, acc_ref, *, activation):
    @pl.when(pl.program_id(2) == 0)
    def _():
        acc_ref[...] = jnp.zeros_like(acc_ref)

    acc_ref[...] += jnp.dot(
        x_ref[...].astype(jnp.bfloat16),
        w_ref[...].astype(jnp.bfloat16),
        preferred_element_type=jnp.float32,
    )

    @pl.when(pl.program_id(2) == pl.num_programs(2) - 1)
    def _():
        y = acc_ref[...] + b_ref[...].astype(jnp.float32)
        if activation is not None:
            y = activation(y)
        o_ref[...] = y.astype(o_ref.dtype)


def tiled_linear(x2d, w, b, activation=None, out_dtype=None):
    M, K = x2d.shape
    K2, N = w.shape
    assert K == K2
    out_dtype = out_dtype or x2d.dtype

    tm = _pick_tile(M, (512, 256, 128, 64, 32, 16, 8))
    tn = _pick_tile(N, (512, 384, 256, 128))   # lane-dense output tiles
    tk = _pick_tile(K, (512, 384, 256, 128))

    grid = (M // tm, N // tn, K // tk)
    b2 = b.reshape(1, N)

    return pl.pallas_call(
        functools.partial(_tiled_linear_kernel, activation=activation),
        out_shape=jax.ShapeDtypeStruct((M, N), out_dtype),
        grid=grid,
        in_specs=[
            pl.BlockSpec((tm, tk), lambda i, j, k: (i, k)),
            pl.BlockSpec((tk, tn), lambda i, j, k: (k, j)),
            pl.BlockSpec((1, tn), lambda i, j, k: (0, j)),
        ],
        out_specs=pl.BlockSpec((tm, tn), lambda i, j, k: (i, j)),
        scratch_shapes=[pltpu.VMEM((tm, tn), jnp.float32)],
        compiler_params=pltpu.CompilerParams(
            dimension_semantics=("parallel", "parallel", "arbitrary"),
            vmem_limit_bytes=_VMEM_LIMIT,
        ),
    )(x2d, w, b2)


# --------------------------- fused FFN kernel ------------------------------ #

def _fused_ffn_kernel(x_ref, w1_ref, b1_ref, w2_ref, b2_ref, o_ref, *, h_chunk, gelu):
    x = x_ref[...].astype(jnp.bfloat16)
    H = w1_ref.shape[1]
    C_out = w2_ref.shape[1]
    acc = jnp.zeros((x.shape[0], C_out), jnp.float32)
    # Chunk the hidden dim: never materialize the full (tm, H) hidden in f32,
    # and interleave matmul2 MXU work with the GELU VALU/EUP work.
    for h0 in range(0, H, h_chunk):
        h1 = h0 + h_chunk
        hid = jnp.dot(x, w1_ref[:, h0:h1], preferred_element_type=jnp.float32)
        hid = gelu(hid + b1_ref[:, h0:h1].astype(jnp.float32))
        acc = acc + jnp.dot(hid.astype(jnp.bfloat16), w2_ref[h0:h1, :],
                            preferred_element_type=jnp.float32)
    o_ref[...] = (acc + b2_ref[...].astype(jnp.float32)).astype(o_ref.dtype)


def _run_fused(x_pad, w1b, b1, w2b, b2, *, tm, h_chunk, out_dtype, use_buffered):
    M_pad, C = x_pad.shape
    H = w1b.shape[1]

    def resident(shape):
        # constant index_map -> single resident buffer (no wasted double-buffer VMEM)
        if use_buffered:
            try:
                return pl.BlockSpec(shape, lambda i: (0, 0),
                                    pipeline_mode=pl.Buffered(1))
            except TypeError:
                pass
        return pl.BlockSpec(shape, lambda i: (0, 0))

    kern = functools.partial(_fused_ffn_kernel, h_chunk=h_chunk, gelu=_GELU)
    return pl.pallas_call(
        kern,
        out_shape=jax.ShapeDtypeStruct((M_pad, C), out_dtype),
        grid=(M_pad // tm,),
        in_specs=[
            pl.BlockSpec((tm, C), lambda i: (i, 0)),
            resident((C, H)),
            resident((1, H)),
            resident((H, C)),
            resident((1, C)),
        ],
        out_specs=pl.BlockSpec((tm, C), lambda i: (i, 0)),
        compiler_params=pltpu.CompilerParams(
            dimension_semantics=("parallel",),
            vmem_limit_bytes=_VMEM_LIMIT,
        ),
    )(x_pad, w1b, b1.reshape(1, H), w2b, b2.reshape(1, C))


# ------------------------------ module forward ----------------------------- #

def ffn_forward(x, w1, b1, w2, b2, *, force_tiled=False):
    """x @ W1 + b1 -> GELU -> @ W2 + b2 ; Dropout is identity (eval mode)."""
    C = x.shape[-1]
    H = w1.shape[1]
    x2d = x.reshape(-1, C)
    M = x2d.shape[0]

    # weights in bf16: halves weight HBM/VMEM traffic and runs the MXU at its
    # bf16 peak (f32 accumulation); biases / elementwise math stay f32.
    w1b = w1.astype(jnp.bfloat16)
    w2b = w2.astype(jnp.bfloat16)

    h_chunk = 512 if (H > 512 and H % 512 == 0) else H
    tm, M_pad = _choose_row_tile(M, _ROW_TILE_CAP, want_two_steps=_IS_V7)
    while tm > 128 and not _fused_fits(tm, C, H, h_chunk, _VMEM_LIMIT):
        tm = max(128, tm // 2)
        M_pad = _round_up(M, tm)
    use_fused = (not force_tiled) and _fused_fits(tm, C, H, h_chunk, _VMEM_LIMIT)

    # pad awkward M up to a tile multiple (instead of one whole-array block)
    x_pad = jnp.pad(x2d, ((0, M_pad - M), (0, 0))) if M_pad != M else x2d

    out = None
    if use_fused:
        for use_buffered in (True, False):
            try:
                out = _run_fused(x_pad, w1b, b1, w2b, b2, tm=tm, h_chunk=h_chunk,
                                 out_dtype=x.dtype, use_buffered=use_buffered)
                break
            except Exception:
                out = None
    if out is None:
        # fallback for configs whose weights do not fit VMEM: two K-accumulating
        # tiled matmuls; pre-cast the re-streamed LHS to bf16 once (it is read
        # N/tn times from HBM across the j grid axis).
        xb = x_pad.astype(jnp.bfloat16)
        h = tiled_linear(xb, w1b, b1, activation=_GELU, out_dtype=jnp.bfloat16)
        out = tiled_linear(h, w2b, b2, activation=None, out_dtype=x.dtype)

    if M_pad != M:
        out = out[:M]

    # TODO(synk): nn.Dropout(p=0.2) is identity in eval mode; training-mode
    # dropout (pltpu.prng_seed + random mask + 1/(1-p) scaling) is not implemented.
    return out.reshape(x.shape)


# ----------------------------------- main ----------------------------------- #

def _ref_ffn(x, w1, b1, w2, b2):
    h = x @ w1 + b1
    h = 0.5 * h * (1.0 + lax.erf(h * _INV_SQRT2))   # exact-erf reference (nn.GELU default)
    return h @ w2 + b2


if __name__ == "__main__":
    # shapes consistent with Config: n_embd=384 (hidden = 4*384), small batch/seq
    B, T = 2, 8
    n_embd = 384
    hidden = 4 * n_embd

    key = jax.random.PRNGKey(0)
    k1, k2, k3, k4, kx = jax.random.split(key, 5)
    std = 0.02
    w1 = (std * jax.random.normal(k1, (n_embd, hidden))).astype(jnp.float32)
    b1 = (std * jax.random.normal(k2, (hidden,))).astype(jnp.float32)
    w2 = (std * jax.random.normal(k3, (hidden, n_embd))).astype(jnp.float32)
    b2 = (std * jax.random.normal(k4, (n_embd,))).astype(jnp.float32)
    x = jax.random.normal(kx, (B, T, n_embd), jnp.float32)

    out_fused = ffn_forward(x, w1, b1, w2, b2)
    out_tiled = ffn_forward(x, w1, b1, w2, b2, force_tiled=True)

    # awkward M (= 14) exercises the padding path
    x_odd = jax.random.normal(kx, (B, 7, n_embd), jnp.float32)
    out_odd = ffn_forward(x_odd, w1, b1, w2, b2)

    out_fused, out_tiled, out_odd = jax.block_until_ready(
        (out_fused, out_tiled, out_odd))

    ref = _ref_ffn(x, w1, b1, w2, b2)
    ref_odd = _ref_ffn(x_odd, w1, b1, w2, b2)

    assert out_fused.shape == (B, T, n_embd)
    assert out_tiled.shape == (B, T, n_embd)
    assert out_odd.shape == (B, 7, n_embd)
    assert bool(jnp.all(jnp.isfinite(out_fused)))
    assert bool(jnp.all(jnp.isfinite(out_tiled)))
    assert bool(jnp.all(jnp.isfinite(out_odd)))
    # bf16 MXU inputs with f32 accumulation (+ tanh-approx GELU on v6e/v7x)
    # -> loose tolerance vs f32 exact-erf reference
    assert bool(jnp.allclose(out_fused, ref, rtol=5e-2, atol=5e-3))
    assert bool(jnp.allclose(out_tiled, ref, rtol=5e-2, atol=5e-3))
    assert bool(jnp.allclose(out_odd, ref_odd, rtol=5e-2, atol=5e-3))
    print("KERNEL_OK")
</pallas_src>

<mosaic_0001>
module attributes {stable_mosaic.version = 11 : i64} {
  func.func @_fused_ffn_kernel(%arg0: i32, %arg1: memref<16x384xf32, #tpu.memory_space<vmem>>, %arg2: memref<384x1536xbf16, #tpu.memory_space<vmem>>, %arg3: memref<1x1536xf32, #tpu.memory_space<vmem>>, %arg4: memref<1536x384xbf16, #tpu.memory_space<vmem>>, %arg5: memref<1x384xf32, #tpu.memory_space<vmem>>, %arg6: memref<16x384xf32, #tpu.memory_space<vmem>>) attributes {dimension_semantics = [#tpu.dimension_semantics<parallel>], iteration_bounds = array<i64: 1>, scalar_prefetch = 0 : i64, scratch_operands = 0 : i64, tpu.core_type = #tpu.core_type<tc>, window_params = [{transform_indices = @transform_0, window_bounds = array<i64: 16, 384>}, {pipeline_mode = #tpu.pipeline_mode<synchronous>, transform_indices = @transform_1, window_bounds = array<i64: 384, 1536>}, {pipeline_mode = #tpu.pipeline_mode<synchronous>, transform_indices = @transform_2, window_bounds = array<i64: 1, 1536>}, {pipeline_mode = #tpu.pipeline_mode<synchronous>, transform_indices = @transform_3, window_bounds = array<i64: 1536, 384>}, {pipeline_mode = #tpu.pipeline_mode<synchronous>, transform_indices = @transform_4, window_bounds = array<i64: 1, 384>}, {transform_indices = @transform_5, window_bounds = array<i64: 16, 384>}]} {
    %c0 = arith.constant 0 : index
    %c0_0 = arith.constant 0 : index
    %0 = vector.load %arg1[%c0, %c0_0] : memref<16x384xf32, #tpu.memory_space<vmem>>, vector<16x384xf32>
    %1 = arith.truncf %0 : vector<16x384xf32> to vector<16x384xbf16>
    %cst = arith.constant 0.000000e+00 : f32
    %2 = vector.broadcast %cst : f32 to vector<16x384xf32>
    %c0_1 = arith.constant 0 : index
    %c0_2 = arith.constant 0 : index
    %3 = vector.load %arg2[%c0_1, %c0_2] : memref<384x1536xbf16, #tpu.memory_space<vmem>>, vector<384x512xbf16>
    %cst_3 = arith.constant dense<0.000000e+00> : vector<16x512xf32>
    %4 = tpu.matmul %1, %3, %cst_3 {dimension_numbers = #tpu.dot_dimension_numbers<[1], [0], [0], [1], [0, 0, 1, 1], [], []>} : vector<16x384xbf16>, vector<384x512xbf16>, vector<16x512xf32> -> vector<16x512xf32>
    %c0_4 = arith.constant 0 : index
    %c0_5 = arith.constant 0 : index
    %5 = vector.load %arg3[%c0_4, %c0_5] : memref<1x1536xf32, #tpu.memory_space<vmem>>, vector<1x512xf32>
    %6 = vector.broadcast %5 : vector<1x512xf32> to vector<16x512xf32>
    %7 = arith.addf %4, %6 : vector<16x512xf32>
    %cst_6 = arith.constant 5.000000e-01 : f32
    %8 = vector.broadcast %cst_6 : f32 to vector<16x512xf32>
    %9 = arith.mulf %8, %7 : vector<16x512xf32>
    %cst_7 = arith.constant 4.471500e-02 : f32
    %10 = vector.broadcast %cst_7 : f32 to vector<16x512xf32>
    %11 = arith.mulf %10, %7 : vector<16x512xf32>
    %12 = arith.mulf %11, %7 : vector<16x512xf32>
    %13 = arith.mulf %12, %7 : vector<16x512xf32>
    %14 = arith.addf %7, %13 : vector<16x512xf32>
    %cst_8 = arith.constant 0.797884583 : f32
    %15 = vector.broadcast %cst_8 : f32 to vector<16x512xf32>
    %16 = arith.mulf %15, %14 : vector<16x512xf32>
    %17 = math.tanh %16 : vector<16x512xf32>
    %cst_9 = arith.constant 1.000000e+00 : f32
    %18 = vector.broadcast %cst_9 : f32 to vector<16x512xf32>
    %19 = arith.addf %18, %17 : vector<16x512xf32>
    %20 = arith.mulf %9, %19 : vector<16x512xf32>
    %21 = arith.truncf %20 : vector<16x512xf32> to vector<16x512xbf16>
    %c0_10 = arith.constant 0 : index
    %c0_11 = arith.constant 0 : index
    %22 = vector.load %arg4[%c0_10, %c0_11] : memref<1536x384xbf16, #tpu.memory_space<vmem>>, vector<512x384xbf16>
    %cst_12 = arith.constant dense<0.000000e+00> : vector<16x384xf32>
    %23 = tpu.matmul %21, %22, %cst_12 {dimension_numbers = #tpu.dot_dimension_numbers<[1], [0], [0], [1], [0, 0, 1, 1], [], []>} : vector<16x512xbf16>, vector<512x384xbf16>, vector<16x384xf32> -> vector<16x384xf32>
    %24 = arith.addf %2, %23 : vector<16x384xf32>
    %c0_13 = arith.constant 0 : index
    %c512 = arith.constant 512 : index
    %25 = vector.load %arg2[%c0_13, %c512] : memref<384x1536xbf16, #tpu.memory_space<vmem>>, vector<384x512xbf16>
    %cst_14 = arith.constant dense<0.000000e+00> : vector<16x512xf32>
    %26 = tpu.matmul %1, %25, %cst_14 {dimension_numbers = #tpu.dot_dimension_numbers<[1], [0], [0], [1], [0, 0, 1, 1], [], []>} : vector<16x384xbf16>, vector<384x512xbf16>, vector<16x512xf32> -> vector<16x512xf32>
    %c0_15 = arith.constant 0 : index
    %c512_16 = arith.constant 512 : index
    %27 = vector.load %arg3[%c0_15, %c512_16] : memref<1x1536xf32, #tpu.memory_space<vmem>>, vector<1x512xf32>
    %28 = vector.broadcast %27 : vector<1x512xf32> to vector<16x512xf32>
    %29 = arith.addf %26, %28 : vector<16x512xf32>
    %cst_17 = arith.constant 5.000000e-01 : f32
    %30 = vector.broadcast %cst_17 : f32 to vector<16x512xf32>
    %31 = arith.mulf %30, %29 : vector<16x512xf32>
    %cst_18 = arith.constant 4.471500e-02 : f32
    %32 = vector.broadcast %cst_18 : f32 to vector<16x512xf32>
    %33 = arith.mulf %32, %29 : vector<16x512xf32>
    %34 = arith.mulf %33, %29 : vector<16x512xf32>
    %35 = arith.mulf %34, %29 : vector<16x512xf32>
    %36 = arith.addf %29, %35 : vector<16x512xf32>
    %cst_19 = arith.constant 0.797884583 : f32
    %37 = vector.broadcast %cst_19 : f32 to vector<16x512xf32>
    %38 = arith.mulf %37, %36 : vector<16x512xf32>
    %39 = math.tanh %38 : vector<16x512xf32>
    %cst_20 = arith.constant 1.000000e+00 : f32
    %40 = vector.broadcast %cst_20 : f32 to vector<16x512xf32>
    %41 = arith.addf %40, %39 : vector<16x512xf32>
    %42 = arith.mulf %31, %41 : vector<16x512xf32>
    %43 = arith.truncf %42 : vector<16x512xf32> to vector<16x512xbf16>
    %c512_21 = arith.constant 512 : index
    %c0_22 = arith.constant 0 : index
    %44 = vector.load %arg4[%c512_21, %c0_22] : memref<1536x384xbf16, #tpu.memory_space<vmem>>, vector<512x384xbf16>
    %cst_23 = arith.constant dense<0.000000e+00> : vector<16x384xf32>
    %45 = tpu.matmul %43, %44, %cst_23 {dimension_numbers = #tpu.dot_dimension_numbers<[1], [0], [0], [1], [0, 0, 1, 1], [], []>} : vector<16x512xbf16>, vector<512x384xbf16>, vector<16x384xf32> -> vector<16x384xf32>
    %46 = arith.addf %24, %45 : vector<16x384xf32>
    %c0_24 = arith.constant 0 : index
    %c1024 = arith.constant 1024 : index
    %47 = vector.load %arg2[%c0_24, %c1024] : memref<384x1536xbf16, #tpu.memory_space<vmem>>, vector<384x512xbf16>
    %cst_25 = arith.constant dense<0.000000e+00> : vector<16x512xf32>
    %48 = tpu.matmul %1, %47, %cst_25 {dimension_numbers = #tpu.dot_dimension_numbers<[1], [0], [0], [1], [0, 0, 1, 1], [], []>} : vector<16x384xbf16>, vector<384x512xbf16>, vector<16x512xf32> -> vector<16x512xf32>
    %c0_26 = arith.constant 0 : index
    %c1024_27 = arith.constant 1024 : index
    %49 = vector.load %arg3[%c0_26, %c1024_27] : memref<1x1536xf32, #tpu.memory_space<vmem>>, vector<1x512xf32>
    %50 = vector.broadcast %49 : vector<1x512xf32> to vector<16x512xf32>
    %51 = arith.addf %48, %50 : vector<16x512xf32>
    %cst_28 = arith.constant 5.000000e-01 : f32
    %52 = vector.broadcast %cst_28 : f32 to vector<16x512xf32>
    %53 = arith.mulf %52, %51 : vector<16x512xf32>
    %cst_29 = arith.constant 4.471500e-02 : f32
    %54 = vector.broadcast %cst_29 : f32 to vector<16x512xf32>
    %55 = arith.mulf %54, %51 : vector<16x512xf32>
    %56 = arith.mulf %55, %51 : vector<16x512xf32>
    %57 = arith.mulf %56, %51 : vector<16x512xf32>
    %58 = arith.addf %51, %57 : vector<16x512xf32>
    %cst_30 = arith.constant 0.797884583 : f32
    %59 = vector.broadcast %cst_30 : f32 to vector<16x512xf32>
    %60 = arith.mulf %59, %58 : vector<16x512xf32>
    %61 = math.tanh %60 : vector<16x512xf32>
    %cst_31 = arith.constant 1.000000e+00 : f32
    %62 = vector.broadcast %cst_31 : f32 to vector<16x512xf32>
    %63 = arith.addf %62, %61 : vector<16x512xf32>
    %64 = arith.mulf %53, %63 : vector<16x512xf32>
    %65 = arith.truncf %64 : vector<16x512xf32> to vector<16x512xbf16>
    %c1024_32 = arith.constant 1024 : index
    %c0_33 = arith.constant 0 : index
    %66 = vector.load %arg4[%c1024_32, %c0_33] : memref<1536x384xbf16, #tpu.memory_space<vmem>>, vector<512x384xbf16>
    %cst_34 = arith.constant dense<0.000000e+00> : vector<16x384xf32>
    %67 = tpu.matmul %65, %66, %cst_34 {dimension_numbers = #tpu.dot_dimension_numbers<[1], [0], [0], [1], [0, 0, 1, 1], [], []>} : vector<16x512xbf16>, vector<512x384xbf16>, vector<16x384xf32> -> vector<16x384xf32>
    %68 = arith.addf %46, %67 : vector<16x384xf32>
    %c0_35 = arith.constant 0 : index
    %c0_36 = arith.constant 0 : index
    %69 = vector.load %arg5[%c0_35, %c0_36] : memref<1x384xf32, #tpu.memory_space<vmem>>, vector<1x384xf32>
    %70 = vector.broadcast %69 : vector<1x384xf32> to vector<16x384xf32>
    %71 = arith.addf %68, %70 : vector<16x384xf32>
    %c0_37 = arith.constant 0 : index
    %c0_38 = arith.constant 0 : index
    %72 = vector.load %arg6[%c0_37, %c0_38] : memref<16x384xf32, #tpu.memory_space<vmem>>, vector<16x384xf32>
    tpu.vector_store %arg6[%c0_37, %c0_38], %71 {strides = array<i32>} : memref<16x384xf32, #tpu.memory_space<vmem>>, vector<16x384xf32>,
    return
  }
  func.func @transform_0(%arg0: i32) -> (i32, i32) {
    %c0_i32 = arith.constant 0 : i32
    %c0_i32_0 = arith.constant 0 : i32
    return %arg0, %c0_i32 : i32, i32
  }
  func.func @transform_1(%arg0: i32) -> (i32, i32) {
    %c0_i32 = arith.constant 0 : i32
    %c0_i32_0 = arith.constant 0 : i32
    %c0_i32_1 = arith.constant 0 : i32
    return %c0_i32, %c0_i32_0 : i32, i32
  }
  func.func @transform_2(%arg0: i32) -> (i32, i32) {
    %c0_i32 = arith.constant 0 : i32
    %c0_i32_0 = arith.constant 0 : i32
    %c0_i32_1 = arith.constant 0 : i32
    return %c0_i32, %c0_i32_0 : i32, i32
  }
  func.func @transform_3(%arg0: i32) -> (i32, i32) {
    %c0_i32 = arith.constant 0 : i32
    %c0_i32_0 = arith.constant 0 : i32
    %c0_i32_1 = arith.constant 0 : i32
    return %c0_i32, %c0_i32_0 : i32, i32
  }
  func.func @transform_4(%arg0: i32) -> (i32, i32) {
    %c0_i32 = arith.constant 0 : i32
    %c0_i32_0 = arith.constant 0 : i32
    %c0_i32_1 = arith.constant 0 : i32
    return %c0_i32, %c0_i32_0 : i32, i32
  }
  func.func @transform_5(%arg0: i32) -> (i32, i32) {
    %c0_i32 = arith.constant 0 : i32
    %c0_i32_0 = arith.constant 0 : i32
    return %arg0, %c0_i32 : i32, i32
  }
}

module attributes {stable_mosaic.version = 11 : i64} {
  func.func @_fused_ffn_kernel(%arg0: i32, %arg1: memref<16x384xf32, #tpu.memory_space<vmem>>, %arg2: memref<384x1536xbf16, #tpu.memory_space<vmem>>, %arg3: memref<1x1536xf32, #tpu.memory_space<vmem>>, %arg4: memref<1536x384xbf16, #tpu.memory_space<vmem>>, %arg5: memref<1x384xf32, #tpu.memory_space<vmem>>, %arg6: memref<16x384xf32, #tpu.memory_space<vmem>>) attributes {dimension_semantics = [#tpu.dimension_semantics<parallel>], iteration_bounds = array<i64: 1>, scalar_prefetch = 0 : i64, scratch_operands = 0 : i64, tpu.core_type = #tpu.core_type<tc>, window_params = [{transform_indices = @transform_0, window_bounds = array<i64: 16, 384>}, {pipeline_mode = #tpu.pipeline_mode<synchronous>, transform_indices = @transform_1, window_bounds = array<i64: 384, 1536>}, {pipeline_mode = #tpu.pipeline_mode<synchronous>, transform_indices = @transform_2, window_bounds = array<i64: 1, 1536>}, {pipeline_mode = #tpu.pipeline_mode<synchronous>, transform_indices = @transform_3, window_bounds = array<i64: 1536, 384>}, {pipeline_mode = #tpu.pipeline_mode<synchronous>, transform_indices = @transform_4, window_bounds = array<i64: 1, 384>}, {transform_indices = @transform_5, window_bounds = array<i64: 16, 384>}]} {
    %c0 = arith.constant 0 : index
    %c0_0 = arith.constant 0 : index
    %0 = vector.load %arg1[%c0, %c0_0] : memref<16x384xf32, #tpu.memory_space<vmem>>, vector<16x384xf32>
    %1 = arith.truncf %0 : vector<16x384xf32> to vector<16x384xbf16>
    %cst = arith.constant 0.000000e+00 : f32
    %2 = vector.broadcast %cst : f32 to vector<16x384xf32>
    %c0_1 = arith.constant 0 : index
    %c0_2 = arith.constant 0 : index
    %3 = vector.load %arg2[%c0_1, %c0_2] : memref<384x1536xbf16, #tpu.memory_space<vmem>>, vector<384x512xbf16>
    %cst_3 = arith.constant dense<0.000000e+00> : vector<16x512xf32>
    %4 = tpu.matmul %1, %3, %cst_3 {dimension_numbers = #tpu.dot_dimension_numbers<[1], [0], [0], [1], [0, 0, 1, 1], [], []>} : vector<16x384xbf16>, vector<384x512xbf16>, vector<16x512xf32> -> vector<16x512xf32>
    %c0_4 = arith.constant 0 : index
    %c0_5 = arith.constant 0 : index
    %5 = vector.load %arg3[%c0_4, %c0_5] : memref<1x1536xf32, #tpu.memory_space<vmem>>, vector<1x512xf32>
    %6 = vector.broadcast %5 : vector<1x512xf32> to vector<16x512xf32>
    %7 = arith.addf %4, %6 : vector<16x512xf32>
    %cst_6 = arith.constant 5.000000e-01 : f32
    %8 = vector.broadcast %cst_6 : f32 to vector<16x512xf32>
    %9 = arith.mulf %8, %7 : vector<16x512xf32>
    %cst_7 = arith.constant 4.471500e-02 : f32
    %10 = vector.broadcast %cst_7 : f32 to vector<16x512xf32>
    %11 = arith.mulf %10, %7 : vector<16x512xf32>
    %12 = arith.mulf %11, %7 : vector<16x512xf32>
    %13 = arith.mulf %12, %7 : vector<16x512xf32>
    %14 = arith.addf %7, %13 : vector<16x512xf32>
    %cst_8 = arith.constant 0.797884583 : f32
    %15 = vector.broadcast %cst_8 : f32 to vector<16x512xf32>
    %16 = arith.mulf %15, %14 : vector<16x512xf32>
    %17 = math.tanh %16 : vector<16x512xf32>
    %cst_9 = arith.constant 1.000000e+00 : f32
    %18 = vector.broadcast %cst_9 : f32 to vector<16x512xf32>
    %19 = arith.addf %18, %17 : vector<16x512xf32>
    %20 = arith.mulf %9, %19 : vector<16x512xf32>
    %21 = arith.truncf %20 : vector<16x512xf32> to vector<16x512xbf16>
    %c0_10 = arith.constant 0 : index
    %c0_11 = arith.constant 0 : index
    %22 = vector.load %arg4[%c0_10, %c0_11] : memref<1536x384xbf16, #tpu.memory_space<vmem>>, vector<512x384xbf16>
    %cst_12 = arith.constant dense<0.000000e+00> : vector<16x384xf32>
    %23 = tpu.matmul %21, %22, %cst_12 {dimension_numbers = #tpu.dot_dimension_numbers<[1], [0], [0], [1], [0, 0, 1, 1], [], []>} : vector<16x512xbf16>, vector<512x384xbf16>, vector<16x384xf32> -> vector<16x384xf32>
    %24 = arith.addf %2, %23 : vector<16x384xf32>
    %c0_13 = arith.constant 0 : index
    %c512 = arith.constant 512 : index
    %25 = vector.load %arg2[%c0_13, %c512] : memref<384x1536xbf16, #tpu.memory_space<vmem>>, vector<384x512xbf16>
    %cst_14 = arith.constant dense<0.000000e+00> : vector<16x512xf32>
    %26 = tpu.matmul %1, %25, %cst_14 {dimension_numbers = #tpu.dot_dimension_numbers<[1], [0], [0], [1], [0, 0, 1, 1], [], []>} : vector<16x384xbf16>, vector<384x512xbf16>, vector<16x512xf32> -> vector<16x512xf32>
    %c0_15 = arith.constant 0 : index
    %c512_16 = arith.constant 512 : index
    %27 = vector.load %arg3[%c0_15, %c512_16] : memref<1x1536xf32, #tpu.memory_space<vmem>>, vector<1x512xf32>
    %28 = vector.broadcast %27 : vector<1x512xf32> to vector<16x512xf32>
    %29 = arith.addf %26, %28 : vector<16x512xf32>
    %cst_17 = arith.constant 5.000000e-01 : f32
    %30 = vector.broadcast %cst_17 : f32 to vector<16x512xf32>
    %31 = arith.mulf %30, %29 : vector<16x512xf32>
    %cst_18 = arith.constant 4.471500e-02 : f32
    %32 = vector.broadcast %cst_18 : f32 to vector<16x512xf32>
    %33 = arith.mulf %32, %29 : vector<16x512xf32>
    %34 = arith.mulf %33, %29 : vector<16x512xf32>
    %35 = arith.mulf %34, %29 : vector<16x512xf32>
    %36 = arith.addf %29, %35 : vector<16x512xf32>
    %cst_19 = arith.constant 0.797884583 : f32
    %37 = vector.broadcast %cst_19 : f32 to vector<16x512xf32>
    %38 = arith.mulf %37, %36 : vector<16x512xf32>
    %39 = math.tanh %38 : vector<16x512xf32>
    %cst_20 = arith.constant 1.000000e+00 : f32
    %40 = vector.broadcast %cst_20 : f32 to vector<16x512xf32>
    %41 = arith.addf %40, %39 : vector<16x512xf32>
    %42 = arith.mulf %31, %41 : vector<16x512xf32>
    %43 = arith.truncf %42 : vector<16x512xf32> to vector<16x512xbf16>
    %c512_21 = arith.constant 512 : index
    %c0_22 = arith.constant 0 : index
    %44 = vector.load %arg4[%c512_21, %c0_22] : memref<1536x384xbf16, #tpu.memory_space<vmem>>, vector<512x384xbf16>
    %cst_23 = arith.constant dense<0.000000e+00> : vector<16x384xf32>
    %45 = tpu.matmul %43, %44, %cst_23 {dimension_numbers = #tpu.dot_dimension_numbers<[1], [0], [0], [1], [0, 0, 1, 1], [], []>} : vector<16x512xbf16>, vector<512x384xbf16>, vector<16x384xf32> -> vector<16x384xf32>
    %46 = arith.addf %24, %45 : vector<16x384xf32>
    %c0_24 = arith.constant 0 : index
    %c1024 = arith.constant 1024 : index
    %47 = vector.load %arg2[%c0_24, %c1024] : memref<384x1536xbf16, #tpu.memory_space<vmem>>, vector<384x512xbf16>
    %cst_25 = arith.constant dense<0.000000e+00> : vector<16x512xf32>
    %48 = tpu.matmul %1, %47, %cst_25 {dimension_numbers = #tpu.dot_dimension_numbers<[1], [0], [0], [1], [0, 0, 1, 1], [], []>} : vector<16x384xbf16>, vector<384x512xbf16>, vector<16x512xf32> -> vector<16x512xf32>
    %c0_26 = arith.constant 0 : index
    %c1024_27 = arith.constant 1024 : index
    %49 = vector.load %arg3[%c0_26, %c1024_27] : memref<1x1536xf32, #tpu.memory_space<vmem>>, vector<1x512xf32>
    %50 = vector.broadcast %49 : vector<1x512xf32> to vector<16x512xf32>
    %51 = arith.addf %48, %50 : vector<16x512xf32>
    %cst_28 = arith.constant 5.000000e-01 : f32
    %52 = vector.broadcast %cst_28 : f32 to vector<16x512xf32>
    %53 = arith.mulf %52, %51 : vector<16x512xf32>
    %cst_29 = arith.constant 4.471500e-02 : f32
    %54 = vector.broadcast %cst_29 : f32 to vector<16x512xf32>
    %55 = arith.mulf %54, %51 : vector<16x512xf32>
    %56 = arith.mulf %55, %51 : vector<16x512xf32>
    %57 = arith.mulf %56, %51 : vector<16x512xf32>
    %58 = arith.addf %51, %57 : vector<16x512xf32>
    %cst_30 = arith.constant 0.797884583 : f32
    %59 = vector.broadcast %cst_30 : f32 to vector<16x512xf32>
    %60 = arith.mulf %59, %58 : vector<16x512xf32>
    %61 = math.tanh %60 : vector<16x512xf32>
    %cst_31 = arith.constant 1.000000e+00 : f32
    %62 = vector.broadcast %cst_31 : f32 to vector<16x512xf32>
    %63 = arith.addf %62, %61 : vector<16x512xf32>
    %64 = arith.mulf %53, %63 : vector<16x512xf32>
    %65 = arith.truncf %64 : vector<16x512xf32> to vector<16x512xbf16>
    %c1024_32 = arith.constant 1024 : index
    %c0_33 = arith.constant 0 : index
    %66 = vector.load %arg4[%c1024_32, %c0_33] : memref<1536x384xbf16, #tpu.memory_space<vmem>>, vector<512x384xbf16>
    %cst_34 = arith.constant dense<0.000000e+00> : vector<16x384xf32>
    %67 = tpu.matmul %65, %66, %cst_34 {dimension_numbers = #tpu.dot_dimension_numbers<[1], [0], [0], [1], [0, 0, 1, 1], [], []>} : vector<16x512xbf16>, vector<512x384xbf16>, vector<16x384xf32> -> vector<16x384xf32>
    %68 = arith.addf %46, %67 : vector<16x384xf32>
    %c0_35 = arith.constant 0 : index
    %c0_36 = arith.constant 0 : index
    %69 = vector.load %arg5[%c0_35, %c0_36] : memref<1x384xf32, #tpu.memory_space<vmem>>, vector<1x384xf32>
    %70 = vector.broadcast %69 : vector<1x384xf32> to vector<16x384xf32>
    %71 = arith.addf %68, %70 : vector<16x384xf32>
    %c0_37 = arith.constant 0 : index
    %c0_38 = arith.constant 0 : index
    %72 = vector.load %arg6[%c0_37, %c0_38] : memref<16x384xf32, #tpu.memory_space<vmem>>, vector<16x384xf32>
    tpu.vector_store %arg6[%c0_37, %c0_38], %71 {strides = array<i32>} : memref<16x384xf32, #tpu.memory_space<vmem>>, vector<16x384xf32>,
    return
  }
  func.func @transform_0(%arg0: i32) -> (i32, i32) {
    %c0_i32 = arith.constant 0 : i32
    %c0_i32_0 = arith.constant 0 : i32
    return %arg0, %c0_i32 : i32, i32
  }
  func.func @transform_1(%arg0: i32) -> (i32, i32) {
    %c0_i32 = arith.constant 0 : i32
    %c0_i32_0 = arith.constant 0 : i32
    %c0_i32_1 = arith.constant 0 : i32
    return %c0_i32, %c0_i32_0 : i32, i32
  }
  func.func @transform_2(%arg0: i32) -> (i32, i32) {
    %c0_i32 = arith.constant 0 : i32
    %c0_i32_0 = arith.constant 0 : i32
    %c0_i32_1 = arith.constant 0 : i32
    return %c0_i32, %c0_i32_0 : i32, i32
  }
  func.func @transform_3(%arg0: i32) -> (i32, i32) {
    %c0_i32 = arith.constant 0 : i32
    %c0_i32_0 = arith.constant 0 : i32
    %c0_i32_1 = arith.constant 0 : i32
    return %c0_i32, %c0_i32_0 : i32, i32
  }
  func.func @transform_4(%arg0: i32) -> (i32, i32) {
    %c0_i32 = arith.constant 0 : i32
    %c0_i32_0 = arith.constant 0 : i32
    %c0_i32_1 = arith.constant 0 : i32
    return %c0_i32, %c0_i32_0 : i32, i32
  }
  func.func @transform_5(%arg0: i32) -> (i32, i32) {
    %c0_i32 = arith.constant 0 : i32
    %c0_i32_0 = arith.constant 0 : i32
    return %arg0, %c0_i32 : i32, i32
  }
}

module attributes {stable_mosaic.version = 11 : i64} {
  func.func @_tiled_linear_kernel(%arg0: i32, %arg1: i32, %arg2: i32, %arg3: memref<16x384xbf16, #tpu.memory_space<vmem>>, %arg4: memref<384x512xbf16, #tpu.memory_space<vmem>>, %arg5: memref<1x512xf32, #tpu.memory_space<vmem>>, %arg6: memref<16x512xbf16, #tpu.memory_space<vmem>>, %arg7: memref<16x512xf32, #tpu.memory_space<vmem>>) attributes {dimension_semantics = [#tpu.dimension_semantics<parallel>, #tpu.dimension_semantics<parallel>, #tpu.dimension_semantics<arbitrary>], iteration_bounds = array<i64: 1, 3, 1>, scalar_prefetch = 0 : i64, scratch_operands = 1 : i64, tpu.core_type = #tpu.core_type<tc>, window_params = [{transform_indices = @transform_0, window_bounds = array<i64: 16, 384>}, {transform_indices = @transform_1, window_bounds = array<i64: 384, 512>}, {transform_indices = @transform_2, window_bounds = array<i64: 1, 512>}, {transform_indices = @transform_3, window_bounds = array<i64: 16, 512>}]} {
    %c0_i32 = arith.constant 0 : i32
    %0 = arith.cmpi eq, %arg2, %c0_i32 : i32
    %1 = arith.extui %0 : i1 to i32
    %c0_i32_0 = arith.constant 0 : i32
    %2 = arith.cmpi ne, %1, %c0_i32_0 : i32
    scf.if %2 {
      %cst_10 = arith.constant 0.000000e+00 : f32
      %12 = vector.broadcast %cst_10 : f32 to vector<16x512xf32>
      %c0_11 = arith.constant 0 : index
      %c0_12 = arith.constant 0 : index
      %13 = vector.load %arg7[%c0_11, %c0_12] : memref<16x512xf32, #tpu.memory_space<vmem>>, vector<16x512xf32>
      tpu.vector_store %arg7[%c0_11, %c0_12], %12 {strides = array<i32>} : memref<16x512xf32, #tpu.memory_space<vmem>>, vector<16x512xf32>,
    } else {
    }
    %c0 = arith.constant 0 : index
    %c0_1 = arith.constant 0 : index
    %3 = vector.load %arg7[%c0, %c0_1] : memref<16x512xf32, #tpu.memory_space<vmem>>, vector<16x512xf32>
    %c0_2 = arith.constant 0 : index
    %c0_3 = arith.constant 0 : index
    %4 = vector.load %arg3[%c0_2, %c0_3] : memref<16x384xbf16, #tpu.memory_space<vmem>>, vector<16x384xbf16>
    %c0_4 = arith.constant 0 : index
    %c0_5 = arith.constant 0 : index
    %5 = vector.load %arg4[%c0_4, %c0_5] : memref<384x512xbf16, #tpu.memory_space<vmem>>, vector<384x512xbf16>
    %cst = arith.constant dense<0.000000e+00> : vector<16x512xf32>
    %6 = tpu.matmul %4, %5, %cst {dimension_numbers = #tpu.dot_dimension_numbers<[1], [0], [0], [1], [0, 0, 1, 1], [], []>} : vector<16x384xbf16>, vector<384x512xbf16>, vector<16x512xf32> -> vector<16x512xf32>
    %7 = arith.addf %3, %6 : vector<16x512xf32>
    %c0_6 = arith.constant 0 : index
    %c0_7 = arith.constant 0 : index
    %8 = vector.load %arg7[%c0_6, %c0_7] : memref<16x512xf32, #tpu.memory_space<vmem>>, vector<16x512xf32>
    tpu.vector_store %arg7[%c0_6, %c0_7], %7 {strides = array<i32>} : memref<16x512xf32, #tpu.memory_space<vmem>>, vector<16x512xf32>,
    %c0_i32_8 = arith.constant 0 : i32
    %9 = arith.cmpi eq, %arg2, %c0_i32_8 : i32
    %10 = arith.extui %9 : i1 to i32
    %c0_i32_9 = arith.constant 0 : i32
    %11 = arith.cmpi ne, %10, %c0_i32_9 : i32
    scf.if %11 {
      %c0_10 = arith.constant 0 : index
      %c0_11 = arith.constant 0 : index
      %12 = vector.load %arg7[%c0_10, %c0_11] : memref<16x512xf32, #tpu.memory_space<vmem>>, vector<16x512xf32>
      %c0_12 = arith.constant 0 : index
      %c0_13 = arith.constant 0 : index
      %13 = vector.load %arg5[%c0_12, %c0_13] : memref<1x512xf32, #tpu.memory_space<vmem>>, vector<1x512xf32>
      %14 = vector.broadcast %13 : vector<1x512xf32> to vector<16x512xf32>
      %15 = arith.addf %12, %14 : vector<16x512xf32>
      %cst_14 = arith.constant 5.000000e-01 : f32
      %16 = vector.broadcast %cst_14 : f32 to vector<16x512xf32>
      %17 = arith.mulf %16, %15 : vector<16x512xf32>
      %cst_15 = arith.constant 4.471500e-02 : f32
      %18 = vector.broadcast %cst_15 : f32 to vector<16x512xf32>
      %19 = arith.mulf %18, %15 : vector<16x512xf32>
      %20 = arith.mulf %19, %15 : vector<16x512xf32>
      %21 = arith.mulf %20, %15 : vector<16x512xf32>
      %22 = arith.addf %15, %21 : vector<16x512xf32>
      %cst_16 = arith.constant 0.797884583 : f32
      %23 = vector.broadcast %cst_16 : f32 to vector<16x512xf32>
      %24 = arith.mulf %23, %22 : vector<16x512xf32>
      %25 = math.tanh %24 : vector<16x512xf32>
      %cst_17 = arith.constant 1.000000e+00 : f32
      %26 = vector.broadcast %cst_17 : f32 to vector<16x512xf32>
      %27 = arith.addf %26, %25 : vector<16x512xf32>
      %28 = arith.mulf %17, %27 : vector<16x512xf32>
      %29 = arith.truncf %28 : vector<16x512xf32> to vector<16x512xbf16>
      %c0_18 = arith.constant 0 : index
      %c0_19 = arith.constant 0 : index
      %30 = vector.load %arg6[%c0_18, %c0_19] : memref<16x512xbf16, #tpu.memory_space<vmem>>, vector<16x512xbf16>
      tpu.vector_store %arg6[%c0_18, %c0_19], %29 {strides = array<i32>} : memref<16x512xbf16, #tpu.memory_space<vmem>>, vector<16x512xbf16>,
    } else {
    }
    return
  }
  func.func @transform_0(%arg0: i32, %arg1: i32, %arg2: i32) -> (i32, i32) {
    %c0_i32 = arith.constant 0 : i32
    return %arg0, %arg2 : i32, i32
  }
  func.func @transform_1(%arg0: i32, %arg1: i32, %arg2: i32) -> (i32, i32) {
    %c0_i32 = arith.constant 0 : i32
    return %arg2, %arg1 : i32, i32
  }
  func.func @transform_2(%arg0: i32, %arg1: i32, %arg2: i32) -> (i32, i32) {
    %c0_i32 = arith.constant 0 : i32
    %c0_i32_0 = arith.constant 0 : i32
    return %c0_i32, %arg1 : i32, i32
  }
  func.func @transform_3(%arg0: i32, %arg1: i32, %arg2: i32) -> (i32, i32) {
    %c0_i32 = arith.constant 0 : i32
    return %arg0, %arg1 : i32, i32
  }
}

</mosaic_0001>

<bundles_post_ra>
// kernel: tpu_custom_call.1
= control target key start
LH: loop header
LB: loop body
LE: loop exit
PB: predicated region body
PF: predicated region fallthrough
CT: control target
= control target key end

     0   :  { %10 = vsyncpa [#allocation3], 0  ;;  %s7093_s0 = inlined_call_operand.hbm [shape: f32[16,384], index: 0, kind: input, shape index: {}]   ;;  %s7094_s1 = inlined_call_operand.hbm [shape: bf16[384,1536], index: 1, kind: input, shape index: {}]   ;;  %s7095_s2 = inlined_call_operand.hbm [shape: f32[1,1536], index: 2, kind: input, shape index: {}]   ;;  %s7096_s3 = inlined_call_operand.hbm [shape: bf16[1536,384], index: 3, kind: input, shape index: {}]   ;;  %s7097_s4 = inlined_call_operand.hbm [shape: f32[1,384], index: 4, kind: input, shape index: {}]   ;;  %s7098_s5 = inlined_call_operand.hbm [shape: f32[16,384], index: 5, kind: output, shape index: {}]  }
   0x1   :  { %11 = vsyncpa [#allocation6], 0 }
   0x2   :  { %12 = vsyncpa [#allocation9], 0 }
   0x3   :  { %13 = vsyncpa [#allocation4], 0  ;;  %s6824_s18 = smov [#allocation5]  }
   0x4   :  { %s31_s19 = sshll.u32 %s6824_s18, 4  ;;  %s32_s19 = int_to_ptr.vmem [resolvable:$true] %s31_s19 }
   0x5   :  { %s6704_s20 = scalar_lea.vmem %s32_s19, 36864  ;;  %p6709_p1 = scmp.lt.s32.totalorder %s32_s19, %s32_s19 }
   0x6   :  { %p6705_p0 = scmp.ne.s32.totalorder %s32_s19, %s6704_s20  ;;  %p6710_p2 = scmp.lt.s32.totalorder %s6704_s20, %s6704_s20 }
   0x8   :  { %p6711_p3 = por %p6710_p2, %p6709_p1 }
   0xa   :  { %p6712_p4 = pnand %p6711_p3, %p6705_p0 }
   0xc   :  { %6715 = shalt.err (!%p6712_p4)
}
   0xd   :  { %s6825_s21 = smov 768   ;;  %s6826_s22 = smov 48  }
   0xe   :  { %37 = dma.hbm_to_vmem [thread:$0]  %s7094_s1, 36864, %s32_s19, [#allocation6], %s6825_s21, %s6825_s21, %s6826_s22  }
   0xf   :  { %s6827_s25 = smov [#allocation8]  }
  0x10   :  { %s53_s26 = sshll.u32 %s6827_s25, 4  ;;  %s54_s26 = int_to_ptr.vmem [resolvable:$true] %s53_s26 }
  0x11   :  { %s6724_s27 = scalar_lea.vmem %s54_s26, 36864  ;;  %p6729_p6 = scmp.lt.s32.totalorder %s54_s26, %s54_s26 }
  0x12   :  { %p6725_p5 = scmp.ne.s32.totalorder %s54_s26, %s6724_s27  ;;  %p6730_p7 = scmp.lt.s32.totalorder %s6724_s27, %s6724_s27 }
  0x14   :  { %p6731_p8 = por %p6730_p7, %p6729_p6 }
  0x16   :  { %p6732_p9 = pnand %p6731_p8, %p6725_p5 }
  0x18   :  { %6735 = shalt.err (!%p6732_p9)
}
  0x19   :  { %s6828_s28 = smov 192   ;;  %s6829_s29 = smov 12  }
  0x1a   :  { %59 = dma.hbm_to_vmem [thread:$0]  %s7096_s3, 36864, %s54_s26, [#allocation9], %s6828_s28, %s6828_s28, %s6829_s29  }
  0x1b   :  { %s6830_s7 = smov [#allocation2]  }
  0x1c   :  { %s19_s8 = sshll.u32 %s6830_s7, 4  ;;  %s20_s8 = int_to_ptr.vmem [resolvable:$true] %s19_s8 }
  0x1d   :  { %s6744_s1 = scalar_lea.vmem %s20_s8, 768  ;;  %p6749_p11 = scmp.lt.s32.totalorder %s20_s8, %s20_s8 }
  0x1e   :  { %p6745_p10 = scmp.ne.s32.totalorder %s20_s8, %s6744_s1  ;;  %p6750_p12 = scmp.lt.s32.totalorder %s6744_s1, %s6744_s1 }
  0x20   :  { %p6751_p13 = por %p6750_p12, %p6749_p11 }
  0x22   :  { %p6752_p0 = pnand %p6751_p13, %p6745_p10 }
  0x24   :  { %6755 = shalt.err (!%p6752_p0)
}
  0x25   :  { %s6831_s9 = smov 384   ;;  %s6832_s10 = smov 24  }
  0x26   :  { %25 = dma.hbm_to_vmem [thread:$0]  %s7093_s0, 768, %s20_s8, [#allocation3], %s6831_s9, %s6831_s9, %s6832_s10  }
  0x27   :  { %s6833_s3 = smov [#allocation7]   ;;  %s6834_s14 = smov [#allocation10]  }
  0x28   :  { %s44_s13 = sshll.u32 %s6833_s3, 4  ;;  %s66_s15 = sshll.u32 %s6834_s14, 4  ;;  %s45_s13 = int_to_ptr.vmem [resolvable:$true] %s44_s13  ;;  %s67_s15 = int_to_ptr.vmem [resolvable:$true] %s66_s15 }
  0x29   :  { %s6764_s16 = scalar_lea.vmem %s45_s13, 192  ;;  %p6769_p2 = scmp.lt.s32.totalorder %s45_s13, %s45_s13 }
  0x2a   :  { %p6765_p1 = scmp.ne.s32.totalorder %s45_s13, %s6764_s16  ;;  %p6770_p3 = scmp.lt.s32.totalorder %s6764_s16, %s6764_s16 }
  0x2c   :  { %p6771_p4 = por %p6770_p3, %p6769_p2 }
  0x2e   :  { %p6772_p5 = pnand %p6771_p4, %p6765_p1 }
  0x30   :  { %6775 = shalt.err (!%p6772_p5)
}
  0x31   :  { %47 = dma.hbm_to_vmem [thread:$0]  %s7095_s2, 192, %s45_s13, [#allocation6]  }
  0x32   :  { %s6784_s19 = scalar_lea.vmem %s67_s15, 48  ;;  %s6788_s0 = scalar_lea.vmem %s67_s15, 64 }
  0x33   :  { %p6785_p6 = scmp.ne.s32.totalorder %s67_s15, %s6784_s19  ;;  %p6789_p7 = scmp.lt.s32.totalorder %s67_s15, %s67_s15 }
  0x34   :  { %p6790_p8 = scmp.lt.s32.totalorder %s6788_s0, %s6784_s19 }
  0x36   :  { %p6791_p9 = por %p6790_p8, %p6789_p7 }
  0x38   :  { %p6792_p10 = pnand %p6791_p9, %p6785_p6 }
  0x3a   :  { %6795 = shalt.err (!%p6792_p10)
}
  0x3b   :  { %69 = dma.hbm_to_vmem [thread:$0]  %s7097_s4, 48, %s67_s15, [#allocation9]  }
  0x3c   :  { %6816 = dma.done.wait [#allocation3], 768  }
  0x3d   :  { %6817 = vsyncadd [#allocation3], 4294966528 }
  0x3e   :  { %6818 = dma.done.wait [#allocation6], 37056  }
  0x3f   :  { %6819 = vsyncadd [#allocation6], 4294930240 }
  0x40   :  { %6820 = dma.done.wait [#allocation9], 36912  }
  0x41   :  { %6821 = vsyncadd [#allocation9], 4294930384  ;;  %v6835_v0 = vmov 0   ;;  %v5832_v1 = vld [vmem:[#allocation5 + $0x2a4] ss:$48 sps:$4 sm:$0xff]   ;;  %v91_v34 = vld [vmem:[#allocation2 + $0x28] sm:$0xff] }
  0x42   :  { %768 = vmatprep.mubr.bf16.mxu1 %v6835_v0  ;;  %v5834_v2 = vld [vmem:[#allocation5 + $0x8a4] ss:$48 sps:$4 sm:$0xff]   ;;  %693 = vmatprep.subr.bf16.mxu0 %v5832_v1  ;;  %v5836_v3 = vld [vmem:[#allocation5 + $0x2a0] ss:$48 sps:$4 sm:$0xff]   ;;  %v5884_v36 = vld [vmem:[#allocation5 + $0x2ac] ss:$48 sps:$4 sm:$0xff]  }
  0x43   :  { %v5837_v4 = vld [vmem:[#allocation5 + $0x8a0] ss:$48 sps:$4 sm:$0xff]   ;;  %736 = vmatprep.subr.bf16.mxu1 %v5834_v2  ;;  %v5838_v5 = vld [vmem:[#allocation5 + $0x244] ss:$48 sps:$4 sm:$0xff]   ;;  %694 = vmatpush1.bf16.msra.mxu0 %v5836_v3  ;;  %v5882_v38 = vld [vmem:[#allocation5 + $0x2a8] ss:$48 sps:$4 sm:$0xff]  }
  0x44   :  { %737 = vmatpush1.bf16.msra.mxu1 %v5837_v4  ;;  %v5840_v6 = vld [vmem:[#allocation5 + $0x844] ss:$48 sps:$4 sm:$0xff]   ;;  %v5842_v7 = vld [vmem:[#allocation5 + $0x240] ss:$48 sps:$4 sm:$0xff]   ;;  %695 = vmatprep.subr.bf16.mxu0 %v5838_v5  ;;  %v5890_v41 = vld [vmem:[#allocation5 + $0x24c] ss:$48 sps:$4 sm:$0xff]  }
  0x45   :  { %v5843_v8 = vld [vmem:[#allocation5 + $0x840] ss:$48 sps:$4 sm:$0xff]   ;;  %738 = vmatprep.subr.bf16.mxu1 %v5840_v6  ;;  %v5844_v9 = vld [vmem:[#allocation5 + $0x1e4] ss:$48 sps:$4 sm:$0xff]   ;;  %v5888_v42 = vld [vmem:[#allocation5 + $0x248] ss:$48 sps:$4 sm:$0xff]  }
  0x46   :  { %v5846_v10 = vld [vmem:[#allocation5 + $0x7e4] ss:$48 sps:$4 sm:$0xff]   ;;  %v5848_v11 = vld [vmem:[#allocation5 + $0x1e0] ss:$48 sps:$4 sm:$0xff]   ;;  %v5896_v45 = vld [vmem:[#allocation5 + $0x1ec] ss:$48 sps:$4 sm:$0xff]  }
  0x47   :  { %v5849_v12 = vld [vmem:[#allocation5 + $0x7e0] ss:$48 sps:$4 sm:$0xff]   ;;  %696 = vmatpush1.bf16.msra.mxu0 %v5842_v7  ;;  %v5850_v13 = vld [vmem:[#allocation5 + $0x184] ss:$48 sps:$4 sm:$0xff]   ;;  %v5894_v46 = vld [vmem:[#allocation5 + $0x1e8] ss:$48 sps:$4 sm:$0xff]  }
  0x48   :  { %739 = vmatpush1.bf16.msra.mxu1 %v5843_v8  ;;  %697 = vmatprep.subr.bf16.mxu0 %v5844_v9  ;;  %v5852_v14 = vld [vmem:[#allocation5 + $0x784] ss:$48 sps:$4 sm:$0xff]   ;;  %v5854_v15 = vld [vmem:[#allocation5 + $0x180] ss:$48 sps:$4 sm:$0xff]   ;;  %v5902_v49 = vld [vmem:[#allocation5 + $0x18c] ss:$48 sps:$4 sm:$0xff]  }
  0x49   :  { %740 = vmatprep.subr.bf16.mxu1 %v5846_v10  ;;  %v5855_v16 = vld [vmem:[#allocation5 + $0x780] ss:$48 sps:$4 sm:$0xff]   ;;  %v5856_v17 = vld [vmem:[#allocation5 + $0x124] ss:$48 sps:$4 sm:$0xff]   ;;  %v87_v50 = vld [vmem:[#allocation2 + $0x8] sm:$0xff]  ;;  %s6836_s2 = smov [#allocation11]  }
  0x4a   :  { %v5858_v18 = vld [vmem:[#allocation5 + $0x724] ss:$48 sps:$4 sm:$0xff]   ;;  %v5860_v19 = vld [vmem:[#allocation5 + $0x120] ss:$48 sps:$4 sm:$0xff]   ;;  %v5900_v52 = vld [vmem:[#allocation5 + $0x188] ss:$48 sps:$4 sm:$0xff]  }
  0x4b   :  { %698 = vmatpush1.bf16.msra.mxu0 %v5848_v11  ;;  %v5861_v20 = vld [vmem:[#allocation5 + $0x720] ss:$48 sps:$4 sm:$0xff]   ;;  %v5862_v21 = vld [vmem:[#allocation5 + $0xc4] ss:$48 sps:$4 sm:$0xff]   ;;  %v5908_v56 = vld [vmem:[#allocation5 + $0x12c] ss:$48 sps:$4 sm:$0xff]  }
  0x4c   :  { %741 = vmatpush1.bf16.msra.mxu1 %v5849_v12  ;;  %699 = vmatprep.subr.bf16.mxu0 %v5850_v13  ;;  %v5864_v22 = vld [vmem:[#allocation5 + $0x6c4] ss:$48 sps:$4 sm:$0xff]   ;;  %v5866_v23 = vld [vmem:[#allocation5 + $0xc0] ss:$48 sps:$4 sm:$0xff]   ;;  %v5906_v57 = vld [vmem:[#allocation5 + $0x128] ss:$48 sps:$4 sm:$0xff]  }
  0x4d   :  { %742 = vmatprep.subr.bf16.mxu1 %v5852_v14  ;;  %v5867_v24 = vld [vmem:[#allocation5 + $0x6c0] ss:$48 sps:$4 sm:$0xff]   ;;  %v5868_v25 = vld [vmem:[#allocation5 + $0x64] ss:$48 sps:$4 sm:$0xff]   ;;  %v5914_v60 = vld [vmem:[#allocation5 + $0xcc] ss:$48 sps:$4 sm:$0xff]  }
  0x4e   :  { %v5870_v26 = vld [vmem:[#allocation5 + $0x664] ss:$48 sps:$4 sm:$0xff]   ;;  %v5872_v27 = vld [vmem:[#allocation5 + $0x60] ss:$48 sps:$4 sm:$0xff]   ;;  %v5912_v61 = vld [vmem:[#allocation5 + $0xc8] ss:$48 sps:$4 sm:$0xff]  }
  0x4f   :  { %700 = vmatpush1.bf16.msra.mxu0 %v5854_v15  ;;  %v5873_v28 = vld [vmem:[#allocation5 + $0x660] ss:$48 sps:$4 sm:$0xff]   ;;  %v5874_v29 = vld [vmem:[#allocation5 + $0x4] ss:$48 sps:$4 sm:$0xff]   ;;  %v5920_v1 = vld [vmem:[#allocation5 + $0x6c] ss:$48 sps:$4 sm:$0xff]  }
  0x50   :  { %743 = vmatpush1.bf16.msra.mxu1 %v5855_v16  ;;  %701 = vmatprep.subr.bf16.mxu0 %v5856_v17  ;;  %v5876_v30 = vld [vmem:[#allocation5 + $0x604] ss:$48 sps:$4 sm:$0xff]   ;;  %v5878_v31 = vld [vmem:[#allocation5] ss:$48 sps:$4 sm:$0xff]   ;;  %v5918_v2 = vld [vmem:[#allocation5 + $0x68] ss:$48 sps:$4 sm:$0xff]  }
  0x51   :  { %744 = vmatprep.subr.bf16.mxu1 %v5858_v18  ;;  %v5879_v32 = vld [vmem:[#allocation5 + $0x600] ss:$48 sps:$4 sm:$0xff]   ;;  %v5880_v35 = vld [vmem:[#allocation5 + $0x5a4] ss:$48 sps:$4 sm:$0xff]   ;;  %v5926_v5 = vld [vmem:[#allocation5 + $0xc] ss:$48 sps:$4 sm:$0xff]  }
  0x52   :  { %v88_v33 = vld [vmem:[#allocation2 + $0x10] sm:$0xff]  ;;  %v90_v51 = vld [vmem:[#allocation2 + $0x20] sm:$0xff]  ;;  %v5924_v6 = vld [vmem:[#allocation5 + $0x8] ss:$48 sps:$4 sm:$0xff]   ;;  %s5097_s4 = sshll.u32 %s6836_s2, 4  ;;  %s5098_s4 = int_to_ptr.vmem [resolvable:$true] %s5097_s4 }
  0x53   :  { %702 = vmatpush1.bf16.msra.mxu0 %v5860_v19  ;;  %v6886_v37 = vpack.c.bf16 %v91_v34, %v88_v33  ;;  %v5885_v39 = vld [vmem:[#allocation5 + $0x5a0] ss:$48 sps:$4 sm:$0xff]   ;;  %v5886_v40 = vld [vmem:[#allocation5 + $0x544] ss:$48 sps:$4 sm:$0xff]   ;;  %v6889_v54 = vpack.c.bf16 %v90_v51, %v87_v50  ;;  %v89_v9 = vld [vmem:[#allocation2 + $0x18] sm:$0xff]  ;;  %s6796_s22 = scalar_lea.vmem %s5098_s4, 768  ;;  %p6801_p12 = scmp.lt.s32.totalorder %s5098_s4, %s5098_s4 }
  0x54   :  { %745 = vmatpush1.bf16.msra.mxu1 %v5861_v20  ;;  %703 = vmatprep.subr.bf16.mxu0 %v5862_v21  ;;  %v5891_v43 = vld [vmem:[#allocation5 + $0x540] ss:$48 sps:$4 sm:$0xff]   ;;  %v5892_v44 = vld [vmem:[#allocation5 + $0x4e4] ss:$48 sps:$4 sm:$0xff]   ;;  %v5930_v10 = vld [vmem:[#allocation5 + $0x5ac] ss:$48 sps:$4 sm:$0xff]   ;;  %p6797_p11 = scmp.ne.s32.totalorder %s5098_s4, %s6796_s22  ;;  %p6802_p13 = scmp.lt.s32.totalorder %s6796_s22, %s6796_s22 }
  0x55   :  { %746 = vmatprep.subr.bf16.mxu1 %v5864_v22  ;;  %v5897_v47 = vld [vmem:[#allocation5 + $0x4e0] ss:$48 sps:$4 sm:$0xff]   ;;  %v5898_v48 = vld [vmem:[#allocation5 + $0x484] ss:$48 sps:$4 sm:$0xff]   ;;  %725 = vmatprep.mubr.bf16.mxu0 %v6889_v54  ;;  %v5933_v11 = vld [vmem:[#allocation5 + $0x8ac] ss:$48 sps:$4 sm:$0xff]  }
  0x56   :  { %v5903_v53 = vld [vmem:[#allocation5 + $0x480] ss:$48 sps:$4 sm:$0xff]   ;;  %v5904_v55 = vld [vmem:[#allocation5 + $0x424] ss:$48 sps:$4 sm:$0xff]   ;;  %v5928_v13 = vld [vmem:[#allocation5 + $0x5a8] ss:$48 sps:$4 sm:$0xff]   ;;  %p6803_p0 = por %p6802_p13, %p6801_p12 }
  0x57   :  { %704 = vmatpush1.bf16.msra.mxu0 %v5866_v23  ;;  %v5909_v58 = vld [vmem:[#allocation5 + $0x420] ss:$48 sps:$4 sm:$0xff]   ;;  %v5910_v59 = vld [vmem:[#allocation5 + $0x3c4] ss:$48 sps:$4 sm:$0xff]   ;;  %v5931_v14 = vld [vmem:[#allocation5 + $0x8a8] ss:$48 sps:$4 sm:$0xff]  }
  0x58   :  { %747 = vmatpush1.bf16.msra.mxu1 %v5867_v24  ;;  %705 = vmatprep.subr.bf16.mxu0 %v5868_v25  ;;  %v5915_v62 = vld [vmem:[#allocation5 + $0x3c0] ss:$48 sps:$4 sm:$0xff]   ;;  %v5916_v63 = vld [vmem:[#allocation5 + $0x364] ss:$48 sps:$4 sm:$0xff]   ;;  %v5936_v15 = vld [vmem:[#allocation5 + $0x54c] ss:$48 sps:$4 sm:$0xff]   ;;  %p6804_p1 = pnand %p6803_p0, %p6797_p11 }
  0x59   :  { %748 = vmatprep.subr.bf16.mxu1 %v5870_v26  ;;  %v5921_v3 = vld [vmem:[#allocation5 + $0x360] ss:$48 sps:$4 sm:$0xff]   ;;  %v5922_v4 = vld [vmem:[#allocation5 + $0x304] ss:$48 sps:$4 sm:$0xff]   ;;  %v5939_v16 = vld [vmem:[#allocation5 + $0x84c] ss:$48 sps:$4 sm:$0xff]  }
  0x5a   :  { %v5927_v7 = vld [vmem:[#allocation5 + $0x300] ss:$48 sps:$4 sm:$0xff]   ;;  %v5934_v17 = vld [vmem:[#allocation5 + $0x548] ss:$48 sps:$4 sm:$0xff]   ;;  %v5942_v19 = vld [vmem:[#allocation5 + $0x4ec] ss:$48 sps:$4 sm:$0xff]  }
  0x5b   :  { %706 = vmatpush1.bf16.msra.mxu0 %v5872_v27  ;;  %v86_v8 = vld [vmem:[#allocation2] sm:$0xff]  ;;  %v5937_v18 = vld [vmem:[#allocation5 + $0x848] ss:$48 sps:$4 sm:$0xff]   ;;  %v5945_v20 = vld [vmem:[#allocation5 + $0x7ec] ss:$48 sps:$4 sm:$0xff]  }
  0x5c   :  { %749 = vmatpush1.bf16.msra.mxu1 %v5873_v28  ;;  %707 = vmatprep.subr.bf16.mxu0 %v5874_v29  ;;  %v6893_v12 = vpack.c.bf16 %v89_v9, %v86_v8  ;;  %v5940_v21 = vld [vmem:[#allocation5 + $0x4e8] ss:$48 sps:$4 sm:$0xff]   ;;  %v5948_v23 = vld [vmem:[#allocation5 + $0x48c] ss:$48 sps:$4 sm:$0xff]   ;;  %v5982_v50 = vld [vmem:[#allocation5 + $0x250] ss:$48 sps:$4 sm:$0xff]  }
  0x5d   :  { %750 = vmatprep.subr.bf16.mxu1 %v5876_v30  ;;  %v5943_v22 = vld [vmem:[#allocation5 + $0x7e8] ss:$48 sps:$4 sm:$0xff]   ;;  %v5951_v24 = vld [vmem:[#allocation5 + $0x78c] ss:$48 sps:$4 sm:$0xff]   ;;  %v5985_v51 = vld [vmem:[#allocation5 + $0x850] ss:$48 sps:$4 sm:$0xff]  }
  0x5e   :  { %v5946_v25 = vld [vmem:[#allocation5 + $0x488] ss:$48 sps:$4 sm:$0xff]   ;;  %v5954_v27 = vld [vmem:[#allocation5 + $0x42c] ss:$48 sps:$4 sm:$0xff]   ;;  %v6012_v8 = vld [vmem:[#allocation5 + $0x70] ss:$48 sps:$4 sm:$0xff]  }
  0x5f   :  { %708 = vmatpush1.bf16.msra.mxu0 %v5878_v31  ;;  %v5949_v26 = vld [vmem:[#allocation5 + $0x788] ss:$48 sps:$4 sm:$0xff]   ;;  %v5957_v28 = vld [vmem:[#allocation5 + $0x72c] ss:$48 sps:$4 sm:$0xff]   ;;  %v6015_v9 = vld [vmem:[#allocation5 + $0x670] ss:$48 sps:$4 sm:$0xff]  }
  0x60   :  { %751 = vmatpush1.bf16.msra.mxu1 %v5879_v32  ;;  %709 = vmatprep.subr.bf16.mxu0 %v5880_v35  ;;  %v5952_v29 = vld [vmem:[#allocation5 + $0x428] ss:$48 sps:$4 sm:$0xff]   ;;  %v5960_v31 = vld [vmem:[#allocation5 + $0x3cc] ss:$48 sps:$4 sm:$0xff]  }
  0x61   :  { %779 = vmatprep.subr.bf16.mxu1 %v5884_v36  ;;  %v5955_v30 = vld [vmem:[#allocation5 + $0x728] ss:$48 sps:$4 sm:$0xff]   ;;  %v5963_v32 = vld [vmem:[#allocation5 + $0x6cc] ss:$48 sps:$4 sm:$0xff]  }
  0x62   :  { %v5958_v33 = vld [vmem:[#allocation5 + $0x3c8] ss:$48 sps:$4 sm:$0xff]   ;;  %v5966_v35 = vld [vmem:[#allocation5 + $0x36c] ss:$48 sps:$4 sm:$0xff]  }
  0x63   :  { %769 = vmatmul.mubr.bf16.vlgmr.msra.gmra.mxu1 %v6886_v37  ;;  %710 = vmatpush2.bf16.msra.mxu0 %v5885_v39  ;;  %v5961_v34 = vld [vmem:[#allocation5 + $0x6c8] ss:$48 sps:$4 sm:$0xff]   ;;  %v5969_v36 = vld [vmem:[#allocation5 + $0x66c] ss:$48 sps:$4 sm:$0xff]  }
  0x64   :  { %780 = vmatpush1.bf16.msra.mxu1 %v5882_v38  ;;  %711 = vmatprep.subr.bf16.mxu0 %v5886_v40  ;;  %v5964_v38 = vld [vmem:[#allocation5 + $0x368] ss:$48 sps:$4 sm:$0xff]   ;;  %v5972_v40 = vld [vmem:[#allocation5 + $0x30c] ss:$48 sps:$4 sm:$0xff]  }
  0x65   :  { %781 = vmatprep.subr.bf16.mxu1 %v5890_v41  ;;  %811 = vmatprep.mubr.bf16.mxu1 %v6889_v54  ;;  %v5967_v39 = vld [vmem:[#allocation5 + $0x668] ss:$48 sps:$4 sm:$0xff]   ;;  %v5975_v41 = vld [vmem:[#allocation5 + $0x60c] ss:$48 sps:$4 sm:$0xff]  }
  0x67   :  { %712 = vmatpush2.bf16.msra.mxu0 %v5891_v43  ;;  %v5973_v43 = vld [vmem:[#allocation5 + $0x608] ss:$48 sps:$4 sm:$0xff]  }
  0x68   :  { %782 = vmatpush1.bf16.msra.mxu1 %v5888_v42  ;;  %713 = vmatprep.subr.bf16.mxu0 %v5892_v44  ;;  %v5970_v42 = vld [vmem:[#allocation5 + $0x308] ss:$48 sps:$4 sm:$0xff]   ;;  %v5978_v44 = vld [vmem:[#allocation5 + $0x2b4] ss:$48 sps:$4 sm:$0xff]  }
  0x69   :  { %783 = vmatprep.subr.bf16.mxu1 %v5896_v45  ;;  %v5981_v45 = vld [vmem:[#allocation5 + $0x8b4] ss:$48 sps:$4 sm:$0xff]  }
  0x6b   :  { %714 = vmatpush2.bf16.msra.mxu0 %v5897_v47  ;;  %v5979_v47 = vld [vmem:[#allocation5 + $0x8b0] ss:$48 sps:$4 sm:$0xff]  }
  0x6c   :  { %784 = vmatpush1.bf16.msra.mxu1 %v5894_v46  ;;  %715 = vmatprep.subr.bf16.mxu0 %v5898_v48  ;;  %v5976_v46 = vld [vmem:[#allocation5 + $0x2b0] ss:$48 sps:$4 sm:$0xff]   ;;  %v5984_v48 = vld [vmem:[#allocation5 + $0x254] ss:$48 sps:$4 sm:$0xff]  }
  0x6d   :  { %785 = vmatprep.subr.bf16.mxu1 %v5902_v49  ;;  %v5987_v49 = vld [vmem:[#allocation5 + $0x854] ss:$48 sps:$4 sm:$0xff]  }
  0x6f   :  { %716 = vmatpush2.bf16.msra.mxu0 %v5903_v53  ;;  %v5993_v53 = vld [vmem:[#allocation5 + $0x7f4] ss:$48 sps:$4 sm:$0xff]  }
  0x70   :  { %786 = vmatpush1.bf16.msra.mxu1 %v5900_v52  ;;  %717 = vmatprep.subr.bf16.mxu0 %v5904_v55  ;;  %v5990_v52 = vld [vmem:[#allocation5 + $0x1f4] ss:$48 sps:$4 sm:$0xff]   ;;  %v5988_v55 = vld [vmem:[#allocation5 + $0x1f0] ss:$48 sps:$4 sm:$0xff]  }
  0x71   :  { %787 = vmatprep.subr.bf16.mxu1 %v5908_v56  ;;  %v5991_v56 = vld [vmem:[#allocation5 + $0x7f0] ss:$48 sps:$4 sm:$0xff]  }
  0x73   :  { %718 = vmatpush2.bf16.msra.mxu0 %v5909_v58  ;;  %v5999_v58 = vld [vmem:[#allocation5 + $0x794] ss:$48 sps:$4 sm:$0xff]  }
  0x74   :  { %788 = vmatpush1.bf16.msra.mxu1 %v5906_v57  ;;  %719 = vmatprep.subr.bf16.mxu0 %v5910_v59  ;;  %v5996_v57 = vld [vmem:[#allocation5 + $0x194] ss:$48 sps:$4 sm:$0xff]   ;;  %v5994_v59 = vld [vmem:[#allocation5 + $0x190] ss:$48 sps:$4 sm:$0xff]  }
  0x75   :  { %789 = vmatprep.subr.bf16.mxu1 %v5914_v60  ;;  %v5997_v60 = vld [vmem:[#allocation5 + $0x790] ss:$48 sps:$4 sm:$0xff]  }
  0x77   :  { %720 = vmatpush2.bf16.msra.mxu0 %v5915_v62  ;;  %v6005_v62 = vld [vmem:[#allocation5 + $0x734] ss:$48 sps:$4 sm:$0xff]  }
  0x78   :  { %790 = vmatpush1.bf16.msra.mxu1 %v5912_v61  ;;  %721 = vmatprep.subr.bf16.mxu0 %v5916_v63  ;;  %v6002_v61 = vld [vmem:[#allocation5 + $0x134] ss:$48 sps:$4 sm:$0xff]   ;;  %v6000_v63 = vld [vmem:[#allocation5 + $0x130] ss:$48 sps:$4 sm:$0xff]  }
  0x79   :  { %791 = vmatprep.subr.bf16.mxu1 %v5920_v1  ;;  %v6003_v1 = vld [vmem:[#allocation5 + $0x730] ss:$48 sps:$4 sm:$0xff]  }
  0x7b   :  { %722 = vmatpush2.bf16.msra.mxu0 %v5921_v3  ;;  %v6011_v3 = vld [vmem:[#allocation5 + $0x6d4] ss:$48 sps:$4 sm:$0xff]  }
  0x7c   :  { %792 = vmatpush1.bf16.msra.mxu1 %v5918_v2  ;;  %723 = vmatprep.subr.bf16.mxu0 %v5922_v4  ;;  %v6008_v2 = vld [vmem:[#allocation5 + $0xd4] ss:$48 sps:$4 sm:$0xff]   ;;  %v6006_v4 = vld [vmem:[#allocation5 + $0xd0] ss:$48 sps:$4 sm:$0xff]  }
  0x7d   :  { %793 = vmatprep.subr.bf16.mxu1 %v5926_v5  ;;  %v6009_v5 = vld [vmem:[#allocation5 + $0x6d0] ss:$48 sps:$4 sm:$0xff]  }
  0x7f   :  { %724 = vmatpush2.bf16.msra.mxu0 %v5927_v7  ;;  %v6017_v7 = vld [vmem:[#allocation5 + $0x674] ss:$48 sps:$4 sm:$0xff]  }
  0x80   :  { %794 = vmatpush1.bf16.msra.mxu1 %v5924_v6  ;;  %822 = vmatprep.subr.bf16.mxu0 %v5933_v11  ;;  %v6014_v6 = vld [vmem:[#allocation5 + $0x74] ss:$48 sps:$4 sm:$0xff]  }
  0x81   :  { %795 = vmatprep.subr.bf16.mxu1 %v5930_v10  ;;  %v6020_v10 = vld [vmem:[#allocation5 + $0x14] ss:$48 sps:$4 sm:$0xff]  }
  0x82   :  { %726 = vmatmul.mubr.bf16.vlgmr.msra.gmra.mxu0 %v6893_v12  ;;  %v6023_v11 = vld [vmem:[#allocation5 + $0x614] ss:$48 sps:$4 sm:$0xff]  }
  0x83   :  { %823 = vmatpush1.bf16.msra.mxu0 %v5931_v14  ;;  %854 = vmatprep.mubr.bf16.mxu0 %v6835_v0  ;;  %v6021_v14 = vld [vmem:[#allocation5 + $0x610] ss:$48 sps:$4 sm:$0xff]  }
  0x84   :  { %796 = vmatpush2.bf16.msra.mxu1 %v5928_v13  ;;  %824 = vmatprep.subr.bf16.mxu0 %v5939_v16  ;;  %v6018_v13 = vld [vmem:[#allocation5 + $0x10] ss:$48 sps:$4 sm:$0xff]   ;;  %v6029_v16 = vld [vmem:[#allocation5 + $0x2bc] ss:$48 sps:$4 sm:$0xff]  }
  0x85   :  { %797 = vmatprep.subr.bf16.mxu1 %v5936_v15  ;;  %v6026_v15 = vld [vmem:[#allocation5 + $0x5b4] ss:$48 sps:$4 sm:$0xff]  }
  0x87   :  { %825 = vmatpush1.bf16.msra.mxu0 %v5937_v18  ;;  %v6027_v18 = vld [vmem:[#allocation5 + $0x2b8] ss:$48 sps:$4 sm:$0xff]  }
  0x88   :  { %798 = vmatpush2.bf16.msra.mxu1 %v5934_v17  ;;  %826 = vmatprep.subr.bf16.mxu0 %v5945_v20  ;;  %v6024_v17 = vld [vmem:[#allocation5 + $0x5b0] ss:$48 sps:$4 sm:$0xff]   ;;  %v6035_v20 = vld [vmem:[#allocation5 + $0x25c] ss:$48 sps:$4 sm:$0xff]  }
  0x89   :  { %799 = vmatprep.subr.bf16.mxu1 %v5942_v19  ;;  %v6032_v19 = vld [vmem:[#allocation5 + $0x554] ss:$48 sps:$4 sm:$0xff]  }
  0x8b   :  { %827 = vmatpush1.bf16.msra.mxu0 %v5943_v22  ;;  %v6033_v22 = vld [vmem:[#allocation5 + $0x258] ss:$48 sps:$4 sm:$0xff]  }
  0x8c   :  { %800 = vmatpush2.bf16.msra.mxu1 %v5940_v21  ;;  %828 = vmatprep.subr.bf16.mxu0 %v5951_v24  ;;  %v6030_v21 = vld [vmem:[#allocation5 + $0x550] ss:$48 sps:$4 sm:$0xff]   ;;  %v6041_v24 = vld [vmem:[#allocation5 + $0x1fc] ss:$48 sps:$4 sm:$0xff]  }
  0x8d   :  { %801 = vmatprep.subr.bf16.mxu1 %v5948_v23  ;;  %v6038_v23 = vld [vmem:[#allocation5 + $0x4f4] ss:$48 sps:$4 sm:$0xff]  }
  0x8f   :  { %829 = vmatpush1.bf16.msra.mxu0 %v5949_v26  ;;  %v6039_v26 = vld [vmem:[#allocation5 + $0x1f8] ss:$48 sps:$4 sm:$0xff]  }
  0x90   :  { %802 = vmatpush2.bf16.msra.mxu1 %v5946_v25  ;;  %830 = vmatprep.subr.bf16.mxu0 %v5957_v28  ;;  %v6036_v25 = vld [vmem:[#allocation5 + $0x4f0] ss:$48 sps:$4 sm:$0xff]   ;;  %v6047_v28 = vld [vmem:[#allocation5 + $0x19c] ss:$48 sps:$4 sm:$0xff]  }
  0x91   :  { %803 = vmatprep.subr.bf16.mxu1 %v5954_v27  ;;  %v6044_v27 = vld [vmem:[#allocation5 + $0x494] ss:$48 sps:$4 sm:$0xff]  }
  0x93   :  { %831 = vmatpush1.bf16.msra.mxu0 %v5955_v30  ;;  %v6045_v30 = vld [vmem:[#allocation5 + $0x198] ss:$48 sps:$4 sm:$0xff]  }
  0x94   :  { %804 = vmatpush2.bf16.msra.mxu1 %v5952_v29  ;;  %832 = vmatprep.subr.bf16.mxu0 %v5963_v32  ;;  %v6042_v29 = vld [vmem:[#allocation5 + $0x490] ss:$48 sps:$4 sm:$0xff]   ;;  %v6053_v32 = vld [vmem:[#allocation5 + $0x13c] ss:$48 sps:$4 sm:$0xff]  }
  0x95   :  { %805 = vmatprep.subr.bf16.mxu1 %v5960_v31  ;;  %v6050_v31 = vld [vmem:[#allocation5 + $0x434] ss:$48 sps:$4 sm:$0xff]  }
  0x97   :  { %833 = vmatpush1.bf16.msra.mxu0 %v5961_v34  ;;  %v6051_v34 = vld [vmem:[#allocation5 + $0x138] ss:$48 sps:$4 sm:$0xff]  }
  0x98   :  { %806 = vmatpush2.bf16.msra.mxu1 %v5958_v33  ;;  %834 = vmatprep.subr.bf16.mxu0 %v5969_v36  ;;  %v6048_v33 = vld [vmem:[#allocation5 + $0x430] ss:$48 sps:$4 sm:$0xff]   ;;  %v6059_v36 = vld [vmem:[#allocation5 + $0xdc] ss:$48 sps:$4 sm:$0xff]  }
  0x99   :  { %807 = vmatprep.subr.bf16.mxu1 %v5966_v35  ;;  %v6056_v35 = vld [vmem:[#allocation5 + $0x3d4] ss:$48 sps:$4 sm:$0xff]  }
  0x9b   :  { %835 = vmatpush1.bf16.msra.mxu0 %v5967_v39  ;;  %v6057_v39 = vld [vmem:[#allocation5 + $0xd8] ss:$48 sps:$4 sm:$0xff]  }
  0x9c   :  { %808 = vmatpush2.bf16.msra.mxu1 %v5964_v38  ;;  %836 = vmatprep.subr.bf16.mxu0 %v5975_v41  ;;  %v6054_v38 = vld [vmem:[#allocation5 + $0x3d0] ss:$48 sps:$4 sm:$0xff]   ;;  %v6065_v41 = vld [vmem:[#allocation5 + $0x7c] ss:$48 sps:$4 sm:$0xff]  }
  0x9d   :  { %809 = vmatprep.subr.bf16.mxu1 %v5972_v40  ;;  %v6062_v40 = vld [vmem:[#allocation5 + $0x374] ss:$48 sps:$4 sm:$0xff]  }
  0x9f   :  { %837 = vmatpush1.bf16.msra.mxu0 %v5973_v43  ;;  %v6063_v43 = vld [vmem:[#allocation5 + $0x78] ss:$48 sps:$4 sm:$0xff]  }
  0xa0   :  { %810 = vmatpush2.bf16.msra.mxu1 %v5970_v42  ;;  %1667 = vmatprep.subr.bf16.mxu0 %v5978_v44  ;;  %v6060_v42 = vld [vmem:[#allocation5 + $0x370] ss:$48 sps:$4 sm:$0xff]   ;;  %v6068_v44 = vld [vmem:[#allocation5 + $0x314] ss:$48 sps:$4 sm:$0xff]  }
  0xa1   :  { %1710 = vmatprep.subr.bf16.mxu1 %v5981_v45  ;;  %v6071_v45 = vld [vmem:[#allocation5 + $0x1c] ss:$48 sps:$4 sm:$0xff]  }
  0xa2   :  { %855 = vmatmul.mubr.bf16.vlgmr.msra.gmra.mxu0 %v6886_v37 }
  0xa3   :  { %812 = vmatmul.mubr.bf16.vlgmr.msra.gmra.mxu1 %v6893_v12  ;;  %1668 = vmatpush1.bf16.msra.mxu0 %v5976_v46  ;;  %v6066_v46 = vld [vmem:[#allocation5 + $0x310] ss:$48 sps:$4 sm:$0xff]  }
  0xa4   :  { %1711 = vmatpush1.bf16.msra.mxu1 %v5979_v47  ;;  %1669 = vmatprep.subr.bf16.mxu0 %v5984_v48  ;;  %v6069_v47 = vld [vmem:[#allocation5 + $0x18] ss:$48 sps:$4 sm:$0xff]   ;;  %v6074_v48 = vld [vmem:[#allocation5 + $0x5bc] ss:$48 sps:$4 sm:$0xff]  }
  0xa5   :  { %1712 = vmatprep.subr.bf16.mxu1 %v5987_v49  ;;  %1742 = vmatprep.mubr.bf16.mxu1 %v6835_v0  ;;  %v6077_v49 = vld [vmem:[#allocation5 + $0x8bc] ss:$48 sps:$4 sm:$0xff]  }
  0xa6   :  { %1699 = vmatprep.mubr.bf16.mxu0 %v6889_v54 }
  0xa7   :  { %1670 = vmatpush1.bf16.msra.mxu0 %v5982_v50  ;;  %v6072_v50 = vld [vmem:[#allocation5 + $0x5b8] ss:$48 sps:$4 sm:$0xff]  }
  0xa8   :  { %1713 = vmatpush1.bf16.msra.mxu1 %v5985_v51  ;;  %1671 = vmatprep.subr.bf16.mxu0 %v5990_v52  ;;  %v6075_v51 = vld [vmem:[#allocation5 + $0x8b8] ss:$48 sps:$4 sm:$0xff]   ;;  %v6080_v52 = vld [vmem:[#allocation5 + $0x55c] ss:$48 sps:$4 sm:$0xff]  }
  0xa9   :  { %1714 = vmatprep.subr.bf16.mxu1 %v5993_v53  ;;  %v6083_v53 = vld [vmem:[#allocation5 + $0x85c] ss:$48 sps:$4 sm:$0xff]  }
  0xab   :  { %1672 = vmatpush1.bf16.msra.mxu0 %v5988_v55  ;;  %v6078_v55 = vld [vmem:[#allocation5 + $0x558] ss:$48 sps:$4 sm:$0xff]  }
  0xac   :  { %1715 = vmatpush1.bf16.msra.mxu1 %v5991_v56  ;;  %1673 = vmatprep.subr.bf16.mxu0 %v5996_v57  ;;  %v6081_v56 = vld [vmem:[#allocation5 + $0x858] ss:$48 sps:$4 sm:$0xff]   ;;  %v6086_v57 = vld [vmem:[#allocation5 + $0x4fc] ss:$48 sps:$4 sm:$0xff]  }
  0xad   :  { %1716 = vmatprep.subr.bf16.mxu1 %v5999_v58  ;;  %v6089_v58 = vld [vmem:[#allocation5 + $0x7fc] ss:$48 sps:$4 sm:$0xff]  }
  0xaf   :  { %1674 = vmatpush1.bf16.msra.mxu0 %v5994_v59  ;;  %v6084_v59 = vld [vmem:[#allocation5 + $0x4f8] ss:$48 sps:$4 sm:$0xff]  }
  0xb0   :  { %1717 = vmatpush1.bf16.msra.mxu1 %v5997_v60  ;;  %1675 = vmatprep.subr.bf16.mxu0 %v6002_v61  ;;  %v6087_v60 = vld [vmem:[#allocation5 + $0x7f8] ss:$48 sps:$4 sm:$0xff]   ;;  %v6092_v61 = vld [vmem:[#allocation5 + $0x49c] ss:$48 sps:$4 sm:$0xff]  }
  0xb1   :  { %1718 = vmatprep.subr.bf16.mxu1 %v6005_v62  ;;  %v6095_v62 = vld [vmem:[#allocation5 + $0x79c] ss:$48 sps:$4 sm:$0xff]  }
  0xb3   :  { %1676 = vmatpush1.bf16.msra.mxu0 %v6000_v63  ;;  %v6090_v63 = vld [vmem:[#allocation5 + $0x498] ss:$48 sps:$4 sm:$0xff]  }
  0xb4   :  { %1719 = vmatpush1.bf16.msra.mxu1 %v6003_v1  ;;  %1677 = vmatprep.subr.bf16.mxu0 %v6008_v2  ;;  %v6093_v1 = vld [vmem:[#allocation5 + $0x798] ss:$48 sps:$4 sm:$0xff]   ;;  %v6098_v2 = vld [vmem:[#allocation5 + $0x43c] ss:$48 sps:$4 sm:$0xff]  }
  0xb5   :  { %1720 = vmatprep.subr.bf16.mxu1 %v6011_v3  ;;  %v6101_v3 = vld [vmem:[#allocation5 + $0x73c] ss:$48 sps:$4 sm:$0xff]  }
  0xb7   :  { %1678 = vmatpush1.bf16.msra.mxu0 %v6006_v4  ;;  %v6096_v4 = vld [vmem:[#allocation5 + $0x438] ss:$48 sps:$4 sm:$0xff]  }
  0xb8   :  { %1721 = vmatpush1.bf16.msra.mxu1 %v6009_v5  ;;  %1679 = vmatprep.subr.bf16.mxu0 %v6014_v6  ;;  %v6099_v5 = vld [vmem:[#allocation5 + $0x738] ss:$48 sps:$4 sm:$0xff]   ;;  %v6104_v6 = vld [vmem:[#allocation5 + $0x3dc] ss:$48 sps:$4 sm:$0xff]  }
  0xb9   :  { %1722 = vmatprep.subr.bf16.mxu1 %v6017_v7  ;;  %v6107_v7 = vld [vmem:[#allocation5 + $0x6dc] ss:$48 sps:$4 sm:$0xff]  }
  0xbb   :  { %1680 = vmatpush1.bf16.msra.mxu0 %v6012_v8  ;;  %v6102_v8 = vld [vmem:[#allocation5 + $0x3d8] ss:$48 sps:$4 sm:$0xff]  }
  0xbc   :  { %1723 = vmatpush1.bf16.msra.mxu1 %v6015_v9  ;;  %1681 = vmatprep.subr.bf16.mxu0 %v6020_v10  ;;  %v6105_v9 = vld [vmem:[#allocation5 + $0x6d8] ss:$48 sps:$4 sm:$0xff]   ;;  %v6110_v10 = vld [vmem:[#allocation5 + $0x37c] ss:$48 sps:$4 sm:$0xff]  }
  0xbd   :  { %1724 = vmatprep.subr.bf16.mxu1 %v6023_v11  ;;  %v6113_v11 = vld [vmem:[#allocation5 + $0x67c] ss:$48 sps:$4 sm:$0xff]  }
  0xbf   :  { %1682 = vmatpush1.bf16.msra.mxu0 %v6018_v13  ;;  %v6108_v13 = vld [vmem:[#allocation5 + $0x378] ss:$48 sps:$4 sm:$0xff]  }
  0xc0   :  { %1725 = vmatpush1.bf16.msra.mxu1 %v6021_v14  ;;  %1683 = vmatprep.subr.bf16.mxu0 %v6026_v15  ;;  %v6111_v14 = vld [vmem:[#allocation5 + $0x678] ss:$48 sps:$4 sm:$0xff]   ;;  %v6116_v15 = vld [vmem:[#allocation5 + $0x31c] ss:$48 sps:$4 sm:$0xff]  }
  0xc1   :  { %1753 = vmatprep.subr.bf16.mxu1 %v6029_v16  ;;  %v6119_v16 = vld [vmem:[#allocation5 + $0x61c] ss:$48 sps:$4 sm:$0xff]  }
  0xc3   :  { %1743 = vmatmul.mubr.bf16.vlgmr.msra.gmra.mxu1 %v6886_v37  ;;  %1684 = vmatpush2.bf16.msra.mxu0 %v6024_v17  ;;  %v6114_v17 = vld [vmem:[#allocation5 + $0x318] ss:$48 sps:$4 sm:$0xff]  }
  0xc4   :  { %1754 = vmatpush1.bf16.msra.mxu1 %v6027_v18  ;;  %1685 = vmatprep.subr.bf16.mxu0 %v6032_v19  ;;  %v6117_v18 = vld [vmem:[#allocation5 + $0x618] ss:$48 sps:$4 sm:$0xff]   ;;  %v6120_v19 = vld [vmem:[#allocation8 + $0x3a8] ss:$12 sps:$4 sm:$0xff]  }
  0xc5   :  { %1755 = vmatprep.subr.bf16.mxu1 %v6035_v20  ;;  %1785 = vmatprep.mubr.bf16.mxu1 %v6889_v54  ;;  %v6122_v20 = vld [vmem:[#allocation8 + $0x3ac] ss:$12 sps:$4 sm:$0xff]  }
  0xc7   :  { %1686 = vmatpush2.bf16.msra.mxu0 %v6030_v21  ;;  %v6125_v21 = vld [vmem:[#allocation8 + $0x394] ss:$12 sps:$4 sm:$0xff]  }
  0xc8   :  { %1756 = vmatpush1.bf16.msra.mxu1 %v6033_v22  ;;  %1687 = vmatprep.subr.bf16.mxu0 %v6038_v23  ;;  %v6123_v22 = vld [vmem:[#allocation8 + $0x390] ss:$12 sps:$4 sm:$0xff]  }
  0xc9   :  { %1757 = vmatprep.subr.bf16.mxu1 %v6041_v24  ;;  %v6128_v23 = vld [vmem:[#allocation8 + $0x37c] ss:$12 sps:$4 sm:$0xff]   ;;  %v6126_v24 = vld [vmem:[#allocation8 + $0x378] ss:$12 sps:$4 sm:$0xff]  }
  0xcb   :  { %1688 = vmatpush2.bf16.msra.mxu0 %v6036_v25  ;;  %v6131_v25 = vld [vmem:[#allocation8 + $0x364] ss:$12 sps:$4 sm:$0xff]  }
  0xcc   :  { %1758 = vmatpush1.bf16.msra.mxu1 %v6039_v26  ;;  %1689 = vmatprep.subr.bf16.mxu0 %v6044_v27  ;;  %v6129_v26 = vld [vmem:[#allocation8 + $0x360] ss:$12 sps:$4 sm:$0xff]  }
  0xcd   :  { %1759 = vmatprep.subr.bf16.mxu1 %v6047_v28  ;;  %v6134_v27 = vld [vmem:[#allocation8 + $0x34c] ss:$12 sps:$4 sm:$0xff]   ;;  %v6132_v28 = vld [vmem:[#allocation8 + $0x348] ss:$12 sps:$4 sm:$0xff]  }
  0xcf   :  { %1690 = vmatpush2.bf16.msra.mxu0 %v6042_v29  ;;  %v6137_v29 = vld [vmem:[#allocation8 + $0x334] ss:$12 sps:$4 sm:$0xff]  }
  0xd0   :  { %1760 = vmatpush1.bf16.msra.mxu1 %v6045_v30  ;;  %1691 = vmatprep.subr.bf16.mxu0 %v6050_v31  ;;  %v6135_v30 = vld [vmem:[#allocation8 + $0x330] ss:$12 sps:$4 sm:$0xff]  }
  0xd1   :  { %1761 = vmatprep.subr.bf16.mxu1 %v6053_v32  ;;  %v6140_v31 = vld [vmem:[#allocation8 + $0x31c] ss:$12 sps:$4 sm:$0xff]   ;;  %v6138_v32 = vld [vmem:[#allocation8 + $0x318] ss:$12 sps:$4 sm:$0xff]  }
  0xd3   :  { %1692 = vmatpush2.bf16.msra.mxu0 %v6048_v33  ;;  %v6143_v33 = vld [vmem:[#allocation8 + $0x304] ss:$12 sps:$4 sm:$0xff]  }
  0xd4   :  { %1762 = vmatpush1.bf16.msra.mxu1 %v6051_v34  ;;  %1693 = vmatprep.subr.bf16.mxu0 %v6056_v35  ;;  %v6141_v34 = vld [vmem:[#allocation8 + $0x300] ss:$12 sps:$4 sm:$0xff]  }
  0xd5   :  { %1763 = vmatprep.subr.bf16.mxu1 %v6059_v36  ;;  %v6146_v35 = vld [vmem:[#allocation8 + $0x46c] ss:$12 sps:$4 sm:$0xff]  }
  0xd6   :  { %v6149_v36 = vld [vmem:[#allocation8 + $0x52c] ss:$12 sps:$4 sm:$0xff]  }
  0xd7   :  { %1694 = vmatpush2.bf16.msra.mxu0 %v6054_v38  ;;  %v6144_v38 = vld [vmem:[#allocation8 + $0x468] ss:$12 sps:$4 sm:$0xff]  }
  0xd8   :  { %1764 = vmatpush1.bf16.msra.mxu1 %v6057_v39  ;;  %1695 = vmatprep.subr.bf16.mxu0 %v6062_v40  ;;  %v6147_v39 = vld [vmem:[#allocation8 + $0x528] ss:$12 sps:$4 sm:$0xff]  }
  0xd9   :  { %1765 = vmatprep.subr.bf16.mxu1 %v6065_v41  ;;  %v6152_v40 = vld [vmem:[#allocation8 + $0x454] ss:$12 sps:$4 sm:$0xff]  }
  0xda   :  { %v6155_v41 = vld [vmem:[#allocation8 + $0x514] ss:$12 sps:$4 sm:$0xff]  }
  0xdb   :  { %1696 = vmatpush2.bf16.msra.mxu0 %v6060_v42  ;;  %v6150_v42 = vld [vmem:[#allocation8 + $0x450] ss:$12 sps:$4 sm:$0xff]  }
  0xdc   :  { %1766 = vmatpush1.bf16.msra.mxu1 %v6063_v43  ;;  %1697 = vmatprep.subr.bf16.mxu0 %v6068_v44  ;;  %v6153_v43 = vld [vmem:[#allocation8 + $0x510] ss:$12 sps:$4 sm:$0xff]   ;;  %v6156_v44 = vld [vmem:[#allocation8 + $0x438] ss:$12 sps:$4 sm:$0xff]  }
  0xdd   :  { %1767 = vmatprep.subr.bf16.mxu1 %v6071_v45  ;;  %v6158_v45 = vld [vmem:[#allocation8 + $0x43c] ss:$12 sps:$4 sm:$0xff]  }
  0xdf   :  { %1698 = vmatpush2.bf16.msra.mxu0 %v6066_v46  ;;  %v6159_v46 = vld [vmem:[#allocation8 + $0x4f8] ss:$12 sps:$4 sm:$0xff]  }
  0xe0   :  { %1768 = vmatpush1.bf16.msra.mxu1 %v6069_v47  ;;  %1796 = vmatprep.subr.bf16.mxu0 %v6077_v49  ;;  %v6161_v47 = vld [vmem:[#allocation8 + $0x4fc] ss:$12 sps:$4 sm:$0xff]   ;;  %v193_v49 = vlaneseq }
  0xe1   :  { %1769 = vmatprep.subr.bf16.mxu1 %v6074_v48  ;;  %v6164_v48 = vld [vmem:[#allocation8 + $0x424] ss:$12 sps:$4 sm:$0xff]  }
  0xe2   :  { %1700 = vmatmul.mubr.bf16.vlgmr.msra.gmra.mxu0 %v6893_v12 }
  0xe3   :  { %1797 = vmatpush1.bf16.msra.mxu0 %v6075_v51  ;;  %1828 = vmatprep.mubr.bf16.mxu0 %v6835_v0  ;;  %v6162_v51 = vld [vmem:[#allocation8 + $0x420] ss:$12 sps:$4 sm:$0xff]  }
  0xe4   :  { %1770 = vmatpush2.bf16.msra.mxu1 %v6072_v50  ;;  %1798 = vmatprep.subr.bf16.mxu0 %v6083_v53  ;;  %v6167_v50 = vld [vmem:[#allocation8 + $0x4e4] ss:$12 sps:$4 sm:$0xff]   ;;  %v6170_v53 = vld [vmem:[#allocation8 + $0x40c] ss:$12 sps:$4 sm:$0xff]  }
  0xe5   :  { %1771 = vmatprep.subr.bf16.mxu1 %v6080_v52  ;;  %v6165_v52 = vld [vmem:[#allocation8 + $0x4e0] ss:$12 sps:$4 sm:$0xff]  }
  0xe7   :  { %1799 = vmatpush1.bf16.msra.mxu0 %v6081_v56  ;;  %v6173_v56 = vld [vmem:[#allocation8 + $0x4cc] ss:$12 sps:$4 sm:$0xff]  }
  0xe8   :  { %1772 = vmatpush2.bf16.msra.mxu1 %v6078_v55  ;;  %1800 = vmatprep.subr.bf16.mxu0 %v6089_v58  ;;  %v6168_v55 = vld [vmem:[#allocation8 + $0x408] ss:$12 sps:$4 sm:$0xff]  }
  0xe9   :  { %1773 = vmatprep.subr.bf16.mxu1 %v6086_v57  ;;  %v6907_v57 = vshrl.u32 %v193_v49, 7  ;;  %v6171_v58 = vld [vmem:[#allocation8 + $0x4c8] ss:$12 sps:$4 sm:$0xff]  }
  0xeb   :  { %1801 = vmatpush1.bf16.msra.mxu0 %v6087_v60  ;;  %v6179_v60 = vld [vmem:[#allocation8 + $0x4b4] ss:$12 sps:$4 sm:$0xff]  }
  0xec   :  { %1774 = vmatpush2.bf16.msra.mxu1 %v6084_v59  ;;  %1802 = vmatprep.subr.bf16.mxu0 %v6095_v62  ;;  %v6176_v59 = vld [vmem:[#allocation8 + $0x3f4] ss:$12 sps:$4 sm:$0xff]   ;;  %v6174_v62 = vld [vmem:[#allocation8 + $0x3f0] ss:$12 sps:$4 sm:$0xff]  }
  0xed   :  { %1775 = vmatprep.subr.bf16.mxu1 %v6092_v61  ;;  %v6909_v61 = vld [vmem:[#allocation7] sm:$0xf] }
  0xef   :  { %1803 = vmatpush1.bf16.msra.mxu0 %v6093_v1  ;;  %v6177_v1 = vld [vmem:[#allocation8 + $0x4b0] ss:$12 sps:$4 sm:$0xff]  }
  0xf0   :  { %1776 = vmatpush2.bf16.msra.mxu1 %v6090_v63  ;;  %1804 = vmatprep.subr.bf16.mxu0 %v6101_v3  ;;  %v6912_v63 = vsub.s32 0, %v6907_v57 }
  0xf1   :  { %1777 = vmatprep.subr.bf16.mxu1 %v6098_v2 }
  0xf2   :  { %v196_v2 = vrot.slane %v6909_v61, %v6912_v63 }
  0xf3   :  { %1805 = vmatpush1.bf16.msra.mxu0 %v6099_v5  ;;  %v6185_v5 = vld [vmem:[#allocation8 + $0x49c] ss:$12 sps:$4 sm:$0xff]  }
  0xf4   :  { %1778 = vmatpush2.bf16.msra.mxu1 %v6096_v4  ;;  %1806 = vmatprep.subr.bf16.mxu0 %v6107_v7  ;;  %v6182_v4 = vld [vmem:[#allocation8 + $0x3dc] ss:$12 sps:$4 sm:$0xff]   ;;  %v6180_v7 = vld [vmem:[#allocation8 + $0x3d8] ss:$12 sps:$4 sm:$0xff]  }
  0xf5   :  { %1779 = vmatprep.subr.bf16.mxu1 %v6104_v6 }
  0xf7   :  { %1807 = vmatpush1.bf16.msra.mxu0 %v6105_v9 }
  0xf8   :  { %1780 = vmatpush2.bf16.msra.mxu1 %v6102_v8  ;;  %1808 = vmatprep.subr.bf16.mxu0 %v6113_v11  ;;  %v6183_v8 = vld [vmem:[#allocation8 + $0x498] ss:$12 sps:$4 sm:$0xff]  }
  0xf9   :  { %1781 = vmatprep.subr.bf16.mxu1 %v6110_v10 }
  0xfb   :  { %1809 = vmatpush1.bf16.msra.mxu0 %v6111_v14  ;;  %v6188_v14 = vld [vmem:[#allocation8 + $0x3c4] ss:$12 sps:$4 sm:$0xff]  }
  0xfc   :  { %1782 = vmatpush2.bf16.msra.mxu1 %v6108_v13  ;;  %1810 = vmatprep.subr.bf16.mxu0 %v6119_v16 }
  0xfd   :  { %1783 = vmatprep.subr.bf16.mxu1 %v6116_v15  ;;  %v6191_v15 = vld [vmem:[#allocation8 + $0x484] ss:$12 sps:$4 sm:$0xff]  }
  0xff   :  { %1811 = vmatpush1.bf16.msra.mxu0 %v6117_v18  ;;  %v6189_v18 = vld [vmem:[#allocation8 + $0x480] ss:$12 sps:$4 sm:$0xff]  }
 0x100   :  { %1784 = vmatpush2.bf16.msra.mxu1 %v6114_v17  ;;  %2555 = vmatprep.subr.bf16.mxu0 %v6122_v20  ;;  %v6186_v17 = vld [vmem:[#allocation8 + $0x3c0] ss:$12 sps:$4 sm:$0xff]  }
 0x101   :  { %2598 = vmatprep.subr.bf16.mxu1 %v6149_v36  ;;  %v6204_v36 = vld [vmem:[#allocation8 + $0x5bc] ss:$12 sps:$4 sm:$0xff]  }
 0x102   :  { %1829 = vmatmul.mubr.bf16.vlgmr.msra.gmra.mxu0 %v6886_v37 }
 0x103   :  { %1786 = vmatmul.mubr.bf16.vlgmr.msra.gmra.mxu1 %v6893_v12  ;;  %2556 = vmatpush1.bf16.msra.mxu0 %v6120_v19 }
 0x104   :  { %2557 = vmatprep.subr.bf16.mxu0 %v6125_v21  ;;  %2599 = vmatpush1.bf16.msra.mxu1 %v6147_v39  ;;  %v6202_v39 = vld [vmem:[#allocation8 + $0x5b8] ss:$12 sps:$4 sm:$0xff]  }
 0x105   :  { %2600 = vmatprep.subr.bf16.mxu1 %v6155_v41  ;;  %v6209_v41 = vld [vmem:[#allocation8 + $0x5a4] ss:$12 sps:$4 sm:$0xff]  }
 0x107   :  { %2558 = vmatpush1.bf16.msra.mxu0 %v6123_v22 }
 0x108   :  { %2559 = vmatprep.subr.bf16.mxu0 %v6128_v23  ;;  %2601 = vmatpush1.bf16.msra.mxu1 %v6153_v43  ;;  %v6214_v43 = vld [vmem:[#allocation8 + $0x58c] ss:$12 sps:$4 sm:$0xff]  }
 0x109   :  { %2602 = vmatprep.subr.bf16.mxu1 %v6161_v47  ;;  %v6219_v47 = vld [vmem:[#allocation8 + $0x574] ss:$12 sps:$4 sm:$0xff]  }
 0x10b   :  { %2560 = vmatpush1.bf16.msra.mxu0 %v6126_v24  ;;  %v6194_v24 = vld [vmem:[#allocation8 + $0x5ec] ss:$12 sps:$4 sm:$0xff]  }
 0x10c   :  { %2561 = vmatprep.subr.bf16.mxu0 %v6131_v25  ;;  %2603 = vmatpush1.bf16.msra.mxu1 %v6159_v46  ;;  %v6195_v25 = vld [vmem:[#allocation8 + $0x470] ss:$12 sps:$4 sm:$0xff]  }
 0x10d   :  { %2604 = vmatprep.subr.bf16.mxu1 %v6167_v50  ;;  %v6217_v46 = vld [vmem:[#allocation8 + $0x570] ss:$12 sps:$4 sm:$0xff]  }
 0x10f   :  { %2562 = vmatpush1.bf16.msra.mxu0 %v6129_v26 }
 0x110   :  { %2563 = vmatprep.subr.bf16.mxu0 %v6134_v27  ;;  %2605 = vmatpush1.bf16.msra.mxu1 %v6165_v52 }
 0x111   :  { %2606 = vmatprep.subr.bf16.mxu1 %v6173_v56 }
 0x113   :  { %2564 = vmatpush1.bf16.msra.mxu0 %v6132_v28  ;;  %v6192_v28 = vld [vmem:[#allocation8 + $0x5e8] ss:$12 sps:$4 sm:$0xff]  }
 0x114   :  { %2565 = vmatprep.subr.bf16.mxu0 %v6137_v29  ;;  %2607 = vmatpush1.bf16.msra.mxu1 %v6171_v58  ;;  %v6222_v58 = vld [vmem:[#allocation8 + $0x558] ss:$12 sps:$4 sm:$0xff]  }
 0x115   :  { %2608 = vmatprep.subr.bf16.mxu1 %v6179_v60 }
 0x117   :  { %2566 = vmatpush1.bf16.msra.mxu0 %v6135_v30 }
 0x118   :  { %2567 = vmatprep.subr.bf16.mxu0 %v6140_v31  ;;  %2609 = vmatpush1.bf16.msra.mxu1 %v6177_v1 }
 0x119   :  { %2610 = vmatprep.subr.bf16.mxu1 %v6185_v5 }
 0x11b   :  { %2568 = vmatpush1.bf16.msra.mxu0 %v6138_v32  ;;  %v6199_v32 = vld [vmem:[#allocation8 + $0x5d4] ss:$12 sps:$4 sm:$0xff]  }
 0x11c   :  { %2569 = vmatprep.subr.bf16.mxu0 %v6143_v33  ;;  %2611 = vmatpush1.bf16.msra.mxu1 %v6183_v8 }
 0x11d   :  { %2612 = vmatprep.subr.bf16.mxu1 %v6191_v15  ;;  %v6229_v15 = vld [vmem:[#allocation8 + $0x544] ss:$12 sps:$4 sm:$0xff]  }
 0x11f   :  { %2570 = vmatpush1.bf16.msra.mxu0 %v6141_v34  ;;  %v6197_v34 = vld [vmem:[#allocation8 + $0x5d0] ss:$12 sps:$4 sm:$0xff]  }
 0x120   :  { %2571 = vmatprep.subr.bf16.mxu0 %v6146_v35  ;;  %2613 = vmatpush1.bf16.msra.mxu1 %v6189_v18 }
 0x121   :  { %2614 = vmatprep.subr.bf16.mxu1 %v6194_v24 }
 0x123   :  { %2572 = vmatpush2.bf16.msra.mxu0 %v6144_v38  ;;  %v770_v3 = vpop.f32.mrf.mxu1 }
 0x124   :  { %2573 = vmatprep.subr.bf16.mxu0 %v6152_v40  ;;  %2615 = vmatpush2.bf16.msra.mxu1 %v6192_v28  ;;  %v6207_v40 = vld [vmem:[#allocation8 + $0x5a0] ss:$12 sps:$4 sm:$0xff]  }
 0x125   :  { %v6916_v10 = vpop.f32.mrf.mxu1  ;;  %2616 = vmatprep.subr.bf16.mxu1 %v6199_v32 }
 0x127   :  { %2574 = vmatpush2.bf16.msra.mxu0 %v6150_v42  ;;  %v774_v21 = vpop.f32.mrf.mxu1  ;;  %v6212_v42 = vld [vmem:[#allocation8 + $0x588] ss:$12 sps:$4 sm:$0xff]  }
 0x128   :  { %2575 = vmatprep.subr.bf16.mxu0 %v6158_v45  ;;  %2617 = vmatpush2.bf16.msra.mxu1 %v6197_v34  ;;  %v6930_v45 = vsub.s32 3, %v6907_v57 }
 0x129   :  { %2618 = vmatprep.subr.bf16.mxu1 %v6204_v36  ;;  %v6934_v50 = vpop.f32.mrf.mxu1 }
 0x12a   :  { %v208_v52 = vrot.slane %v6909_v61, %v6930_v45 }
 0x12b   :  { %2576 = vmatpush2.bf16.msra.mxu0 %v6156_v44  ;;  %v6927_v44 = vsub.s32 2, %v6907_v57 }
 0x12c   :  { %2577 = vmatprep.subr.bf16.mxu0 %v6164_v48  ;;  %2619 = vmatpush2.bf16.msra.mxu1 %v6202_v39 }
 0x12d   :  { %2620 = vmatprep.subr.bf16.mxu1 %v6209_v41  ;;  %v204_v49 = vrot.slane %v6909_v61, %v6927_v44 }
 0x12f   :  { %2578 = vmatpush2.bf16.msra.mxu0 %v6162_v51 }
 0x130   :  { %2579 = vmatprep.subr.bf16.mxu0 %v6170_v53  ;;  %2621 = vmatpush2.bf16.msra.mxu1 %v6207_v40 }
 0x131   :  { %2622 = vmatprep.subr.bf16.mxu1 %v6214_v43 }
 0x133   :  { %2580 = vmatpush2.bf16.msra.mxu0 %v6168_v55 }
 0x134   :  { %2581 = vmatprep.subr.bf16.mxu0 %v6176_v59  ;;  %2623 = vmatpush2.bf16.msra.mxu1 %v6212_v42  ;;  %v6224_v59 = vld [vmem:[#allocation8 + $0x55c] ss:$12 sps:$4 sm:$0xff]  }
 0x135   :  { %2624 = vmatprep.subr.bf16.mxu1 %v6219_v47 }
 0x137   :  { %2582 = vmatpush2.bf16.msra.mxu0 %v6174_v62 }
 0x138   :  { %2583 = vmatprep.subr.bf16.mxu0 %v6182_v4  ;;  %2625 = vmatpush2.bf16.msra.mxu1 %v6217_v46 }
 0x139   :  { %2626 = vmatprep.subr.bf16.mxu1 %v6224_v59 }
 0x13b   :  { %2584 = vmatpush2.bf16.msra.mxu0 %v6180_v7 }
 0x13c   :  { %2585 = vmatprep.subr.bf16.mxu0 %v6188_v14  ;;  %2627 = vmatpush2.bf16.msra.mxu1 %v6222_v58  ;;  %v6227_v14 = vld [vmem:[#allocation8 + $0x540] ss:$12 sps:$4 sm:$0xff]  }
 0x13d   :  { %2628 = vmatprep.subr.bf16.mxu1 %v6229_v15  ;;  %v1165_v15 = vld [vmem:[#allocation7 + $0x4] sm:$0xf] }
 0x13f   :  { %2586 = vmatpush2.bf16.msra.mxu0 %v6186_v17 }
 0x140   :  { %5687 = vmatprep.subr.bf16.mxu0 %v6195_v25  ;;  %2629 = vmatpush2.bf16.msra.mxu1 %v6227_v14 }
 0x142   :  { %v727_v6 = vpop.f32.mrf.mxu0 }
 0x143   :  { %v728_v9 = vadd.f32 %v727_v6, %v196_v2 }
 0x144   :  { %v6918_v11 = vpop.f32.mrf.mxu0 }
 0x145   :  { %v6920_v13 = vadd.f32 %v770_v3, %v728_v9 }
 0x146   :  { %v731_v16 = vpop.f32.mrf.mxu0 }
 0x147   :  { %v873_v19 = vmul.f32 0.044715, %v6920_v13  ;;  %v732_v20 = vadd.f32 %v731_v16, %v196_v2  ;;  %v865_v4 = vmul.f32 0.5, %v6920_v13 }
 0x148   :  { %v6936_v51 = vpop.f32.mrf.mxu0 }
 0x149   :  { %v881_v22 = vmul.f32 %v873_v19, %v6920_v13  ;;  %v775_v23 = vadd.f32 %v774_v21, %v732_v20 }
 0x14b   :  { %v889_v26 = vmul.f32 %v881_v22, %v6920_v13  ;;  %v877_v27 = vmul.f32 0.044715, %v775_v23  ;;  %v869_v5 = vmul.f32 0.5, %v775_v23 }
 0x14d   :  { %v897_v29 = vadd.f32 %v889_v26, %v6920_v13  ;;  %v885_v30 = vmul.f32 %v877_v27, %v775_v23 }
 0x14f   :  { %v893_v31 = vmul.f32 %v885_v30, %v775_v23  ;;  %v905_v33 = vmul.f32 0.7978846, %v897_v29 }
 0x151   :  { %v901_v35 = vadd.f32 %v893_v31, %v775_v23  ;;  %6648 = vtanh.f32 %v905_v33  ;;  %v6232_v31 = vld [vmem:[#allocation8 + $0x5f0] ss:$12 sps:$4 sm:$0xff]  }
 0x152   :  { %5709 = vmatprep.subr.bf16.mxu1 %v6232_v31 }
 0x153   :  { %v909_v38 = vmul.f32 0.7978846, %v901_v35 }
 0x155   :  { %6650 = vtanh.f32 %v909_v38 }
 0x15e   :  { %v6649_v48 = vpop.eup %6648 }
 0x15f   :  { %v921_v60 = vadd.f32 1.0, %v6649_v48 }
 0x161   :  { %v929_v16 = vmul.f32 %v921_v60, %v865_v4 }
 0x162   :  { %v6651_v53 = vpop.eup %6650  ;;  %v856_v56 = vpop.f32.mrf.mxu0 }
 0x163   :  { %v813_v55 = vpop.f32.mrf.mxu1  ;;  %v925_v1 = vadd.f32 1.0, %v6651_v53 }
 0x164   :  { %v814_v62 = vadd.f32 %v813_v55, %v204_v49  ;;  %v858_v3 = vpop.f32.mrf.mxu0 }
 0x165   :  { %v815_v2 = vpop.f32.mrf.mxu1  ;;  %v933_v17 = vmul.f32 %v925_v1, %v869_v5 }
 0x166   :  { %v857_v6 = vadd.f32 %v856_v56, %v814_v62  ;;  %v816_v7 = vadd.f32 %v815_v2, %v208_v52  ;;  %v860_v9 = vpop.f32.mrf.mxu0 }
 0x167   :  { %v817_v8 = vpop.f32.mrf.mxu1  ;;  %v6941_v22 = vpack.c.bf16 %v933_v17, %v929_v16  ;;  %v6948_v17 = vsub.s32 1, %v6907_v57 }
 0x168   :  { %v875_v18 = vmul.f32 0.044715, %v857_v6  ;;  %v859_v19 = vadd.f32 %v858_v3, %v816_v7  ;;  %v818_v20 = vadd.f32 %v817_v8, %v204_v49  ;;  %v862_v26 = vpop.f32.mrf.mxu0  ;;  %v867_v56 = vmul.f32 0.5, %v857_v6 }
 0x169   :  { %v819_v21 = vpop.f32.mrf.mxu1 }
 0x16a   :  { %v883_v24 = vmul.f32 %v875_v18, %v857_v6  ;;  %v876_v25 = vmul.f32 0.044715, %v859_v19  ;;  %v861_v13 = vadd.f32 %v860_v9, %v818_v20  ;;  %v820_v23 = vadd.f32 %v819_v21, %v208_v52 }
 0x16b   :  { %v868_v58 = vmul.f32 0.5, %v859_v19  ;;  %v1174_v18 = vrot.slane %v1165_v15, %v6948_v17 }
 0x16c   :  { %v891_v27 = vmul.f32 %v883_v24, %v857_v6  ;;  %v884_v28 = vmul.f32 %v876_v25, %v859_v19  ;;  %v879_v29 = vmul.f32 0.044715, %v861_v13  ;;  %v863_v30 = vadd.f32 %v862_v26, %v820_v23 }
 0x16d   :  { %v871_v60 = vmul.f32 0.5, %v861_v13 }
 0x16e   :  { %v899_v32 = vadd.f32 %v891_v27, %v857_v6  ;;  %v892_v33 = vmul.f32 %v884_v28, %v859_v19  ;;  %v887_v34 = vmul.f32 %v879_v29, %v861_v13  ;;  %v880_v35 = vmul.f32 0.044715, %v863_v30 }
 0x16f   :  { %v872_v2 = vmul.f32 0.5, %v863_v30  ;;  %v1170_v6 = vrot.slane %v1165_v15, %v6912_v63 }
 0x170   :  { %v907_v36 = vmul.f32 0.7978846, %v899_v32  ;;  %v895_v38 = vmul.f32 %v887_v34, %v861_v13  ;;  %v888_v39 = vmul.f32 %v880_v35, %v863_v30  ;;  %v900_v40 = vadd.f32 %v892_v33, %v859_v19 }
 0x172   :  { %6652 = vtanh.f32 %v907_v36  ;;  %v903_v41 = vadd.f32 %v895_v38, %v861_v13  ;;  %v896_v42 = vmul.f32 %v888_v39, %v863_v30  ;;  %v908_v43 = vmul.f32 0.7978846, %v900_v40 }
 0x174   :  { %v911_v46 = vmul.f32 0.7978846, %v903_v41  ;;  %v904_v47 = vadd.f32 %v896_v42, %v863_v30  ;;  %6654 = vtanh.f32 %v908_v43 }
 0x176   :  { %6656 = vtanh.f32 %v911_v46  ;;  %v912_v48 = vmul.f32 0.7978846, %v904_v47 }
 0x178   :  { %6658 = vtanh.f32 %v912_v48 }
 0x17f   :  { %v6653_v49 = vpop.eup %6652 }
 0x180   :  { %v923_v53 = vadd.f32 1.0, %v6653_v49 }
 0x181   :  { %v6655_v52 = vpop.eup %6654 }
 0x182   :  { %v924_v59 = vadd.f32 1.0, %v6655_v52  ;;  %v931_v4 = vmul.f32 %v923_v53, %v867_v56 }
 0x183   :  { %v6657_v55 = vpop.eup %6656  ;;  %v1744_v16 = vpop.f32.mrf.mxu1 }
 0x184   :  { %v927_v62 = vadd.f32 1.0, %v6657_v55  ;;  %v932_v7 = vmul.f32 %v924_v59, %v868_v58  ;;  %v200_v59 = vrot.slane %v6909_v61, %v6948_v17 }
 0x185   :  { %v6659_v1 = vpop.eup %6658  ;;  %v1746_v19 = vpop.f32.mrf.mxu1 }
 0x186   :  { %v928_v3 = vadd.f32 1.0, %v6659_v1  ;;  %v935_v5 = vmul.f32 %v927_v62, %v871_v60  ;;  %v734_v62 = vadd.f32 %v6936_v51, %v200_v59  ;;  %v730_v1 = vadd.f32 %v6918_v11, %v200_v59 }
 0x187   :  { %v1748_v23 = vpop.f32.mrf.mxu1 }
 0x188   :  { %v936_v8 = vmul.f32 %v928_v3, %v872_v2  ;;  %v6943_v9 = vpack.c.bf16 %v935_v5, %v931_v4  ;;  %v6963_v2 = vadd.f32 %v6934_v50, %v734_v62  ;;  %v6966_v3 = vadd.f32 %v6916_v10, %v730_v1  ;;  %v6200_v1 = vld [vmem:[#allocation8 + $0x458] ss:$12 sps:$4 sm:$0xff]  }
 0x189   :  { %v1750_v34 = vpop.f32.mrf.mxu1  ;;  %v1178_v5 = vrot.slane %v1165_v15, %v6927_v44 }
 0x18a   :  { %v6945_v14 = vpack.c.bf16 %v936_v8, %v932_v7  ;;  %v878_v4 = vmul.f32 0.044715, %v6963_v2  ;;  %v874_v61 = vmul.f32 0.044715, %v6966_v3 }
 0x18c   :  { %v882_v10 = vmul.f32 %v874_v61, %v6966_v3 }
 0x1a2   :  { %v1701_v20 = vpop.f32.mrf.mxu0 }
 0x1a3   :  { %v1702_v21 = vadd.f32 %v1701_v20, %v1170_v6 }
 0x1a4   :  { %v1703_v24 = vpop.f32.mrf.mxu0 }
 0x1a5   :  { %v6952_v25 = vadd.f32 %v1744_v16, %v1702_v21  ;;  %v1704_v13 = vadd.f32 %v1703_v24, %v1174_v18  ;;  %v1182_v16 = vrot.slane %v1165_v15, %v6930_v45 }
 0x1a6   :  { %v1705_v26 = vpop.f32.mrf.mxu0 }
 0x1a7   :  { %v1847_v27 = vmul.f32 0.044715, %v6952_v25  ;;  %v1747_v28 = vadd.f32 %v1746_v19, %v1704_v13  ;;  %v1706_v29 = vadd.f32 %v1705_v26, %v1170_v6  ;;  %v886_v6 = vmul.f32 %v878_v4, %v6963_v2 }
 0x1a8   :  { %v1707_v30 = vpop.f32.mrf.mxu0 }
 0x1a9   :  { %v1855_v57 = vmul.f32 %v1847_v27, %v6952_v25  ;;  %v1848_v31 = vmul.f32 0.044715, %v1747_v28  ;;  %v1749_v32 = vadd.f32 %v1748_v23, %v1706_v29  ;;  %v1708_v33 = vadd.f32 %v1707_v30, %v1174_v18 }
 0x1ab   :  { %v1863_v35 = vmul.f32 %v1855_v57, %v6952_v25  ;;  %v1856_v36 = vmul.f32 %v1848_v31, %v1747_v28  ;;  %v1851_v38 = vmul.f32 0.044715, %v1749_v32  ;;  %v1751_v39 = vadd.f32 %v1750_v34, %v1708_v33 }
 0x1ac   :  { %v1843_v23 = vmul.f32 0.5, %v1749_v32  ;;  %v1840_v33 = vmul.f32 0.5, %v1747_v28  ;;  %v1839_v34 = vmul.f32 0.5, %v6952_v25 }
 0x1ad   :  { %v1871_v40 = vadd.f32 %v1863_v35, %v6952_v25  ;;  %v1859_v41 = vmul.f32 %v1851_v38, %v1749_v32  ;;  %v1852_v42 = vmul.f32 0.044715, %v1751_v39  ;;  %v1864_v43 = vmul.f32 %v1856_v36, %v1747_v28 }
 0x1ae   :  { %v1844_v30 = vmul.f32 0.5, %v1751_v39  ;;  %v894_v36 = vmul.f32 %v886_v6, %v6963_v2 }
 0x1af   :  { %v1867_v46 = vmul.f32 %v1859_v41, %v1749_v32  ;;  %v1860_v47 = vmul.f32 %v1852_v42, %v1751_v39  ;;  %v1879_v48 = vmul.f32 0.7978846, %v1871_v40  ;;  %v1872_v49 = vadd.f32 %v1864_v43, %v1747_v28 }
 0x1b1   :  { %v1875_v52 = vadd.f32 %v1867_v46, %v1749_v32  ;;  %v1868_v53 = vmul.f32 %v1860_v47, %v1751_v39  ;;  %v1880_v55 = vmul.f32 0.7978846, %v1872_v49  ;;  %6660 = vtanh.f32 %v1879_v48 }
 0x1b3   :  { %v1876_v56 = vadd.f32 %v1868_v53, %v1751_v39  ;;  %v1883_v58 = vmul.f32 0.7978846, %v1875_v52  ;;  %6662 = vtanh.f32 %v1880_v55  ;;  %v6196_v53 = vld [vmem:[#allocation8 + $0x3b0] ss:$12 sps:$4 sm:$0xff]   ;;  %v890_v55 = vmul.f32 %v882_v10, %v6966_v3 }
 0x1b5   :  { %v1884_v60 = vmul.f32 0.7978846, %v1876_v56  ;;  %6664 = vtanh.f32 %v1883_v58  ;;  %v902_v56 = vadd.f32 %v894_v36, %v6963_v2  ;;  %v6225_v36 = vld [vmem:[#allocation8 + $0x3e0] ss:$12 sps:$4 sm:$0xff]  }
 0x1b7   :  { %6666 = vtanh.f32 %v1884_v60 }
 0x1be   :  { %v6661_v7 = vpop.eup %6660 }
 0x1bf   :  { %v1895_v26 = vadd.f32 1.0, %v6661_v7 }
 0x1c0   :  { %v6663_v8 = vpop.eup %6662 }
 0x1c1   :  { %v1896_v13 = vadd.f32 1.0, %v6663_v8  ;;  %v1903_v46 = vmul.f32 %v1895_v26, %v1839_v34  ;;  %v6201_v8 = vld [vmem:[#allocation8 + $0x398] ss:$12 sps:$4 sm:$0xff]   ;;  %v6210_v26 = vld [vmem:[#allocation8 + $0x428] ss:$12 sps:$4 sm:$0xff]  }
 0x1c2   :  { %v6665_v51 = vpop.eup %6664  ;;  %v1830_v18 = vpop.f32.mrf.mxu0  ;;  %v6221_v34 = vld [vmem:[#allocation8 + $0x338] ss:$12 sps:$4 sm:$0xff]  }
 0x1c3   :  { %v1787_v11 = vpop.f32.mrf.mxu1  ;;  %v1899_v19 = vadd.f32 1.0, %v6665_v51  ;;  %v1904_v43 = vmul.f32 %v1896_v13, %v1840_v33  ;;  %v910_v51 = vmul.f32 0.7978846, %v902_v56  ;;  %v6220_v33 = vld [vmem:[#allocation8 + $0x3f8] ss:$12 sps:$4 sm:$0xff]  }
 0x1c4   :  { %v1788_v50 = vadd.f32 %v1787_v11, %v1178_v5  ;;  %v6667_v20 = vpop.eup %6666  ;;  %v1832_v24 = vpop.f32.mrf.mxu0 }
 0x1c5   :  { %v1789_v21 = vpop.f32.mrf.mxu1  ;;  %v1900_v15 = vadd.f32 1.0, %v6667_v20  ;;  %v1907_v35 = vmul.f32 %v1899_v19, %v1843_v23  ;;  %6668 = vtanh.f32 %v910_v51 }
 0x1c6   :  { %v6974_v27 = vadd.f32 %v1830_v18, %v1788_v50  ;;  %v1790_v29 = vadd.f32 %v1789_v21, %v1182_v16  ;;  %v1834_v31 = vpop.f32.mrf.mxu0  ;;  %v6205_v18 = vld [vmem:[#allocation8 + $0x440] ss:$12 sps:$4 sm:$0xff]  }
 0x1c7   :  { %v1791_v57 = vpop.f32.mrf.mxu1  ;;  %v1908_v32 = vmul.f32 %v1900_v15, %v1844_v30  ;;  %v6985_v52 = vpack.c.bf16 %v1907_v35, %v1903_v46  ;;  %v6211_v15 = vld [vmem:[#allocation8 + $0x368] ss:$12 sps:$4 sm:$0xff]  }
 0x1c8   :  { %v1849_v38 = vmul.f32 0.044715, %v6974_v27  ;;  %v6979_v40 = vadd.f32 %v1832_v24, %v1790_v29  ;;  %v1792_v41 = vadd.f32 %v1791_v57, %v1178_v5  ;;  %v1836_v25 = vpop.f32.mrf.mxu0  ;;  %v6206_v24 = vld [vmem:[#allocation8 + $0x380] ss:$12 sps:$4 sm:$0xff]   ;;  %v6215_v57 = vld [vmem:[#allocation8 + $0x410] ss:$12 sps:$4 sm:$0xff]  }
 0x1c9   :  { %v1793_v42 = vpop.f32.mrf.mxu1  ;;  %v1912_v49 = vpack.c.bf16 %v1908_v32, %v1904_v43  ;;  %v6230_v46 = vld [vmem:[#allocation8 + $0x3c8] ss:$12 sps:$4 sm:$0xff]  }
 0x1ca   :  { %v1857_v39 = vmul.f32 %v1849_v38, %v6974_v27  ;;  %v1850_v47 = vmul.f32 0.044715, %v6979_v40  ;;  %v6983_v48 = vadd.f32 %v1834_v31, %v1792_v41  ;;  %v1794_v28 = vadd.f32 %v1793_v42, %v1182_v16  ;;  %v6216_v31 = vld [vmem:[#allocation8 + $0x350] ss:$12 sps:$4 sm:$0xff]   ;;  %v6226_v42 = vld [vmem:[#allocation8 + $0x320] ss:$12 sps:$4 sm:$0xff]  }
 0x1cb   :  { %2587 = vmatprep.mubr.bf16.mxu0 %v1912_v49  ;;  %v898_v16 = vadd.f32 %v890_v55, %v6966_v3  ;;  %v1842_v55 = vmul.f32 0.5, %v6979_v40 }
 0x1cc   :  { %v1865_v58 = vmul.f32 %v1857_v39, %v6974_v27  ;;  %v1858_v59 = vmul.f32 %v1850_v47, %v6979_v40  ;;  %v1853_v60 = vmul.f32 0.044715, %v6983_v48  ;;  %v6992_v62 = vadd.f32 %v1836_v25, %v1794_v28  ;;  %2588 = vmatmul.mubr.bf16.vlgmr.msra.gmra.mxu0 %v6985_v52 }
 0x1cd   :  { %5688 = vmatpush3.bf16.msra.mxu0 %v6196_v53  ;;  %2673 = vmatprep.mubr.bf16.mxu0 %v1912_v49  ;;  %v906_v13 = vmul.f32 0.7978846, %v898_v16  ;;  %v1845_v25 = vmul.f32 0.5, %v6983_v48  ;;  %v866_v16 = vmul.f32 0.5, %v6966_v3  ;;  %v6241_v3 = vld [vmem:[#allocation8 + $0x518] ss:$12 sps:$4 sm:$0xff]  }
 0x1ce   :  { %v1873_v4 = vadd.f32 %v1865_v58, %v6974_v27  ;;  %v1866_v5 = vmul.f32 %v1858_v59, %v6979_v40  ;;  %v1861_v7 = vmul.f32 %v1853_v60, %v6983_v48  ;;  %v1854_v61 = vmul.f32 0.044715, %v6992_v62  ;;  %5689 = vmatprep.subr.bf16.mxu0 %v6200_v1  ;;  %v6231_v59 = vld [vmem:[#allocation8 + $0x308] ss:$12 sps:$4 sm:$0xff]  }
 0x1cf   :  { %v1846_v56 = vmul.f32 0.5, %v6992_v62  ;;  %v1841_v60 = vmul.f32 0.5, %v6974_v27  ;;  %v6237_v27 = vld [vmem:[#allocation8 + $0x5d8] ss:$12 sps:$4 sm:$0xff]  }
 0x1d0   :  { %v1869_v6 = vmul.f32 %v1861_v7, %v6983_v48  ;;  %v1862_v11 = vmul.f32 %v1854_v61, %v6992_v62  ;;  %v1874_v50 = vadd.f32 %v1866_v5, %v6979_v40  ;;  %v1881_v19 = vmul.f32 0.7978846, %v1873_v4 }
 0x1d1   :  { %5690 = vmatpush3.bf16.msra.mxu0 %v6201_v8  ;;  %v870_v4 = vmul.f32 0.5, %v6963_v2  ;;  %v6235_v8 = vld [vmem:[#allocation8 + $0xac] ss:$12 sps:$4 sm:$0xff]  }
 0x1d2   :  { %v1877_v20 = vadd.f32 %v1869_v6, %v6983_v48  ;;  %v1870_v10 = vmul.f32 %v1862_v11, %v6992_v62  ;;  %v1882_v21 = vmul.f32 0.7978846, %v1874_v50  ;;  %5691 = vmatprep.subr.bf16.mxu0 %v6205_v18  ;;  %v6669_v35 = vpop.eup %6668  ;;  %v6236_v6 = vld [vmem:[#allocation8 + $0x530] ss:$12 sps:$4 sm:$0xff]   ;;  %v6240_v50 = vld [vmem:[#allocation8 + $0x94] ss:$12 sps:$4 sm:$0xff]  }
 0x1d3   :  { %v926_v53 = vadd.f32 1.0, %v6669_v35  ;;  %v6258_v35 = vld [vmem:[#allocation8 + $0x30] ss:$12 sps:$4 sm:$0xff]  }
 0x1d4   :  { %v1885_v23 = vmul.f32 0.7978846, %v1877_v20  ;;  %v1878_v29 = vadd.f32 %v1870_v10, %v6992_v62  ;;  %6670 = vtanh.f32 %v1882_v21  ;;  %v6233_v62 = vld [vmem:[#allocation8 + $0xa8] ss:$12 sps:$4 sm:$0xff]   ;;  %v6242_v20 = vld [vmem:[#allocation8 + $0x5c0] ss:$12 sps:$4 sm:$0xff]  }
 0x1d5   :  { %6672 = vtanh.f32 %v1881_v19  ;;  %5692 = vmatpush3.bf16.msra.mxu0 %v6206_v24  ;;  %v934_v51 = vmul.f32 %v926_v53, %v870_v4  ;;  %v6238_v19 = vld [vmem:[#allocation8 + $0x90] ss:$12 sps:$4 sm:$0xff]   ;;  %v6246_v21 = vld [vmem:[#allocation8 + $0x500] ss:$12 sps:$4 sm:$0xff]   ;;  %v6243_v24 = vld [vmem:[#allocation8 + $0x78] ss:$12 sps:$4 sm:$0xff]  }
 0x1d6   :  { %6674 = vtanh.f32 %v1885_v23  ;;  %v1886_v30 = vmul.f32 0.7978846, %v1878_v29  ;;  %5693 = vmatprep.subr.bf16.mxu0 %v6210_v26  ;;  %v6245_v10 = vld [vmem:[#allocation8 + $0x7c] ss:$12 sps:$4 sm:$0xff]   ;;  %v6250_v23 = vld [vmem:[#allocation8 + $0x64] ss:$12 sps:$4 sm:$0xff]  }
 0x1d7   :  { %6676 = vtanh.f32 %v906_v13  ;;  %v6247_v13 = vld [vmem:[#allocation8 + $0x5a8] ss:$12 sps:$4 sm:$0xff]   ;;  %v6248_v26 = vld [vmem:[#allocation8 + $0x60] ss:$12 sps:$4 sm:$0xff]   ;;  %v6252_v29 = vld [vmem:[#allocation8 + $0x590] ss:$12 sps:$4 sm:$0xff]  }
 0x1d8   :  { %6678 = vtanh.f32 %v1886_v30  ;;  %v6255_v30 = vld [vmem:[#allocation8 + $0x4c] ss:$12 sps:$4 sm:$0xff]   ;;  %v6283_v53 = vld [vmem:[#allocation8 + $0x214] ss:$12 sps:$4 sm:$0xff]  }
 0x1d9   :  { %5694 = vmatpush3.bf16.msra.mxu0 %v6211_v15  ;;  %v6256_v15 = vld [vmem:[#allocation8 + $0x4d0] ss:$12 sps:$4 sm:$0xff]   ;;  %v6284_v4 = vld [vmem:[#allocation8 + $0x138] ss:$12 sps:$4 sm:$0xff]  }
 0x1da   :  { %5695 = vmatprep.subr.bf16.mxu0 %v6215_v57  ;;  %v6253_v57 = vld [vmem:[#allocation8 + $0x48] ss:$12 sps:$4 sm:$0xff]  }
 0x1dd   :  { %5696 = vmatpush3.bf16.msra.mxu0 %v6216_v31  ;;  %v6257_v31 = vld [vmem:[#allocation8 + $0x578] ss:$12 sps:$4 sm:$0xff]  }
 0x1de   :  { %5697 = vmatprep.subr.bf16.mxu0 %v6220_v33  ;;  %v6260_v33 = vld [vmem:[#allocation8 + $0x34] ss:$12 sps:$4 sm:$0xff]  }
 0x1e1   :  { %v6671_v38 = vpop.eup %6670  ;;  %5698 = vmatpush3.bf16.msra.mxu0 %v6221_v34  ;;  %v6261_v34 = vld [vmem:[#allocation8 + $0x4b8] ss:$12 sps:$4 sm:$0xff]  }
 0x1e2   :  { %v6673_v41 = vpop.eup %6672  ;;  %5699 = vmatprep.subr.bf16.mxu0 %v6225_v36  ;;  %v1898_v39 = vadd.f32 1.0, %v6671_v38  ;;  %v6262_v36 = vld [vmem:[#allocation8 + $0x560] ss:$12 sps:$4 sm:$0xff]   ;;  %v6265_v38 = vld [vmem:[#allocation8 + $0x1c] ss:$12 sps:$4 sm:$0xff]  }
 0x1e3   :  { %v6675_v32 = vpop.eup %6674  ;;  %v1897_v49 = vadd.f32 1.0, %v6673_v41  ;;  %v6266_v41 = vld [vmem:[#allocation8 + $0x4a0] ss:$12 sps:$4 sm:$0xff]  }
 0x1e4   :  { %v6677_v43 = vpop.eup %6676  ;;  %v1901_v47 = vadd.f32 1.0, %v6675_v32  ;;  %v1906_v7 = vmul.f32 %v1898_v39, %v1842_v55  ;;  %v6263_v32 = vld [vmem:[#allocation8 + $0x18] ss:$12 sps:$4 sm:$0xff]   ;;  %v6268_v39 = vld [vmem:[#allocation8] ss:$12 sps:$4 sm:$0xff]  }
 0x1e5   :  { %v6679_v28 = vpop.eup %6678  ;;  %5700 = vmatpush3.bf16.msra.mxu0 %v6226_v42  ;;  %v922_v5 = vadd.f32 1.0, %v6677_v43  ;;  %v1905_v48 = vmul.f32 %v1897_v49, %v1841_v60  ;;  %v6267_v42 = vld [vmem:[#allocation8 + $0x548] ss:$12 sps:$4 sm:$0xff]   ;;  %v6270_v43 = vld [vmem:[#allocation8 + $0x4] ss:$12 sps:$4 sm:$0xff]  }
 0x1e6   :  { %v1902_v58 = vadd.f32 1.0, %v6679_v28  ;;  %v1909_v1 = vmul.f32 %v1901_v47, %v1845_v25  ;;  %5701 = vmatprep.subr.bf16.mxu0 %v6230_v46  ;;  %v6271_v46 = vld [vmem:[#allocation8 + $0x488] ss:$12 sps:$4 sm:$0xff]   ;;  %v6277_v47 = vld [vmem:[#allocation8 + $0x22c] ss:$12 sps:$4 sm:$0xff]  }
 0x1e7   :  { %v930_v18 = vmul.f32 %v922_v5, %v866_v16  ;;  %v6274_v28 = vld [vmem:[#allocation8 + $0x16c] ss:$12 sps:$4 sm:$0xff]   ;;  %v6275_v25 = vld [vmem:[#allocation8 + $0x228] ss:$12 sps:$4 sm:$0xff]   ;;  %v6295_v5 = vld [vmem:[#allocation8 + $0x1e4] ss:$12 sps:$4 sm:$0xff]  }
 0x1e8   :  { %v1910_v61 = vmul.f32 %v1902_v58, %v1846_v56  ;;  %v7012_v11 = vpack.c.bf16 %v1909_v1, %v1905_v48  ;;  %v6272_v49 = vld [vmem:[#allocation8 + $0x168] ss:$12 sps:$4 sm:$0xff]   ;;  %v6281_v56 = vld [vmem:[#allocation8 + $0x210] ss:$12 sps:$4 sm:$0xff]   ;;  %v6287_v1 = vld [vmem:[#allocation8 + $0x1f8] ss:$12 sps:$4 sm:$0xff]  }
 0x1e9   :  { %5702 = vmatpush3.bf16.msra.mxu0 %v6231_v59  ;;  %v7015_v2 = vpack.c.bf16 %v934_v51, %v930_v18  ;;  %v6280_v55 = vld [vmem:[#allocation8 + $0x154] ss:$12 sps:$4 sm:$0xff]   ;;  %v6278_v58 = vld [vmem:[#allocation8 + $0x150] ss:$12 sps:$4 sm:$0xff]   ;;  %v6301_v48 = vld [vmem:[#allocation8 + $0x1cc] ss:$12 sps:$4 sm:$0xff]  }
 0x1ea   :  { %v1914_v40 = vpack.c.bf16 %v1910_v61, %v1906_v7  ;;  %3235 = vmatprep.subr.bf16.mxu0 %v6235_v8  ;;  %v6289_v59 = vld [vmem:[#allocation8 + $0x1fc] ss:$12 sps:$4 sm:$0xff]   ;;  %v6292_v7 = vld [vmem:[#allocation8 + $0x124] ss:$12 sps:$4 sm:$0xff]   ;;  %v6293_v61 = vld [vmem:[#allocation8 + $0x1e0] ss:$12 sps:$4 sm:$0xff]  }
 0x1eb   :  { %v6286_v60 = vld [vmem:[#allocation8 + $0x13c] ss:$12 sps:$4 sm:$0xff]   ;;  %v6290_v8 = vld [vmem:[#allocation8 + $0x120] ss:$12 sps:$4 sm:$0xff]  }
 0x1ec   :  { %2630 = vmatprep.mubr.bf16.mxu1 %v1914_v40  ;;  %2674 = vmatmul.mubr.bf16.vlgmr.msra.gmra.mxu0 %v6985_v52  ;;  %v6251_v52 = vld [vmem:[#allocation8 + $0x4e8] ss:$12 sps:$4 sm:$0xff]   ;;  %v6298_v16 = vld [vmem:[#allocation8 + $0x10c] ss:$12 sps:$4 sm:$0xff]   ;;  %v6302_v18 = vld [vmem:[#allocation8 + $0xf0] ss:$12 sps:$4 sm:$0xff]  }
 0x1ed   :  { %2631 = vmatmul.mubr.bf16.vlgmr.msra.gmra.mxu1 %v7012_v11  ;;  %3236 = vmatpush1.bf16.msra.mxu0 %v6233_v62  ;;  %v6299_v51 = vld [vmem:[#allocation8 + $0x1c8] ss:$12 sps:$4 sm:$0xff]  }
 0x1ee   :  { %5710 = vmatpush3.bf16.msra.mxu1 %v6236_v6  ;;  %3267 = vmatprep.mubr.bf16.mxu0 %v7015_v2  ;;  %v6307_v6 = vld [vmem:[#allocation8 + $0x1b4] ss:$12 sps:$4 sm:$0xff]  }
 0x1ef   :  { %2714 = vmatprep.mubr.bf16.mxu1 %v1914_v40  ;;  %5711 = vmatprep.subr.bf16.mxu1 %v6237_v27  ;;  %v6296_v40 = vld [vmem:[#allocation8 + $0x108] ss:$12 sps:$4 sm:$0xff]  }
 0x1f0   :  { %3237 = vmatprep.subr.bf16.mxu0 %v6240_v50  ;;  %v6304_v62 = vld [vmem:[#allocation8 + $0xf4] ss:$12 sps:$4 sm:$0xff]   ;;  %v6313_v27 = vld [vmem:[#allocation8 + $0x19c] ss:$12 sps:$4 sm:$0xff]  }
 0x1f1   :  { %3238 = vmatpush1.bf16.msra.mxu0 %v6238_v19  ;;  %v6310_v50 = vld [vmem:[#allocation8 + $0xdc] ss:$12 sps:$4 sm:$0xff]   ;;  %v6308_v19 = vld [vmem:[#allocation8 + $0xd8] ss:$12 sps:$4 sm:$0xff]  }
 0x1f2   :  { %5712 = vmatpush3.bf16.msra.mxu1 %v6241_v3  ;;  %3239 = vmatprep.subr.bf16.mxu0 %v6245_v10  ;;  %v6311_v3 = vld [vmem:[#allocation8 + $0x198] ss:$12 sps:$4 sm:$0xff]  }
 0x1f3   :  { %5713 = vmatprep.subr.bf16.mxu1 %v6242_v20  ;;  %v6319_v20 = vld [vmem:[#allocation8 + $0x184] ss:$12 sps:$4 sm:$0xff]  }
 0x1f4   :  { %v6316_v10 = vld [vmem:[#allocation8 + $0xc4] ss:$12 sps:$4 sm:$0xff]  }
 0x1f5   :  { %3240 = vmatpush1.bf16.msra.mxu0 %v6243_v24  ;;  %v6314_v24 = vld [vmem:[#allocation8 + $0xc0] ss:$12 sps:$4 sm:$0xff]  }
 0x1f6   :  { %5714 = vmatpush3.bf16.msra.mxu1 %v6246_v21  ;;  %3241 = vmatprep.subr.bf16.mxu0 %v6250_v23  ;;  %v6317_v21 = vld [vmem:[#allocation8 + $0x180] ss:$12 sps:$4 sm:$0xff]   ;;  %v6323_v23 = vld [vmem:[#allocation8 + $0x170] ss:$12 sps:$4 sm:$0xff]  }
 0x1f7   :  { %5715 = vmatprep.subr.bf16.mxu1 %v6247_v13  ;;  %v6322_v13 = vld [vmem:[#allocation8 + $0x2ec] ss:$12 sps:$4 sm:$0xff]  }
 0x1f9   :  { %3242 = vmatpush1.bf16.msra.mxu0 %v6248_v26  ;;  %v6324_v26 = vld [vmem:[#allocation8 + $0xb0] ss:$12 sps:$4 sm:$0xff]  }
 0x1fa   :  { %5716 = vmatpush3.bf16.msra.mxu1 %v6251_v52  ;;  %3243 = vmatprep.subr.bf16.mxu0 %v6255_v30  ;;  %v6320_v52 = vld [vmem:[#allocation8 + $0x2e8] ss:$12 sps:$4 sm:$0xff]   ;;  %v6328_v30 = vld [vmem:[#allocation8 + $0x158] ss:$12 sps:$4 sm:$0xff]  }
 0x1fb   :  { %5717 = vmatprep.subr.bf16.mxu1 %v6252_v29  ;;  %v6327_v29 = vld [vmem:[#allocation8 + $0x2d4] ss:$12 sps:$4 sm:$0xff]  }
 0x1fd   :  { %3244 = vmatpush1.bf16.msra.mxu0 %v6253_v57  ;;  %v6329_v57 = vld [vmem:[#allocation8 + $0x98] ss:$12 sps:$4 sm:$0xff]  }
 0x1fe   :  { %5718 = vmatpush3.bf16.msra.mxu1 %v6256_v15  ;;  %3245 = vmatprep.subr.bf16.mxu0 %v6260_v33  ;;  %v6325_v15 = vld [vmem:[#allocation8 + $0x2d0] ss:$12 sps:$4 sm:$0xff]   ;;  %v6333_v33 = vld [vmem:[#allocation8 + $0x140] ss:$12 sps:$4 sm:$0xff]  }
 0x1ff   :  { %5719 = vmatprep.subr.bf16.mxu1 %v6257_v31  ;;  %v6332_v31 = vld [vmem:[#allocation8 + $0x2bc] ss:$12 sps:$4 sm:$0xff]  }
 0x201   :  { %3246 = vmatpush1.bf16.msra.mxu0 %v6258_v35  ;;  %v6334_v35 = vld [vmem:[#allocation8 + $0x80] ss:$12 sps:$4 sm:$0xff]  }
 0x202   :  { %5720 = vmatpush3.bf16.msra.mxu1 %v6261_v34  ;;  %3247 = vmatprep.subr.bf16.mxu0 %v6265_v38  ;;  %v6330_v34 = vld [vmem:[#allocation8 + $0x2b8] ss:$12 sps:$4 sm:$0xff]   ;;  %v6338_v38 = vld [vmem:[#allocation8 + $0x128] ss:$12 sps:$4 sm:$0xff]  }
 0x203   :  { %5721 = vmatprep.subr.bf16.mxu1 %v6262_v36  ;;  %v6337_v36 = vld [vmem:[#allocation8 + $0x2a4] ss:$12 sps:$4 sm:$0xff]  }
 0x205   :  { %3248 = vmatpush1.bf16.msra.mxu0 %v6263_v32  ;;  %v6339_v32 = vld [vmem:[#allocation8 + $0x68] ss:$12 sps:$4 sm:$0xff]  }
 0x206   :  { %5722 = vmatpush3.bf16.msra.mxu1 %v6266_v41  ;;  %3249 = vmatprep.subr.bf16.mxu0 %v6270_v43  ;;  %v6335_v41 = vld [vmem:[#allocation8 + $0x2a0] ss:$12 sps:$4 sm:$0xff]   ;;  %v6340_v43 = vld [vmem:[#allocation8 + $0x288] ss:$12 sps:$4 sm:$0xff]  }
 0x207   :  { %5723 = vmatprep.subr.bf16.mxu1 %v6267_v42  ;;  %v6342_v42 = vld [vmem:[#allocation8 + $0x28c] ss:$12 sps:$4 sm:$0xff]  }
 0x209   :  { %3250 = vmatpush1.bf16.msra.mxu0 %v6268_v39  ;;  %v6347_v39 = vld [vmem:[#allocation8 + $0x274] ss:$12 sps:$4 sm:$0xff]  }
 0x20a   :  { %5724 = vmatpush3.bf16.msra.mxu1 %v6271_v46  ;;  %3251 = vmatprep.subr.bf16.mxu0 %v6274_v28  ;;  %v6344_v46 = vld [vmem:[#allocation8 + $0x50] ss:$12 sps:$4 sm:$0xff]  }
 0x20b   :  { %3278 = vmatprep.subr.bf16.mxu1 %v6277_v47  ;;  %v6348_v47 = vld [vmem:[#allocation8 + $0xf8] ss:$12 sps:$4 sm:$0xff]   ;;  %v6345_v28 = vld [vmem:[#allocation8 + $0x270] ss:$12 sps:$4 sm:$0xff]  }
 0x20d   :  { %2715 = vmatmul.mubr.bf16.vlgmr.msra.gmra.mxu1 %v7012_v11  ;;  %3252 = vmatpush2.bf16.msra.mxu0 %v6272_v49  ;;  %v6305_v11 = vld [vmem:[#allocation8 + $0x1b0] ss:$12 sps:$4 sm:$0xff]  }
 0x20e   :  { %3279 = vmatpush1.bf16.msra.mxu1 %v6275_v25  ;;  %3310 = vmatprep.mubr.bf16.mxu1 %v6945_v14  ;;  %v6349_v25 = vld [vmem:[#allocation8 + $0x38] ss:$12 sps:$4 sm:$0xff]   ;;  %v6352_v49 = vld [vmem:[#allocation8 + $0x25c] ss:$12 sps:$4 sm:$0xff]  }
 0x20f   :  { %3280 = vmatprep.subr.bf16.mxu1 %v6283_v53  ;;  %3253 = vmatprep.subr.bf16.mxu0 %v6280_v55  ;;  %v6353_v53 = vld [vmem:[#allocation8 + $0xe0] ss:$12 sps:$4 sm:$0xff]   ;;  %v6350_v55 = vld [vmem:[#allocation8 + $0x258] ss:$12 sps:$4 sm:$0xff]  }
 0x211   :  { %3254 = vmatpush2.bf16.msra.mxu0 %v6278_v58  ;;  %v6357_v58 = vld [vmem:[#allocation8 + $0x244] ss:$12 sps:$4 sm:$0xff]  }
 0x212   :  { %3281 = vmatpush1.bf16.msra.mxu1 %v6281_v56  ;;  %3255 = vmatprep.subr.bf16.mxu0 %v6286_v60  ;;  %v6354_v56 = vld [vmem:[#allocation8 + $0x20] ss:$12 sps:$4 sm:$0xff]  }
 0x213   :  { %3282 = vmatprep.subr.bf16.mxu1 %v6289_v59  ;;  %v6358_v59 = vld [vmem:[#allocation8 + $0xc8] ss:$12 sps:$4 sm:$0xff]   ;;  %v6355_v60 = vld [vmem:[#allocation8 + $0x240] ss:$12 sps:$4 sm:$0xff]  }
 0x215   :  { %3256 = vmatpush2.bf16.msra.mxu0 %v6284_v4  ;;  %v6360_v4 = vld [vmem:[#allocation8 + $0x2f0] ss:$12 sps:$4 sm:$0xff]  }
 0x216   :  { %3283 = vmatpush1.bf16.msra.mxu1 %v6287_v1  ;;  %3257 = vmatprep.subr.bf16.mxu0 %v6292_v7  ;;  %v6359_v1 = vld [vmem:[#allocation8 + $0x8] ss:$12 sps:$4 sm:$0xff]   ;;  %v6364_v7 = vld [vmem:[#allocation8 + $0x230] ss:$12 sps:$4 sm:$0xff]  }
 0x217   :  { %3284 = vmatprep.subr.bf16.mxu1 %v6295_v5  ;;  %v6363_v5 = vld [vmem:[#allocation5 + $0x2c4] ss:$48 sps:$4 sm:$0xff]  }
 0x219   :  { %3258 = vmatpush2.bf16.msra.mxu0 %v6290_v8  ;;  %v6365_v8 = vld [vmem:[#allocation8 + $0x2d8] ss:$12 sps:$4 sm:$0xff]  }
 0x21a   :  { %3285 = vmatpush1.bf16.msra.mxu1 %v6293_v61  ;;  %3259 = vmatprep.subr.bf16.mxu0 %v6298_v16  ;;  %v6361_v61 = vld [vmem:[#allocation5 + $0x2c0] ss:$48 sps:$4 sm:$0xff]  }
 0x21b   :  { %3286 = vmatprep.subr.bf16.mxu1 %v6301_v48  ;;  %v6368_v48 = vld [vmem:[#allocation5 + $0x264] ss:$48 sps:$4 sm:$0xff]  }
 0x21c   :  { %v6369_v16 = vld [vmem:[#allocation8 + $0x218] ss:$12 sps:$4 sm:$0xff]  }
 0x21d   :  { %3260 = vmatpush2.bf16.msra.mxu0 %v6296_v40  ;;  %v6370_v40 = vld [vmem:[#allocation8 + $0x2c0] ss:$12 sps:$4 sm:$0xff]  }
 0x21e   :  { %3287 = vmatpush1.bf16.msra.mxu1 %v6299_v51  ;;  %3261 = vmatprep.subr.bf16.mxu0 %v6304_v62  ;;  %v6366_v51 = vld [vmem:[#allocation5 + $0x260] ss:$48 sps:$4 sm:$0xff]   ;;  %v6374_v62 = vld [vmem:[#allocation8 + $0x200] ss:$12 sps:$4 sm:$0xff]  }
 0x21f   :  { %3288 = vmatprep.subr.bf16.mxu1 %v6307_v6  ;;  %v6373_v6 = vld [vmem:[#allocation5 + $0x204] ss:$48 sps:$4 sm:$0xff]  }
 0x221   :  { %3262 = vmatpush2.bf16.msra.mxu0 %v6302_v18  ;;  %v6375_v18 = vld [vmem:[#allocation8 + $0x2a8] ss:$12 sps:$4 sm:$0xff]  }
 0x222   :  { %3289 = vmatpush1.bf16.msra.mxu1 %v6305_v11  ;;  %3263 = vmatprep.subr.bf16.mxu0 %v6310_v50  ;;  %v6371_v11 = vld [vmem:[#allocation5 + $0x200] ss:$48 sps:$4 sm:$0xff]   ;;  %v6380_v50 = vld [vmem:[#allocation8 + $0x290] ss:$12 sps:$4 sm:$0xff]  }
 0x223   :  { %3290 = vmatprep.subr.bf16.mxu1 %v6313_v27  ;;  %v6379_v27 = vld [vmem:[#allocation8 + $0x1e8] ss:$12 sps:$4 sm:$0xff]  }
 0x225   :  { %3264 = vmatpush2.bf16.msra.mxu0 %v6308_v19  ;;  %v6384_v19 = vld [vmem:[#allocation8 + $0x1d0] ss:$12 sps:$4 sm:$0xff]  }
 0x226   :  { %3291 = vmatpush1.bf16.msra.mxu1 %v6311_v3  ;;  %3265 = vmatprep.subr.bf16.mxu0 %v6316_v10  ;;  %v6383_v3 = vld [vmem:[#allocation5 + $0x144] ss:$48 sps:$4 sm:$0xff]  }
 0x227   :  { %3292 = vmatprep.subr.bf16.mxu1 %v6319_v20  ;;  %v6381_v20 = vld [vmem:[#allocation5 + $0x140] ss:$48 sps:$4 sm:$0xff]  }
 0x228   :  { %v6385_v10 = vld [vmem:[#allocation8 + $0x278] ss:$12 sps:$4 sm:$0xff]  }
 0x229   :  { %3266 = vmatpush2.bf16.msra.mxu0 %v6314_v24  ;;  %v6389_v24 = vld [vmem:[#allocation8 + $0x1b8] ss:$12 sps:$4 sm:$0xff]  }
 0x22a   :  { %3293 = vmatpush1.bf16.msra.mxu1 %v6317_v21  ;;  %5731 = vmatprep.subr.bf16.mxu0 %v6323_v23  ;;  %v6388_v21 = vld [vmem:[#allocation5 + $0xe4] ss:$48 sps:$4 sm:$0xff]   ;;  %v6390_v23 = vld [vmem:[#allocation8 + $0x260] ss:$12 sps:$4 sm:$0xff]  }
 0x22b   :  { %3294 = vmatprep.subr.bf16.mxu1 %v6322_v13  ;;  %v6386_v13 = vld [vmem:[#allocation5 + $0xe0] ss:$48 sps:$4 sm:$0xff]  }
 0x22c   :  { %3268 = vmatmul.mubr.bf16.vlgmr.msra.gmra.mxu0 %v6941_v22 }
 0x22d   :  { %5732 = vmatpush3.bf16.msra.mxu0 %v6324_v26  ;;  %3353 = vmatprep.mubr.bf16.mxu0 %v7015_v2  ;;  %v6343_v2 = vld [vmem:[#allocation8 + $0x110] ss:$12 sps:$4 sm:$0xff]   ;;  %v6394_v26 = vld [vmem:[#allocation8 + $0x1a0] ss:$12 sps:$4 sm:$0xff]  }
 0x22e   :  { %3295 = vmatpush2.bf16.msra.mxu1 %v6320_v52  ;;  %5733 = vmatprep.subr.bf16.mxu0 %v6328_v30  ;;  %v6393_v52 = vld [vmem:[#allocation5 + $0x84] ss:$48 sps:$4 sm:$0xff]  }
 0x22f   :  { %3296 = vmatprep.subr.bf16.mxu1 %v6327_v29  ;;  %v6391_v29 = vld [vmem:[#allocation5 + $0x80] ss:$48 sps:$4 sm:$0xff]  }
 0x230   :  { %v6395_v30 = vld [vmem:[#allocation8 + $0x248] ss:$12 sps:$4 sm:$0xff]  }
 0x231   :  { %5734 = vmatpush3.bf16.msra.mxu0 %v6329_v57  ;;  %v6399_v57 = vld [vmem:[#allocation8 + $0x188] ss:$12 sps:$4 sm:$0xff]  }
 0x232   :  { %3297 = vmatpush2.bf16.msra.mxu1 %v6325_v15  ;;  %5735 = vmatprep.subr.bf16.mxu0 %v6333_v33  ;;  %v6398_v15 = vld [vmem:[#allocation5 + $0x24] ss:$48 sps:$4 sm:$0xff]  }
 0x233   :  { %3298 = vmatprep.subr.bf16.mxu1 %v6332_v31  ;;  %v6396_v31 = vld [vmem:[#allocation5 + $0x20] ss:$48 sps:$4 sm:$0xff]   ;;  %v6405_v33 = vld [vmem:[#allocation5 + $0x8c4] ss:$48 sps:$4 sm:$0xff]  }
 0x235   :  { %5736 = vmatpush3.bf16.msra.mxu0 %v6334_v35  ;;  %v6403_v35 = vld [vmem:[#allocation5 + $0x8c0] ss:$48 sps:$4 sm:$0xff]  }
 0x236   :  { %3299 = vmatpush2.bf16.msra.mxu1 %v6330_v34  ;;  %5737 = vmatprep.subr.bf16.mxu0 %v6338_v38  ;;  %v6402_v34 = vld [vmem:[#allocation5 + $0x5c4] ss:$48 sps:$4 sm:$0xff]  }
 0x237   :  { %3300 = vmatprep.subr.bf16.mxu1 %v6337_v36  ;;  %v6400_v36 = vld [vmem:[#allocation5 + $0x5c0] ss:$48 sps:$4 sm:$0xff]   ;;  %v6411_v38 = vld [vmem:[#allocation5 + $0x864] ss:$48 sps:$4 sm:$0xff]  }
 0x239   :  { %5738 = vmatpush3.bf16.msra.mxu0 %v6339_v32  ;;  %v6409_v32 = vld [vmem:[#allocation5 + $0x860] ss:$48 sps:$4 sm:$0xff]  }
 0x23a   :  { %3301 = vmatpush2.bf16.msra.mxu1 %v6335_v41  ;;  %5739 = vmatprep.subr.bf16.mxu0 %v6343_v2  ;;  %v6408_v41 = vld [vmem:[#allocation5 + $0x564] ss:$48 sps:$4 sm:$0xff]  }
 0x23b   :  { %3302 = vmatprep.subr.bf16.mxu1 %v6342_v42  ;;  %v6406_v42 = vld [vmem:[#allocation5 + $0x560] ss:$48 sps:$4 sm:$0xff]   ;;  %v6417_v2 = vld [vmem:[#allocation5 + $0x804] ss:$48 sps:$4 sm:$0xff]  }
 0x23d   :  { %5740 = vmatpush3.bf16.msra.mxu0 %v6344_v46  ;;  %v6415_v46 = vld [vmem:[#allocation5 + $0x800] ss:$48 sps:$4 sm:$0xff]  }
 0x23e   :  { %3303 = vmatpush2.bf16.msra.mxu1 %v6340_v43  ;;  %5741 = vmatprep.subr.bf16.mxu0 %v6348_v47  ;;  %v6414_v43 = vld [vmem:[#allocation5 + $0x504] ss:$48 sps:$4 sm:$0xff]  }
 0x23f   :  { %3304 = vmatprep.subr.bf16.mxu1 %v6347_v39  ;;  %v6412_v39 = vld [vmem:[#allocation5 + $0x500] ss:$48 sps:$4 sm:$0xff]   ;;  %v6423_v47 = vld [vmem:[#allocation5 + $0x7a4] ss:$48 sps:$4 sm:$0xff]  }
 0x241   :  { %5742 = vmatpush3.bf16.msra.mxu0 %v6349_v25  ;;  %v6418_v25 = vld [vmem:[#allocation5 + $0x4a0] ss:$48 sps:$4 sm:$0xff]  }
 0x242   :  { %3305 = vmatpush2.bf16.msra.mxu1 %v6345_v28  ;;  %5743 = vmatprep.subr.bf16.mxu0 %v6353_v53  ;;  %v6420_v28 = vld [vmem:[#allocation5 + $0x4a4] ss:$48 sps:$4 sm:$0xff]  }
 0x243   :  { %3306 = vmatprep.subr.bf16.mxu1 %v6352_v49  ;;  %v6429_v49 = vld [vmem:[#allocation5 + $0x744] ss:$48 sps:$4 sm:$0xff]  }
 0x244   :  { %v6426_v53 = vld [vmem:[#allocation5 + $0x444] ss:$48 sps:$4 sm:$0xff]  }
 0x245   :  { %5744 = vmatpush3.bf16.msra.mxu0 %v6354_v56  ;;  %v6424_v56 = vld [vmem:[#allocation5 + $0x440] ss:$48 sps:$4 sm:$0xff]  }
 0x246   :  { %3307 = vmatpush2.bf16.msra.mxu1 %v6350_v55  ;;  %5745 = vmatprep.subr.bf16.mxu0 %v6358_v59  ;;  %v6427_v55 = vld [vmem:[#allocation5 + $0x740] ss:$48 sps:$4 sm:$0xff]   ;;  %v6432_v59 = vld [vmem:[#allocation5 + $0x3e4] ss:$48 sps:$4 sm:$0xff]  }
 0x247   :  { %3308 = vmatprep.subr.bf16.mxu1 %v6357_v58  ;;  %v6435_v58 = vld [vmem:[#allocation5 + $0x6e4] ss:$48 sps:$4 sm:$0xff]  }
 0x249   :  { %5746 = vmatpush3.bf16.msra.mxu0 %v6359_v1  ;;  %v6430_v1 = vld [vmem:[#allocation5 + $0x3e0] ss:$48 sps:$4 sm:$0xff]  }
 0x24a   :  { %3309 = vmatpush2.bf16.msra.mxu1 %v6355_v60  ;;  %4001 = vmatprep.subr.bf16.mxu0 %v6363_v5  ;;  %v6433_v60 = vld [vmem:[#allocation5 + $0x6e0] ss:$48 sps:$4 sm:$0xff]   ;;  %v6438_v5 = vld [vmem:[#allocation5 + $0x384] ss:$48 sps:$4 sm:$0xff]  }
 0x24b   :  { %5753 = vmatprep.subr.bf16.mxu1 %v6360_v4  ;;  %v6441_v4 = vld [vmem:[#allocation5 + $0x684] ss:$48 sps:$4 sm:$0xff]  }
 0x24c   :  { %3354 = vmatmul.mubr.bf16.vlgmr.msra.gmra.mxu0 %v6941_v22  ;;  %v6378_v22 = vld [vmem:[#allocation5 + $0x1a4] ss:$48 sps:$4 sm:$0xff]  }
 0x24d   :  { %3311 = vmatmul.mubr.bf16.vlgmr.msra.gmra.mxu1 %v6943_v9  ;;  %4002 = vmatpush1.bf16.msra.mxu0 %v6361_v61  ;;  %v6436_v61 = vld [vmem:[#allocation5 + $0x380] ss:$48 sps:$4 sm:$0xff]  }
 0x24e   :  { %5754 = vmatpush3.bf16.msra.mxu1 %v6364_v7  ;;  %3394 = vmatprep.mubr.bf16.mxu1 %v6945_v14  ;;  %v6376_v14 = vld [vmem:[#allocation5 + $0x1a0] ss:$48 sps:$4 sm:$0xff]  }
 0x24f   :  { %5755 = vmatprep.subr.bf16.mxu1 %v6365_v8  ;;  %4003 = vmatprep.subr.bf16.mxu0 %v6368_v48  ;;  %v6439_v7 = vld [vmem:[#allocation5 + $0x680] ss:$48 sps:$4 sm:$0xff]   ;;  %v6447_v8 = vld [vmem:[#allocation5 + $0x624] ss:$48 sps:$4 sm:$0xff]  }
 0x250   :  { %4033 = vmatprep.mubr.bf16.mxu0 %v6889_v54  ;;  %v6444_v48 = vld [vmem:[#allocation5 + $0x324] ss:$48 sps:$4 sm:$0xff]  }
 0x251   :  { %4004 = vmatpush1.bf16.msra.mxu0 %v6366_v51  ;;  %v6442_v51 = vld [vmem:[#allocation5 + $0x320] ss:$48 sps:$4 sm:$0xff]  }
 0x252   :  { %5756 = vmatpush3.bf16.msra.mxu1 %v6369_v16  ;;  %4005 = vmatprep.subr.bf16.mxu0 %v6373_v6  ;;  %v6445_v16 = vld [vmem:[#allocation5 + $0x620] ss:$48 sps:$4 sm:$0xff]   ;;  %v6474_v6 = vld [vmem:[#allocation5 + $0x8cc] ss:$48 sps:$4 sm:$0xff]  }
 0x253   :  { %5757 = vmatprep.subr.bf16.mxu1 %v6370_v40  ;;  %v6450_v40 = vld [vmem:[#allocation5 + $0x2cc] ss:$48 sps:$4 sm:$0xff]  }
 0x255   :  { %4006 = vmatpush1.bf16.msra.mxu0 %v6371_v11  ;;  %v6453_v11 = vld [vmem:[#allocation5 + $0x26c] ss:$48 sps:$4 sm:$0xff]  }
 0x256   :  { %5758 = vmatpush3.bf16.msra.mxu1 %v6374_v62  ;;  %4007 = vmatprep.subr.bf16.mxu0 %v6378_v22  ;;  %v6448_v62 = vld [vmem:[#allocation5 + $0x2c8] ss:$48 sps:$4 sm:$0xff]   ;;  %v6480_v22 = vld [vmem:[#allocation5 + $0x86c] ss:$48 sps:$4 sm:$0xff]  }
 0x257   :  { %5759 = vmatprep.subr.bf16.mxu1 %v6375_v18  ;;  %v6472_v18 = vld [vmem:[#allocation5 + $0x8c8] ss:$48 sps:$4 sm:$0xff]  }
 0x259   :  { %4008 = vmatpush1.bf16.msra.mxu0 %v6376_v14  ;;  %v6456_v14 = vld [vmem:[#allocation5 + $0x20c] ss:$48 sps:$4 sm:$0xff]  }
 0x25a   :  { %5760 = vmatpush3.bf16.msra.mxu1 %v6379_v27  ;;  %4009 = vmatprep.subr.bf16.mxu0 %v6383_v3  ;;  %v6451_v27 = vld [vmem:[#allocation5 + $0x268] ss:$48 sps:$4 sm:$0xff]   ;;  %v6486_v3 = vld [vmem:[#allocation5 + $0x80c] ss:$48 sps:$4 sm:$0xff]  }
 0x25b   :  { %5761 = vmatprep.subr.bf16.mxu1 %v6380_v50  ;;  %v6478_v50 = vld [vmem:[#allocation5 + $0x868] ss:$48 sps:$4 sm:$0xff]  }
 0x25d   :  { %4010 = vmatpush1.bf16.msra.mxu0 %v6381_v20  ;;  %v6459_v20 = vld [vmem:[#allocation5 + $0x1ac] ss:$48 sps:$4 sm:$0xff]  }
 0x25e   :  { %5762 = vmatpush3.bf16.msra.mxu1 %v6384_v19  ;;  %4011 = vmatprep.subr.bf16.mxu0 %v6388_v21  ;;  %v6454_v19 = vld [vmem:[#allocation5 + $0x208] ss:$48 sps:$4 sm:$0xff]   ;;  %v6492_v21 = vld [vmem:[#allocation5 + $0x7ac] ss:$48 sps:$4 sm:$0xff]  }
 0x25f   :  { %5763 = vmatprep.subr.bf16.mxu1 %v6385_v10  ;;  %v6484_v10 = vld [vmem:[#allocation5 + $0x808] ss:$48 sps:$4 sm:$0xff]  }
 0x261   :  { %4012 = vmatpush1.bf16.msra.mxu0 %v6386_v13  ;;  %v6462_v13 = vld [vmem:[#allocation5 + $0x14c] ss:$48 sps:$4 sm:$0xff]  }
 0x262   :  { %5764 = vmatpush3.bf16.msra.mxu1 %v6389_v24  ;;  %4013 = vmatprep.subr.bf16.mxu0 %v6393_v52  ;;  %v6457_v24 = vld [vmem:[#allocation5 + $0x1a8] ss:$48 sps:$4 sm:$0xff]   ;;  %v6498_v52 = vld [vmem:[#allocation5 + $0x74c] ss:$48 sps:$4 sm:$0xff]  }
 0x263   :  { %5765 = vmatprep.subr.bf16.mxu1 %v6390_v23  ;;  %v6490_v23 = vld [vmem:[#allocation5 + $0x7a8] ss:$48 sps:$4 sm:$0xff]  }
 0x265   :  { %4014 = vmatpush1.bf16.msra.mxu0 %v6391_v29  ;;  %v6504_v29 = vld [vmem:[#allocation5 + $0x6ec] ss:$48 sps:$4 sm:$0xff]  }
 0x266   :  { %5766 = vmatpush3.bf16.msra.mxu1 %v6394_v26  ;;  %4015 = vmatprep.subr.bf16.mxu0 %v6398_v15  ;;  %v6496_v26 = vld [vmem:[#allocation5 + $0x748] ss:$48 sps:$4 sm:$0xff]   ;;  %v6468_v15 = vld [vmem:[#allocation5 + $0x8c] ss:$48 sps:$4 sm:$0xff]  }
 0x267   :  { %5767 = vmatprep.subr.bf16.mxu1 %v6395_v30  ;;  %v6463_v30 = vld [vmem:[#allocation5 + $0xe8] ss:$48 sps:$4 sm:$0xff]  }
 0x269   :  { %4016 = vmatpush1.bf16.msra.mxu0 %v6396_v31 }
 0x26a   :  { %5768 = vmatpush3.bf16.msra.mxu1 %v6399_v57  ;;  %4017 = vmatprep.subr.bf16.mxu0 %v6402_v34  ;;  %v6502_v57 = vld [vmem:[#allocation5 + $0x6e8] ss:$48 sps:$4 sm:$0xff]  }
 0x26b   :  { %4044 = vmatprep.subr.bf16.mxu1 %v6405_v33  ;;  %v6510_v33 = vld [vmem:[#allocation5 + $0x68c] ss:$48 sps:$4 sm:$0xff]   ;;  %v6466_v34 = vld [vmem:[#allocation5 + $0x88] ss:$48 sps:$4 sm:$0xff]  }
 0x26d   :  { %3395 = vmatmul.mubr.bf16.vlgmr.msra.gmra.mxu1 %v6943_v9  ;;  %4018 = vmatpush2.bf16.msra.mxu0 %v6400_v36  ;;  %v6421_v9 = vld [vmem:[#allocation5 + $0x7a0] ss:$48 sps:$4 sm:$0xff]   ;;  %v6508_v36 = vld [vmem:[#allocation5 + $0x688] ss:$48 sps:$4 sm:$0xff]  }
 0x26e   :  { %4045 = vmatpush1.bf16.msra.mxu1 %v6403_v35  ;;  %4076 = vmatprep.mubr.bf16.mxu1 %v6835_v0  ;;  %v6471_v35 = vld [vmem:[#allocation5 + $0x2c] ss:$48 sps:$4 sm:$0xff]  }
 0x26f   :  { %4046 = vmatprep.subr.bf16.mxu1 %v6411_v38  ;;  %4019 = vmatprep.subr.bf16.mxu0 %v6408_v41  ;;  %v6516_v41 = vld [vmem:[#allocation5 + $0x62c] ss:$48 sps:$4 sm:$0xff]  }
 0x271   :  { %4020 = vmatpush2.bf16.msra.mxu0 %v6406_v42  ;;  %v6477_v42 = vld [vmem:[#allocation5 + $0x5cc] ss:$48 sps:$4 sm:$0xff]  }
 0x272   :  { %4047 = vmatpush1.bf16.msra.mxu1 %v6409_v32  ;;  %4021 = vmatprep.subr.bf16.mxu0 %v6414_v43  ;;  %v6469_v32 = vld [vmem:[#allocation5 + $0x28] ss:$48 sps:$4 sm:$0xff]  }
 0x273   :  { %4048 = vmatprep.subr.bf16.mxu1 %v6417_v2  ;;  %v6514_v2 = vld [vmem:[#allocation5 + $0x628] ss:$48 sps:$4 sm:$0xff]  }
 0x275   :  { %4022 = vmatpush2.bf16.msra.mxu0 %v6412_v39  ;;  %v6483_v39 = vld [vmem:[#allocation5 + $0x56c] ss:$48 sps:$4 sm:$0xff]  }
 0x276   :  { %4049 = vmatpush1.bf16.msra.mxu1 %v6415_v46  ;;  %4023 = vmatprep.subr.bf16.mxu0 %v6420_v28  ;;  %v6475_v46 = vld [vmem:[#allocation5 + $0x5c8] ss:$48 sps:$4 sm:$0xff]  }
 0x277   :  { %4050 = vmatprep.subr.bf16.mxu1 %v6423_v47 }
 0x279   :  { %4024 = vmatpush2.bf16.msra.mxu0 %v6418_v25 }
 0x27a   :  { %4051 = vmatpush1.bf16.msra.mxu1 %v6421_v9  ;;  %4025 = vmatprep.subr.bf16.mxu0 %v6426_v53 }
 0x27b   :  { %4052 = vmatprep.subr.bf16.mxu1 %v6429_v49  ;;  %v6481_v49 = vld [vmem:[#allocation5 + $0x568] ss:$48 sps:$4 sm:$0xff]  }
 0x27d   :  { %4026 = vmatpush2.bf16.msra.mxu0 %v6424_v56 }
 0x27e   :  { %4053 = vmatpush1.bf16.msra.mxu1 %v6427_v55  ;;  %4027 = vmatprep.subr.bf16.mxu0 %v6432_v59  ;;  %v6489_v55 = vld [vmem:[#allocation5 + $0x50c] ss:$48 sps:$4 sm:$0xff]  }
 0x27f   :  { %4054 = vmatprep.subr.bf16.mxu1 %v6435_v58 }
 0x281   :  { %4028 = vmatpush2.bf16.msra.mxu0 %v6430_v1 }
 0x282   :  { %4055 = vmatpush1.bf16.msra.mxu1 %v6433_v60  ;;  %4029 = vmatprep.subr.bf16.mxu0 %v6438_v5  ;;  %v6487_v5 = vld [vmem:[#allocation5 + $0x508] ss:$48 sps:$4 sm:$0xff]  }
 0x283   :  { %4056 = vmatprep.subr.bf16.mxu1 %v6441_v4 }
 0x285   :  { %4030 = vmatpush2.bf16.msra.mxu0 %v6436_v61  ;;  %v6495_v61 = vld [vmem:[#allocation5 + $0x4ac] ss:$48 sps:$4 sm:$0xff]  }
 0x286   :  { %4057 = vmatpush1.bf16.msra.mxu1 %v6439_v7  ;;  %4031 = vmatprep.subr.bf16.mxu0 %v6444_v48 }
 0x287   :  { %4058 = vmatprep.subr.bf16.mxu1 %v6447_v8 }
 0x289   :  { %4032 = vmatpush2.bf16.msra.mxu0 %v6442_v51  ;;  %v6493_v51 = vld [vmem:[#allocation5 + $0x4a8] ss:$48 sps:$4 sm:$0xff]  }
 0x28a   :  { %4059 = vmatpush1.bf16.msra.mxu1 %v6445_v16  ;;  %4130 = vmatprep.subr.bf16.mxu0 %v6474_v6  ;;  %v6522_v16 = vld [vmem:[#allocation8 + $0x6ac] ss:$12 sps:$4 sm:$0xff]   ;;  %v6525_v6 = vld [vmem:[#allocation8 + $0x694] ss:$12 sps:$4 sm:$0xff]  }
 0x28b   :  { %4087 = vmatprep.subr.bf16.mxu1 %v6450_v40  ;;  %v6520_v40 = vld [vmem:[#allocation8 + $0x6a8] ss:$12 sps:$4 sm:$0xff]  }
 0x28c   :  { %4034 = vmatmul.mubr.bf16.vlgmr.msra.gmra.mxu0 %v6893_v12  ;;  %v2589_v31 = vpop.f32.mrf.mxu0 }
 0x28d   :  { %4077 = vmatmul.mubr.bf16.vlgmr.msra.gmra.mxu1 %v6886_v37  ;;  %4131 = vmatpush1.bf16.msra.mxu0 %v6472_v18  ;;  %v6528_v18 = vld [vmem:[#allocation8 + $0x67c] ss:$12 sps:$4 sm:$0xff]  }
 0x28e   :  { %4088 = vmatpush1.bf16.msra.mxu1 %v6448_v62  ;;  %4132 = vmatprep.subr.bf16.mxu0 %v6480_v22  ;;  %v2591_v38 = vpop.f32.mrf.mxu0  ;;  %v6501_v62 = vld [vmem:[#allocation5 + $0x44c] ss:$48 sps:$4 sm:$0xff]   ;;  %v6499_v22 = vld [vmem:[#allocation5 + $0x448] ss:$48 sps:$4 sm:$0xff]  }
 0x28f   :  { %4089 = vmatprep.subr.bf16.mxu1 %v6453_v11  ;;  %4162 = vmatprep.mubr.bf16.mxu0 %v6835_v0  ;;  %v6460_v0 = vld [vmem:[#allocation5 + $0x148] ss:$48 sps:$4 sm:$0xff]  }
 0x290   :  { %4119 = vmatprep.mubr.bf16.mxu1 %v6889_v54  ;;  %v6465_v54 = vld [vmem:[#allocation5 + $0xec] ss:$48 sps:$4 sm:$0xff]   ;;  %v2593_v43 = vpop.f32.mrf.mxu0 }
 0x291   :  { %4133 = vmatpush1.bf16.msra.mxu0 %v6478_v50  ;;  %v6523_v11 = vld [vmem:[#allocation8 + $0x690] ss:$12 sps:$4 sm:$0xff]  }
 0x292   :  { %4090 = vmatpush1.bf16.msra.mxu1 %v6451_v27  ;;  %4134 = vmatprep.subr.bf16.mxu0 %v6486_v3  ;;  %v2595_v47 = vpop.f32.mrf.mxu0  ;;  %v6507_v27 = vld [vmem:[#allocation5 + $0x3ec] ss:$48 sps:$4 sm:$0xff]   ;;  %v6505_v3 = vld [vmem:[#allocation5 + $0x3e8] ss:$48 sps:$4 sm:$0xff]  }
 0x293   :  { %4091 = vmatprep.subr.bf16.mxu1 %v6456_v14  ;;  %v6526_v14 = vld [vmem:[#allocation8 + $0x678] ss:$12 sps:$4 sm:$0xff]  }
 0x294   :  { %v6531_v50 = vld [vmem:[#allocation8 + $0x664] ss:$12 sps:$4 sm:$0xff]  }
 0x295   :  { %4135 = vmatpush1.bf16.msra.mxu0 %v6484_v10  ;;  %v6534_v10 = vld [vmem:[#allocation8 + $0x64c] ss:$12 sps:$4 sm:$0xff]  }
 0x296   :  { %4092 = vmatpush1.bf16.msra.mxu1 %v6454_v19  ;;  %4136 = vmatprep.subr.bf16.mxu0 %v6492_v21  ;;  %v6513_v19 = vld [vmem:[#allocation5 + $0x38c] ss:$48 sps:$4 sm:$0xff]   ;;  %v6511_v21 = vld [vmem:[#allocation5 + $0x388] ss:$48 sps:$4 sm:$0xff]  }
 0x297   :  { %4093 = vmatprep.subr.bf16.mxu1 %v6459_v20  ;;  %v6529_v20 = vld [vmem:[#allocation8 + $0x660] ss:$12 sps:$4 sm:$0xff]  }
 0x299   :  { %4137 = vmatpush1.bf16.msra.mxu0 %v6490_v23  ;;  %v6537_v23 = vld [vmem:[#allocation8 + $0x634] ss:$12 sps:$4 sm:$0xff]  }
 0x29a   :  { %4094 = vmatpush1.bf16.msra.mxu1 %v6457_v24  ;;  %4138 = vmatprep.subr.bf16.mxu0 %v6498_v52  ;;  %v6519_v24 = vld [vmem:[#allocation5 + $0x32c] ss:$48 sps:$4 sm:$0xff]   ;;  %v6517_v52 = vld [vmem:[#allocation5 + $0x328] ss:$48 sps:$4 sm:$0xff]  }
 0x29b   :  { %4095 = vmatprep.subr.bf16.mxu1 %v6462_v13  ;;  %v6532_v13 = vld [vmem:[#allocation8 + $0x648] ss:$12 sps:$4 sm:$0xff]  }
 0x29d   :  { %4139 = vmatpush1.bf16.msra.mxu0 %v6496_v26  ;;  %v6540_v26 = vld [vmem:[#allocation8 + $0x61c] ss:$12 sps:$4 sm:$0xff]  }
 0x29e   :  { %4096 = vmatpush1.bf16.msra.mxu1 %v6460_v0  ;;  %4140 = vmatprep.subr.bf16.mxu0 %v6504_v29  ;;  %v6535_v0 = vld [vmem:[#allocation8 + $0x630] ss:$12 sps:$4 sm:$0xff]   ;;  %v6538_v29 = vld [vmem:[#allocation8 + $0x618] ss:$12 sps:$4 sm:$0xff]  }
 0x29f   :  { %4097 = vmatprep.subr.bf16.mxu1 %v6465_v54 }
 0x2a1   :  { %4141 = vmatpush1.bf16.msra.mxu0 %v6502_v57 }
 0x2a2   :  { %4098 = vmatpush1.bf16.msra.mxu1 %v6463_v30  ;;  %4142 = vmatprep.subr.bf16.mxu0 %v6510_v33 }
 0x2a3   :  { %4099 = vmatprep.subr.bf16.mxu1 %v6468_v15 }
 0x2a5   :  { %4143 = vmatpush1.bf16.msra.mxu0 %v6508_v36 }
 0x2a6   :  { %4100 = vmatpush1.bf16.msra.mxu1 %v6466_v34  ;;  %4144 = vmatprep.subr.bf16.mxu0 %v6516_v41  ;;  %v6541_v34 = vld [vmem:[#allocation8 + $0x600] ss:$12 sps:$4 sm:$0xff]  }
 0x2a7   :  { %4101 = vmatprep.subr.bf16.mxu1 %v6471_v35 }
 0x2a9   :  { %4145 = vmatpush1.bf16.msra.mxu0 %v6514_v2  ;;  %v6552_v2 = vld [vmem:[#allocation8 + $0x73c] ss:$12 sps:$4 sm:$0xff]  }
 0x2aa   :  { %4102 = vmatpush1.bf16.msra.mxu1 %v6469_v32  ;;  %4889 = vmatprep.subr.bf16.mxu0 %v6522_v16  ;;  %v6549_v32 = vld [vmem:[#allocation8 + $0x754] ss:$12 sps:$4 sm:$0xff]  }
 0x2ab   :  { %4103 = vmatprep.subr.bf16.mxu1 %v6477_v42  ;;  %v6547_v42 = vld [vmem:[#allocation8 + $0x750] ss:$12 sps:$4 sm:$0xff]  }
 0x2ac   :  { %v5703_v9 = vpop.f32.mrf.mxu0  ;;  %4163 = vmatmul.mubr.bf16.vlgmr.msra.gmra.mxu0 %v6886_v37 }
 0x2ad   :  { %v2632_v28 = vpop.f32.mrf.mxu1  ;;  %4890 = vmatpush1.bf16.msra.mxu0 %v6520_v40  ;;  %v6571_v40 = vld [vmem:[#allocation8 + $0x770] ss:$12 sps:$4 sm:$0xff]  }
 0x2ae   :  { %v7033_v25 = vadd.f32 %v2632_v28, %v2589_v31  ;;  %4104 = vmatpush2.bf16.msra.mxu1 %v6475_v46  ;;  %v5704_v56 = vpop.f32.mrf.mxu0  ;;  %4891 = vmatprep.subr.bf16.mxu0 %v6525_v6  ;;  %v6543_v31 = vld [vmem:[#allocation8 + $0x604] ss:$12 sps:$4 sm:$0xff]   ;;  %v6553_v46 = vld [vmem:[#allocation8 + $0x720] ss:$12 sps:$4 sm:$0xff]   ;;  %v6556_v28 = vld [vmem:[#allocation8 + $0x708] ss:$12 sps:$4 sm:$0xff]  }
 0x2af   :  { %v2634_v53 = vpop.f32.mrf.mxu1  ;;  %4105 = vmatprep.subr.bf16.mxu1 %v6483_v39  ;;  %v7038_v59 = vadd.f32 %v5704_v56, %v5703_v9  ;;  %v6555_v39 = vld [vmem:[#allocation8 + $0x724] ss:$12 sps:$4 sm:$0xff]   ;;  %v6561_v9 = vld [vmem:[#allocation8 + $0x6f4] ss:$12 sps:$4 sm:$0xff]  }
 0x2b0   :  { %v7036_v58 = vadd.f32 %v2634_v53, %v2591_v38  ;;  %v5706_v1 = vpop.f32.mrf.mxu0  ;;  %v6546_v38 = vld [vmem:[#allocation8 + $0x76c] ss:$12 sps:$4 sm:$0xff]   ;;  %v6564_v53 = vld [vmem:[#allocation8 + $0x6dc] ss:$12 sps:$4 sm:$0xff]   ;;  %v6567_v56 = vld [vmem:[#allocation8 + $0x6c4] ss:$12 sps:$4 sm:$0xff]  }
 0x2b1   :  { %v2636_v60 = vpop.f32.mrf.mxu1  ;;  %4892 = vmatpush1.bf16.msra.mxu0 %v6523_v11  ;;  %v6568_v6 = vld [vmem:[#allocation8 + $0x828] ss:$12 sps:$4 sm:$0xff]   ;;  %v6578_v11 = vld [vmem:[#allocation8 + $0x7f8] ss:$12 sps:$4 sm:$0xff]  }
 0x2b2   :  { %v7040_v4 = vadd.f32 %v2636_v60, %v2593_v43  ;;  %4106 = vmatpush2.bf16.msra.mxu1 %v6481_v49  ;;  %v5707_v8 = vpop.f32.mrf.mxu0  ;;  %4893 = vmatprep.subr.bf16.mxu0 %v6528_v18  ;;  %v6550_v43 = vld [vmem:[#allocation8 + $0x738] ss:$12 sps:$4 sm:$0xff]   ;;  %v6559_v49 = vld [vmem:[#allocation8 + $0x6f0] ss:$12 sps:$4 sm:$0xff]   ;;  %v6583_v18 = vld [vmem:[#allocation8 + $0x7e0] ss:$12 sps:$4 sm:$0xff]  }
 0x2b3   :  { %v2638_v7 = vpop.f32.mrf.mxu1  ;;  %4107 = vmatprep.subr.bf16.mxu1 %v6489_v55  ;;  %v5708_v37 = vadd.f32 %v5707_v8, %v5706_v1  ;;  %v6562_v55 = vld [vmem:[#allocation8 + $0x6d8] ss:$12 sps:$4 sm:$0xff]  }
 0x2b4   :  { %v7042_v48 = vadd.f32 %v2638_v7, %v2595_v47  ;;  %v6558_v47 = vld [vmem:[#allocation8 + $0x70c] ss:$12 sps:$4 sm:$0xff]  }
 0x2b5   :  { %4894 = vmatpush1.bf16.msra.mxu0 %v6526_v14  ;;  %v6595_v14 = vld [vmem:[#allocation8 + $0x7b4] ss:$12 sps:$4 sm:$0xff]  }
 0x2b6   :  { %4108 = vmatpush2.bf16.msra.mxu1 %v6487_v5  ;;  %4895 = vmatprep.subr.bf16.mxu0 %v6531_v50  ;;  %v6565_v5 = vld [vmem:[#allocation8 + $0x6c0] ss:$12 sps:$4 sm:$0xff]  }
 0x2b7   :  { %4109 = vmatprep.subr.bf16.mxu1 %v6495_v61 }
 0x2b9   :  { %4896 = vmatpush1.bf16.msra.mxu0 %v6529_v20  ;;  %v6600_v20 = vld [vmem:[#allocation8 + $0x79c] ss:$12 sps:$4 sm:$0xff]  }
 0x2ba   :  { %4110 = vmatpush2.bf16.msra.mxu1 %v6493_v51  ;;  %4897 = vmatprep.subr.bf16.mxu0 %v6534_v10  ;;  %v6570_v51 = vld [vmem:[#allocation8 + $0x82c] ss:$12 sps:$4 sm:$0xff]  }
 0x2bb   :  { %4111 = vmatprep.subr.bf16.mxu1 %v6501_v62  ;;  %v6575_v62 = vld [vmem:[#allocation8 + $0x814] ss:$12 sps:$4 sm:$0xff]  }
 0x2bd   :  { %4898 = vmatpush1.bf16.msra.mxu0 %v6532_v13 }
 0x2be   :  { %4112 = vmatpush2.bf16.msra.mxu1 %v6499_v22  ;;  %4899 = vmatprep.subr.bf16.mxu0 %v6537_v23  ;;  %v6588_v22 = vld [vmem:[#allocation8 + $0x7c8] ss:$12 sps:$4 sm:$0xff]  }
 0x2bf   :  { %4113 = vmatprep.subr.bf16.mxu1 %v6507_v27  ;;  %v6593_v27 = vld [vmem:[#allocation8 + $0x7b0] ss:$12 sps:$4 sm:$0xff]  }
 0x2c1   :  { %4900 = vmatpush1.bf16.msra.mxu0 %v6535_v0 }
 0x2c2   :  { %4114 = vmatpush2.bf16.msra.mxu1 %v6505_v3  ;;  %4901 = vmatprep.subr.bf16.mxu0 %v6540_v26  ;;  %v6605_v26 = vld [vmem:[#allocation8 + $0x784] ss:$12 sps:$4 sm:$0xff]  }
 0x2c3   :  { %4115 = vmatprep.subr.bf16.mxu1 %v6513_v19 }
 0x2c5   :  { %4902 = vmatpush1.bf16.msra.mxu0 %v6538_v29 }
 0x2c6   :  { %4116 = vmatpush2.bf16.msra.mxu1 %v6511_v21  ;;  %4903 = vmatprep.subr.bf16.mxu0 %v6543_v31  ;;  %v6598_v21 = vld [vmem:[#allocation8 + $0x798] ss:$12 sps:$4 sm:$0xff]  }
 0x2c7   :  { %4117 = vmatprep.subr.bf16.mxu1 %v6519_v24 }
 0x2c9   :  { %4904 = vmatpush1.bf16.msra.mxu0 %v6541_v34 }
 0x2ca   :  { %4118 = vmatpush2.bf16.msra.mxu1 %v6517_v52  ;;  %4905 = vmatprep.subr.bf16.mxu0 %v6546_v38  ;;  %v6608_v38 = vld [vmem:[#allocation8 + $0x8e8] ss:$12 sps:$4 sm:$0xff]  }
 0x2cb   :  { %4932 = vmatprep.subr.bf16.mxu1 %v6570_v51 }
 0x2cd   :  { %v5725_v54 = vpop.f32.mrf.mxu1  ;;  %4120 = vmatmul.mubr.bf16.vlgmr.msra.gmra.mxu1 %v6893_v12  ;;  %v6544_v12 = vld [vmem:[#allocation8 + $0x768] ss:$12 sps:$4 sm:$0xff]  }
 0x2ce   :  { %4906 = vmatpush2.bf16.msra.mxu0 %v6544_v12  ;;  %4933 = vmatpush1.bf16.msra.mxu1 %v6568_v6  ;;  %v6613_v12 = vld [vmem:[#allocation8 + $0x8d4] ss:$12 sps:$4 sm:$0xff]  }
 0x2cf   :  { %v5726_v30 = vpop.f32.mrf.mxu1  ;;  %4907 = vmatprep.subr.bf16.mxu0 %v6549_v32  ;;  %4934 = vmatprep.subr.bf16.mxu1 %v6575_v62  ;;  %v6611_v32 = vld [vmem:[#allocation8 + $0x8d0] ss:$12 sps:$4 sm:$0xff]  }
 0x2d0   :  { %v5727_v15 = vadd.f32 %v5726_v30, %v5725_v54 }
 0x2d1   :  { %v5728_v57 = vpop.f32.mrf.mxu1 }
 0x2d2   :  { %v7046_v33 = vadd.f32 %v5727_v15, %v7038_v59  ;;  %4908 = vmatpush2.bf16.msra.mxu0 %v6547_v42  ;;  %v6603_v15 = vld [vmem:[#allocation8 + $0x780] ss:$12 sps:$4 sm:$0xff]   ;;  %v6616_v42 = vld [vmem:[#allocation8 + $0x8bc] ss:$12 sps:$4 sm:$0xff]  }
 0x2d3   :  { %v5729_v35 = vpop.f32.mrf.mxu1  ;;  %4909 = vmatprep.subr.bf16.mxu0 %v6552_v2  ;;  %v6619_v2 = vld [vmem:[#allocation8 + $0x8a4] ss:$12 sps:$4 sm:$0xff]  }
 0x2d4   :  { %v5730_v36 = vadd.f32 %v5729_v35, %v5728_v57  ;;  %v6610_v35 = vld [vmem:[#allocation8 + $0x8ec] ss:$12 sps:$4 sm:$0xff]  }
 0x2d6   :  { %v7048_v41 = vadd.f32 %v5730_v36, %v5708_v37  ;;  %4910 = vmatpush2.bf16.msra.mxu0 %v6550_v43  ;;  %v6617_v43 = vld [vmem:[#allocation8 + $0x8a0] ss:$12 sps:$4 sm:$0xff]  }
 0x2d7   :  { %4911 = vmatprep.subr.bf16.mxu0 %v6555_v39  ;;  %v6620_v39 = vld [vmem:[#allocation8 + $0x888] ss:$12 sps:$4 sm:$0xff]  }
 0x2da   :  { %4912 = vmatpush2.bf16.msra.mxu0 %v6553_v46  ;;  %v6622_v46 = vld [vmem:[#allocation8 + $0x88c] ss:$12 sps:$4 sm:$0xff]  }
 0x2db   :  { %4913 = vmatprep.subr.bf16.mxu0 %v6558_v47  ;;  %v6625_v47 = vld [vmem:[#allocation8 + $0x874] ss:$12 sps:$4 sm:$0xff]  }
 0x2de   :  { %4914 = vmatpush2.bf16.msra.mxu0 %v6556_v28  ;;  %v6628_v28 = vld [vmem:[#allocation8 + $0x85c] ss:$12 sps:$4 sm:$0xff]  }
 0x2df   :  { %4915 = vmatprep.subr.bf16.mxu0 %v6561_v9 }
 0x2e2   :  { %4916 = vmatpush2.bf16.msra.mxu0 %v6559_v49  ;;  %v6626_v49 = vld [vmem:[#allocation8 + $0x858] ss:$12 sps:$4 sm:$0xff]  }
 0x2e3   :  { %4917 = vmatprep.subr.bf16.mxu0 %v6564_v53  ;;  %v6631_v53 = vld [vmem:[#allocation8 + $0x844] ss:$12 sps:$4 sm:$0xff]  }
 0x2e6   :  { %4918 = vmatpush2.bf16.msra.mxu0 %v6562_v55 }
 0x2e7   :  { %4919 = vmatprep.subr.bf16.mxu0 %v6567_v56 }
 0x2ea   :  { %4920 = vmatpush2.bf16.msra.mxu0 %v6565_v5 }
 0x2eb   :  { %5775 = vmatprep.subr.bf16.mxu0 %v6571_v40 }
 0x2ec   :  { %v3269_v59 = vpop.f32.mrf.mxu0 }
 0x2ed   :  { %v3270_v60 = vadd.f32 %v3269_v59, %v7033_v25  ;;  %v6573_v25 = vld [vmem:[#allocation8 + $0x810] ss:$12 sps:$4 sm:$0xff]  }
 0x2ee   :  { %v3271_v1 = vpop.f32.mrf.mxu0  ;;  %4935 = vmatpush1.bf16.msra.mxu1 %v6573_v25 }
 0x2ef   :  { %v3272_v7 = vadd.f32 %v3271_v1, %v7036_v58  ;;  %v6580_v58 = vld [vmem:[#allocation8 + $0x7fc] ss:$12 sps:$4 sm:$0xff]  }
 0x2f0   :  { %v3273_v61 = vpop.f32.mrf.mxu0  ;;  %4936 = vmatprep.subr.bf16.mxu1 %v6580_v58 }
 0x2f1   :  { %v3274_v8 = vadd.f32 %v3273_v61, %v7040_v4  ;;  %v6585_v4 = vld [vmem:[#allocation8 + $0x7e4] ss:$12 sps:$4 sm:$0xff]  }
 0x2f2   :  { %v3275_v37 = vpop.f32.mrf.mxu0  ;;  %4937 = vmatpush1.bf16.msra.mxu1 %v6578_v11 }
 0x2f3   :  { %v3276_v16 = vadd.f32 %v3275_v37, %v7042_v48  ;;  %4938 = vmatprep.subr.bf16.mxu1 %v6585_v4  ;;  %v6590_v48 = vld [vmem:[#allocation8 + $0x7cc] ss:$12 sps:$4 sm:$0xff]   ;;  %v7068_v37 = vld [vmem:[#allocation7 + $0x8] sm:$0xf] }
 0x2f4   :  { %v3508_v40 = vrot.slane %v7068_v37, %v6948_v17 }
 0x2f6   :  { %4939 = vmatpush1.bf16.msra.mxu1 %v6583_v18 }
 0x2f7   :  { %4940 = vmatprep.subr.bf16.mxu1 %v6590_v48 }
 0x2fa   :  { %4941 = vmatpush1.bf16.msra.mxu1 %v6588_v22 }
 0x2fb   :  { %4942 = vmatprep.subr.bf16.mxu1 %v6595_v14 }
 0x2fe   :  { %4943 = vmatpush1.bf16.msra.mxu1 %v6593_v27 }
 0x2ff   :  { %4944 = vmatprep.subr.bf16.mxu1 %v6600_v20 }
 0x302   :  { %4945 = vmatpush1.bf16.msra.mxu1 %v6598_v21 }
 0x303   :  { %4946 = vmatprep.subr.bf16.mxu1 %v6605_v26 }
 0x306   :  { %4947 = vmatpush1.bf16.msra.mxu1 %v6603_v15 }
 0x307   :  { %4948 = vmatprep.subr.bf16.mxu1 %v6610_v35 }
 0x30a   :  { %4949 = vmatpush2.bf16.msra.mxu1 %v6608_v38 }
 0x30b   :  { %4950 = vmatprep.subr.bf16.mxu1 %v6613_v12 }
 0x30c   :  { %v5747_v19 = vpop.f32.mrf.mxu0 }
 0x30d   :  { %v3312_v50 = vpop.f32.mrf.mxu1 }
 0x30e   :  { %v7054_v3 = vadd.f32 %v3312_v50, %v3270_v60  ;;  %v5748_v13 = vpop.f32.mrf.mxu0  ;;  %4951 = vmatpush2.bf16.msra.mxu1 %v6611_v32  ;;  %v6629_v60 = vld [vmem:[#allocation8 + $0x840] ss:$12 sps:$4 sm:$0xff]  }
 0x30f   :  { %v3314_v10 = vpop.f32.mrf.mxu1  ;;  %v5749_v23 = vadd.f32 %v5748_v13, %v5747_v19  ;;  %4952 = vmatprep.subr.bf16.mxu1 %v6616_v42 }
 0x310   :  { %v7056_v24 = vadd.f32 %v3314_v10, %v3272_v7  ;;  %v5750_v54 = vpop.f32.mrf.mxu0 }
 0x311   :  { %v3316_v52 = vpop.f32.mrf.mxu1  ;;  %v3356_v29 = vadd.f32 %v5749_v23, %v7046_v33  ;;  %v6614_v33 = vld [vmem:[#allocation8 + $0x8b8] ss:$12 sps:$4 sm:$0xff]  }
 0x312   :  { %v7058_v0 = vadd.f32 %v3316_v52, %v3274_v8  ;;  %v5751_v31 = vpop.f32.mrf.mxu0  ;;  %4953 = vmatpush2.bf16.msra.mxu1 %v6614_v33  ;;  %v6632_v8 = vld [vmem:[#allocation8 + $0x8f0] ss:$12 sps:$4 sm:$0xff]  }
 0x313   :  { %v3318_v30 = vpop.f32.mrf.mxu1  ;;  %v5752_v34 = vadd.f32 %v5751_v31, %v5750_v54  ;;  %4954 = vmatprep.subr.bf16.mxu1 %v6619_v2 }
 0x314   :  { %v7061_v57 = vadd.f32 %v3318_v30, %v3276_v16  ;;  %v3504_v16 = vrot.slane %v7068_v37, %v6912_v63 }
 0x315   :  { %v3359_v36 = vadd.f32 %v5752_v34, %v7048_v41  ;;  %v6623_v41 = vld [vmem:[#allocation8 + $0x870] ss:$12 sps:$4 sm:$0xff]  }
 0x316   :  { %4955 = vmatpush2.bf16.msra.mxu1 %v6617_v43 }
 0x317   :  { %4956 = vmatprep.subr.bf16.mxu1 %v6622_v46 }
 0x31a   :  { %4957 = vmatpush2.bf16.msra.mxu1 %v6620_v39 }
 0x31b   :  { %4958 = vmatprep.subr.bf16.mxu1 %v6625_v47 }
 0x31e   :  { %4959 = vmatpush2.bf16.msra.mxu1 %v6623_v41 }
 0x31f   :  { %4960 = vmatprep.subr.bf16.mxu1 %v6628_v28 }
 0x322   :  { %4961 = vmatpush2.bf16.msra.mxu1 %v6626_v49 }
 0x323   :  { %4962 = vmatprep.subr.bf16.mxu1 %v6631_v53 }
 0x326   :  { %4963 = vmatpush2.bf16.msra.mxu1 %v6629_v60 }
 0x327   :  { %5797 = vmatprep.subr.bf16.mxu1 %v6632_v8 }
 0x32d   :  { %v5769_v9 = vpop.f32.mrf.mxu1 }
 0x32f   :  { %v5770_v55 = vpop.f32.mrf.mxu1 }
 0x330   :  { %v5771_v56 = vadd.f32 %v5770_v55, %v5769_v9 }
 0x331   :  { %v5772_v59 = vpop.f32.mrf.mxu1 }
 0x332   :  { %v7064_v1 = vadd.f32 %v5771_v56, %v3356_v29 }
 0x333   :  { %v5773_v5 = vpop.f32.mrf.mxu1 }
 0x334   :  { %v5774_v7 = vadd.f32 %v5773_v5, %v5772_v59 }
 0x336   :  { %v7066_v61 = vadd.f32 %v5774_v7, %v3359_v36 }
 0x34c   :  { %v4035_v6 = vpop.f32.mrf.mxu0 }
 0x34d   :  { %v4078_v51 = vpop.f32.mrf.mxu1  ;;  %v4036_v25 = vadd.f32 %v4035_v6, %v3504_v16 }
 0x34e   :  { %v4037_v11 = vpop.f32.mrf.mxu0 }
 0x34f   :  { %v4080_v62 = vpop.f32.mrf.mxu1  ;;  %v4079_v58 = vadd.f32 %v4078_v51, %v4036_v25  ;;  %v4038_v18 = vadd.f32 %v4037_v11, %v3508_v40  ;;  %v6576_v25 = vld [vmem:[#allocation8 + $0x758] ss:$12 sps:$4 sm:$0xff]   ;;  %v6581_v11 = vld [vmem:[#allocation8 + $0x740] ss:$12 sps:$4 sm:$0xff]  }
 0x350   :  { %v4039_v4 = vpop.f32.mrf.mxu0 }
 0x351   :  { %v4082_v22 = vpop.f32.mrf.mxu1  ;;  %v4181_v48 = vmul.f32 0.044715, %v4079_v58  ;;  %v4081_v27 = vadd.f32 %v4080_v62, %v4038_v18  ;;  %v4040_v14 = vadd.f32 %v4039_v4, %v3504_v16  ;;  %v4173_v60 = vmul.f32 0.5, %v4079_v58  ;;  %v6577_v62 = vld [vmem:[#allocation8 + $0x698] ss:$12 sps:$4 sm:$0xff]  }
 0x352   :  { %v4041_v50 = vpop.f32.mrf.mxu0  ;;  %v6582_v18 = vld [vmem:[#allocation8 + $0x680] ss:$12 sps:$4 sm:$0xff]   ;;  %v6586_v4 = vld [vmem:[#allocation8 + $0x728] ss:$12 sps:$4 sm:$0xff]  }
 0x353   :  { %v4189_v19 = vmul.f32 %v4181_v48, %v4079_v58  ;;  %v4182_v20 = vmul.f32 0.044715, %v4081_v27  ;;  %v4083_v10 = vadd.f32 %v4082_v22, %v4040_v14  ;;  %v4042_v21 = vadd.f32 %v4041_v50, %v3508_v40  ;;  %v4084_v13 = vpop.f32.mrf.mxu1  ;;  %v6572_v40 = vld [vmem:[#allocation8 + $0x6b0] ss:$12 sps:$4 sm:$0xff]   ;;  %v6597_v50 = vld [vmem:[#allocation8 + $0x638] ss:$12 sps:$4 sm:$0xff]  }
 0x354   :  { %v4174_v55 = vmul.f32 0.5, %v4081_v27  ;;  %v6591_v22 = vld [vmem:[#allocation8 + $0x710] ss:$12 sps:$4 sm:$0xff]  }
 0x355   :  { %v4197_v23 = vmul.f32 %v4189_v19, %v4079_v58  ;;  %v4190_v52 = vmul.f32 %v4182_v20, %v4081_v27  ;;  %v4185_v54 = vmul.f32 0.044715, %v4083_v10  ;;  %v4085_v26 = vadd.f32 %v4084_v13, %v4042_v21  ;;  %v6592_v48 = vld [vmem:[#allocation8 + $0x650] ss:$12 sps:$4 sm:$0xff]   ;;  %v6601_v20 = vld [vmem:[#allocation8 + $0x6e0] ss:$12 sps:$4 sm:$0xff]  }
 0x356   :  { %v4177_v49 = vmul.f32 0.5, %v4083_v10  ;;  %v3512_v19 = vrot.slane %v7068_v37, %v6927_v44 }
 0x357   :  { %v4205_v29 = vadd.f32 %v4197_v23, %v4079_v58  ;;  %v4198_v30 = vmul.f32 %v4190_v52, %v4081_v27  ;;  %v4193_v15 = vmul.f32 %v4185_v54, %v4083_v10  ;;  %v4186_v31 = vmul.f32 0.044715, %v4085_v26  ;;  %v6587_v58 = vld [vmem:[#allocation8 + $0x668] ss:$12 sps:$4 sm:$0xff]   ;;  %v6602_v23 = vld [vmem:[#allocation8 + $0x620] ss:$12 sps:$4 sm:$0xff]  }
 0x358   :  { %v4178_v56 = vmul.f32 0.5, %v4085_v26  ;;  %v6606_v54 = vld [vmem:[#allocation8 + $0x6c8] ss:$12 sps:$4 sm:$0xff]  }
 0x359   :  { %v4201_v34 = vmul.f32 %v4193_v15, %v4083_v10  ;;  %v4194_v35 = vmul.f32 %v4186_v31, %v4085_v26  ;;  %v4206_v36 = vadd.f32 %v4198_v30, %v4081_v27  ;;  %v4213_v38 = vmul.f32 0.7978846, %v4205_v29  ;;  %v6596_v27 = vld [vmem:[#allocation8 + $0x6f8] ss:$12 sps:$4 sm:$0xff]  }
 0x35b   :  { %v4209_v12 = vadd.f32 %v4201_v34, %v4083_v10  ;;  %v4202_v32 = vmul.f32 %v4194_v35, %v4085_v26  ;;  %v4214_v42 = vmul.f32 0.7978846, %v4206_v36  ;;  %v3516_v10 = vrot.slane %v7068_v37, %v6930_v45  ;;  %v6607_v34 = vld [vmem:[#allocation8 + $0x608] ss:$12 sps:$4 sm:$0xff]  }
 0x35d   :  { %v4217_v33 = vmul.f32 0.7978846, %v4209_v12  ;;  %v4210_v2 = vadd.f32 %v4202_v32, %v4085_v26  ;;  %6680 = vtanh.f32 %v4214_v42 }
 0x35e   :  { %6682 = vtanh.f32 %v4213_v38 }
 0x35f   :  { %6684 = vtanh.f32 %v4217_v33  ;;  %v4218_v43 = vmul.f32 0.7978846, %v4210_v2 }
 0x361   :  { %6686 = vtanh.f32 %v4218_v43 }
 0x36a   :  { %v6681_v46 = vpop.eup %6680 }
 0x36b   :  { %v6683_v39 = vpop.eup %6682  ;;  %v4230_v41 = vadd.f32 1.0, %v6681_v46 }
 0x36c   :  { %v6685_v47 = vpop.eup %6684  ;;  %v4229_v53 = vadd.f32 1.0, %v6683_v39  ;;  %v4164_v14 = vpop.f32.mrf.mxu0 }
 0x36d   :  { %v4233_v28 = vadd.f32 1.0, %v6685_v47  ;;  %v4238_v7 = vmul.f32 %v4230_v41, %v4174_v55 }
 0x36e   :  { %v6687_v9 = vpop.eup %6686  ;;  %v4237_v16 = vmul.f32 %v4229_v53, %v4173_v60  ;;  %v4166_v21 = vpop.f32.mrf.mxu0 }
 0x36f   :  { %v4234_v59 = vadd.f32 1.0, %v6687_v9  ;;  %v4241_v5 = vmul.f32 %v4233_v28, %v4177_v49 }
 0x370   :  { %v4168_v15 = vpop.f32.mrf.mxu0 }
 0x371   :  { %v4242_v8 = vmul.f32 %v4234_v59, %v4178_v56  ;;  %v4245_v6 = vpack.c.bf16 %v4241_v5, %v4237_v16 }
 0x372   :  { %v4170_v33 = vpop.f32.mrf.mxu0 }
 0x373   :  { %v4246_v51 = vpack.c.bf16 %v4242_v8, %v4238_v7 }
 0x375   :  { %4921 = vmatprep.mubr.bf16.mxu0 %v4246_v51 }
 0x376   :  { %4922 = vmatmul.mubr.bf16.vlgmr.msra.gmra.mxu0 %v4245_v6 }
 0x377   :  { %5776 = vmatpush3.bf16.msra.mxu0 %v6572_v40  ;;  %5007 = vmatprep.mubr.bf16.mxu0 %v4246_v51 }
 0x378   :  { %5777 = vmatprep.subr.bf16.mxu0 %v6576_v25 }
 0x37b   :  { %5778 = vmatpush3.bf16.msra.mxu0 %v6577_v62 }
 0x37c   :  { %5779 = vmatprep.subr.bf16.mxu0 %v6581_v11 }
 0x37f   :  { %5780 = vmatpush3.bf16.msra.mxu0 %v6582_v18 }
 0x380   :  { %5781 = vmatprep.subr.bf16.mxu0 %v6586_v4 }
 0x383   :  { %5782 = vmatpush3.bf16.msra.mxu0 %v6587_v58 }
 0x384   :  { %5783 = vmatprep.subr.bf16.mxu0 %v6591_v22 }
 0x387   :  { %5784 = vmatpush3.bf16.msra.mxu0 %v6592_v48 }
 0x388   :  { %5785 = vmatprep.subr.bf16.mxu0 %v6596_v27 }
 0x38b   :  { %5786 = vmatpush3.bf16.msra.mxu0 %v6597_v50 }
 0x38c   :  { %5787 = vmatprep.subr.bf16.mxu0 %v6601_v20 }
 0x38d   :  { %v4121_v13 = vpop.f32.mrf.mxu1 }
 0x38e   :  { %v4122_v52 = vadd.f32 %v4121_v13, %v3512_v19 }
 0x38f   :  { %v4123_v26 = vpop.f32.mrf.mxu1  ;;  %5788 = vmatpush3.bf16.msra.mxu0 %v6602_v23  ;;  %v6634_v23 = vld [vmem:[#allocation8 + $0x8d8] ss:$12 sps:$4 sm:$0xff]  }
 0x390   :  { %v4165_v29 = vadd.f32 %v4164_v14, %v4122_v52  ;;  %v4124_v30 = vadd.f32 %v4123_v26, %v3516_v10  ;;  %5789 = vmatprep.subr.bf16.mxu0 %v6606_v54  ;;  %v6635_v52 = vld [vmem:[#allocation8 + $0x818] ss:$12 sps:$4 sm:$0xff]   ;;  %v6636_v54 = vld [vmem:[#allocation8 + $0x8c0] ss:$12 sps:$4 sm:$0xff]  }
 0x391   :  { %v4125_v31 = vpop.f32.mrf.mxu1  ;;  %v6637_v26 = vld [vmem:[#allocation8 + $0x800] ss:$12 sps:$4 sm:$0xff]  }
 0x392   :  { %v4183_v35 = vmul.f32 0.044715, %v4165_v29  ;;  %v4167_v36 = vadd.f32 %v4166_v21, %v4124_v30  ;;  %v4126_v38 = vadd.f32 %v4125_v31, %v3512_v19  ;;  %v4175_v27 = vmul.f32 0.5, %v4165_v29  ;;  %v6633_v21 = vld [vmem:[#allocation8 + $0x830] ss:$12 sps:$4 sm:$0xff]  }
 0x393   :  { %v4127_v12 = vpop.f32.mrf.mxu1  ;;  %5790 = vmatpush3.bf16.msra.mxu0 %v6607_v34  ;;  %v6638_v30 = vld [vmem:[#allocation8 + $0x8a8] ss:$12 sps:$4 sm:$0xff]   ;;  %v6641_v31 = vld [vmem:[#allocation8 + $0x7d0] ss:$12 sps:$4 sm:$0xff]   ;;  %v6642_v34 = vld [vmem:[#allocation8 + $0x878] ss:$12 sps:$4 sm:$0xff]  }
 0x394   :  { %v4191_v45 = vmul.f32 %v4183_v35, %v4165_v29  ;;  %v4184_v37 = vmul.f32 0.044715, %v4167_v36  ;;  %v4169_v32 = vadd.f32 %v4168_v15, %v4126_v38  ;;  %v4128_v42 = vadd.f32 %v4127_v12, %v3516_v10  ;;  %v6640_v15 = vld [vmem:[#allocation8 + $0x890] ss:$12 sps:$4 sm:$0xff]   ;;  %v6643_v35 = vld [vmem:[#allocation8 + $0x7b8] ss:$12 sps:$4 sm:$0xff]  }
 0x395   :  { %v4176_v58 = vmul.f32 0.5, %v4167_v36  ;;  %v6645_v38 = vld [vmem:[#allocation8 + $0x7a0] ss:$12 sps:$4 sm:$0xff]   ;;  %v6646_v12 = vld [vmem:[#allocation8 + $0x848] ss:$12 sps:$4 sm:$0xff]  }
 0x396   :  { %v4199_v2 = vmul.f32 %v4191_v45, %v4165_v29  ;;  %v4192_v43 = vmul.f32 %v4184_v37, %v4167_v36  ;;  %v4187_v46 = vmul.f32 0.044715, %v4169_v32  ;;  %v4171_v39 = vadd.f32 %v4170_v33, %v4128_v42  ;;  %5008 = vmatmul.mubr.bf16.vlgmr.msra.gmra.mxu0 %v4245_v6  ;;  %v6647_v45 = vld [vmem:[#allocation8 + $0x788] ss:$12 sps:$4 sm:$0xff]   ;;  %v5063_v42 = vld [vmem:[#allocation10] sm:$0x7] }
 0x397   :  { %v4179_v18 = vmul.f32 0.5, %v4169_v32 }
 0x398   :  { %v4207_v47 = vadd.f32 %v4199_v2, %v4165_v29  ;;  %v4195_v41 = vmul.f32 %v4187_v46, %v4169_v32  ;;  %v4188_v28 = vmul.f32 0.044715, %v4171_v39  ;;  %v4200_v9 = vmul.f32 %v4192_v43, %v4167_v36  ;;  %v6639_v29 = vld [vmem:[#allocation8 + $0x7e8] ss:$12 sps:$4 sm:$0xff]  }
 0x399   :  { %v4180_v22 = vmul.f32 0.5, %v4171_v39  ;;  %v5068_v43 = vrot.slane %v5063_v42, %v6912_v63 }
 0x39a   :  { %v4203_v49 = vmul.f32 %v4195_v41, %v4169_v32  ;;  %v4196_v53 = vmul.f32 %v4188_v28, %v4171_v39  ;;  %v4215_v55 = vmul.f32 0.7978846, %v4207_v47  ;;  %v4208_v56 = vadd.f32 %v4200_v9, %v4167_v36  ;;  %v6644_v36 = vld [vmem:[#allocation8 + $0x860] ss:$12 sps:$4 sm:$0xff]  }
 0x39b   :  { %v5072_v28 = vrot.slane %v5063_v42, %v6948_v17 }
 0x39c   :  { %v4211_v59 = vadd.f32 %v4203_v49, %v4169_v32  ;;  %v4204_v60 = vmul.f32 %v4196_v53, %v4171_v39  ;;  %v4216_v5 = vmul.f32 0.7978846, %v4208_v56  ;;  %6688 = vtanh.f32 %v4215_v55 }
 0x39e   :  { %v4212_v7 = vadd.f32 %v4204_v60, %v4171_v39  ;;  %v4219_v8 = vmul.f32 0.7978846, %v4211_v59  ;;  %6690 = vtanh.f32 %v4216_v5 }
 0x3a0   :  { %v4220_v16 = vmul.f32 0.7978846, %v4212_v7  ;;  %6692 = vtanh.f32 %v4219_v8 }
 0x3a2   :  { %6694 = vtanh.f32 %v4220_v16 }
 0x3a9   :  { %v6689_v51 = vpop.eup %6688 }
 0x3aa   :  { %v4231_v4 = vadd.f32 1.0, %v6689_v51 }
 0x3ab   :  { %v6691_v40 = vpop.eup %6690 }
 0x3ac   :  { %v4232_v62 = vadd.f32 1.0, %v6691_v40  ;;  %v4239_v20 = vmul.f32 %v4231_v4, %v4175_v27 }
 0x3ad   :  { %v6693_v25 = vpop.eup %6692 }
 0x3ae   :  { %v4235_v6 = vadd.f32 1.0, %v6693_v25  ;;  %v4240_v50 = vmul.f32 %v4232_v62, %v4176_v58 }
 0x3af   :  { %v6695_v11 = vpop.eup %6694 }
 0x3b0   :  { %v4236_v48 = vadd.f32 1.0, %v6695_v11  ;;  %v4243_v14 = vmul.f32 %v4235_v6, %v4179_v18 }
 0x3b2   :  { %v4244_v19 = vmul.f32 %v4236_v48, %v4180_v22  ;;  %v4247_v13 = vpack.c.bf16 %v4243_v14, %v4239_v20 }
 0x3b4   :  { %v4248_v10 = vpack.c.bf16 %v4244_v19, %v4240_v50 }
 0x3b6   :  { %4964 = vmatprep.mubr.bf16.mxu1 %v4248_v10 }
 0x3b7   :  { %4965 = vmatmul.mubr.bf16.vlgmr.msra.gmra.mxu1 %v4247_v13 }
 0x3b8   :  { %5798 = vmatpush3.bf16.msra.mxu1 %v6633_v21  ;;  %5048 = vmatprep.mubr.bf16.mxu1 %v4248_v10 }
 0x3b9   :  { %5799 = vmatprep.subr.bf16.mxu1 %v6634_v23 }
 0x3bc   :  { %5800 = vmatpush3.bf16.msra.mxu1 %v6635_v52 }
 0x3bd   :  { %5801 = vmatprep.subr.bf16.mxu1 %v6636_v54 }
 0x3c0   :  { %5802 = vmatpush3.bf16.msra.mxu1 %v6637_v26 }
 0x3c1   :  { %5803 = vmatprep.subr.bf16.mxu1 %v6638_v30 }
 0x3c4   :  { %5804 = vmatpush3.bf16.msra.mxu1 %v6639_v29 }
 0x3c5   :  { %5805 = vmatprep.subr.bf16.mxu1 %v6640_v15 }
 0x3c8   :  { %5806 = vmatpush3.bf16.msra.mxu1 %v6641_v31 }
 0x3c9   :  { %5807 = vmatprep.subr.bf16.mxu1 %v6642_v34 }
 0x3cc   :  { %5808 = vmatpush3.bf16.msra.mxu1 %v6643_v35 }
 0x3cd   :  { %5809 = vmatprep.subr.bf16.mxu1 %v6644_v36 }
 0x3d0   :  { %5810 = vmatpush3.bf16.msra.mxu1 %v6645_v38 }
 0x3d1   :  { %5811 = vmatprep.subr.bf16.mxu1 %v6646_v12 }
 0x3d4   :  { %5812 = vmatpush3.bf16.msra.mxu1 %v6647_v45 }
 0x3d7   :  { %5049 = vmatmul.mubr.bf16.vlgmr.msra.gmra.mxu1 %v4247_v13 }
 0x436   :  { %v4923_v37 = vpop.f32.mrf.mxu0 }
 0x438   :  { %v4925_v32 = vpop.f32.mrf.mxu0 }
 0x43a   :  { %v4927_v46 = vpop.f32.mrf.mxu0 }
 0x43c   :  { %v4929_v56 = vpop.f32.mrf.mxu0 }
 0x456   :  { %v5791_v17 = vpop.f32.mrf.mxu0 }
 0x458   :  { %v5792_v16 = vpop.f32.mrf.mxu0 }
 0x459   :  { %v5793_v25 = vadd.f32 %v5792_v16, %v5791_v17 }
 0x45a   :  { %v5794_v51 = vpop.f32.mrf.mxu0 }
 0x45c   :  { %v5795_v6 = vpop.f32.mrf.mxu0 }
 0x45d   :  { %v5796_v58 = vadd.f32 %v5795_v6, %v5794_v51 }
 0x477   :  { %v4966_v33 = vpop.f32.mrf.mxu1 }
 0x478   :  { %v4967_v2 = vadd.f32 %v4966_v33, %v4923_v37 }
 0x479   :  { %v4968_v39 = vpop.f32.mrf.mxu1 }
 0x47a   :  { %v5057_v47 = vadd.f32 %v4967_v2, %v7054_v3  ;;  %v4969_v41 = vadd.f32 %v4968_v39, %v4925_v32 }
 0x47b   :  { %v4970_v9 = vpop.f32.mrf.mxu1 }
 0x47c   :  { %v5080_v49 = vadd.f32 %v5068_v43, %v5057_v47  ;;  %v5058_v53 = vadd.f32 %v4969_v41, %v7056_v24  ;;  %v4971_v55 = vadd.f32 %v4970_v9, %v4927_v46 }
 0x47d   :  { %v4972_v59 = vpop.f32.mrf.mxu1 }
 0x47e   :  { %5086 = vst [vmem:[#allocation11] sm:$0xff] %v5080_v49  ;;  %v5081_v60 = vadd.f32 %v5072_v28, %v5058_v53  ;;  %v5060_v5 = vadd.f32 %v4971_v55, %v7058_v0  ;;  %v4973_v7 = vadd.f32 %v4972_v59, %v4929_v56  ;;  %v5076_v0 = vrot.slane %v5063_v42, %v6927_v44 }
 0x480   :  { %5087 = vst [vmem:[#allocation11 + $0x8] sm:$0xff] %v5081_v60  ;;  %v5083_v63 = vadd.f32 %v5068_v43, %v5060_v5  ;;  %v5061_v8 = vadd.f32 %v4973_v7, %v7061_v57 }
 0x482   :  { %5089 = vst [vmem:[#allocation11 + $0x18] sm:$0xff] %v5083_v63  ;;  %v5084_v3 = vadd.f32 %v5072_v28, %v5061_v8 }
 0x484   :  { %5090 = vst [vmem:[#allocation11 + $0x20] sm:$0xff] %v5084_v3 }
 0x497   :  { %v5813_v40 = vpop.f32.mrf.mxu1 }
 0x499   :  { %v5814_v24 = vpop.f32.mrf.mxu1 }
 0x49a   :  { %v5815_v62 = vadd.f32 %v5814_v24, %v5813_v40 }
 0x49b   :  { %v5816_v11 = vpop.f32.mrf.mxu1 }
 0x49c   :  { %v5051_v18 = vadd.f32 %v5815_v62, %v5793_v25 }
 0x49d   :  { %v5817_v4 = vpop.f32.mrf.mxu1 }
 0x49e   :  { %v5059_v22 = vadd.f32 %v5051_v18, %v7064_v1  ;;  %v5818_v57 = vadd.f32 %v5817_v4, %v5816_v11 }
 0x4a0   :  { %v5082_v48 = vadd.f32 %v5076_v0, %v5059_v22  ;;  %v5054_v27 = vadd.f32 %v5818_v57, %v5796_v58 }
 0x4a2   :  { %5088 = vst [vmem:[#allocation11 + $0x10] sm:$0xff] %v5082_v48  ;;  %v5062_v14 = vadd.f32 %v5054_v27, %v7066_v61 }
 0x4a4   :  { %v5085_v50 = vadd.f32 %v5076_v0, %v5062_v14 }
 0x4a6   :  { %5091 = vst [vmem:[#allocation11 + $0x28] sm:$0xff] %v5085_v50 }
 0x4a7   :  { %6807 = shalt.err (!%p6804_p1)
}
 0x4a8   :  { %5103 = dma.vmem_to_hbm [thread:$0]  %s5098_s4, 768, %s7098_s5, [#allocation4], %s6831_s9, %s6831_s9, %s6832_s10  }
 0x4a9   :  { %6822 = dma.done.wait [#allocation4], 768  }
 0x4aa   :  { %6823 = vsyncadd [#allocation4], 4294966528 }
 0x4ab   :  { %5107 = vsyncpa [#allocation3], 1 }
 0x4ac   :  { %5108 = vsyncpa [#allocation6], 1 }
 0x4ad   :  { %5109 = vsyncpa [#allocation9], 1 }
 0x4ae   :  { %5110 = vsyncpa [#allocation4], 1 }

// kernel: tpu_custom_call.1
= control target key start
LH: loop header
LB: loop body
LE: loop exit
PB: predicated region body
PF: predicated region fallthrough
CT: control target
= control target key end

     0   :  { %10 = vsyncpa [#allocation3], 0  ;;  %s7093_s0 = inlined_call_operand.hbm [shape: f32[16,384], index: 0, kind: input, shape index: {}]   ;;  %s7094_s1 = inlined_call_operand.hbm [shape: bf16[384,1536], index: 1, kind: input, shape index: {}]   ;;  %s7095_s2 = inlined_call_operand.hbm [shape: f32[1,1536], index: 2, kind: input, shape index: {}]   ;;  %s7096_s3 = inlined_call_operand.hbm [shape: bf16[1536,384], index: 3, kind: input, shape index: {}]   ;;  %s7097_s4 = inlined_call_operand.hbm [shape: f32[1,384], index: 4, kind: input, shape index: {}]   ;;  %s7098_s5 = inlined_call_operand.hbm [shape: f32[16,384], index: 5, kind: output, shape index: {}]  }
   0x1   :  { %11 = vsyncpa [#allocation6], 0 }
   0x2   :  { %12 = vsyncpa [#allocation9], 0 }
   0x3   :  { %13 = vsyncpa [#allocation4], 0  ;;  %s6824_s18 = smov [#allocation5]  }
   0x4   :  { %s31_s19 = sshll.u32 %s6824_s18, 4  ;;  %s32_s19 = int_to_ptr.vmem [resolvable:$true] %s31_s19 }
   0x5   :  { %s6704_s20 = scalar_lea.vmem %s32_s19, 36864  ;;  %p6709_p1 = scmp.lt.s32.totalorder %s32_s19, %s32_s19 }
   0x6   :  { %p6705_p0 = scmp.ne.s32.totalorder %s32_s19, %s6704_s20  ;;  %p6710_p2 = scmp.lt.s32.totalorder %s6704_s20, %s6704_s20 }
   0x8   :  { %p6711_p3 = por %p6710_p2, %p6709_p1 }
   0xa   :  { %p6712_p4 = pnand %p6711_p3, %p6705_p0 }
   0xc   :  { %6715 = shalt.err (!%p6712_p4)
}
   0xd   :  { %s6825_s21 = smov 768   ;;  %s6826_s22 = smov 48  }
   0xe   :  { %37 = dma.hbm_to_vmem [thread:$0]  %s7094_s1, 36864, %s32_s19, [#allocation6], %s6825_s21, %s6825_s21, %s6826_s22  }
   0xf   :  { %s6827_s25 = smov [#allocation8]  }
  0x10   :  { %s53_s26 = sshll.u32 %s6827_s25, 4  ;;  %s54_s26 = int_to_ptr.vmem [resolvable:$true] %s53_s26 }
  0x11   :  { %s6724_s27 = scalar_lea.vmem %s54_s26, 36864  ;;  %p6729_p6 = scmp.lt.s32.totalorder %s54_s26, %s54_s26 }
  0x12   :  { %p6725_p5 = scmp.ne.s32.totalorder %s54_s26, %s6724_s27  ;;  %p6730_p7 = scmp.lt.s32.totalorder %s6724_s27, %s6724_s27 }
  0x14   :  { %p6731_p8 = por %p6730_p7, %p6729_p6 }
  0x16   :  { %p6732_p9 = pnand %p6731_p8, %p6725_p5 }
  0x18   :  { %6735 = shalt.err (!%p6732_p9)
}
  0x19   :  { %s6828_s28 = smov 192   ;;  %s6829_s29 = smov 12  }
  0x1a   :  { %59 = dma.hbm_to_vmem [thread:$0]  %s7096_s3, 36864, %s54_s26, [#allocation9], %s6828_s28, %s6828_s28, %s6829_s29  }
  0x1b   :  { %s6830_s7 = smov [#allocation2]  }
  0x1c   :  { %s19_s8 = sshll.u32 %s6830_s7, 4  ;;  %s20_s8 = int_to_ptr.vmem [resolvable:$true] %s19_s8 }
  0x1d   :  { %s6744_s1 = scalar_lea.vmem %s20_s8, 768  ;;  %p6749_p11 = scmp.lt.s32.totalorder %s20_s8, %s20_s8 }
  0x1e   :  { %p6745_p10 = scmp.ne.s32.totalorder %s20_s8, %s6744_s1  ;;  %p6750_p12 = scmp.lt.s32.totalorder %s6744_s1, %s6744_s1 }
  0x20   :  { %p6751_p13 = por %p6750_p12, %p6749_p11 }
  0x22   :  { %p6752_p0 = pnand %p6751_p13, %p6745_p10 }
  0x24   :  { %6755 = shalt.err (!%p6752_p0)
}
  0x25   :  { %s6831_s9 = smov 384   ;;  %s6832_s10 = smov 24  }
  0x26   :  { %25 = dma.hbm_to_vmem [thread:$0]  %s7093_s0, 768, %s20_s8, [#allocation3], %s6831_s9, %s6831_s9, %s6832_s10  }
  0x27   :  { %s6833_s3 = smov [#allocation7]   ;;  %s6834_s14 = smov [#allocation10]  }
  0x28   :  { %s44_s13 = sshll.u32 %s6833_s3, 4  ;;  %s66_s15 = sshll.u32 %s6834_s14, 4  ;;  %s45_s13 = int_to_ptr.vmem [resolvable:$true] %s44_s13  ;;  %s67_s15 = int_to_ptr.vmem [resolvable:$true] %s66_s15 }
  0x29   :  { %s6764_s16 = scalar_lea.vmem %s45_s13, 192  ;;  %p6769_p2 = scmp.lt.s32.totalorder %s45_s13, %s45_s13 }
  0x2a   :  { %p6765_p1 = scmp.ne.s32.totalorder %s45_s13, %s6764_s16  ;;  %p6770_p3 = scmp.lt.s32.totalorder %s6764_s16, %s6764_s16 }
  0x2c   :  { %p6771_p4 = por %p6770_p3, %p6769_p2 }
  0x2e   :  { %p6772_p5 = pnand %p6771_p4, %p6765_p1 }
  0x30   :  { %6775 = shalt.err (!%p6772_p5)
}
  0x31   :  { %47 = dma.hbm_to_vmem [thread:$0]  %s7095_s2, 192, %s45_s13, [#allocation6]  }
  0x32   :  { %s6784_s19 = scalar_lea.vmem %s67_s15, 48  ;;  %s6788_s0 = scalar_lea.vmem %s67_s15, 64 }
  0x33   :  { %p6785_p6 = scmp.ne.s32.totalorder %s67_s15, %s6784_s19  ;;  %p6789_p7 = scmp.lt.s32.totalorder %s67_s15, %s67_s15 }
  0x34   :  { %p6790_p8 = scmp.lt.s32.totalorder %s6788_s0, %s6784_s19 }
  0x36   :  { %p6791_p9 = por %p6790_p8, %p6789_p7 }
  0x38   :  { %p6792_p10 = pnand %p6791_p9, %p6785_p6 }
  0x3a   :  { %6795 = shalt.err (!%p6792_p10)
}
  0x3b   :  { %69 = dma.hbm_to_vmem [thread:$0]  %s7097_s4, 48, %s67_s15, [#allocation9]  }
  0x3c   :  { %6816 = dma.done.wait [#allocation3], 768  }
  0x3d   :  { %6817 = vsyncadd [#allocation3], 4294966528 }
  0x3e   :  { %6818 = dma.done.wait [#allocation6], 37056  }
  0x3f   :  { %6819 = vsyncadd [#allocation6], 4294930240 }
  0x40   :  { %6820 = dma.done.wait [#allocation9], 36912  }
  0x41   :  { %6821 = vsyncadd [#allocation9], 4294930384  ;;  %v6835_v0 = vmov 0   ;;  %v5832_v1 = vld [vmem:[#allocation5 + $0x2a4] ss:$48 sps:$4 sm:$0xff]   ;;  %v91_v34 = vld [vmem:[#allocation2 + $0x28] sm:$0xff] }
  0x42   :  { %768 = vmatprep.mubr.bf16.mxu1 %v6835_v0  ;;  %v5834_v2 = vld [vmem:[#allocation5 + $0x8a4] ss:$48 sps:$4 sm:$0xff]   ;;  %693 = vmatprep.subr.bf16.mxu0 %v5832_v1  ;;  %v5836_v3 = vld [vmem:[#allocation5 + $0x2a0] ss:$48 sps:$4 sm:$0xff]   ;;  %v5884_v36 = vld [vmem:[#allocation5 + $0x2ac] ss:$48 sps:$4 sm:$0xff]  }
  0x43   :  { %v5837_v4 = vld [vmem:[#allocation5 + $0x8a0] ss:$48 sps:$4 sm:$0xff]   ;;  %736 = vmatprep.subr.bf16.mxu1 %v5834_v2  ;;  %v5838_v5 = vld [vmem:[#allocation5 + $0x244] ss:$48 sps:$4 sm:$0xff]   ;;  %694 = vmatpush1.bf16.msra.mxu0 %v5836_v3  ;;  %v5882_v38 = vld [vmem:[#allocation5 + $0x2a8] ss:$48 sps:$4 sm:$0xff]  }
  0x44   :  { %737 = vmatpush1.bf16.msra.mxu1 %v5837_v4  ;;  %v5840_v6 = vld [vmem:[#allocation5 + $0x844] ss:$48 sps:$4 sm:$0xff]   ;;  %v5842_v7 = vld [vmem:[#allocation5 + $0x240] ss:$48 sps:$4 sm:$0xff]   ;;  %695 = vmatprep.subr.bf16.mxu0 %v5838_v5  ;;  %v5890_v41 = vld [vmem:[#allocation5 + $0x24c] ss:$48 sps:$4 sm:$0xff]  }
  0x45   :  { %v5843_v8 = vld [vmem:[#allocation5 + $0x840] ss:$48 sps:$4 sm:$0xff]   ;;  %738 = vmatprep.subr.bf16.mxu1 %v5840_v6  ;;  %v5844_v9 = vld [vmem:[#allocation5 + $0x1e4] ss:$48 sps:$4 sm:$0xff]   ;;  %v5888_v42 = vld [vmem:[#allocation5 + $0x248] ss:$48 sps:$4 sm:$0xff]  }
  0x46   :  { %v5846_v10 = vld [vmem:[#allocation5 + $0x7e4] ss:$48 sps:$4 sm:$0xff]   ;;  %v5848_v11 = vld [vmem:[#allocation5 + $0x1e0] ss:$48 sps:$4 sm:$0xff]   ;;  %v5896_v45 = vld [vmem:[#allocation5 + $0x1ec] ss:$48 sps:$4 sm:$0xff]  }
  0x47   :  { %v5849_v12 = vld [vmem:[#allocation5 + $0x7e0] ss:$48 sps:$4 sm:$0xff]   ;;  %696 = vmatpush1.bf16.msra.mxu0 %v5842_v7  ;;  %v5850_v13 = vld [vmem:[#allocation5 + $0x184] ss:$48 sps:$4 sm:$0xff]   ;;  %v5894_v46 = vld [vmem:[#allocation5 + $0x1e8] ss:$48 sps:$4 sm:$0xff]  }
  0x48   :  { %739 = vmatpush1.bf16.msra.mxu1 %v5843_v8  ;;  %697 = vmatprep.subr.bf16.mxu0 %v5844_v9  ;;  %v5852_v14 = vld [vmem:[#allocation5 + $0x784] ss:$48 sps:$4 sm:$0xff]   ;;  %v5854_v15 = vld [vmem:[#allocation5 + $0x180] ss:$48 sps:$4 sm:$0xff]   ;;  %v5902_v49 = vld [vmem:[#allocation5 + $0x18c] ss:$48 sps:$4 sm:$0xff]  }
  0x49   :  { %740 = vmatprep.subr.bf16.mxu1 %v5846_v10  ;;  %v5855_v16 = vld [vmem:[#allocation5 + $0x780] ss:$48 sps:$4 sm:$0xff]   ;;  %v5856_v17 = vld [vmem:[#allocation5 + $0x124] ss:$48 sps:$4 sm:$0xff]   ;;  %v87_v50 = vld [vmem:[#allocation2 + $0x8] sm:$0xff]  ;;  %s6836_s2 = smov [#allocation11]  }
  0x4a   :  { %v5858_v18 = vld [vmem:[#allocation5 + $0x724] ss:$48 sps:$4 sm:$0xff]   ;;  %v5860_v19 = vld [vmem:[#allocation5 + $0x120] ss:$48 sps:$4 sm:$0xff]   ;;  %v5900_v52 = vld [vmem:[#allocation5 + $0x188] ss:$48 sps:$4 sm:$0xff]  }
  0x4b   :  { %698 = vmatpush1.bf16.msra.mxu0 %v5848_v11  ;;  %v5861_v20 = vld [vmem:[#allocation5 + $0x720] ss:$48 sps:$4 sm:$0xff]   ;;  %v5862_v21 = vld [vmem:[#allocation5 + $0xc4] ss:$48 sps:$4 sm:$0xff]   ;;  %v5908_v56 = vld [vmem:[#allocation5 + $0x12c] ss:$48 sps:$4 sm:$0xff]  }
  0x4c   :  { %741 = vmatpush1.bf16.msra.mxu1 %v5849_v12  ;;  %699 = vmatprep.subr.bf16.mxu0 %v5850_v13  ;;  %v5864_v22 = vld [vmem:[#allocation5 + $0x6c4] ss:$48 sps:$4 sm:$0xff]   ;;  %v5866_v23 = vld [vmem:[#allocation5 + $0xc0] ss:$48 sps:$4 sm:$0xff]   ;;  %v5906_v57 = vld [vmem:[#allocation5 + $0x128] ss:$48 sps:$4 sm:$0xff]  }
  0x4d   :  { %742 = vmatprep.subr.bf16.mxu1 %v5852_v14  ;;  %v5867_v24 = vld [vmem:[#allocation5 + $0x6c0] ss:$48 sps:$4 sm:$0xff]   ;;  %v5868_v25 = vld [vmem:[#allocation5 + $0x64] ss:$48 sps:$4 sm:$0xff]   ;;  %v5914_v60 = vld [vmem:[#allocation5 + $0xcc] ss:$48 sps:$4 sm:$0xff]  }
  0x4e   :  { %v5870_v26 = vld [vmem:[#allocation5 + $0x664] ss:$48 sps:$4 sm:$0xff]   ;;  %v5872_v27 = vld [vmem:[#allocation5 + $0x60] ss:$48 sps:$4 sm:$0xff]   ;;  %v5912_v61 = vld [vmem:[#allocation5 + $0xc8] ss:$48 sps:$4 sm:$0xff]  }
  0x4f   :  { %700 = vmatpush1.bf16.msra.mxu0 %v5854_v15  ;;  %v5873_v28 = vld [vmem:[#allocation5 + $0x660] ss:$48 sps:$4 sm:$0xff]   ;;  %v5874_v29 = vld [vmem:[#allocation5 + $0x4] ss:$48 sps:$4 sm:$0xff]   ;;  %v5920_v1 = vld [vmem:[#allocation5 + $0x6c] ss:$48 sps:$4 sm:$0xff]  }
  0x50   :  { %743 = vmatpush1.bf16.msra.mxu1 %v5855_v16  ;;  %701 = vmatprep.subr.bf16.mxu0 %v5856_v17  ;;  %v5876_v30 = vld [vmem:[#allocation5 + $0x604] ss:$48 sps:$4 sm:$0xff]   ;;  %v5878_v31 = vld [vmem:[#allocation5] ss:$48 sps:$4 sm:$0xff]   ;;  %v5918_v2 = vld [vmem:[#allocation5 + $0x68] ss:$48 sps:$4 sm:$0xff]  }
  0x51   :  { %744 = vmatprep.subr.bf16.mxu1 %v5858_v18  ;;  %v5879_v32 = vld [vmem:[#allocation5 + $0x600] ss:$48 sps:$4 sm:$0xff]   ;;  %v5880_v35 = vld [vmem:[#allocation5 + $0x5a4] ss:$48 sps:$4 sm:$0xff]   ;;  %v5926_v5 = vld [vmem:[#allocation5 + $0xc] ss:$48 sps:$4 sm:$0xff]  }
  0x52   :  { %v88_v33 = vld [vmem:[#allocation2 + $0x10] sm:$0xff]  ;;  %v90_v51 = vld [vmem:[#allocation2 + $0x20] sm:$0xff]  ;;  %v5924_v6 = vld [vmem:[#allocation5 + $0x8] ss:$48 sps:$4 sm:$0xff]   ;;  %s5097_s4 = sshll.u32 %s6836_s2, 4  ;;  %s5098_s4 = int_to_ptr.vmem [resolvable:$true] %s5097_s4 }
  0x53   :  { %702 = vmatpush1.bf16.msra.mxu0 %v5860_v19  ;;  %v6886_v37 = vpack.c.bf16 %v91_v34, %v88_v33  ;;  %v5885_v39 = vld [vmem:[#allocation5 + $0x5a0] ss:$48 sps:$4 sm:$0xff]   ;;  %v5886_v40 = vld [vmem:[#allocation5 + $0x544] ss:$48 sps:$4 sm:$0xff]   ;;  %v6889_v54 = vpack.c.bf16 %v90_v51, %v87_v50  ;;  %v89_v9 = vld [vmem:[#allocation2 + $0x18] sm:$0xff]  ;;  %s6796_s22 = scalar_lea.vmem %s5098_s4, 768  ;;  %p6801_p12 = scmp.lt.s32.totalorder %s5098_s4, %s5098_s4 }
  0x54   :  { %745 = vmatpush1.bf16.msra.mxu1 %v5861_v20  ;;  %703 = vmatprep.subr.bf16.mxu0 %v5862_v21  ;;  %v5891_v43 = vld [vmem:[#allocation5 + $0x540] ss:$48 sps:$4 sm:$0xff]   ;;  %v5892_v44 = vld [vmem:[#allocation5 + $0x4e4] ss:$48 sps:$4 sm:$0xff]   ;;  %v5930_v10 = vld [vmem:[#allocation5 + $0x5ac] ss:$48 sps:$4 sm:$0xff]   ;;  %p6797_p11 = scmp.ne.s32.totalorder %s5098_s4, %s6796_s22  ;;  %p6802_p13 = scmp.lt.s32.totalorder %s6796_s22, %s6796_s22 }
  0x55   :  { %746 = vmatprep.subr.bf16.mxu1 %v5864_v22  ;;  %v5897_v47 = vld [vmem:[#allocation5 + $0x4e0] ss:$48 sps:$4 sm:$0xff]   ;;  %v5898_v48 = vld [vmem:[#allocation5 + $0x484] ss:$48 sps:$4 sm:$0xff]   ;;  %725 = vmatprep.mubr.bf16.mxu0 %v6889_v54  ;;  %v5933_v11 = vld [vmem:[#allocation5 + $0x8ac] ss:$48 sps:$4 sm:$0xff]  }
  0x56   :  { %v5903_v53 = vld [vmem:[#allocation5 + $0x480] ss:$48 sps:$4 sm:$0xff]   ;;  %v5904_v55 = vld [vmem:[#allocation5 + $0x424] ss:$48 sps:$4 sm:$0xff]   ;;  %v5928_v13 = vld [vmem:[#allocation5 + $0x5a8] ss:$48 sps:$4 sm:$0xff]   ;;  %p6803_p0 = por %p6802_p13, %p6801_p12 }
  0x57   :  { %704 = vmatpush1.bf16.msra.mxu0 %v5866_v23  ;;  %v5909_v58 = vld [vmem:[#allocation5 + $0x420] ss:$48 sps:$4 sm:$0xff]   ;;  %v5910_v59 = vld [vmem:[#allocation5 + $0x3c4] ss:$48 sps:$4 sm:$0xff]   ;;  %v5931_v14 = vld [vmem:[#allocation5 + $0x8a8] ss:$48 sps:$4 sm:$0xff]  }
  0x58   :  { %747 = vmatpush1.bf16.msra.mxu1 %v5867_v24  ;;  %705 = vmatprep.subr.bf16.mxu0 %v5868_v25  ;;  %v5915_v62 = vld [vmem:[#allocation5 + $0x3c0] ss:$48 sps:$4 sm:$0xff]   ;;  %v5916_v63 = vld [vmem:[#allocation5 + $0x364] ss:$48 sps:$4 sm:$0xff]   ;;  %v5936_v15 = vld [vmem:[#allocation5 + $0x54c] ss:$48 sps:$4 sm:$0xff]   ;;  %p6804_p1 = pnand %p6803_p0, %p6797_p11 }
  0x59   :  { %748 = vmatprep.subr.bf16.mxu1 %v5870_v26  ;;  %v5921_v3 = vld [vmem:[#allocation5 + $0x360] ss:$48 sps:$4 sm:$0xff]   ;;  %v5922_v4 = vld [vmem:[#allocation5 + $0x304] ss:$48 sps:$4 sm:$0xff]   ;;  %v5939_v16 = vld [vmem:[#allocation5 + $0x84c] ss:$48 sps:$4 sm:$0xff]  }
  0x5a   :  { %v5927_v7 = vld [vmem:[#allocation5 + $0x300] ss:$48 sps:$4 sm:$0xff]   ;;  %v5934_v17 = vld [vmem:[#allocation5 + $0x548] ss:$48 sps:$4 sm:$0xff]   ;;  %v5942_v19 = vld [vmem:[#allocation5 + $0x4ec] ss:$48 sps:$4 sm:$0xff]  }
  0x5b   :  { %706 = vmatpush1.bf16.msra.mxu0 %v5872_v27  ;;  %v86_v8 = vld [vmem:[#allocation2] sm:$0xff]  ;;  %v5937_v18 = vld [vmem:[#allocation5 + $0x848] ss:$48 sps:$4 sm:$0xff]   ;;  %v5945_v20 = vld [vmem:[#allocation5 + $0x7ec] ss:$48 sps:$4 sm:$0xff]  }
  0x5c   :  { %749 = vmatpush1.bf16.msra.mxu1 %v5873_v28  ;;  %707 = vmatprep.subr.bf16.mxu0 %v5874_v29  ;;  %v6893_v12 = vpack.c.bf16 %v89_v9, %v86_v8  ;;  %v5940_v21 = vld [vmem:[#allocation5 + $0x4e8] ss:$48 sps:$4 sm:$0xff]   ;;  %v5948_v23 = vld [vmem:[#allocation5 + $0x48c] ss:$48 sps:$4 sm:$0xff]   ;;  %v5982_v50 = vld [vmem:[#allocation5 + $0x250] ss:$48 sps:$4 sm:$0xff]  }
  0x5d   :  { %750 = vmatprep.subr.bf16.mxu1 %v5876_v30  ;;  %v5943_v22 = vld [vmem:[#allocation5 + $0x7e8] ss:$48 sps:$4 sm:$0xff]   ;;  %v5951_v24 = vld [vmem:[#allocation5 + $0x78c] ss:$48 sps:$4 sm:$0xff]   ;;  %v5985_v51 = vld [vmem:[#allocation5 + $0x850] ss:$48 sps:$4 sm:$0xff]  }
  0x5e   :  { %v5946_v25 = vld [vmem:[#allocation5 + $0x488] ss:$48 sps:$4 sm:$0xff]   ;;  %v5954_v27 = vld [vmem:[#allocation5 + $0x42c] ss:$48 sps:$4 sm:$0xff]   ;;  %v6012_v8 = vld [vmem:[#allocation5 + $0x70] ss:$48 sps:$4 sm:$0xff]  }
  0x5f   :  { %708 = vmatpush1.bf16.msra.mxu0 %v5878_v31  ;;  %v5949_v26 = vld [vmem:[#allocation5 + $0x788] ss:$48 sps:$4 sm:$0xff]   ;;  %v5957_v28 = vld [vmem:[#allocation5 + $0x72c] ss:$48 sps:$4 sm:$0xff]   ;;  %v6015_v9 = vld [vmem:[#allocation5 + $0x670] ss:$48 sps:$4 sm:$0xff]  }
  0x60   :  { %751 = vmatpush1.bf16.msra.mxu1 %v5879_v32  ;;  %709 = vmatprep.subr.bf16.mxu0 %v5880_v35  ;;  %v5952_v29 = vld [vmem:[#allocation5 + $0x428] ss:$48 sps:$4 sm:$0xff]   ;;  %v5960_v31 = vld [vmem:[#allocation5 + $0x3cc] ss:$48 sps:$4 sm:$0xff]  }
  0x61   :  { %779 = vmatprep.subr.bf16.mxu1 %v5884_v36  ;;  %v5955_v30 = vld [vmem:[#allocation5 + $0x728] ss:$48 sps:$4 sm:$0xff]   ;;  %v5963_v32 = vld [vmem:[#allocation5 + $0x6cc] ss:$48 sps:$4 sm:$0xff]  }
  0x62   :  { %v5958_v33 = vld [vmem:[#allocation5 + $0x3c8] ss:$48 sps:$4 sm:$0xff]   ;;  %v5966_v35 = vld [vmem:[#allocation5 + $0x36c] ss:$48 sps:$4 sm:$0xff]  }
  0x63   :  { %769 = vmatmul.mubr.bf16.vlgmr.msra.gmra.mxu1 %v6886_v37  ;;  %710 = vmatpush2.bf16.msra.mxu0 %v5885_v39  ;;  %v5961_v34 = vld [vmem:[#allocation5 + $0x6c8] ss:$48 sps:$4 sm:$0xff]   ;;  %v5969_v36 = vld [vmem:[#allocation5 + $0x66c] ss:$48 sps:$4 sm:$0xff]  }
  0x64   :  { %780 = vmatpush1.bf16.msra.mxu1 %v5882_v38  ;;  %711 = vmatprep.subr.bf16.mxu0 %v5886_v40  ;;  %v5964_v38 = vld [vmem:[#allocation5 + $0x368] ss:$48 sps:$4 sm:$0xff]   ;;  %v5972_v40 = vld [vmem:[#allocation5 + $0x30c] ss:$48 sps:$4 sm:$0xff]  }
  0x65   :  { %781 = vmatprep.subr.bf16.mxu1 %v5890_v41  ;;  %811 = vmatprep.mubr.bf16.mxu1 %v6889_v54  ;;  %v5967_v39 = vld [vmem:[#allocation5 + $0x668] ss:$48 sps:$4 sm:$0xff]   ;;  %v5975_v41 = vld [vmem:[#allocation5 + $0x60c] ss:$48 sps:$4 sm:$0xff]  }
  0x67   :  { %712 = vmatpush2.bf16.msra.mxu0 %v5891_v43  ;;  %v5973_v43 = vld [vmem:[#allocation5 + $0x608] ss:$48 sps:$4 sm:$0xff]  }
  0x68   :  { %782 = vmatpush1.bf16.msra.mxu1 %v5888_v42  ;;  %713 = vmatprep.subr.bf16.mxu0 %v5892_v44  ;;  %v5970_v42 = vld [vmem:[#allocation5 + $0x308] ss:$48 sps:$4 sm:$0xff]   ;;  %v5978_v44 = vld [vmem:[#allocation5 + $0x2b4] ss:$48 sps:$4 sm:$0xff]  }
  0x69   :  { %783 = vmatprep.subr.bf16.mxu1 %v5896_v45  ;;  %v5981_v45 = vld [vmem:[#allocation5 + $0x8b4] ss:$48 sps:$4 sm:$0xff]  }
  0x6b   :  { %714 = vmatpush2.bf16.msra.mxu0 %v5897_v47  ;;  %v5979_v47 = vld [vmem:[#allocation5 + $0x8b0] ss:$48 sps:$4 sm:$0xff]  }
  0x6c   :  { %784 = vmatpush1.bf16.msra.mxu1 %v5894_v46  ;;  %715 = vmatprep.subr.bf16.mxu0 %v5898_v48  ;;  %v5976_v46 = vld [vmem:[#allocation5 + $0x2b0] ss:$48 sps:$4 sm:$0xff]   ;;  %v5984_v48 = vld [vmem:[#allocation5 + $0x254] ss:$48 sps:$4 sm:$0xff]  }
  0x6d   :  { %785 = vmatprep.subr.bf16.mxu1 %v5902_v49  ;;  %v5987_v49 = vld [vmem:[#allocation5 + $0x854] ss:$48 sps:$4 sm:$0xff]  }
  0x6f   :  { %716 = vmatpush2.bf16.msra.mxu0 %v5903_v53  ;;  %v5993_v53 = vld [vmem:[#allocation5 + $0x7f4] ss:$48 sps:$4 sm:$0xff]  }
  0x70   :  { %786 = vmatpush1.bf16.msra.mxu1 %v5900_v52  ;;  %717 = vmatprep.subr.bf16.mxu0 %v5904_v55  ;;  %v5990_v52 = vld [vmem:[#allocation5 + $0x1f4] ss:$48 sps:$4 sm:$0xff]   ;;  %v5988_v55 = vld [vmem:[#allocation5 + $0x1f0] ss:$48 sps:$4 sm:$0xff]  }
  0x71   :  { %787 = vmatprep.subr.bf16.mxu1 %v5908_v56  ;;  %v5991_v56 = vld [vmem:[#allocation5 + $0x7f0] ss:$48 sps:$4 sm:$0xff]  }
  0x73   :  { %718 = vmatpush2.bf16.msra.mxu0 %v5909_v58  ;;  %v5999_v58 = vld [vmem:[#allocation5 + $0x794] ss:$48 sps:$4 sm:$0xff]  }
  0x74   :  { %788 = vmatpush1.bf16.msra.mxu1 %v5906_v57  ;;  %719 = vmatprep.subr.bf16.mxu0 %v5910_v59  ;;  %v5996_v57 = vld [vmem:[#allocation5 + $0x194] ss:$48 sps:$4 sm:$0xff]   ;;  %v5994_v59 = vld [vmem:[#allocation5 + $0x190] ss:$48 sps:$4 sm:$0xff]  }
  0x75   :  { %789 = vmatprep.subr.bf16.mxu1 %v5914_v60  ;;  %v5997_v60 = vld [vmem:[#allocation5 + $0x790] ss:$48 sps:$4 sm:$0xff]  }
  0x77   :  { %720 = vmatpush2.bf16.msra.mxu0 %v5915_v62  ;;  %v6005_v62 = vld [vmem:[#allocation5 + $0x734] ss:$48 sps:$4 sm:$0xff]  }
  0x78   :  { %790 = vmatpush1.bf16.msra.mxu1 %v5912_v61  ;;  %721 = vmatprep.subr.bf16.mxu0 %v5916_v63  ;;  %v6002_v61 = vld [vmem:[#allocation5 + $0x134] ss:$48 sps:$4 sm:$0xff]   ;;  %v6000_v63 = vld [vmem:[#allocation5 + $0x130] ss:$48 sps:$4 sm:$0xff]  }
  0x79   :  { %791 = vmatprep.subr.bf16.mxu1 %v5920_v1  ;;  %v6003_v1 = vld [vmem:[#allocation5 + $0x730] ss:$48 sps:$4 sm:$0xff]  }
  0x7b   :  { %722 = vmatpush2.bf16.msra.mxu0 %v5921_v3  ;;  %v6011_v3 = vld [vmem:[#allocation5 + $0x6d4] ss:$48 sps:$4 sm:$0xff]  }
  0x7c   :  { %792 = vmatpush1.bf16.msra.mxu1 %v5918_v2  ;;  %723 = vmatprep.subr.bf16.mxu0 %v5922_v4  ;;  %v6008_v2 = vld [vmem:[#allocation5 + $0xd4] ss:$48 sps:$4 sm:$0xff]   ;;  %v6006_v4 = vld [vmem:[#allocation5 + $0xd0] ss:$48 sps:$4 sm:$0xff]  }
  0x7d   :  { %793 = vmatprep.subr.bf16.mxu1 %v5926_v5  ;;  %v6009_v5 = vld [vmem:[#allocation5 + $0x6d0] ss:$48 sps:$4 sm:$0xff]  }
  0x7f   :  { %724 = vmatpush2.bf16.msra.mxu0 %v5927_v7  ;;  %v6017_v7 = vld [vmem:[#allocation5 + $0x674] ss:$48 sps:$4 sm:$0xff]  }
  0x80   :  { %794 = vmatpush1.bf16.msra.mxu1 %v5924_v6  ;;  %822 = vmatprep.subr.bf16.mxu0 %v5933_v11  ;;  %v6014_v6 = vld [vmem:[#allocation5 + $0x74] ss:$48 sps:$4 sm:$0xff]  }
  0x81   :  { %795 = vmatprep.subr.bf16.mxu1 %v5930_v10  ;;  %v6020_v10 = vld [vmem:[#allocation5 + $0x14] ss:$48 sps:$4 sm:$0xff]  }
  0x82   :  { %726 = vmatmul.mubr.bf16.vlgmr.msra.gmra.mxu0 %v6893_v12  ;;  %v6023_v11 = vld [vmem:[#allocation5 + $0x614] ss:$48 sps:$4 sm:$0xff]  }
  0x83   :  { %823 = vmatpush1.bf16.msra.mxu0 %v5931_v14  ;;  %854 = vmatprep.mubr.bf16.mxu0 %v6835_v0  ;;  %v6021_v14 = vld [vmem:[#allocation5 + $0x610] ss:$48 sps:$4 sm:$0xff]  }
  0x84   :  { %796 = vmatpush2.bf16.msra.mxu1 %v5928_v13  ;;  %824 = vmatprep.subr.bf16.mxu0 %v5939_v16  ;;  %v6018_v13 = vld [vmem:[#allocation5 + $0x10] ss:$48 sps:$4 sm:$0xff]   ;;  %v6029_v16 = vld [vmem:[#allocation5 + $0x2bc] ss:$48 sps:$4 sm:$0xff]  }
  0x85   :  { %797 = vmatprep.subr.bf16.mxu1 %v5936_v15  ;;  %v6026_v15 = vld [vmem:[#allocation5 + $0x5b4] ss:$48 sps:$4 sm:$0xff]  }
  0x87   :  { %825 = vmatpush1.bf16.msra.mxu0 %v5937_v18  ;;  %v6027_v18 = vld [vmem:[#allocation5 + $0x2b8] ss:$48 sps:$4 sm:$0xff]  }
  0x88   :  { %798 = vmatpush2.bf16.msra.mxu1 %v5934_v17  ;;  %826 = vmatprep.subr.bf16.mxu0 %v5945_v20  ;;  %v6024_v17 = vld [vmem:[#allocation5 + $0x5b0] ss:$48 sps:$4 sm:$0xff]   ;;  %v6035_v20 = vld [vmem:[#allocation5 + $0x25c] ss:$48 sps:$4 sm:$0xff]  }
  0x89   :  { %799 = vmatprep.subr.bf16.mxu1 %v5942_v19  ;;  %v6032_v19 = vld [vmem:[#allocation5 + $0x554] ss:$48 sps:$4 sm:$0xff]  }
  0x8b   :  { %827 = vmatpush1.bf16.msra.mxu0 %v5943_v22  ;;  %v6033_v22 = vld [vmem:[#allocation5 + $0x258] ss:$48 sps:$4 sm:$0xff]  }
  0x8c   :  { %800 = vmatpush2.bf16.msra.mxu1 %v5940_v21  ;;  %828 = vmatprep.subr.bf16.mxu0 %v5951_v24  ;;  %v6030_v21 = vld [vmem:[#allocation5 + $0x550] ss:$48 sps:$4 sm:$0xff]   ;;  %v6041_v24 = vld [vmem:[#allocation5 + $0x1fc] ss:$48 sps:$4 sm:$0xff]  }
  0x8d   :  { %801 = vmatprep.subr.bf16.mxu1 %v5948_v23  ;;  %v6038_v23 = vld [vmem:[#allocation5 + $0x4f4] ss:$48 sps:$4 sm:$0xff]  }
  0x8f   :  { %829 = vmatpush1.bf16.msra.mxu0 %v5949_v26  ;;  %v6039_v26 = vld [vmem:[#allocation5 + $0x1f8] ss:$48 sps:$4 sm:$0xff]  }
  0x90   :  { %802 = vmatpush2.bf16.msra.mxu1 %v5946_v25  ;;  %830 = vmatprep.subr.bf16.mxu0 %v5957_v28  ;;  %v6036_v25 = vld [vmem:[#allocation5 + $0x4f0] ss:$48 sps:$4 sm:$0xff]   ;;  %v6047_v28 = vld [vmem:[#allocation5 + $0x19c] ss:$48 sps:$4 sm:$0xff]  }
  0x91   :  { %803 = vmatprep.subr.bf16.mxu1 %v5954_v27  ;;  %v6044_v27 = vld [vmem:[#allocation5 + $0x494] ss:$48 sps:$4 sm:$0xff]  }
  0x93   :  { %831 = vmatpush1.bf16.msra.mxu0 %v5955_v30  ;;  %v6045_v30 = vld [vmem:[#allocation5 + $0x198] ss:$48 sps:$4 sm:$0xff]  }
  0x94   :  { %804 = vmatpush2.bf16.msra.mxu1 %v5952_v29  ;;  %832 = vmatprep.subr.bf16.mxu0 %v5963_v32  ;;  %v6042_v29 = vld [vmem:[#allocation5 + $0x490] ss:$48 sps:$4 sm:$0xff]   ;;  %v6053_v32 = vld [vmem:[#allocation5 + $0x13c] ss:$48 sps:$4 sm:$0xff]  }
  0x95   :  { %805 = vmatprep.subr.bf16.mxu1 %v5960_v31  ;;  %v6050_v31 = vld [vmem:[#allocation5 + $0x434] ss:$48 sps:$4 sm:$0xff]  }
  0x97   :  { %833 = vmatpush1.bf16.msra.mxu0 %v5961_v34  ;;  %v6051_v34 = vld [vmem:[#allocation5 + $0x138] ss:$48 sps:$4 sm:$0xff]  }
  0x98   :  { %806 = vmatpush2.bf16.msra.mxu1 %v5958_v33  ;;  %834 = vmatprep.subr.bf16.mxu0 %v5969_v36  ;;  %v6048_v33 = vld [vmem:[#allocation5 + $0x430] ss:$48 sps:$4 sm:$0xff]   ;;  %v6059_v36 = vld [vmem:[#allocation5 + $0xdc] ss:$48 sps:$4 sm:$0xff]  }
  0x99   :  { %807 = vmatprep.subr.bf16.mxu1 %v5966_v35  ;;  %v6056_v35 = vld [vmem:[#allocation5 + $0x3d4] ss:$48 sps:$4 sm:$0xff]  }
  0x9b   :  { %835 = vmatpush1.bf16.msra.mxu0 %v5967_v39  ;;  %v6057_v39 = vld [vmem:[#allocation5 + $0xd8] ss:$48 sps:$4 sm:$0xff]  }
  0x9c   :  { %808 = vmatpush2.bf16.msra.mxu1 %v5964_v38  ;;  %836 = vmatprep.subr.bf16.mxu0 %v5975_v41  ;;  %v6054_v38 = vld [vmem:[#allocation5 + $0x3d0] ss:$48 sps:$4 sm:$0xff]   ;;  %v6065_v41 = vld [vmem:[#allocation5 + $0x7c] ss:$48 sps:$4 sm:$0xff]  }
  0x9d   :  { %809 = vmatprep.subr.bf16.mxu1 %v5972_v40  ;;  %v6062_v40 = vld [vmem:[#allocation5 + $0x374] ss:$48 sps:$4 sm:$0xff]  }
  0x9f   :  { %837 = vmatpush1.bf16.msra.mxu0 %v5973_v43  ;;  %v6063_v43 = vld [vmem:[#allocation5 + $0x78] ss:$48 sps:$4 sm:$0xff]  }
  0xa0   :  { %810 = vmatpush2.bf16.msra.mxu1 %v5970_v42  ;;  %1667 = vmatprep.subr.bf16.mxu0 %v5978_v44  ;;  %v6060_v42 = vld [vmem:[#allocation5 + $0x370] ss:$48 sps:$4 sm:$0xff]   ;;  %v6068_v44 = vld [vmem:[#allocation5 + $0x314] ss:$48 sps:$4 sm:$0xff]  }
  0xa1   :  { %1710 = vmatprep.subr.bf16.mxu1 %v5981_v45  ;;  %v6071_v45 = vld [vmem:[#allocation5 + $0x1c] ss:$48 sps:$4 sm:$0xff]  }
  0xa2   :  { %855 = vmatmul.mubr.bf16.vlgmr.msra.gmra.mxu0 %v6886_v37 }
  0xa3   :  { %812 = vmatmul.mubr.bf16.vlgmr.msra.gmra.mxu1 %v6893_v12  ;;  %1668 = vmatpush1.bf16.msra.mxu0 %v5976_v46  ;;  %v6066_v46 = vld [vmem:[#allocation5 + $0x310] ss:$48 sps:$4 sm:$0xff]  }
  0xa4   :  { %1711 = vmatpush1.bf16.msra.mxu1 %v5979_v47  ;;  %1669 = vmatprep.subr.bf16.mxu0 %v5984_v48  ;;  %v6069_v47 = vld [vmem:[#allocation5 + $0x18] ss:$48 sps:$4 sm:$0xff]   ;;  %v6074_v48 = vld [vmem:[#allocation5 + $0x5bc] ss:$48 sps:$4 sm:$0xff]  }
  0xa5   :  { %1712 = vmatprep.subr.bf16.mxu1 %v5987_v49  ;;  %1742 = vmatprep.mubr.bf16.mxu1 %v6835_v0  ;;  %v6077_v49 = vld [vmem:[#allocation5 + $0x8bc] ss:$48 sps:$4 sm:$0xff]  }
  0xa6   :  { %1699 = vmatprep.mubr.bf16.mxu0 %v6889_v54 }
  0xa7   :  { %1670 = vmatpush1.bf16.msra.mxu0 %v5982_v50  ;;  %v6072_v50 = vld [vmem:[#allocation5 + $0x5b8] ss:$48 sps:$4 sm:$0xff]  }
  0xa8   :  { %1713 = vmatpush1.bf16.msra.mxu1 %v5985_v51  ;;  %1671 = vmatprep.subr.bf16.mxu0 %v5990_v52  ;;  %v6075_v51 = vld [vmem:[#allocation5 + $0x8b8] ss:$48 sps:$4 sm:$0xff]   ;;  %v6080_v52 = vld [vmem:[#allocation5 + $0x55c] ss:$48 sps:$4 sm:$0xff]  }
  0xa9   :  { %1714 = vmatprep.subr.bf16.mxu1 %v5993_v53  ;;  %v6083_v53 = vld [vmem:[#allocation5 + $0x85c] ss:$48 sps:$4 sm:$0xff]  }
  0xab   :  { %1672 = vmatpush1.bf16.msra.mxu0 %v5988_v55  ;;  %v6078_v55 = vld [vmem:[#allocation5 + $0x558] ss:$48 sps:$4 sm:$0xff]  }
  0xac   :  { %1715 = vmatpush1.bf16.msra.mxu1 %v5991_v56  ;;  %1673 = vmatprep.subr.bf16.mxu0 %v5996_v57  ;;  %v6081_v56 = vld [vmem:[#allocation5 + $0x858] ss:$48 sps:$4 sm:$0xff]   ;;  %v6086_v57 = vld [vmem:[#allocation5 + $0x4fc] ss:$48 sps:$4 sm:$0xff]  }
  0xad   :  { %1716 = vmatprep.subr.bf16.mxu1 %v5999_v58  ;;  %v6089_v58 = vld [vmem:[#allocation5 + $0x7fc] ss:$48 sps:$4 sm:$0xff]  }
  0xaf   :  { %1674 = vmatpush1.bf16.msra.mxu0 %v5994_v59  ;;  %v6084_v59 = vld [vmem:[#allocation5 + $0x4f8] ss:$48 sps:$4 sm:$0xff]  }
  0xb0   :  { %1717 = vmatpush1.bf16.msra.mxu1 %v5997_v60  ;;  %1675 = vmatprep.subr.bf16.mxu0 %v6002_v61  ;;  %v6087_v60 = vld [vmem:[#allocation5 + $0x7f8] ss:$48 sps:$4 sm:$0xff]   ;;  %v6092_v61 = vld [vmem:[#allocation5 + $0x49c] ss:$48 sps:$4 sm:$0xff]  }
  0xb1   :  { %1718 = vmatprep.subr.bf16.mxu1 %v6005_v62  ;;  %v6095_v62 = vld [vmem:[#allocation5 + $0x79c] ss:$48 sps:$4 sm:$0xff]  }
  0xb3   :  { %1676 = vmatpush1.bf16.msra.mxu0 %v6000_v63  ;;  %v6090_v63 = vld [vmem:[#allocation5 + $0x498] ss:$48 sps:$4 sm:$0xff]  }
  0xb4   :  { %1719 = vmatpush1.bf16.msra.mxu1 %v6003_v1  ;;  %1677 = vmatprep.subr.bf16.mxu0 %v6008_v2  ;;  %v6093_v1 = vld [vmem:[#allocation5 + $0x798] ss:$48 sps:$4 sm:$0xff]   ;;  %v6098_v2 = vld [vmem:[#allocation5 + $0x43c] ss:$48 sps:$4 sm:$0xff]  }
  0xb5   :  { %1720 = vmatprep.subr.bf16.mxu1 %v6011_v3  ;;  %v6101_v3 = vld [vmem:[#allocation5 + $0x73c] ss:$48 sps:$4 sm:$0xff]  }
  0xb7   :  { %1678 = vmatpush1.bf16.msra.mxu0 %v6006_v4  ;;  %v6096_v4 = vld [vmem:[#allocation5 + $0x438] ss:$48 sps:$4 sm:$0xff]  }
  0xb8   :  { %1721 = vmatpush1.bf16.msra.mxu1 %v6009_v5  ;;  %1679 = vmatprep.subr.bf16.mxu0 %v6014_v6  ;;  %v6099_v5 = vld [vmem:[#allocation5 + $0x738] ss:$48 sps:$4 sm:$0xff]   ;;  %v6104_v6 = vld [vmem:[#allocation5 + $0x3dc] ss:$48 sps:$4 sm:$0xff]  }
  0xb9   :  { %1722 = vmatprep.subr.bf16.mxu1 %v6017_v7  ;;  %v6107_v7 = vld [vmem:[#allocation5 + $0x6dc] ss:$48 sps:$4 sm:$0xff]  }
  0xbb   :  { %1680 = vmatpush1.bf16.msra.mxu0 %v6012_v8  ;;  %v6102_v8 = vld [vmem:[#allocation5 + $0x3d8] ss:$48 sps:$4 sm:$0xff]  }
  0xbc   :  { %1723 = vmatpush1.bf16.msra.mxu1 %v6015_v9  ;;  %1681 = vmatprep.subr.bf16.mxu0 %v6020_v10  ;;  %v6105_v9 = vld [vmem:[#allocation5 + $0x6d8] ss:$48 sps:$4 sm:$0xff]   ;;  %v6110_v10 = vld [vmem:[#allocation5 + $0x37c] ss:$48 sps:$4 sm:$0xff]  }
  0xbd   :  { %1724 = vmatprep.subr.bf16.mxu1 %v6023_v11  ;;  %v6113_v11 = vld [vmem:[#allocation5 + $0x67c] ss:$48 sps:$4 sm:$0xff]  }
  0xbf   :  { %1682 = vmatpush1.bf16.msra.mxu0 %v6018_v13  ;;  %v6108_v13 = vld [vmem:[#allocation5 + $0x378] ss:$48 sps:$4 sm:$0xff]  }
  0xc0   :  { %1725 = vmatpush1.bf16.msra.mxu1 %v6021_v14  ;;  %1683 = vmatprep.subr.bf16.mxu0 %v6026_v15  ;;  %v6111_v14 = vld [vmem:[#allocation5 + $0x678] ss:$48 sps:$4 sm:$0xff]   ;;  %v6116_v15 = vld [vmem:[#allocation5 + $0x31c] ss:$48 sps:$4 sm:$0xff]  }
  0xc1   :  { %1753 = vmatprep.subr.bf16.mxu1 %v6029_v16  ;;  %v6119_v16 = vld [vmem:[#allocation5 + $0x61c] ss:$48 sps:$4 sm:$0xff]  }
  0xc3   :  { %1743 = vmatmul.mubr.bf16.vlgmr.msra.gmra.mxu1 %v6886_v37  ;;  %1684 = vmatpush2.bf16.msra.mxu0 %v6024_v17  ;;  %v6114_v17 = vld [vmem:[#allocation5 + $0x318] ss:$48 sps:$4 sm:$0xff]  }
  0xc4   :  { %1754 = vmatpush1.bf16.msra.mxu1 %v6027_v18  ;;  %1685 = vmatprep.subr.bf16.mxu0 %v6032_v19  ;;  %v6117_v18 = vld [vmem:[#allocation5 + $0x618] ss:$48 sps:$4 sm:$0xff]   ;;  %v6120_v19 = vld [vmem:[#allocation8 + $0x3a8] ss:$12 sps:$4 sm:$0xff]  }
  0xc5   :  { %1755 = vmatprep.subr.bf16.mxu1 %v6035_v20  ;;  %1785 = vmatprep.mubr.bf16.mxu1 %v6889_v54  ;;  %v6122_v20 = vld [vmem:[#allocation8 + $0x3ac] ss:$12 sps:$4 sm:$0xff]  }
  0xc7   :  { %1686 = vmatpush2.bf16.msra.mxu0 %v6030_v21  ;;  %v6125_v21 = vld [vmem:[#allocation8 + $0x394] ss:$12 sps:$4 sm:$0xff]  }
  0xc8   :  { %1756 = vmatpush1.bf16.msra.mxu1 %v6033_v22  ;;  %1687 = vmatprep.subr.bf16.mxu0 %v6038_v23  ;;  %v6123_v22 = vld [vmem:[#allocation8 + $0x390] ss:$12 sps:$4 sm:$0xff]  }
  0xc9   :  { %1757 = vmatprep.subr.bf16.mxu1 %v6041_v24  ;;  %v6128_v23 = vld [vmem:[#allocation8 + $0x37c] ss:$12 sps:$4 sm:$0xff]   ;;  %v6126_v24 = vld [vmem:[#allocation8 + $0x378] ss:$12 sps:$4 sm:$0xff]  }
  0xcb   :  { %1688 = vmatpush2.bf16.msra.mxu0 %v6036_v25  ;;  %v6131_v25 = vld [vmem:[#allocation8 + $0x364] ss:$12 sps:$4 sm:$0xff]  }
  0xcc   :  { %1758 = vmatpush1.bf16.msra.mxu1 %v6039_v26  ;;  %1689 = vmatprep.subr.bf16.mxu0 %v6044_v27  ;;  %v6129_v26 = vld [vmem:[#allocation8 + $0x360] ss:$12 sps:$4 sm:$0xff]  }
  0xcd   :  { %1759 = vmatprep.subr.bf16.mxu1 %v6047_v28  ;;  %v6134_v27 = vld [vmem:[#allocation8 + $0x34c] ss:$12 sps:$4 sm:$0xff]   ;;  %v6132_v28 = vld [vmem:[#allocation8 + $0x348] ss:$12 sps:$4 sm:$0xff]  }
  0xcf   :  { %1690 = vmatpush2.bf16.msra.mxu0 %v6042_v29  ;;  %v6137_v29 = vld [vmem:[#allocation8 + $0x334] ss:$12 sps:$4 sm:$0xff]  }
  0xd0   :  { %1760 = vmatpush1.bf16.msra.mxu1 %v6045_v30  ;;  %1691 = vmatprep.subr.bf16.mxu0 %v6050_v31  ;;  %v6135_v30 = vld [vmem:[#allocation8 + $0x330] ss:$12 sps:$4 sm:$0xff]  }
  0xd1   :  { %1761 = vmatprep.subr.bf16.mxu1 %v6053_v32  ;;  %v6140_v31 = vld [vmem:[#allocation8 + $0x31c] ss:$12 sps:$4 sm:$0xff]   ;;  %v6138_v32 = vld [vmem:[#allocation8 + $0x318] ss:$12 sps:$4 sm:$0xff]  }
  0xd3   :  { %1692 = vmatpush2.bf16.msra.mxu0 %v6048_v33  ;;  %v6143_v33 = vld [vmem:[#allocation8 + $0x304] ss:$12 sps:$4 sm:$0xff]  }
  0xd4   :  { %1762 = vmatpush1.bf16.msra.mxu1 %v6051_v34  ;;  %1693 = vmatprep.subr.bf16.mxu0 %v6056_v35  ;;  %v6141_v34 = vld [vmem:[#allocation8 + $0x300] ss:$12 sps:$4 sm:$0xff]  }
  0xd5   :  { %1763 = vmatprep.subr.bf16.mxu1 %v6059_v36  ;;  %v6146_v35 = vld [vmem:[#allocation8 + $0x46c] ss:$12 sps:$4 sm:$0xff]  }
  0xd6   :  { %v6149_v36 = vld [vmem:[#allocation8 + $0x52c] ss:$12 sps:$4 sm:$0xff]  }
  0xd7   :  { %1694 = vmatpush2.bf16.msra.mxu0 %v6054_v38  ;;  %v6144_v38 = vld [vmem:[#allocation8 + $0x468] ss:$12 sps:$4 sm:$0xff]  }
  0xd8   :  { %1764 = vmatpush1.bf16.msra.mxu1 %v6057_v39  ;;  %1695 = vmatprep.subr.bf16.mxu0 %v6062_v40  ;;  %v6147_v39 = vld [vmem:[#allocation8 + $0x528] ss:$12 sps:$4 sm:$0xff]  }
  0xd9   :  { %1765 = vmatprep.subr.bf16.mxu1 %v6065_v41  ;;  %v6152_v40 = vld [vmem:[#allocation8 + $0x454] ss:$12 sps:$4 sm:$0xff]  }
  0xda   :  { %v6155_v41 = vld [vmem:[#allocation8 + $0x514] ss:$12 sps:$4 sm:$0xff]  }
  0xdb   :  { %1696 = vmatpush2.bf16.msra.mxu0 %v6060_v42  ;;  %v6150_v42 = vld [vmem:[#allocation8 + $0x450] ss:$12 sps:$4 sm:$0xff]  }
  0xdc   :  { %1766 = vmatpush1.bf16.msra.mxu1 %v6063_v43  ;;  %1697 = vmatprep.subr.bf16.mxu0 %v6068_v44  ;;  %v6153_v43 = vld [vmem:[#allocation8 + $0x510] ss:$12 sps:$4 sm:$0xff]   ;;  %v6156_v44 = vld [vmem:[#allocation8 + $0x438] ss:$12 sps:$4 sm:$0xff]  }
  0xdd   :  { %1767 = vmatprep.subr.bf16.mxu1 %v6071_v45  ;;  %v6158_v45 = vld [vmem:[#allocation8 + $0x43c] ss:$12 sps:$4 sm:$0xff]  }
  0xdf   :  { %1698 = vmatpush2.bf16.msra.mxu0 %v6066_v46  ;;  %v6159_v46 = vld [vmem:[#allocation8 + $0x4f8] ss:$12 sps:$4 sm:$0xff]  }
  0xe0   :  { %1768 = vmatpush1.bf16.msra.mxu1 %v6069_v47  ;;  %1796 = vmatprep.subr.bf16.mxu0 %v6077_v49  ;;  %v6161_v47 = vld [vmem:[#allocation8 + $0x4fc] ss:$12 sps:$4 sm:$0xff]   ;;  %v193_v49 = vlaneseq }
  0xe1   :  { %1769 = vmatprep.subr.bf16.mxu1 %v6074_v48  ;;  %v6164_v48 = vld [vmem:[#allocation8 + $0x424] ss:$12 sps:$4 sm:$0xff]  }
  0xe2   :  { %1700 = vmatmul.mubr.bf16.vlgmr.msra.gmra.mxu0 %v6893_v12 }
  0xe3   :  { %1797 = vmatpush1.bf16.msra.mxu0 %v6075_v51  ;;  %1828 = vmatprep.mubr.bf16.mxu0 %v6835_v0  ;;  %v6162_v51 = vld [vmem:[#allocation8 + $0x420] ss:$12 sps:$4 sm:$0xff]  }
  0xe4   :  { %1770 = vmatpush2.bf16.msra.mxu1 %v6072_v50  ;;  %1798 = vmatprep.subr.bf16.mxu0 %v6083_v53  ;;  %v6167_v50 = vld [vmem:[#allocation8 + $0x4e4] ss:$12 sps:$4 sm:$0xff]   ;;  %v6170_v53 = vld [vmem:[#allocation8 + $0x40c] ss:$12 sps:$4 sm:$0xff]  }
  0xe5   :  { %1771 = vmatprep.subr.bf16.mxu1 %v6080_v52  ;;  %v6165_v52 = vld [vmem:[#allocation8 + $0x4e0] ss:$12 sps:$4 sm:$0xff]  }
  0xe7   :  { %1799 = vmatpush1.bf16.msra.mxu0 %v6081_v56  ;;  %v6173_v56 = vld [vmem:[#allocation8 + $0x4cc] ss:$12 sps:$4 sm:$0xff]  }
  0xe8   :  { %1772 = vmatpush2.bf16.msra.mxu1 %v6078_v55  ;;  %1800 = vmatprep.subr.bf16.mxu0 %v6089_v58  ;;  %v6168_v55 = vld [vmem:[#allocation8 + $0x408] ss:$12 sps:$4 sm:$0xff]  }
  0xe9   :  { %1773 = vmatprep.subr.bf16.mxu1 %v6086_v57  ;;  %v6907_v57 = vshrl.u32 %v193_v49, 7  ;;  %v6171_v58 = vld [vmem:[#allocation8 + $0x4c8] ss:$12 sps:$4 sm:$0xff]  }
  0xeb   :  { %1801 = vmatpush1.bf16.msra.mxu0 %v6087_v60  ;;  %v6179_v60 = vld [vmem:[#allocation8 + $0x4b4] ss:$12 sps:$4 sm:$0xff]  }
  0xec   :  { %1774 = vmatpush2.bf16.msra.mxu1 %v6084_v59  ;;  %1802 = vmatprep.subr.bf16.mxu0 %v6095_v62  ;;  %v6176_v59 = vld [vmem:[#allocation8 + $0x3f4] ss:$12 sps:$4 sm:$0xff]   ;;  %v6174_v62 = vld [vmem:[#allocation8 + $0x3f0] ss:$12 sps:$4 sm:$0xff]  }
  0xed   :  { %1775 = vmatprep.subr.bf16.mxu1 %v6092_v61  ;;  %v6909_v61 = vld [vmem:[#allocation7] sm:$0xf] }
  0xef   :  { %1803 = vmatpush1.bf16.msra.mxu0 %v6093_v1  ;;  %v6177_v1 = vld [vmem:[#allocation8 + $0x4b0] ss:$12 sps:$4 sm:$0xff]  }
  0xf0   :  { %1776 = vmatpush2.bf16.msra.mxu1 %v6090_v63  ;;  %1804 = vmatprep.subr.bf16.mxu0 %v6101_v3  ;;  %v6912_v63 = vsub.s32 0, %v6907_v57 }
  0xf1   :  { %1777 = vmatprep.subr.bf16.mxu1 %v6098_v2 }
  0xf2   :  { %v196_v2 = vrot.slane %v6909_v61, %v6912_v63 }
  0xf3   :  { %1805 = vmatpush1.bf16.msra.mxu0 %v6099_v5  ;;  %v6185_v5 = vld [vmem:[#allocation8 + $0x49c] ss:$12 sps:$4 sm:$0xff]  }
  0xf4   :  { %1778 = vmatpush2.bf16.msra.mxu1 %v6096_v4  ;;  %1806 = vmatprep.subr.bf16.mxu0 %v6107_v7  ;;  %v6182_v4 = vld [vmem:[#allocation8 + $0x3dc] ss:$12 sps:$4 sm:$0xff]   ;;  %v6180_v7 = vld [vmem:[#allocation8 + $0x3d8] ss:$12 sps:$4 sm:$0xff]  }
  0xf5   :  { %1779 = vmatprep.subr.bf16.mxu1 %v6104_v6 }
  0xf7   :  { %1807 = vmatpush1.bf16.msra.mxu0 %v6105_v9 }
  0xf8   :  { %1780 = vmatpush2.bf16.msra.mxu1 %v6102_v8  ;;  %1808 = vmatprep.subr.bf16.mxu0 %v6113_v11  ;;  %v6183_v8 = vld [vmem:[#allocation8 + $0x498] ss:$12 sps:$4 sm:$0xff]  }
  0xf9   :  { %1781 = vmatprep.subr.bf16.mxu1 %v6110_v10 }
  0xfb   :  { %1809 = vmatpush1.bf16.msra.mxu0 %v6111_v14  ;;  %v6188_v14 = vld [vmem:[#allocation8 + $0x3c4] ss:$12 sps:$4 sm:$0xff]  }
  0xfc   :  { %1782 = vmatpush2.bf16.msra.mxu1 %v6108_v13  ;;  %1810 = vmatprep.subr.bf16.mxu0 %v6119_v16 }
  0xfd   :  { %1783 = vmatprep.subr.bf16.mxu1 %v6116_v15  ;;  %v6191_v15 = vld [vmem:[#allocation8 + $0x484] ss:$12 sps:$4 sm:$0xff]  }
  0xff   :  { %1811 = vmatpush1.bf16.msra.mxu0 %v6117_v18  ;;  %v6189_v18 = vld [vmem:[#allocation8 + $0x480] ss:$12 sps:$4 sm:$0xff]  }
 0x100   :  { %1784 = vmatpush2.bf16.msra.mxu1 %v6114_v17  ;;  %2555 = vmatprep.subr.bf16.mxu0 %v6122_v20  ;;  %v6186_v17 = vld [vmem:[#allocation8 + $0x3c0] ss:$12 sps:$4 sm:$0xff]  }
 0x101   :  { %2598 = vmatprep.subr.bf16.mxu1 %v6149_v36  ;;  %v6204_v36 = vld [vmem:[#allocation8 + $0x5bc] ss:$12 sps:$4 sm:$0xff]  }
 0x102   :  { %1829 = vmatmul.mubr.bf16.vlgmr.msra.gmra.mxu0 %v6886_v37 }
 0x103   :  { %1786 = vmatmul.mubr.bf16.vlgmr.msra.gmra.mxu1 %v6893_v12  ;;  %2556 = vmatpush1.bf16.msra.mxu0 %v6120_v19 }
 0x104   :  { %2557 = vmatprep.subr.bf16.mxu0 %v6125_v21  ;;  %2599 = vmatpush1.bf16.msra.mxu1 %v6147_v39  ;;  %v6202_v39 = vld [vmem:[#allocation8 + $0x5b8] ss:$12 sps:$4 sm:$0xff]  }
 0x105   :  { %2600 = vmatprep.subr.bf16.mxu1 %v6155_v41  ;;  %v6209_v41 = vld [vmem:[#allocation8 + $0x5a4] ss:$12 sps:$4 sm:$0xff]  }
 0x107   :  { %2558 = vmatpush1.bf16.msra.mxu0 %v6123_v22 }
 0x108   :  { %2559 = vmatprep.subr.bf16.mxu0 %v6128_v23  ;;  %2601 = vmatpush1.bf16.msra.mxu1 %v6153_v43  ;;  %v6214_v43 = vld [vmem:[#allocation8 + $0x58c] ss:$12 sps:$4 sm:$0xff]  }
 0x109   :  { %2602 = vmatprep.subr.bf16.mxu1 %v6161_v47  ;;  %v6219_v47 = vld [vmem:[#allocation8 + $0x574] ss:$12 sps:$4 sm:$0xff]  }
 0x10b   :  { %2560 = vmatpush1.bf16.msra.mxu0 %v6126_v24  ;;  %v6194_v24 = vld [vmem:[#allocation8 + $0x5ec] ss:$12 sps:$4 sm:$0xff]  }
 0x10c   :  { %2561 = vmatprep.subr.bf16.mxu0 %v6131_v25  ;;  %2603 = vmatpush1.bf16.msra.mxu1 %v6159_v46  ;;  %v6195_v25 = vld [vmem:[#allocation8 + $0x470] ss:$12 sps:$4 sm:$0xff]  }
 0x10d   :  { %2604 = vmatprep.subr.bf16.mxu1 %v6167_v50  ;;  %v6217_v46 = vld [vmem:[#allocation8 + $0x570] ss:$12 sps:$4 sm:$0xff]  }
 0x10f   :  { %2562 = vmatpush1.bf16.msra.mxu0 %v6129_v26 }
 0x110   :  { %2563 = vmatprep.subr.bf16.mxu0 %v6134_v27  ;;  %2605 = vmatpush1.bf16.msra.mxu1 %v6165_v52 }
 0x111   :  { %2606 = vmatprep.subr.bf16.mxu1 %v6173_v56 }
 0x113   :  { %2564 = vmatpush1.bf16.msra.mxu0 %v6132_v28  ;;  %v6192_v28 = vld [vmem:[#allocation8 + $0x5e8] ss:$12 sps:$4 sm:$0xff]  }
 0x114   :  { %2565 = vmatprep.subr.bf16.mxu0 %v6137_v29  ;;  %2607 = vmatpush1.bf16.msra.mxu1 %v6171_v58  ;;  %v6222_v58 = vld [vmem:[#allocation8 + $0x558] ss:$12 sps:$4 sm:$0xff]  }
 0x115   :  { %2608 = vmatprep.subr.bf16.mxu1 %v6179_v60 }
 0x117   :  { %2566 = vmatpush1.bf16.msra.mxu0 %v6135_v30 }
 0x118   :  { %2567 = vmatprep.subr.bf16.mxu0 %v6140_v31  ;;  %2609 = vmatpush1.bf16.msra.mxu1 %v6177_v1 }
 0x119   :  { %2610 = vmatprep.subr.bf16.mxu1 %v6185_v5 }
 0x11b   :  { %2568 = vmatpush1.bf16.msra.mxu0 %v6138_v32  ;;  %v6199_v32 = vld [vmem:[#allocation8 + $0x5d4] ss:$12 sps:$4 sm:$0xff]  }
 0x11c   :  { %2569 = vmatprep.subr.bf16.mxu0 %v6143_v33  ;;  %2611 = vmatpush1.bf16.msra.mxu1 %v6183_v8 }
 0x11d   :  { %2612 = vmatprep.subr.bf16.mxu1 %v6191_v15  ;;  %v6229_v15 = vld [vmem:[#allocation8 + $0x544] ss:$12 sps:$4 sm:$0xff]  }
 0x11f   :  { %2570 = vmatpush1.bf16.msra.mxu0 %v6141_v34  ;;  %v6197_v34 = vld [vmem:[#allocation8 + $0x5d0] ss:$12 sps:$4 sm:$0xff]  }
 0x120   :  { %2571 = vmatprep.subr.bf16.mxu0 %v6146_v35  ;;  %2613 = vmatpush1.bf16.msra.mxu1 %v6189_v18 }
 0x121   :  { %2614 = vmatprep.subr.bf16.mxu1 %v6194_v24 }
 0x123   :  { %2572 = vmatpush2.bf16.msra.mxu0 %v6144_v38  ;;  %v770_v3 = vpop.f32.mrf.mxu1 }
 0x124   :  { %2573 = vmatprep.subr.bf16.mxu0 %v6152_v40  ;;  %2615 = vmatpush2.bf16.msra.mxu1 %v6192_v28  ;;  %v6207_v40 = vld [vmem:[#allocation8 + $0x5a0] ss:$12 sps:$4 sm:$0xff]  }
 0x125   :  { %v6916_v10 = vpop.f32.mrf.mxu1  ;;  %2616 = vmatprep.subr.bf16.mxu1 %v6199_v32 }
 0x127   :  { %2574 = vmatpush2.bf16.msra.mxu0 %v6150_v42  ;;  %v774_v21 = vpop.f32.mrf.mxu1  ;;  %v6212_v42 = vld [vmem:[#allocation8 + $0x588] ss:$12 sps:$4 sm:$0xff]  }
 0x128   :  { %2575 = vmatprep.subr.bf16.mxu0 %v6158_v45  ;;  %2617 = vmatpush2.bf16.msra.mxu1 %v6197_v34  ;;  %v6930_v45 = vsub.s32 3, %v6907_v57 }
 0x129   :  { %2618 = vmatprep.subr.bf16.mxu1 %v6204_v36  ;;  %v6934_v50 = vpop.f32.mrf.mxu1 }
 0x12a   :  { %v208_v52 = vrot.slane %v6909_v61, %v6930_v45 }
 0x12b   :  { %2576 = vmatpush2.bf16.msra.mxu0 %v6156_v44  ;;  %v6927_v44 = vsub.s32 2, %v6907_v57 }
 0x12c   :  { %2577 = vmatprep.subr.bf16.mxu0 %v6164_v48  ;;  %2619 = vmatpush2.bf16.msra.mxu1 %v6202_v39 }
 0x12d   :  { %2620 = vmatprep.subr.bf16.mxu1 %v6209_v41  ;;  %v204_v49 = vrot.slane %v6909_v61, %v6927_v44 }
 0x12f   :  { %2578 = vmatpush2.bf16.msra.mxu0 %v6162_v51 }
 0x130   :  { %2579 = vmatprep.subr.bf16.mxu0 %v6170_v53  ;;  %2621 = vmatpush2.bf16.msra.mxu1 %v6207_v40 }
 0x131   :  { %2622 = vmatprep.subr.bf16.mxu1 %v6214_v43 }
 0x133   :  { %2580 = vmatpush2.bf16.msra.mxu0 %v6168_v55 }
 0x134   :  { %2581 = vmatprep.subr.bf16.mxu0 %v6176_v59  ;;  %2623 = vmatpush2.bf16.msra.mxu1 %v6212_v42  ;;  %v6224_v59 = vld [vmem:[#allocation8 + $0x55c] ss:$12 sps:$4 sm:$0xff]  }
 0x135   :  { %2624 = vmatprep.subr.bf16.mxu1 %v6219_v47 }
 0x137   :  { %2582 = vmatpush2.bf16.msra.mxu0 %v6174_v62 }
 0x138   :  { %2583 = vmatprep.subr.bf16.mxu0 %v6182_v4  ;;  %2625 = vmatpush2.bf16.msra.mxu1 %v6217_v46 }
 0x139   :  { %2626 = vmatprep.subr.bf16.mxu1 %v6224_v59 }
 0x13b   :  { %2584 = vmatpush2.bf16.msra.mxu0 %v6180_v7 }
 0x13c   :  { %2585 = vmatprep.subr.bf16.mxu0 %v6188_v14  ;;  %2627 = vmatpush2.bf16.msra.mxu1 %v6222_v58  ;;  %v6227_v14 = vld [vmem:[#allocation8 + $0x540] ss:$12 sps:$4 sm:$0xff]  }
 0x13d   :  { %2628 = vmatprep.subr.bf16.mxu1 %v6229_v15  ;;  %v1165_v15 = vld [vmem:[#allocation7 + $0x4] sm:$0xf] }
 0x13f   :  { %2586 = vmatpush2.bf16.msra.mxu0 %v6186_v17 }
 0x140   :  { %5687 = vmatprep.subr.bf16.mxu0 %v6195_v25  ;;  %2629 = vmatpush2.bf16.msra.mxu1 %v6227_v14 }
 0x142   :  { %v727_v6 = vpop.f32.mrf.mxu0 }
 0x143   :  { %v728_v9 = vadd.f32 %v727_v6, %v196_v2 }
 0x144   :  { %v6918_v11 = vpop.f32.mrf.mxu0 }
 0x145   :  { %v6920_v13 = vadd.f32 %v770_v3, %v728_v9 }
 0x146   :  { %v731_v16 = vpop.f32.mrf.mxu0 }
 0x147   :  { %v873_v19 = vmul.f32 0.044715, %v6920_v13  ;;  %v732_v20 = vadd.f32 %v731_v16, %v196_v2  ;;  %v865_v4 = vmul.f32 0.5, %v6920_v13 }
 0x148   :  { %v6936_v51 = vpop.f32.mrf.mxu0 }
 0x149   :  { %v881_v22 = vmul.f32 %v873_v19, %v6920_v13  ;;  %v775_v23 = vadd.f32 %v774_v21, %v732_v20 }
 0x14b   :  { %v889_v26 = vmul.f32 %v881_v22, %v6920_v13  ;;  %v877_v27 = vmul.f32 0.044715, %v775_v23  ;;  %v869_v5 = vmul.f32 0.5, %v775_v23 }
 0x14d   :  { %v897_v29 = vadd.f32 %v889_v26, %v6920_v13  ;;  %v885_v30 = vmul.f32 %v877_v27, %v775_v23 }
 0x14f   :  { %v893_v31 = vmul.f32 %v885_v30, %v775_v23  ;;  %v905_v33 = vmul.f32 0.7978846, %v897_v29 }
 0x151   :  { %v901_v35 = vadd.f32 %v893_v31, %v775_v23  ;;  %6648 = vtanh.f32 %v905_v33  ;;  %v6232_v31 = vld [vmem:[#allocation8 + $0x5f0] ss:$12 sps:$4 sm:$0xff]  }
 0x152   :  { %5709 = vmatprep.subr.bf16.mxu1 %v6232_v31 }
 0x153   :  { %v909_v38 = vmul.f32 0.7978846, %v901_v35 }
 0x155   :  { %6650 = vtanh.f32 %v909_v38 }
 0x15e   :  { %v6649_v48 = vpop.eup %6648 }
 0x15f   :  { %v921_v60 = vadd.f32 1.0, %v6649_v48 }
 0x161   :  { %v929_v16 = vmul.f32 %v921_v60, %v865_v4 }
 0x162   :  { %v6651_v53 = vpop.eup %6650  ;;  %v856_v56 = vpop.f32.mrf.mxu0 }
 0x163   :  { %v813_v55 = vpop.f32.mrf.mxu1  ;;  %v925_v1 = vadd.f32 1.0, %v6651_v53 }
 0x164   :  { %v814_v62 = vadd.f32 %v813_v55, %v204_v49  ;;  %v858_v3 = vpop.f32.mrf.mxu0 }
 0x165   :  { %v815_v2 = vpop.f32.mrf.mxu1  ;;  %v933_v17 = vmul.f32 %v925_v1, %v869_v5 }
 0x166   :  { %v857_v6 = vadd.f32 %v856_v56, %v814_v62  ;;  %v816_v7 = vadd.f32 %v815_v2, %v208_v52  ;;  %v860_v9 = vpop.f32.mrf.mxu0 }
 0x167   :  { %v817_v8 = vpop.f32.mrf.mxu1  ;;  %v6941_v22 = vpack.c.bf16 %v933_v17, %v929_v16  ;;  %v6948_v17 = vsub.s32 1, %v6907_v57 }
 0x168   :  { %v875_v18 = vmul.f32 0.044715, %v857_v6  ;;  %v859_v19 = vadd.f32 %v858_v3, %v816_v7  ;;  %v818_v20 = vadd.f32 %v817_v8, %v204_v49  ;;  %v862_v26 = vpop.f32.mrf.mxu0  ;;  %v867_v56 = vmul.f32 0.5, %v857_v6 }
 0x169   :  { %v819_v21 = vpop.f32.mrf.mxu1 }
 0x16a   :  { %v883_v24 = vmul.f32 %v875_v18, %v857_v6  ;;  %v876_v25 = vmul.f32 0.044715, %v859_v19  ;;  %v861_v13 = vadd.f32 %v860_v9, %v818_v20  ;;  %v820_v23 = vadd.f32 %v819_v21, %v208_v52 }
 0x16b   :  { %v868_v58 = vmul.f32 0.5, %v859_v19  ;;  %v1174_v18 = vrot.slane %v1165_v15, %v6948_v17 }
 0x16c   :  { %v891_v27 = vmul.f32 %v883_v24, %v857_v6  ;;  %v884_v28 = vmul.f32 %v876_v25, %v859_v19  ;;  %v879_v29 = vmul.f32 0.044715, %v861_v13  ;;  %v863_v30 = vadd.f32 %v862_v26, %v820_v23 }
 0x16d   :  { %v871_v60 = vmul.f32 0.5, %v861_v13 }
 0x16e   :  { %v899_v32 = vadd.f32 %v891_v27, %v857_v6  ;;  %v892_v33 = vmul.f32 %v884_v28, %v859_v19  ;;  %v887_v34 = vmul.f32 %v879_v29, %v861_v13  ;;  %v880_v35 = vmul.f32 0.044715, %v863_v30 }
 0x16f   :  { %v872_v2 = vmul.f32 0.5, %v863_v30  ;;  %v1170_v6 = vrot.slane %v1165_v15, %v6912_v63 }
 0x170   :  { %v907_v36 = vmul.f32 0.7978846, %v899_v32  ;;  %v895_v38 = vmul.f32 %v887_v34, %v861_v13  ;;  %v888_v39 = vmul.f32 %v880_v35, %v863_v30  ;;  %v900_v40 = vadd.f32 %v892_v33, %v859_v19 }
 0x172   :  { %6652 = vtanh.f32 %v907_v36  ;;  %v903_v41 = vadd.f32 %v895_v38, %v861_v13  ;;  %v896_v42 = vmul.f32 %v888_v39, %v863_v30  ;;  %v908_v43 = vmul.f32 0.7978846, %v900_v40 }
 0x174   :  { %v911_v46 = vmul.f32 0.7978846, %v903_v41  ;;  %v904_v47 = vadd.f32 %v896_v42, %v863_v30  ;;  %6654 = vtanh.f32 %v908_v43 }
 0x176   :  { %6656 = vtanh.f32 %v911_v46  ;;  %v912_v48 = vmul.f32 0.7978846, %v904_v47 }
 0x178   :  { %6658 = vtanh.f32 %v912_v48 }
 0x17f   :  { %v6653_v49 = vpop.eup %6652 }
 0x180   :  { %v923_v53 = vadd.f32 1.0, %v6653_v49 }
 0x181   :  { %v6655_v52 = vpop.eup %6654 }
 0x182   :  { %v924_v59 = vadd.f32 1.0, %v6655_v52  ;;  %v931_v4 = vmul.f32 %v923_v53, %v867_v56 }
 0x183   :  { %v6657_v55 = vpop.eup %6656  ;;  %v1744_v16 = vpop.f32.mrf.mxu1 }
 0x184   :  { %v927_v62 = vadd.f32 1.0, %v6657_v55  ;;  %v932_v7 = vmul.f32 %v924_v59, %v868_v58  ;;  %v200_v59 = vrot.slane %v6909_v61, %v6948_v17 }
 0x185   :  { %v6659_v1 = vpop.eup %6658  ;;  %v1746_v19 = vpop.f32.mrf.mxu1 }
 0x186   :  { %v928_v3 = vadd.f32 1.0, %v6659_v1  ;;  %v935_v5 = vmul.f32 %v927_v62, %v871_v60  ;;  %v734_v62 = vadd.f32 %v6936_v51, %v200_v59  ;;  %v730_v1 = vadd.f32 %v6918_v11, %v200_v59 }
 0x187   :  { %v1748_v23 = vpop.f32.mrf.mxu1 }
 0x188   :  { %v936_v8 = vmul.f32 %v928_v3, %v872_v2  ;;  %v6943_v9 = vpack.c.bf16 %v935_v5, %v931_v4  ;;  %v6963_v2 = vadd.f32 %v6934_v50, %v734_v62  ;;  %v6966_v3 = vadd.f32 %v6916_v10, %v730_v1  ;;  %v6200_v1 = vld [vmem:[#allocation8 + $0x458] ss:$12 sps:$4 sm:$0xff]  }
 0x189   :  { %v1750_v34 = vpop.f32.mrf.mxu1  ;;  %v1178_v5 = vrot.slane %v1165_v15, %v6927_v44 }
 0x18a   :  { %v6945_v14 = vpack.c.bf16 %v936_v8, %v932_v7  ;;  %v878_v4 = vmul.f32 0.044715, %v6963_v2  ;;  %v874_v61 = vmul.f32 0.044715, %v6966_v3 }
 0x18c   :  { %v882_v10 = vmul.f32 %v874_v61, %v6966_v3 }
 0x1a2   :  { %v1701_v20 = vpop.f32.mrf.mxu0 }
 0x1a3   :  { %v1702_v21 = vadd.f32 %v1701_v20, %v1170_v6 }
 0x1a4   :  { %v1703_v24 = vpop.f32.mrf.mxu0 }
 0x1a5   :  { %v6952_v25 = vadd.f32 %v1744_v16, %v1702_v21  ;;  %v1704_v13 = vadd.f32 %v1703_v24, %v1174_v18  ;;  %v1182_v16 = vrot.slane %v1165_v15, %v6930_v45 }
 0x1a6   :  { %v1705_v26 = vpop.f32.mrf.mxu0 }
 0x1a7   :  { %v1847_v27 = vmul.f32 0.044715, %v6952_v25  ;;  %v1747_v28 = vadd.f32 %v1746_v19, %v1704_v13  ;;  %v1706_v29 = vadd.f32 %v1705_v26, %v1170_v6  ;;  %v886_v6 = vmul.f32 %v878_v4, %v6963_v2 }
 0x1a8   :  { %v1707_v30 = vpop.f32.mrf.mxu0 }
 0x1a9   :  { %v1855_v57 = vmul.f32 %v1847_v27, %v6952_v25  ;;  %v1848_v31 = vmul.f32 0.044715, %v1747_v28  ;;  %v1749_v32 = vadd.f32 %v1748_v23, %v1706_v29  ;;  %v1708_v33 = vadd.f32 %v1707_v30, %v1174_v18 }
 0x1ab   :  { %v1863_v35 = vmul.f32 %v1855_v57, %v6952_v25  ;;  %v1856_v36 = vmul.f32 %v1848_v31, %v1747_v28  ;;  %v1851_v38 = vmul.f32 0.044715, %v1749_v32  ;;  %v1751_v39 = vadd.f32 %v1750_v34, %v1708_v33 }
 0x1ac   :  { %v1843_v23 = vmul.f32 0.5, %v1749_v32  ;;  %v1840_v33 = vmul.f32 0.5, %v1747_v28  ;;  %v1839_v34 = vmul.f32 0.5, %v6952_v25 }
 0x1ad   :  { %v1871_v40 = vadd.f32 %v1863_v35, %v6952_v25  ;;  %v1859_v41 = vmul.f32 %v1851_v38, %v1749_v32  ;;  %v1852_v42 = vmul.f32 0.044715, %v1751_v39  ;;  %v1864_v43 = vmul.f32 %v1856_v36, %v1747_v28 }
 0x1ae   :  { %v1844_v30 = vmul.f32 0.5, %v1751_v39  ;;  %v894_v36 = vmul.f32 %v886_v6, %v6963_v2 }
 0x1af   :  { %v1867_v46 = vmul.f32 %v1859_v41, %v1749_v32  ;;  %v1860_v47 = vmul.f32 %v1852_v42, %v1751_v39  ;;  %v1879_v48 = vmul.f32 0.7978846, %v1871_v40  ;;  %v1872_v49 = vadd.f32 %v1864_v43, %v1747_v28 }
 0x1b1   :  { %v1875_v52 = vadd.f32 %v1867_v46, %v1749_v32  ;;  %v1868_v53 = vmul.f32 %v1860_v47, %v1751_v39  ;;  %v1880_v55 = vmul.f32 0.7978846, %v1872_v49  ;;  %6660 = vtanh.f32 %v1879_v48 }
 0x1b3   :  { %v1876_v56 = vadd.f32 %v1868_v53, %v1751_v39  ;;  %v1883_v58 = vmul.f32 0.7978846, %v1875_v52  ;;  %6662 = vtanh.f32 %v1880_v55  ;;  %v6196_v53 = vld [vmem:[#allocation8 + $0x3b0] ss:$12 sps:$4 sm:$0xff]   ;;  %v890_v55 = vmul.f32 %v882_v10, %v6966_v3 }
 0x1b5   :  { %v1884_v60 = vmul.f32 0.7978846, %v1876_v56  ;;  %6664 = vtanh.f32 %v1883_v58  ;;  %v902_v56 = vadd.f32 %v894_v36, %v6963_v2  ;;  %v6225_v36 = vld [vmem:[#allocation8 + $0x3e0] ss:$12 sps:$4 sm:$0xff]  }
 0x1b7   :  { %6666 = vtanh.f32 %v1884_v60 }
 0x1be   :  { %v6661_v7 = vpop.eup %6660 }
 0x1bf   :  { %v1895_v26 = vadd.f32 1.0, %v6661_v7 }
 0x1c0   :  { %v6663_v8 = vpop.eup %6662 }
 0x1c1   :  { %v1896_v13 = vadd.f32 1.0, %v6663_v8  ;;  %v1903_v46 = vmul.f32 %v1895_v26, %v1839_v34  ;;  %v6201_v8 = vld [vmem:[#allocation8 + $0x398] ss:$12 sps:$4 sm:$0xff]   ;;  %v6210_v26 = vld [vmem:[#allocation8 + $0x428] ss:$12 sps:$4 sm:$0xff]  }
 0x1c2   :  { %v6665_v51 = vpop.eup %6664  ;;  %v1830_v18 = vpop.f32.mrf.mxu0  ;;  %v6221_v34 = vld [vmem:[#allocation8 + $0x338] ss:$12 sps:$4 sm:$0xff]  }
 0x1c3   :  { %v1787_v11 = vpop.f32.mrf.mxu1  ;;  %v1899_v19 = vadd.f32 1.0, %v6665_v51  ;;  %v1904_v43 = vmul.f32 %v1896_v13, %v1840_v33  ;;  %v910_v51 = vmul.f32 0.7978846, %v902_v56  ;;  %v6220_v33 = vld [vmem:[#allocation8 + $0x3f8] ss:$12 sps:$4 sm:$0xff]  }
 0x1c4   :  { %v1788_v50 = vadd.f32 %v1787_v11, %v1178_v5  ;;  %v6667_v20 = vpop.eup %6666  ;;  %v1832_v24 = vpop.f32.mrf.mxu0 }
 0x1c5   :  { %v1789_v21 = vpop.f32.mrf.mxu1  ;;  %v1900_v15 = vadd.f32 1.0, %v6667_v20  ;;  %v1907_v35 = vmul.f32 %v1899_v19, %v1843_v23  ;;  %6668 = vtanh.f32 %v910_v51 }
 0x1c6   :  { %v6974_v27 = vadd.f32 %v1830_v18, %v1788_v50  ;;  %v1790_v29 = vadd.f32 %v1789_v21, %v1182_v16  ;;  %v1834_v31 = vpop.f32.mrf.mxu0  ;;  %v6205_v18 = vld [vmem:[#allocation8 + $0x440] ss:$12 sps:$4 sm:$0xff]  }
 0x1c7   :  { %v1791_v57 = vpop.f32.mrf.mxu1  ;;  %v1908_v32 = vmul.f32 %v1900_v15, %v1844_v30  ;;  %v6985_v52 = vpack.c.bf16 %v1907_v35, %v1903_v46  ;;  %v6211_v15 = vld [vmem:[#allocation8 + $0x368] ss:$12 sps:$4 sm:$0xff]  }
 0x1c8   :  { %v1849_v38 = vmul.f32 0.044715, %v6974_v27  ;;  %v6979_v40 = vadd.f32 %v1832_v24, %v1790_v29  ;;  %v1792_v41 = vadd.f32 %v1791_v57, %v1178_v5  ;;  %v1836_v25 = vpop.f32.mrf.mxu0  ;;  %v6206_v24 = vld [vmem:[#allocation8 + $0x380] ss:$12 sps:$4 sm:$0xff]   ;;  %v6215_v57 = vld [vmem:[#allocation8 + $0x410] ss:$12 sps:$4 sm:$0xff]  }
 0x1c9   :  { %v1793_v42 = vpop.f32.mrf.mxu1  ;;  %v1912_v49 = vpack.c.bf16 %v1908_v32, %v1904_v43  ;;  %v6230_v46 = vld [vmem:[#allocation8 + $0x3c8] ss:$12 sps:$4 sm:$0xff]  }
 0x1ca   :  { %v1857_v39 = vmul.f32 %v1849_v38, %v6974_v27  ;;  %v1850_v47 = vmul.f32 0.044715, %v6979_v40  ;;  %v6983_v48 = vadd.f32 %v1834_v31, %v1792_v41  ;;  %v1794_v28 = vadd.f32 %v1793_v42, %v1182_v16  ;;  %v6216_v31 = vld [vmem:[#allocation8 + $0x350] ss:$12 sps:$4 sm:$0xff]   ;;  %v6226_v42 = vld [vmem:[#allocation8 + $0x320] ss:$12 sps:$4 sm:$0xff]  }
 0x1cb   :  { %2587 = vmatprep.mubr.bf16.mxu0 %v1912_v49  ;;  %v898_v16 = vadd.f32 %v890_v55, %v6966_v3  ;;  %v1842_v55 = vmul.f32 0.5, %v6979_v40 }
 0x1cc   :  { %v1865_v58 = vmul.f32 %v1857_v39, %v6974_v27  ;;  %v1858_v59 = vmul.f32 %v1850_v47, %v6979_v40  ;;  %v1853_v60 = vmul.f32 0.044715, %v6983_v48  ;;  %v6992_v62 = vadd.f32 %v1836_v25, %v1794_v28  ;;  %2588 = vmatmul.mubr.bf16.vlgmr.msra.gmra.mxu0 %v6985_v52 }
 0x1cd   :  { %5688 = vmatpush3.bf16.msra.mxu0 %v6196_v53  ;;  %2673 = vmatprep.mubr.bf16.mxu0 %v1912_v49  ;;  %v906_v13 = vmul.f32 0.7978846, %v898_v16  ;;  %v1845_v25 = vmul.f32 0.5, %v6983_v48  ;;  %v866_v16 = vmul.f32 0.5, %v6966_v3  ;;  %v6241_v3 = vld [vmem:[#allocation8 + $0x518] ss:$12 sps:$4 sm:$0xff]  }
 0x1ce   :  { %v1873_v4 = vadd.f32 %v1865_v58, %v6974_v27  ;;  %v1866_v5 = vmul.f32 %v1858_v59, %v6979_v40  ;;  %v1861_v7 = vmul.f32 %v1853_v60, %v6983_v48  ;;  %v1854_v61 = vmul.f32 0.044715, %v6992_v62  ;;  %5689 = vmatprep.subr.bf16.mxu0 %v6200_v1  ;;  %v6231_v59 = vld [vmem:[#allocation8 + $0x308] ss:$12 sps:$4 sm:$0xff]  }
 0x1cf   :  { %v1846_v56 = vmul.f32 0.5, %v6992_v62  ;;  %v1841_v60 = vmul.f32 0.5, %v6974_v27  ;;  %v6237_v27 = vld [vmem:[#allocation8 + $0x5d8] ss:$12 sps:$4 sm:$0xff]  }
 0x1d0   :  { %v1869_v6 = vmul.f32 %v1861_v7, %v6983_v48  ;;  %v1862_v11 = vmul.f32 %v1854_v61, %v6992_v62  ;;  %v1874_v50 = vadd.f32 %v1866_v5, %v6979_v40  ;;  %v1881_v19 = vmul.f32 0.7978846, %v1873_v4 }
 0x1d1   :  { %5690 = vmatpush3.bf16.msra.mxu0 %v6201_v8  ;;  %v870_v4 = vmul.f32 0.5, %v6963_v2  ;;  %v6235_v8 = vld [vmem:[#allocation8 + $0xac] ss:$12 sps:$4 sm:$0xff]  }
 0x1d2   :  { %v1877_v20 = vadd.f32 %v1869_v6, %v6983_v48  ;;  %v1870_v10 = vmul.f32 %v1862_v11, %v6992_v62  ;;  %v1882_v21 = vmul.f32 0.7978846, %v1874_v50  ;;  %5691 = vmatprep.subr.bf16.mxu0 %v6205_v18  ;;  %v6669_v35 = vpop.eup %6668  ;;  %v6236_v6 = vld [vmem:[#allocation8 + $0x530] ss:$12 sps:$4 sm:$0xff]   ;;  %v6240_v50 = vld [vmem:[#allocation8 + $0x94] ss:$12 sps:$4 sm:$0xff]  }
 0x1d3   :  { %v926_v53 = vadd.f32 1.0, %v6669_v35  ;;  %v6258_v35 = vld [vmem:[#allocation8 + $0x30] ss:$12 sps:$4 sm:$0xff]  }
 0x1d4   :  { %v1885_v23 = vmul.f32 0.7978846, %v1877_v20  ;;  %v1878_v29 = vadd.f32 %v1870_v10, %v6992_v62  ;;  %6670 = vtanh.f32 %v1882_v21  ;;  %v6233_v62 = vld [vmem:[#allocation8 + $0xa8] ss:$12 sps:$4 sm:$0xff]   ;;  %v6242_v20 = vld [vmem:[#allocation8 + $0x5c0] ss:$12 sps:$4 sm:$0xff]  }
 0x1d5   :  { %6672 = vtanh.f32 %v1881_v19  ;;  %5692 = vmatpush3.bf16.msra.mxu0 %v6206_v24  ;;  %v934_v51 = vmul.f32 %v926_v53, %v870_v4  ;;  %v6238_v19 = vld [vmem:[#allocation8 + $0x90] ss:$12 sps:$4 sm:$0xff]   ;;  %v6246_v21 = vld [vmem:[#allocation8 + $0x500] ss:$12 sps:$4 sm:$0xff]   ;;  %v6243_v24 = vld [vmem:[#allocation8 + $0x78] ss:$12 sps:$4 sm:$0xff]  }
 0x1d6   :  { %6674 = vtanh.f32 %v1885_v23  ;;  %v1886_v30 = vmul.f32 0.7978846, %v1878_v29  ;;  %5693 = vmatprep.subr.bf16.mxu0 %v6210_v26  ;;  %v6245_v10 = vld [vmem:[#allocation8 + $0x7c] ss:$12 sps:$4 sm:$0xff]   ;;  %v6250_v23 = vld [vmem:[#allocation8 + $0x64] ss:$12 sps:$4 sm:$0xff]  }
 0x1d7   :  { %6676 = vtanh.f32 %v906_v13  ;;  %v6247_v13 = vld [vmem:[#allocation8 + $0x5a8] ss:$12 sps:$4 sm:$0xff]   ;;  %v6248_v26 = vld [vmem:[#allocation8 + $0x60] ss:$12 sps:$4 sm:$0xff]   ;;  %v6252_v29 = vld [vmem:[#allocation8 + $0x590] ss:$12 sps:$4 sm:$0xff]  }
 0x1d8   :  { %6678 = vtanh.f32 %v1886_v30  ;;  %v6255_v30 = vld [vmem:[#allocation8 + $0x4c] ss:$12 sps:$4 sm:$0xff]   ;;  %v6283_v53 = vld [vmem:[#allocation8 + $0x214] ss:$12 sps:$4 sm:$0xff]  }
 0x1d9   :  { %5694 = vmatpush3.bf16.msra.mxu0 %v6211_v15  ;;  %v6256_v15 = vld [vmem:[#allocation8 + $0x4d0] ss:$12 sps:$4 sm:$0xff]   ;;  %v6284_v4 = vld [vmem:[#allocation8 + $0x138] ss:$12 sps:$4 sm:$0xff]  }
 0x1da   :  { %5695 = vmatprep.subr.bf16.mxu0 %v6215_v57  ;;  %v6253_v57 = vld [vmem:[#allocation8 + $0x48] ss:$12 sps:$4 sm:$0xff]  }
 0x1dd   :  { %5696 = vmatpush3.bf16.msra.mxu0 %v6216_v31  ;;  %v6257_v31 = vld [vmem:[#allocation8 + $0x578] ss:$12 sps:$4 sm:$0xff]  }
 0x1de   :  { %5697 = vmatprep.subr.bf16.mxu0 %v6220_v33  ;;  %v6260_v33 = vld [vmem:[#allocation8 + $0x34] ss:$12 sps:$4 sm:$0xff]  }
 0x1e1   :  { %v6671_v38 = vpop.eup %6670  ;;  %5698 = vmatpush3.bf16.msra.mxu0 %v6221_v34  ;;  %v6261_v34 = vld [vmem:[#allocation8 + $0x4b8] ss:$12 sps:$4 sm:$0xff]  }
 0x1e2   :  { %v6673_v41 = vpop.eup %6672  ;;  %5699 = vmatprep.subr.bf16.mxu0 %v6225_v36  ;;  %v1898_v39 = vadd.f32 1.0, %v6671_v38  ;;  %v6262_v36 = vld [vmem:[#allocation8 + $0x560] ss:$12 sps:$4 sm:$0xff]   ;;  %v6265_v38 = vld [vmem:[#allocation8 + $0x1c] ss:$12 sps:$4 sm:$0xff]  }
 0x1e3   :  { %v6675_v32 = vpop.eup %6674  ;;  %v1897_v49 = vadd.f32 1.0, %v6673_v41  ;;  %v6266_v41 = vld [vmem:[#allocation8 + $0x4a0] ss:$12 sps:$4 sm:$0xff]  }
 0x1e4   :  { %v6677_v43 = vpop.eup %6676  ;;  %v1901_v47 = vadd.f32 1.0, %v6675_v32  ;;  %v1906_v7 = vmul.f32 %v1898_v39, %v1842_v55  ;;  %v6263_v32 = vld [vmem:[#allocation8 + $0x18] ss:$12 sps:$4 sm:$0xff]   ;;  %v6268_v39 = vld [vmem:[#allocation8] ss:$12 sps:$4 sm:$0xff]  }
 0x1e5   :  { %v6679_v28 = vpop.eup %6678  ;;  %5700 = vmatpush3.bf16.msra.mxu0 %v6226_v42  ;;  %v922_v5 = vadd.f32 1.0, %v6677_v43  ;;  %v1905_v48 = vmul.f32 %v1897_v49, %v1841_v60  ;;  %v6267_v42 = vld [vmem:[#allocation8 + $0x548] ss:$12 sps:$4 sm:$0xff]   ;;  %v6270_v43 = vld [vmem:[#allocation8 + $0x4] ss:$12 sps:$4 sm:$0xff]  }
 0x1e6   :  { %v1902_v58 = vadd.f32 1.0, %v6679_v28  ;;  %v1909_v1 = vmul.f32 %v1901_v47, %v1845_v25  ;;  %5701 = vmatprep.subr.bf16.mxu0 %v6230_v46  ;;  %v6271_v46 = vld [vmem:[#allocation8 + $0x488] ss:$12 sps:$4 sm:$0xff]   ;;  %v6277_v47 = vld [vmem:[#allocation8 + $0x22c] ss:$12 sps:$4 sm:$0xff]  }
 0x1e7   :  { %v930_v18 = vmul.f32 %v922_v5, %v866_v16  ;;  %v6274_v28 = vld [vmem:[#allocation8 + $0x16c] ss:$12 sps:$4 sm:$0xff]   ;;  %v6275_v25 = vld [vmem:[#allocation8 + $0x228] ss:$12 sps:$4 sm:$0xff]   ;;  %v6295_v5 = vld [vmem:[#allocation8 + $0x1e4] ss:$12 sps:$4 sm:$0xff]  }
 0x1e8   :  { %v1910_v61 = vmul.f32 %v1902_v58, %v1846_v56  ;;  %v7012_v11 = vpack.c.bf16 %v1909_v1, %v1905_v48  ;;  %v6272_v49 = vld [vmem:[#allocation8 + $0x168] ss:$12 sps:$4 sm:$0xff]   ;;  %v6281_v56 = vld [vmem:[#allocation8 + $0x210] ss:$12 sps:$4 sm:$0xff]   ;;  %v6287_v1 = vld [vmem:[#allocation8 + $0x1f8] ss:$12 sps:$4 sm:$0xff]  }
 0x1e9   :  { %5702 = vmatpush3.bf16.msra.mxu0 %v6231_v59  ;;  %v7015_v2 = vpack.c.bf16 %v934_v51, %v930_v18  ;;  %v6280_v55 = vld [vmem:[#allocation8 + $0x154] ss:$12 sps:$4 sm:$0xff]   ;;  %v6278_v58 = vld [vmem:[#allocation8 + $0x150] ss:$12 sps:$4 sm:$0xff]   ;;  %v6301_v48 = vld [vmem:[#allocation8 + $0x1cc] ss:$12 sps:$4 sm:$0xff]  }
 0x1ea   :  { %v1914_v40 = vpack.c.bf16 %v1910_v61, %v1906_v7  ;;  %3235 = vmatprep.subr.bf16.mxu0 %v6235_v8  ;;  %v6289_v59 = vld [vmem:[#allocation8 + $0x1fc] ss:$12 sps:$4 sm:$0xff]   ;;  %v6292_v7 = vld [vmem:[#allocation8 + $0x124] ss:$12 sps:$4 sm:$0xff]   ;;  %v6293_v61 = vld [vmem:[#allocation8 + $0x1e0] ss:$12 sps:$4 sm:$0xff]  }
 0x1eb   :  { %v6286_v60 = vld [vmem:[#allocation8 + $0x13c] ss:$12 sps:$4 sm:$0xff]   ;;  %v6290_v8 = vld [vmem:[#allocation8 + $0x120] ss:$12 sps:$4 sm:$0xff]  }
 0x1ec   :  { %2630 = vmatprep.mubr.bf16.mxu1 %v1914_v40  ;;  %2674 = vmatmul.mubr.bf16.vlgmr.msra.gmra.mxu0 %v6985_v52  ;;  %v6251_v52 = vld [vmem:[#allocation8 + $0x4e8] ss:$12 sps:$4 sm:$0xff]   ;;  %v6298_v16 = vld [vmem:[#allocation8 + $0x10c] ss:$12 sps:$4 sm:$0xff]   ;;  %v6302_v18 = vld [vmem:[#allocation8 + $0xf0] ss:$12 sps:$4 sm:$0xff]  }
 0x1ed   :  { %2631 = vmatmul.mubr.bf16.vlgmr.msra.gmra.mxu1 %v7012_v11  ;;  %3236 = vmatpush1.bf16.msra.mxu0 %v6233_v62  ;;  %v6299_v51 = vld [vmem:[#allocation8 + $0x1c8] ss:$12 sps:$4 sm:$0xff]  }
 0x1ee   :  { %5710 = vmatpush3.bf16.msra.mxu1 %v6236_v6  ;;  %3267 = vmatprep.mubr.bf16.mxu0 %v7015_v2  ;;  %v6307_v6 = vld [vmem:[#allocation8 + $0x1b4] ss:$12 sps:$4 sm:$0xff]  }
 0x1ef   :  { %2714 = vmatprep.mubr.bf16.mxu1 %v1914_v40  ;;  %5711 = vmatprep.subr.bf16.mxu1 %v6237_v27  ;;  %v6296_v40 = vld [vmem:[#allocation8 + $0x108] ss:$12 sps:$4 sm:$0xff]  }
 0x1f0   :  { %3237 = vmatprep.subr.bf16.mxu0 %v6240_v50  ;;  %v6304_v62 = vld [vmem:[#allocation8 + $0xf4] ss:$12 sps:$4 sm:$0xff]   ;;  %v6313_v27 = vld [vmem:[#allocation8 + $0x19c] ss:$12 sps:$4 sm:$0xff]  }
 0x1f1   :  { %3238 = vmatpush1.bf16.msra.mxu0 %v6238_v19  ;;  %v6310_v50 = vld [vmem:[#allocation8 + $0xdc] ss:$12 sps:$4 sm:$0xff]   ;;  %v6308_v19 = vld [vmem:[#allocation8 + $0xd8] ss:$12 sps:$4 sm:$0xff]  }
 0x1f2   :  { %5712 = vmatpush3.bf16.msra.mxu1 %v6241_v3  ;;  %3239 = vmatprep.subr.bf16.mxu0 %v6245_v10  ;;  %v6311_v3 = vld [vmem:[#allocation8 + $0x198] ss:$12 sps:$4 sm:$0xff]  }
 0x1f3   :  { %5713 = vmatprep.subr.bf16.mxu1 %v6242_v20  ;;  %v6319_v20 = vld [vmem:[#allocation8 + $0x184] ss:$12 sps:$4 sm:$0xff]  }
 0x1f4   :  { %v6316_v10 = vld [vmem:[#allocation8 + $0xc4] ss:$12 sps:$4 sm:$0xff]  }
 0x1f5   :  { %3240 = vmatpush1.bf16.msra.mxu0 %v6243_v24  ;;  %v6314_v24 = vld [vmem:[#allocation8 + $0xc0] ss:$12 sps:$4 sm:$0xff]  }
 0x1f6   :  { %5714 = vmatpush3.bf16.msra.mxu1 %v6246_v21  ;;  %3241 = vmatprep.subr.bf16.mxu0 %v6250_v23  ;;  %v6317_v21 = vld [vmem:[#allocation8 + $0x180] ss:$12 sps:$4 sm:$0xff]   ;;  %v6323_v23 = vld [vmem:[#allocation8 + $0x170] ss:$12 sps:$4 sm:$0xff]  }
 0x1f7   :  { %5715 = vmatprep.subr.bf16.mxu1 %v6247_v13  ;;  %v6322_v13 = vld [vmem:[#allocation8 + $0x2ec] ss:$12 sps:$4 sm:$0xff]  }
 0x1f9   :  { %3242 = vmatpush1.bf16.msra.mxu0 %v6248_v26  ;;  %v6324_v26 = vld [vmem:[#allocation8 + $0xb0] ss:$12 sps:$4 sm:$0xff]  }
 0x1fa   :  { %5716 = vmatpush3.bf16.msra.mxu1 %v6251_v52  ;;  %3243 = vmatprep.subr.bf16.mxu0 %v6255_v30  ;;  %v6320_v52 = vld [vmem:[#allocation8 + $0x2e8] ss:$12 sps:$4 sm:$0xff]   ;;  %v6328_v30 = vld [vmem:[#allocation8 + $0x158] ss:$12 sps:$4 sm:$0xff]  }
 0x1fb   :  { %5717 = vmatprep.subr.bf16.mxu1 %v6252_v29  ;;  %v6327_v29 = vld [vmem:[#allocation8 + $0x2d4] ss:$12 sps:$4 sm:$0xff]  }
 0x1fd   :  { %3244 = vmatpush1.bf16.msra.mxu0 %v6253_v57  ;;  %v6329_v57 = vld [vmem:[#allocation8 + $0x98] ss:$12 sps:$4 sm:$0xff]  }
 0x1fe   :  { %5718 = vmatpush3.bf16.msra.mxu1 %v6256_v15  ;;  %3245 = vmatprep.subr.bf16.mxu0 %v6260_v33  ;;  %v6325_v15 = vld [vmem:[#allocation8 + $0x2d0] ss:$12 sps:$4 sm:$0xff]   ;;  %v6333_v33 = vld [vmem:[#allocation8 + $0x140] ss:$12 sps:$4 sm:$0xff]  }
 0x1ff   :  { %5719 = vmatprep.subr.bf16.mxu1 %v6257_v31  ;;  %v6332_v31 = vld [vmem:[#allocation8 + $0x2bc] ss:$12 sps:$4 sm:$0xff]  }
 0x201   :  { %3246 = vmatpush1.bf16.msra.mxu0 %v6258_v35  ;;  %v6334_v35 = vld [vmem:[#allocation8 + $0x80] ss:$12 sps:$4 sm:$0xff]  }
 0x202   :  { %5720 = vmatpush3.bf16.msra.mxu1 %v6261_v34  ;;  %3247 = vmatprep.subr.bf16.mxu0 %v6265_v38  ;;  %v6330_v34 = vld [vmem:[#allocation8 + $0x2b8] ss:$12 sps:$4 sm:$0xff]   ;;  %v6338_v38 = vld [vmem:[#allocation8 + $0x128] ss:$12 sps:$4 sm:$0xff]  }
 0x203   :  { %5721 = vmatprep.subr.bf16.mxu1 %v6262_v36  ;;  %v6337_v36 = vld [vmem:[#allocation8 + $0x2a4] ss:$12 sps:$4 sm:$0xff]  }
 0x205   :  { %3248 = vmatpush1.bf16.msra.mxu0 %v6263_v32  ;;  %v6339_v32 = vld [vmem:[#allocation8 + $0x68] ss:$12 sps:$4 sm:$0xff]  }
 0x206   :  { %5722 = vmatpush3.bf16.msra.mxu1 %v6266_v41  ;;  %3249 = vmatprep.subr.bf16.mxu0 %v6270_v43  ;;  %v6335_v41 = vld [vmem:[#allocation8 + $0x2a0] ss:$12 sps:$4 sm:$0xff]   ;;  %v6340_v43 = vld [vmem:[#allocation8 + $0x288] ss:$12 sps:$4 sm:$0xff]  }
 0x207   :  { %5723 = vmatprep.subr.bf16.mxu1 %v6267_v42  ;;  %v6342_v42 = vld [vmem:[#allocation8 + $0x28c] ss:$12 sps:$4 sm:$0xff]  }
 0x209   :  { %3250 = vmatpush1.bf16.msra.mxu0 %v6268_v39  ;;  %v6347_v39 = vld [vmem:[#allocation8 + $0x274] ss:$12 sps:$4 sm:$0xff]  }
 0x20a   :  { %5724 = vmatpush3.bf16.msra.mxu1 %v6271_v46  ;;  %3251 = vmatprep.subr.bf16.mxu0 %v6274_v28  ;;  %v6344_v46 = vld [vmem:[#allocation8 + $0x50] ss:$12 sps:$4 sm:$0xff]  }
 0x20b   :  { %3278 = vmatprep.subr.bf16.mxu1 %v6277_v47  ;;  %v6348_v47 = vld [vmem:[#allocation8 + $0xf8] ss:$12 sps:$4 sm:$0xff]   ;;  %v6345_v28 = vld [vmem:[#allocation8 + $0x270] ss:$12 sps:$4 sm:$0xff]  }
 0x20d   :  { %2715 = vmatmul.mubr.bf16.vlgmr.msra.gmra.mxu1 %v7012_v11  ;;  %3252 = vmatpush2.bf16.msra.mxu0 %v6272_v49  ;;  %v6305_v11 = vld [vmem:[#allocation8 + $0x1b0] ss:$12 sps:$4 sm:$0xff]  }
 0x20e   :  { %3279 = vmatpush1.bf16.msra.mxu1 %v6275_v25  ;;  %3310 = vmatprep.mubr.bf16.mxu1 %v6945_v14  ;;  %v6349_v25 = vld [vmem:[#allocation8 + $0x38] ss:$12 sps:$4 sm:$0xff]   ;;  %v6352_v49 = vld [vmem:[#allocation8 + $0x25c] ss:$12 sps:$4 sm:$0xff]  }
 0x20f   :  { %3280 = vmatprep.subr.bf16.mxu1 %v6283_v53  ;;  %3253 = vmatprep.subr.bf16.mxu0 %v6280_v55  ;;  %v6353_v53 = vld [vmem:[#allocation8 + $0xe0] ss:$12 sps:$4 sm:$0xff]   ;;  %v6350_v55 = vld [vmem:[#allocation8 + $0x258] ss:$12 sps:$4 sm:$0xff]  }
 0x211   :  { %3254 = vmatpush2.bf16.msra.mxu0 %v6278_v58  ;;  %v6357_v58 = vld [vmem:[#allocation8 + $0x244] ss:$12 sps:$4 sm:$0xff]  }
 0x212   :  { %3281 = vmatpush1.bf16.msra.mxu1 %v6281_v56  ;;  %3255 = vmatprep.subr.bf16.mxu0 %v6286_v60  ;;  %v6354_v56 = vld [vmem:[#allocation8 + $0x20] ss:$12 sps:$4 sm:$0xff]  }
 0x213   :  { %3282 = vmatprep.subr.bf16.mxu1 %v6289_v59  ;;  %v6358_v59 = vld [vmem:[#allocation8 + $0xc8] ss:$12 sps:$4 sm:$0xff]   ;;  %v6355_v60 = vld [vmem:[#allocation8 + $0x240] ss:$12 sps:$4 sm:$0xff]  }
 0x215   :  { %3256 = vmatpush2.bf16.msra.mxu0 %v6284_v4  ;;  %v6360_v4 = vld [vmem:[#allocation8 + $0x2f0] ss:$12 sps:$4 sm:$0xff]  }
 0x216   :  { %3283 = vmatpush1.bf16.msra.mxu1 %v6287_v1  ;;  %3257 = vmatprep.subr.bf16.mxu0 %v6292_v7  ;;  %v6359_v1 = vld [vmem:[#allocation8 + $0x8] ss:$12 sps:$4 sm:$0xff]   ;;  %v6364_v7 = vld [vmem:[#allocation8 + $0x230] ss:$12 sps:$4 sm:$0xff]  }
 0x217   :  { %3284 = vmatprep.subr.bf16.mxu1 %v6295_v5  ;;  %v6363_v5 = vld [vmem:[#allocation5 + $0x2c4] ss:$48 sps:$4 sm:$0xff]  }
 0x219   :  { %3258 = vmatpush2.bf16.msra.mxu0 %v6290_v8  ;;  %v6365_v8 = vld [vmem:[#allocation8 + $0x2d8] ss:$12 sps:$4 sm:$0xff]  }
 0x21a   :  { %3285 = vmatpush1.bf16.msra.mxu1 %v6293_v61  ;;  %3259 = vmatprep.subr.bf16.mxu0 %v6298_v16  ;;  %v6361_v61 = vld [vmem:[#allocation5 + $0x2c0] ss:$48 sps:$4 sm:$0xff]  }
 0x21b   :  { %3286 = vmatprep.subr.bf16.mxu1 %v6301_v48  ;;  %v6368_v48 = vld [vmem:[#allocation5 + $0x264] ss:$48 sps:$4 sm:$0xff]  }
 0x21c   :  { %v6369_v16 = vld [vmem:[#allocation8 + $0x218] ss:$12 sps:$4 sm:$0xff]  }
 0x21d   :  { %3260 = vmatpush2.bf16.msra.mxu0 %v6296_v40  ;;  %v6370_v40 = vld [vmem:[#allocation8 + $0x2c0] ss:$12 sps:$4 sm:$0xff]  }
 0x21e   :  { %3287 = vmatpush1.bf16.msra.mxu1 %v6299_v51  ;;  %3261 = vmatprep.subr.bf16.mxu0 %v6304_v62  ;;  %v6366_v51 = vld [vmem:[#allocation5 + $0x260] ss:$48 sps:$4 sm:$0xff]   ;;  %v6374_v62 = vld [vmem:[#allocation8 + $0x200] ss:$12 sps:$4 sm:$0xff]  }
 0x21f   :  { %3288 = vmatprep.subr.bf16.mxu1 %v6307_v6  ;;  %v6373_v6 = vld [vmem:[#allocation5 + $0x204] ss:$48 sps:$4 sm:$0xff]  }
 0x221   :  { %3262 = vmatpush2.bf16.msra.mxu0 %v6302_v18  ;;  %v6375_v18 = vld [vmem:[#allocation8 + $0x2a8] ss:$12 sps:$4 sm:$0xff]  }
 0x222   :  { %3289 = vmatpush1.bf16.msra.mxu1 %v6305_v11  ;;  %3263 = vmatprep.subr.bf16.mxu0 %v6310_v50  ;;  %v6371_v11 = vld [vmem:[#allocation5 + $0x200] ss:$48 sps:$4 sm:$0xff]   ;;  %v6380_v50 = vld [vmem:[#allocation8 + $0x290] ss:$12 sps:$4 sm:$0xff]  }
 0x223   :  { %3290 = vmatprep.subr.bf16.mxu1 %v6313_v27  ;;  %v6379_v27 = vld [vmem:[#allocation8 + $0x1e8] ss:$12 sps:$4 sm:$0xff]  }
 0x225   :  { %3264 = vmatpush2.bf16.msra.mxu0 %v6308_v19  ;;  %v6384_v19 = vld [vmem:[#allocation8 + $0x1d0] ss:$12 sps:$4 sm:$0xff]  }
 0x226   :  { %3291 = vmatpush1.bf16.msra.mxu1 %v6311_v3  ;;  %3265 = vmatprep.subr.bf16.mxu0 %v6316_v10  ;;  %v6383_v3 = vld [vmem:[#allocation5 + $0x144] ss:$48 sps:$4 sm:$0xff]  }
 0x227   :  { %3292 = vmatprep.subr.bf16.mxu1 %v6319_v20  ;;  %v6381_v20 = vld [vmem:[#allocation5 + $0x140] ss:$48 sps:$4 sm:$0xff]  }
 0x228   :  { %v6385_v10 = vld [vmem:[#allocation8 + $0x278] ss:$12 sps:$4 sm:$0xff]  }
 0x229   :  { %3266 = vmatpush2.bf16.msra.mxu0 %v6314_v24  ;;  %v6389_v24 = vld [vmem:[#allocation8 + $0x1b8] ss:$12 sps:$4 sm:$0xff]  }
 0x22a   :  { %3293 = vmatpush1.bf16.msra.mxu1 %v6317_v21  ;;  %5731 = vmatprep.subr.bf16.mxu0 %v6323_v23  ;;  %v6388_v21 = vld [vmem:[#allocation5 + $0xe4] ss:$48 sps:$4 sm:$0xff]   ;;  %v6390_v23 = vld [vmem:[#allocation8 + $0x260] ss:$12 sps:$4 sm:$0xff]  }
 0x22b   :  { %3294 = vmatprep.subr.bf16.mxu1 %v6322_v13  ;;  %v6386_v13 = vld [vmem:[#allocation5 + $0xe0] ss:$48 sps:$4 sm:$0xff]  }
 0x22c   :  { %3268 = vmatmul.mubr.bf16.vlgmr.msra.gmra.mxu0 %v6941_v22 }
 0x22d   :  { %5732 = vmatpush3.bf16.msra.mxu0 %v6324_v26  ;;  %3353 = vmatprep.mubr.bf16.mxu0 %v7015_v2  ;;  %v6343_v2 = vld [vmem:[#allocation8 + $0x110] ss:$12 sps:$4 sm:$0xff]   ;;  %v6394_v26 = vld [vmem:[#allocation8 + $0x1a0] ss:$12 sps:$4 sm:$0xff]  }
 0x22e   :  { %3295 = vmatpush2.bf16.msra.mxu1 %v6320_v52  ;;  %5733 = vmatprep.subr.bf16.mxu0 %v6328_v30  ;;  %v6393_v52 = vld [vmem:[#allocation5 + $0x84] ss:$48 sps:$4 sm:$0xff]  }
 0x22f   :  { %3296 = vmatprep.subr.bf16.mxu1 %v6327_v29  ;;  %v6391_v29 = vld [vmem:[#allocation5 + $0x80] ss:$48 sps:$4 sm:$0xff]  }
 0x230   :  { %v6395_v30 = vld [vmem:[#allocation8 + $0x248] ss:$12 sps:$4 sm:$0xff]  }
 0x231   :  { %5734 = vmatpush3.bf16.msra.mxu0 %v6329_v57  ;;  %v6399_v57 = vld [vmem:[#allocation8 + $0x188] ss:$12 sps:$4 sm:$0xff]  }
 0x232   :  { %3297 = vmatpush2.bf16.msra.mxu1 %v6325_v15  ;;  %5735 = vmatprep.subr.bf16.mxu0 %v6333_v33  ;;  %v6398_v15 = vld [vmem:[#allocation5 + $0x24] ss:$48 sps:$4 sm:$0xff]  }
 0x233   :  { %3298 = vmatprep.subr.bf16.mxu1 %v6332_v31  ;;  %v6396_v31 = vld [vmem:[#allocation5 + $0x20] ss:$48 sps:$4 sm:$0xff]   ;;  %v6405_v33 = vld [vmem:[#allocation5 + $0x8c4] ss:$48 sps:$4 sm:$0xff]  }
 0x235   :  { %5736 = vmatpush3.bf16.msra.mxu0 %v6334_v35  ;;  %v6403_v35 = vld [vmem:[#allocation5 + $0x8c0] ss:$48 sps:$4 sm:$0xff]  }
 0x236   :  { %3299 = vmatpush2.bf16.msra.mxu1 %v6330_v34  ;;  %5737 = vmatprep.subr.bf16.mxu0 %v6338_v38  ;;  %v6402_v34 = vld [vmem:[#allocation5 + $0x5c4] ss:$48 sps:$4 sm:$0xff]  }
 0x237   :  { %3300 = vmatprep.subr.bf16.mxu1 %v6337_v36  ;;  %v6400_v36 = vld [vmem:[#allocation5 + $0x5c0] ss:$48 sps:$4 sm:$0xff]   ;;  %v6411_v38 = vld [vmem:[#allocation5 + $0x864] ss:$48 sps:$4 sm:$0xff]  }
 0x239   :  { %5738 = vmatpush3.bf16.msra.mxu0 %v6339_v32  ;;  %v6409_v32 = vld [vmem:[#allocation5 + $0x860] ss:$48 sps:$4 sm:$0xff]  }
 0x23a   :  { %3301 = vmatpush2.bf16.msra.mxu1 %v6335_v41  ;;  %5739 = vmatprep.subr.bf16.mxu0 %v6343_v2  ;;  %v6408_v41 = vld [vmem:[#allocation5 + $0x564] ss:$48 sps:$4 sm:$0xff]  }
 0x23b   :  { %3302 = vmatprep.subr.bf16.mxu1 %v6342_v42  ;;  %v6406_v42 = vld [vmem:[#allocation5 + $0x560] ss:$48 sps:$4 sm:$0xff]   ;;  %v6417_v2 = vld [vmem:[#allocation5 + $0x804] ss:$48 sps:$4 sm:$0xff]  }
 0x23d   :  { %5740 = vmatpush3.bf16.msra.mxu0 %v6344_v46  ;;  %v6415_v46 = vld [vmem:[#allocation5 + $0x800] ss:$48 sps:$4 sm:$0xff]  }
 0x23e   :  { %3303 = vmatpush2.bf16.msra.mxu1 %v6340_v43  ;;  %5741 = vmatprep.subr.bf16.mxu0 %v6348_v47  ;;  %v6414_v43 = vld [vmem:[#allocation5 + $0x504] ss:$48 sps:$4 sm:$0xff]  }
 0x23f   :  { %3304 = vmatprep.subr.bf16.mxu1 %v6347_v39  ;;  %v6412_v39 = vld [vmem:[#allocation5 + $0x500] ss:$48 sps:$4 sm:$0xff]   ;;  %v6423_v47 = vld [vmem:[#allocation5 + $0x7a4] ss:$48 sps:$4 sm:$0xff]  }
 0x241   :  { %5742 = vmatpush3.bf16.msra.mxu0 %v6349_v25  ;;  %v6418_v25 = vld [vmem:[#allocation5 + $0x4a0] ss:$48 sps:$4 sm:$0xff]  }
 0x242   :  { %3305 = vmatpush2.bf16.msra.mxu1 %v6345_v28  ;;  %5743 = vmatprep.subr.bf16.mxu0 %v6353_v53  ;;  %v6420_v28 = vld [vmem:[#allocation5 + $0x4a4] ss:$48 sps:$4 sm:$0xff]  }
 0x243   :  { %3306 = vmatprep.subr.bf16.mxu1 %v6352_v49  ;;  %v6429_v49 = vld [vmem:[#allocation5 + $0x744] ss:$48 sps:$4 sm:$0xff]  }
 0x244   :  { %v6426_v53 = vld [vmem:[#allocation5 + $0x444] ss:$48 sps:$4 sm:$0xff]  }
 0x245   :  { %5744 = vmatpush3.bf16.msra.mxu0 %v6354_v56  ;;  %v6424_v56 = vld [vmem:[#allocation5 + $0x440] ss:$48 sps:$4 sm:$0xff]  }
 0x246   :  { %3307 = vmatpush2.bf16.msra.mxu1 %v6350_v55  ;;  %5745 = vmatprep.subr.bf16.mxu0 %v6358_v59  ;;  %v6427_v55 = vld [vmem:[#allocation5 + $0x740] ss:$48 sps:$4 sm:$0xff]   ;;  %v6432_v59 = vld [vmem:[#allocation5 + $0x3e4] ss:$48 sps:$4 sm:$0xff]  }
 0x247   :  { %3308 = vmatprep.subr.bf16.mxu1 %v6357_v58  ;;  %v6435_v58 = vld [vmem:[#allocation5 + $0x6e4] ss:$48 sps:$4 sm:$0xff]  }
 0x249   :  { %5746 = vmatpush3.bf16.msra.mxu0 %v6359_v1  ;;  %v6430_v1 = vld [vmem:[#allocation5 + $0x3e0] ss:$48 sps:$4 sm:$0xff]  }
 0x24a   :  { %3309 = vmatpush2.bf16.msra.mxu1 %v6355_v60  ;;  %4001 = vmatprep.subr.bf16.mxu0 %v6363_v5  ;;  %v6433_v60 = vld [vmem:[#allocation5 + $0x6e0] ss:$48 sps:$4 sm:$0xff]   ;;  %v6438_v5 = vld [vmem:[#allocation5 + $0x384] ss:$48 sps:$4 sm:$0xff]  }
 0x24b   :  { %5753 = vmatprep.subr.bf16.mxu1 %v6360_v4  ;;  %v6441_v4 = vld [vmem:[#allocation5 + $0x684] ss:$48 sps:$4 sm:$0xff]  }
 0x24c   :  { %3354 = vmatmul.mubr.bf16.vlgmr.msra.gmra.mxu0 %v6941_v22  ;;  %v6378_v22 = vld [vmem:[#allocation5 + $0x1a4] ss:$48 sps:$4 sm:$0xff]  }
 0x24d   :  { %3311 = vmatmul.mubr.bf16.vlgmr.msra.gmra.mxu1 %v6943_v9  ;;  %4002 = vmatpush1.bf16.msra.mxu0 %v6361_v61  ;;  %v6436_v61 = vld [vmem:[#allocation5 + $0x380] ss:$48 sps:$4 sm:$0xff]  }
 0x24e   :  { %5754 = vmatpush3.bf16.msra.mxu1 %v6364_v7  ;;  %3394 = vmatprep.mubr.bf16.mxu1 %v6945_v14  ;;  %v6376_v14 = vld [vmem:[#allocation5 + $0x1a0] ss:$48 sps:$4 sm:$0xff]  }
 0x24f   :  { %5755 = vmatprep.subr.bf16.mxu1 %v6365_v8  ;;  %4003 = vmatprep.subr.bf16.mxu0 %v6368_v48  ;;  %v6439_v7 = vld [vmem:[#allocation5 + $0x680] ss:$48 sps:$4 sm:$0xff]   ;;  %v6447_v8 = vld [vmem:[#allocation5 + $0x624] ss:$48 sps:$4 sm:$0xff]  }
 0x250   :  { %4033 = vmatprep.mubr.bf16.mxu0 %v6889_v54  ;;  %v6444_v48 = vld [vmem:[#allocation5 + $0x324] ss:$48 sps:$4 sm:$0xff]  }
 0x251   :  { %4004 = vmatpush1.bf16.msra.mxu0 %v6366_v51  ;;  %v6442_v51 = vld [vmem:[#allocation5 + $0x320] ss:$48 sps:$4 sm:$0xff]  }
 0x252   :  { %5756 = vmatpush3.bf16.msra.mxu1 %v6369_v16  ;;  %4005 = vmatprep.subr.bf16.mxu0 %v6373_v6  ;;  %v6445_v16 = vld [vmem:[#allocation5 + $0x620] ss:$48 sps:$4 sm:$0xff]   ;;  %v6474_v6 = vld [vmem:[#allocation5 + $0x8cc] ss:$48 sps:$4 sm:$0xff]  }
 0x253   :  { %5757 = vmatprep.subr.bf16.mxu1 %v6370_v40  ;;  %v6450_v40 = vld [vmem:[#allocation5 + $0x2cc] ss:$48 sps:$4 sm:$0xff]  }
 0x255   :  { %4006 = vmatpush1.bf16.msra.mxu0 %v6371_v11  ;;  %v6453_v11 = vld [vmem:[#allocation5 + $0x26c] ss:$48 sps:$4 sm:$0xff]  }
 0x256   :  { %5758 = vmatpush3.bf16.msra.mxu1 %v6374_v62  ;;  %4007 = vmatprep.subr.bf16.mxu0 %v6378_v22  ;;  %v6448_v62 = vld [vmem:[#allocation5 + $0x2c8] ss:$48 sps:$4 sm:$0xff]   ;;  %v6480_v22 = vld [vmem:[#allocation5 + $0x86c] ss:$48 sps:$4 sm:$0xff]  }
 0x257   :  { %5759 = vmatprep.subr.bf16.mxu1 %v6375_v18  ;;  %v6472_v18 = vld [vmem:[#allocation5 + $0x8c8] ss:$48 sps:$4 sm:$0xff]  }
 0x259   :  { %4008 = vmatpush1.bf16.msra.mxu0 %v6376_v14  ;;  %v6456_v14 = vld [vmem:[#allocation5 + $0x20c] ss:$48 sps:$4 sm:$0xff]  }
 0x25a   :  { %5760 = vmatpush3.bf16.msra.mxu1 %v6379_v27  ;;  %4009 = vmatprep.subr.bf16.mxu0 %v6383_v3  ;;  %v6451_v27 = vld [vmem:[#allocation5 + $0x268] ss:$48 sps:$4 sm:$0xff]   ;;  %v6486_v3 = vld [vmem:[#allocation5 + $0x80c] ss:$48 sps:$4 sm:$0xff]  }
 0x25b   :  { %5761 = vmatprep.subr.bf16.mxu1 %v6380_v50  ;;  %v6478_v50 = vld [vmem:[#allocation5 + $0x868] ss:$48 sps:$4 sm:$0xff]  }
 0x25d   :  { %4010 = vmatpush1.bf16.msra.mxu0 %v6381_v20  ;;  %v6459_v20 = vld [vmem:[#allocation5 + $0x1ac] ss:$48 sps:$4 sm:$0xff]  }
 0x25e   :  { %5762 = vmatpush3.bf16.msra.mxu1 %v6384_v19  ;;  %4011 = vmatprep.subr.bf16.mxu0 %v6388_v21  ;;  %v6454_v19 = vld [vmem:[#allocation5 + $0x208] ss:$48 sps:$4 sm:$0xff]   ;;  %v6492_v21 = vld [vmem:[#allocation5 + $0x7ac] ss:$48 sps:$4 sm:$0xff]  }
 0x25f   :  { %5763 = vmatprep.subr.bf16.mxu1 %v6385_v10  ;;  %v6484_v10 = vld [vmem:[#allocation5 + $0x808] ss:$48 sps:$4 sm:$0xff]  }
 0x261   :  { %4012 = vmatpush1.bf16.msra.mxu0 %v6386_v13  ;;  %v6462_v13 = vld [vmem:[#allocation5 + $0x14c] ss:$48 sps:$4 sm:$0xff]  }
 0x262   :  { %5764 = vmatpush3.bf16.msra.mxu1 %v6389_v24  ;;  %4013 = vmatprep.subr.bf16.mxu0 %v6393_v52  ;;  %v6457_v24 = vld [vmem:[#allocation5 + $0x1a8] ss:$48 sps:$4 sm:$0xff]   ;;  %v6498_v52 = vld [vmem:[#allocation5 + $0x74c] ss:$48 sps:$4 sm:$0xff]  }
 0x263   :  { %5765 = vmatprep.subr.bf16.mxu1 %v6390_v23  ;;  %v6490_v23 = vld [vmem:[#allocation5 + $0x7a8] ss:$48 sps:$4 sm:$0xff]  }
 0x265   :  { %4014 = vmatpush1.bf16.msra.mxu0 %v6391_v29  ;;  %v6504_v29 = vld [vmem:[#allocation5 + $0x6ec] ss:$48 sps:$4 sm:$0xff]  }
 0x266   :  { %5766 = vmatpush3.bf16.msra.mxu1 %v6394_v26  ;;  %4015 = vmatprep.subr.bf16.mxu0 %v6398_v15  ;;  %v6496_v26 = vld [vmem:[#allocation5 + $0x748] ss:$48 sps:$4 sm:$0xff]   ;;  %v6468_v15 = vld [vmem:[#allocation5 + $0x8c] ss:$48 sps:$4 sm:$0xff]  }
 0x267   :  { %5767 = vmatprep.subr.bf16.mxu1 %v6395_v30  ;;  %v6463_v30 = vld [vmem:[#allocation5 + $0xe8] ss:$48 sps:$4 sm:$0xff]  }
 0x269   :  { %4016 = vmatpush1.bf16.msra.mxu0 %v6396_v31 }
 0x26a   :  { %5768 = vmatpush3.bf16.msra.mxu1 %v6399_v57  ;;  %4017 = vmatprep.subr.bf16.mxu0 %v6402_v34  ;;  %v6502_v57 = vld [vmem:[#allocation5 + $0x6e8] ss:$48 sps:$4 sm:$0xff]  }
 0x26b   :  { %4044 = vmatprep.subr.bf16.mxu1 %v6405_v33  ;;  %v6510_v33 = vld [vmem:[#allocation5 + $0x68c] ss:$48 sps:$4 sm:$0xff]   ;;  %v6466_v34 = vld [vmem:[#allocation5 + $0x88] ss:$48 sps:$4 sm:$0xff]  }
 0x26d   :  { %3395 = vmatmul.mubr.bf16.vlgmr.msra.gmra.mxu1 %v6943_v9  ;;  %4018 = vmatpush2.bf16.msra.mxu0 %v6400_v36  ;;  %v6421_v9 = vld [vmem:[#allocation5 + $0x7a0] ss:$48 sps:$4 sm:$0xff]   ;;  %v6508_v36 = vld [vmem:[#allocation5 + $0x688] ss:$48 sps:$4 sm:$0xff]  }
 0x26e   :  { %4045 = vmatpush1.bf16.msra.mxu1 %v6403_v35  ;;  %4076 = vmatprep.mubr.bf16.mxu1 %v6835_v0  ;;  %v6471_v35 = vld [vmem:[#allocation5 + $0x2c] ss:$48 sps:$4 sm:$0xff]  }
 0x26f   :  { %4046 = vmatprep.subr.bf16.mxu1 %v6411_v38  ;;  %4019 = vmatprep.subr.bf16.mxu0 %v6408_v41  ;;  %v6516_v41 = vld [vmem:[#allocation5 + $0x62c] ss:$48 sps:$4 sm:$0xff]  }
 0x271   :  { %4020 = vmatpush2.bf16.msra.mxu0 %v6406_v42  ;;  %v6477_v42 = vld [vmem:[#allocation5 + $0x5cc] ss:$48 sps:$4 sm:$0xff]  }
 0x272   :  { %4047 = vmatpush1.bf16.msra.mxu1 %v6409_v32  ;;  %4021 = vmatprep.subr.bf16.mxu0 %v6414_v43  ;;  %v6469_v32 = vld [vmem:[#allocation5 + $0x28] ss:$48 sps:$4 sm:$0xff]  }
 0x273   :  { %4048 = vmatprep.subr.bf16.mxu1 %v6417_v2  ;;  %v6514_v2 = vld [vmem:[#allocation5 + $0x628] ss:$48 sps:$4 sm:$0xff]  }
 0x275   :  { %4022 = vmatpush2.bf16.msra.mxu0 %v6412_v39  ;;  %v6483_v39 = vld [vmem:[#allocation5 + $0x56c] ss:$48 sps:$4 sm:$0xff]  }
 0x276   :  { %4049 = vmatpush1.bf16.msra.mxu1 %v6415_v46  ;;  %4023 = vmatprep.subr.bf16.mxu0 %v6420_v28  ;;  %v6475_v46 = vld [vmem:[#allocation5 + $0x5c8] ss:$48 sps:$4 sm:$0xff]  }
 0x277   :  { %4050 = vmatprep.subr.bf16.mxu1 %v6423_v47 }
 0x279   :  { %4024 = vmatpush2.bf16.msra.mxu0 %v6418_v25 }
 0x27a   :  { %4051 = vmatpush1.bf16.msra.mxu1 %v6421_v9  ;;  %4025 = vmatprep.subr.bf16.mxu0 %v6426_v53 }
 0x27b   :  { %4052 = vmatprep.subr.bf16.mxu1 %v6429_v49  ;;  %v6481_v49 = vld [vmem:[#allocation5 + $0x568] ss:$48 sps:$4 sm:$0xff]  }
 0x27d   :  { %4026 = vmatpush2.bf16.msra.mxu0 %v6424_v56 }
 0x27e   :  { %4053 = vmatpush1.bf16.msra.mxu1 %v6427_v55  ;;  %4027 = vmatprep.subr.bf16.mxu0 %v6432_v59  ;;  %v6489_v55 = vld [vmem:[#allocation5 + $0x50c] ss:$48 sps:$4 sm:$0xff]  }
 0x27f   :  { %4054 = vmatprep.subr.bf16.mxu1 %v6435_v58 }
 0x281   :  { %4028 = vmatpush2.bf16.msra.mxu0 %v6430_v1 }
 0x282   :  { %4055 = vmatpush1.bf16.msra.mxu1 %v6433_v60  ;;  %4029 = vmatprep.subr.bf16.mxu0 %v6438_v5  ;;  %v6487_v5 = vld [vmem:[#allocation5 + $0x508] ss:$48 sps:$4 sm:$0xff]  }
 0x283   :  { %4056 = vmatprep.subr.bf16.mxu1 %v6441_v4 }
 0x285   :  { %4030 = vmatpush2.bf16.msra.mxu0 %v6436_v61  ;;  %v6495_v61 = vld [vmem:[#allocation5 + $0x4ac] ss:$48 sps:$4 sm:$0xff]  }
 0x286   :  { %4057 = vmatpush1.bf16.msra.mxu1 %v6439_v7  ;;  %4031 = vmatprep.subr.bf16.mxu0 %v6444_v48 }
 0x287   :  { %4058 = vmatprep.subr.bf16.mxu1 %v6447_v8 }
 0x289   :  { %4032 = vmatpush2.bf16.msra.mxu0 %v6442_v51  ;;  %v6493_v51 = vld [vmem:[#allocation5 + $0x4a8] ss:$48 sps:$4 sm:$0xff]  }
 0x28a   :  { %4059 = vmatpush1.bf16.msra.mxu1 %v6445_v16  ;;  %4130 = vmatprep.subr.bf16.mxu0 %v6474_v6  ;;  %v6522_v16 = vld [vmem:[#allocation8 + $0x6ac] ss:$12 sps:$4 sm:$0xff]   ;;  %v6525_v6 = vld [vmem:[#allocation8 + $0x694] ss:$12 sps:$4 sm:$0xff]  }
 0x28b   :  { %4087 = vmatprep.subr.bf16.mxu1 %v6450_v40  ;;  %v6520_v40 = vld [vmem:[#allocation8 + $0x6a8] ss:$12 sps:$4 sm:$0xff]  }
 0x28c   :  { %4034 = vmatmul.mubr.bf16.vlgmr.msra.gmra.mxu0 %v6893_v12  ;;  %v2589_v31 = vpop.f32.mrf.mxu0 }
 0x28d   :  { %4077 = vmatmul.mubr.bf16.vlgmr.msra.gmra.mxu1 %v6886_v37  ;;  %4131 = vmatpush1.bf16.msra.mxu0 %v6472_v18  ;;  %v6528_v18 = vld [vmem:[#allocation8 + $0x67c] ss:$12 sps:$4 sm:$0xff]  }
 0x28e   :  { %4088 = vmatpush1.bf16.msra.mxu1 %v6448_v62  ;;  %4132 = vmatprep.subr.bf16.mxu0 %v6480_v22  ;;  %v2591_v38 = vpop.f32.mrf.mxu0  ;;  %v6501_v62 = vld [vmem:[#allocation5 + $0x44c] ss:$48 sps:$4 sm:$0xff]   ;;  %v6499_v22 = vld [vmem:[#allocation5 + $0x448] ss:$48 sps:$4 sm:$0xff]  }
 0x28f   :  { %4089 = vmatprep.subr.bf16.mxu1 %v6453_v11  ;;  %4162 = vmatprep.mubr.bf16.mxu0 %v6835_v0  ;;  %v6460_v0 = vld [vmem:[#allocation5 + $0x148] ss:$48 sps:$4 sm:$0xff]  }
 0x290   :  { %4119 = vmatprep.mubr.bf16.mxu1 %v6889_v54  ;;  %v6465_v54 = vld [vmem:[#allocation5 + $0xec] ss:$48 sps:$4 sm:$0xff]   ;;  %v2593_v43 = vpop.f32.mrf.mxu0 }
 0x291   :  { %4133 = vmatpush1.bf16.msra.mxu0 %v6478_v50  ;;  %v6523_v11 = vld [vmem:[#allocation8 + $0x690] ss:$12 sps:$4 sm:$0xff]  }
 0x292   :  { %4090 = vmatpush1.bf16.msra.mxu1 %v6451_v27  ;;  %4134 = vmatprep.subr.bf16.mxu0 %v6486_v3  ;;  %v2595_v47 = vpop.f32.mrf.mxu0  ;;  %v6507_v27 = vld [vmem:[#allocation5 + $0x3ec] ss:$48 sps:$4 sm:$0xff]   ;;  %v6505_v3 = vld [vmem:[#allocation5 + $0x3e8] ss:$48 sps:$4 sm:$0xff]  }
 0x293   :  { %4091 = vmatprep.subr.bf16.mxu1 %v6456_v14  ;;  %v6526_v14 = vld [vmem:[#allocation8 + $0x678] ss:$12 sps:$4 sm:$0xff]  }
 0x294   :  { %v6531_v50 = vld [vmem:[#allocation8 + $0x664] ss:$12 sps:$4 sm:$0xff]  }
 0x295   :  { %4135 = vmatpush1.bf16.msra.mxu0 %v6484_v10  ;;  %v6534_v10 = vld [vmem:[#allocation8 + $0x64c] ss:$12 sps:$4 sm:$0xff]  }
 0x296   :  { %4092 = vmatpush1.bf16.msra.mxu1 %v6454_v19  ;;  %4136 = vmatprep.subr.bf16.mxu0 %v6492_v21  ;;  %v6513_v19 = vld [vmem:[#allocation5 + $0x38c] ss:$48 sps:$4 sm:$0xff]   ;;  %v6511_v21 = vld [vmem:[#allocation5 + $0x388] ss:$48 sps:$4 sm:$0xff]  }
 0x297   :  { %4093 = vmatprep.subr.bf16.mxu1 %v6459_v20  ;;  %v6529_v20 = vld [vmem:[#allocation8 + $0x660] ss:$12 sps:$4 sm:$0xff]  }
 0x299   :  { %4137 = vmatpush1.bf16.msra.mxu0 %v6490_v23  ;;  %v6537_v23 = vld [vmem:[#allocation8 + $0x634] ss:$12 sps:$4 sm:$0xff]  }
 0x29a   :  { %4094 = vmatpush1.bf16.msra.mxu1 %v6457_v24  ;;  %4138 = vmatprep.subr.bf16.mxu0 %v6498_v52  ;;  %v6519_v24 = vld [vmem:[#allocation5 + $0x32c] ss:$48 sps:$4 sm:$0xff]   ;;  %v6517_v52 = vld [vmem:[#allocation5 + $0x328] ss:$48 sps:$4 sm:$0xff]  }
 0x29b   :  { %4095 = vmatprep.subr.bf16.mxu1 %v6462_v13  ;;  %v6532_v13 = vld [vmem:[#allocation8 + $0x648] ss:$12 sps:$4 sm:$0xff]  }
 0x29d   :  { %4139 = vmatpush1.bf16.msra.mxu0 %v6496_v26  ;;  %v6540_v26 = vld [vmem:[#allocation8 + $0x61c] ss:$12 sps:$4 sm:$0xff]  }
 0x29e   :  { %4096 = vmatpush1.bf16.msra.mxu1 %v6460_v0  ;;  %4140 = vmatprep.subr.bf16.mxu0 %v6504_v29  ;;  %v6535_v0 = vld [vmem:[#allocation8 + $0x630] ss:$12 sps:$4 sm:$0xff]   ;;  %v6538_v29 = vld [vmem:[#allocation8 + $0x618] ss:$12 sps:$4 sm:$0xff]  }
 0x29f   :  { %4097 = vmatprep.subr.bf16.mxu1 %v6465_v54 }
 0x2a1   :  { %4141 = vmatpush1.bf16.msra.mxu0 %v6502_v57 }
 0x2a2   :  { %4098 = vmatpush1.bf16.msra.mxu1 %v6463_v30  ;;  %4142 = vmatprep.subr.bf16.mxu0 %v6510_v33 }
 0x2a3   :  { %4099 = vmatprep.subr.bf16.mxu1 %v6468_v15 }
 0x2a5   :  { %4143 = vmatpush1.bf16.msra.mxu0 %v6508_v36 }
 0x2a6   :  { %4100 = vmatpush1.bf16.msra.mxu1 %v6466_v34  ;;  %4144 = vmatprep.subr.bf16.mxu0 %v6516_v41  ;;  %v6541_v34 = vld [vmem:[#allocation8 + $0x600] ss:$12 sps:$4 sm:$0xff]  }
 0x2a7   :  { %4101 = vmatprep.subr.bf16.mxu1 %v6471_v35 }
 0x2a9   :  { %4145 = vmatpush1.bf16.msra.mxu0 %v6514_v2  ;;  %v6552_v2 = vld [vmem:[#allocation8 + $0x73c] ss:$12 sps:$4 sm:$0xff]  }
 0x2aa   :  { %4102 = vmatpush1.bf16.msra.mxu1 %v6469_v32  ;;  %4889 = vmatprep.subr.bf16.mxu0 %v6522_v16  ;;  %v6549_v32 = vld [vmem:[#allocation8 + $0x754] ss:$12 sps:$4 sm:$0xff]  }
 0x2ab   :  { %4103 = vmatprep.subr.bf16.mxu1 %v6477_v42  ;;  %v6547_v42 = vld [vmem:[#allocation8 + $0x750] ss:$12 sps:$4 sm:$0xff]  }
 0x2ac   :  { %v5703_v9 = vpop.f32.mrf.mxu0  ;;  %4163 = vmatmul.mubr.bf16.vlgmr.msra.gmra.mxu0 %v6886_v37 }
 0x2ad   :  { %v2632_v28 = vpop.f32.mrf.mxu1  ;;  %4890 = vmatpush1.bf16.msra.mxu0 %v6520_v40  ;;  %v6571_v40 = vld [vmem:[#allocation8 + $0x770] ss:$12 sps:$4 sm:$0xff]  }
 0x2ae   :  { %v7033_v25 = vadd.f32 %v2632_v28, %v2589_v31  ;;  %4104 = vmatpush2.bf16.msra.mxu1 %v6475_v46  ;;  %v5704_v56 = vpop.f32.mrf.mxu0  ;;  %4891 = vmatprep.subr.bf16.mxu0 %v6525_v6  ;;  %v6543_v31 = vld [vmem:[#allocation8 + $0x604] ss:$12 sps:$4 sm:$0xff]   ;;  %v6553_v46 = vld [vmem:[#allocation8 + $0x720] ss:$12 sps:$4 sm:$0xff]   ;;  %v6556_v28 = vld [vmem:[#allocation8 + $0x708] ss:$12 sps:$4 sm:$0xff]  }
 0x2af   :  { %v2634_v53 = vpop.f32.mrf.mxu1  ;;  %4105 = vmatprep.subr.bf16.mxu1 %v6483_v39  ;;  %v7038_v59 = vadd.f32 %v5704_v56, %v5703_v9  ;;  %v6555_v39 = vld [vmem:[#allocation8 + $0x724] ss:$12 sps:$4 sm:$0xff]   ;;  %v6561_v9 = vld [vmem:[#allocation8 + $0x6f4] ss:$12 sps:$4 sm:$0xff]  }
 0x2b0   :  { %v7036_v58 = vadd.f32 %v2634_v53, %v2591_v38  ;;  %v5706_v1 = vpop.f32.mrf.mxu0  ;;  %v6546_v38 = vld [vmem:[#allocation8 + $0x76c] ss:$12 sps:$4 sm:$0xff]   ;;  %v6564_v53 = vld [vmem:[#allocation8 + $0x6dc] ss:$12 sps:$4 sm:$0xff]   ;;  %v6567_v56 = vld [vmem:[#allocation8 + $0x6c4] ss:$12 sps:$4 sm:$0xff]  }
 0x2b1   :  { %v2636_v60 = vpop.f32.mrf.mxu1  ;;  %4892 = vmatpush1.bf16.msra.mxu0 %v6523_v11  ;;  %v6568_v6 = vld [vmem:[#allocation8 + $0x828] ss:$12 sps:$4 sm:$0xff]   ;;  %v6578_v11 = vld [vmem:[#allocation8 + $0x7f8] ss:$12 sps:$4 sm:$0xff]  }
 0x2b2   :  { %v7040_v4 = vadd.f32 %v2636_v60, %v2593_v43  ;;  %4106 = vmatpush2.bf16.msra.mxu1 %v6481_v49  ;;  %v5707_v8 = vpop.f32.mrf.mxu0  ;;  %4893 = vmatprep.subr.bf16.mxu0 %v6528_v18  ;;  %v6550_v43 = vld [vmem:[#allocation8 + $0x738] ss:$12 sps:$4 sm:$0xff]   ;;  %v6559_v49 = vld [vmem:[#allocation8 + $0x6f0] ss:$12 sps:$4 sm:$0xff]   ;;  %v6583_v18 = vld [vmem:[#allocation8 + $0x7e0] ss:$12 sps:$4 sm:$0xff]  }
 0x2b3   :  { %v2638_v7 = vpop.f32.mrf.mxu1  ;;  %4107 = vmatprep.subr.bf16.mxu1 %v6489_v55  ;;  %v5708_v37 = vadd.f32 %v5707_v8, %v5706_v1  ;;  %v6562_v55 = vld [vmem:[#allocation8 + $0x6d8] ss:$12 sps:$4 sm:$0xff]  }
 0x2b4   :  { %v7042_v48 = vadd.f32 %v2638_v7, %v2595_v47  ;;  %v6558_v47 = vld [vmem:[#allocation8 + $0x70c] ss:$12 sps:$4 sm:$0xff]  }
 0x2b5   :  { %4894 = vmatpush1.bf16.msra.mxu0 %v6526_v14  ;;  %v6595_v14 = vld [vmem:[#allocation8 + $0x7b4] ss:$12 sps:$4 sm:$0xff]  }
 0x2b6   :  { %4108 = vmatpush2.bf16.msra.mxu1 %v6487_v5  ;;  %4895 = vmatprep.subr.bf16.mxu0 %v6531_v50  ;;  %v6565_v5 = vld [vmem:[#allocation8 + $0x6c0] ss:$12 sps:$4 sm:$0xff]  }
 0x2b7   :  { %4109 = vmatprep.subr.bf16.mxu1 %v6495_v61 }
 0x2b9   :  { %4896 = vmatpush1.bf16.msra.mxu0 %v6529_v20  ;;  %v6600_v20 = vld [vmem:[#allocation8 + $0x79c] ss:$12 sps:$4 sm:$0xff]  }
 0x2ba   :  { %4110 = vmatpush2.bf16.msra.mxu1 %v6493_v51  ;;  %4897 = vmatprep.subr.bf16.mxu0 %v6534_v10  ;;  %v6570_v51 = vld [vmem:[#allocation8 + $0x82c] ss:$12 sps:$4 sm:$0xff]  }
 0x2bb   :  { %4111 = vmatprep.subr.bf16.mxu1 %v6501_v62  ;;  %v6575_v62 = vld [vmem:[#allocation8 + $0x814] ss:$12 sps:$4 sm:$0xff]  }
 0x2bd   :  { %4898 = vmatpush1.bf16.msra.mxu0 %v6532_v13 }
 0x2be   :  { %4112 = vmatpush2.bf16.msra.mxu1 %v6499_v22  ;;  %4899 = vmatprep.subr.bf16.mxu0 %v6537_v23  ;;  %v6588_v22 = vld [vmem:[#allocation8 + $0x7c8] ss:$12 sps:$4 sm:$0xff]  }
 0x2bf   :  { %4113 = vmatprep.subr.bf16.mxu1 %v6507_v27  ;;  %v6593_v27 = vld [vmem:[#allocation8 + $0x7b0] ss:$12 sps:$4 sm:$0xff]  }
 0x2c1   :  { %4900 = vmatpush1.bf16.msra.mxu0 %v6535_v0 }
 0x2c2   :  { %4114 = vmatpush2.bf16.msra.mxu1 %v6505_v3  ;;  %4901 = vmatprep.subr.bf16.mxu0 %v6540_v26  ;;  %v6605_v26 = vld [vmem:[#allocation8 + $0x784] ss:$12 sps:$4 sm:$0xff]  }
 0x2c3   :  { %4115 = vmatprep.subr.bf16.mxu1 %v6513_v19 }
 0x2c5   :  { %4902 = vmatpush1.bf16.msra.mxu0 %v6538_v29 }
 0x2c6   :  { %4116 = vmatpush2.bf16.msra.mxu1 %v6511_v21  ;;  %4903 = vmatprep.subr.bf16.mxu0 %v6543_v31  ;;  %v6598_v21 = vld [vmem:[#allocation8 + $0x798] ss:$12 sps:$4 sm:$0xff]  }
 0x2c7   :  { %4117 = vmatprep.subr.bf16.mxu1 %v6519_v24 }
 0x2c9   :  { %4904 = vmatpush1.bf16.msra.mxu0 %v6541_v34 }
 0x2ca   :  { %4118 = vmatpush2.bf16.msra.mxu1 %v6517_v52  ;;  %4905 = vmatprep.subr.bf16.mxu0 %v6546_v38  ;;  %v6608_v38 = vld [vmem:[#allocation8 + $0x8e8] ss:$12 sps:$4 sm:$0xff]  }
 0x2cb   :  { %4932 = vmatprep.subr.bf16.mxu1 %v6570_v51 }
 0x2cd   :  { %v5725_v54 = vpop.f32.mrf.mxu1  ;;  %4120 = vmatmul.mubr.bf16.vlgmr.msra.gmra.mxu1 %v6893_v12  ;;  %v6544_v12 = vld [vmem:[#allocation8 + $0x768] ss:$12 sps:$4 sm:$0xff]  }
 0x2ce   :  { %4906 = vmatpush2.bf16.msra.mxu0 %v6544_v12  ;;  %4933 = vmatpush1.bf16.msra.mxu1 %v6568_v6  ;;  %v6613_v12 = vld [vmem:[#allocation8 + $0x8d4] ss:$12 sps:$4 sm:$0xff]  }
 0x2cf   :  { %v5726_v30 = vpop.f32.mrf.mxu1  ;;  %4907 = vmatprep.subr.bf16.mxu0 %v6549_v32  ;;  %4934 = vmatprep.subr.bf16.mxu1 %v6575_v62  ;;  %v6611_v32 = vld [vmem:[#allocation8 + $0x8d0] ss:$12 sps:$4 sm:$0xff]  }
 0x2d0   :  { %v5727_v15 = vadd.f32 %v5726_v30, %v5725_v54 }
 0x2d1   :  { %v5728_v57 = vpop.f32.mrf.mxu1 }
 0x2d2   :  { %v7046_v33 = vadd.f32 %v5727_v15, %v7038_v59  ;;  %4908 = vmatpush2.bf16.msra.mxu0 %v6547_v42  ;;  %v6603_v15 = vld [vmem:[#allocation8 + $0x780] ss:$12 sps:$4 sm:$0xff]   ;;  %v6616_v42 = vld [vmem:[#allocation8 + $0x8bc] ss:$12 sps:$4 sm:$0xff]  }
 0x2d3   :  { %v5729_v35 = vpop.f32.mrf.mxu1  ;;  %4909 = vmatprep.subr.bf16.mxu0 %v6552_v2  ;;  %v6619_v2 = vld [vmem:[#allocation8 + $0x8a4] ss:$12 sps:$4 sm:$0xff]  }
 0x2d4   :  { %v5730_v36 = vadd.f32 %v5729_v35, %v5728_v57  ;;  %v6610_v35 = vld [vmem:[#allocation8 + $0x8ec] ss:$12 sps:$4 sm:$0xff]  }
 0x2d6   :  { %v7048_v41 = vadd.f32 %v5730_v36, %v5708_v37  ;;  %4910 = vmatpush2.bf16.msra.mxu0 %v6550_v43  ;;  %v6617_v43 = vld [vmem:[#allocation8 + $0x8a0] ss:$12 sps:$4 sm:$0xff]  }
 0x2d7   :  { %4911 = vmatprep.subr.bf16.mxu0 %v6555_v39  ;;  %v6620_v39 = vld [vmem:[#allocation8 + $0x888] ss:$12 sps:$4 sm:$0xff]  }
 0x2da   :  { %4912 = vmatpush2.bf16.msra.mxu0 %v6553_v46  ;;  %v6622_v46 = vld [vmem:[#allocation8 + $0x88c] ss:$12 sps:$4 sm:$0xff]  }
 0x2db   :  { %4913 = vmatprep.subr.bf16.mxu0 %v6558_v47  ;;  %v6625_v47 = vld [vmem:[#allocation8 + $0x874] ss:$12 sps:$4 sm:$0xff]  }
 0x2de   :  { %4914 = vmatpush2.bf16.msra.mxu0 %v6556_v28  ;;  %v6628_v28 = vld [vmem:[#allocation8 + $0x85c] ss:$12 sps:$4 sm:$0xff]  }
 0x2df   :  { %4915 = vmatprep.subr.bf16.mxu0 %v6561_v9 }
 0x2e2   :  { %4916 = vmatpush2.bf16.msra.mxu0 %v6559_v49  ;;  %v6626_v49 = vld [vmem:[#allocation8 + $0x858] ss:$12 sps:$4 sm:$0xff]  }
 0x2e3   :  { %4917 = vmatprep.subr.bf16.mxu0 %v6564_v53  ;;  %v6631_v53 = vld [vmem:[#allocation8 + $0x844] ss:$12 sps:$4 sm:$0xff]  }
 0x2e6   :  { %4918 = vmatpush2.bf16.msra.mxu0 %v6562_v55 }
 0x2e7   :  { %4919 = vmatprep.subr.bf16.mxu0 %v6567_v56 }
 0x2ea   :  { %4920 = vmatpush2.bf16.msra.mxu0 %v6565_v5 }
 0x2eb   :  { %5775 = vmatprep.subr.bf16.mxu0 %v6571_v40 }
 0x2ec   :  { %v3269_v59 = vpop.f32.mrf.mxu0 }
 0x2ed   :  { %v3270_v60 = vadd.f32 %v3269_v59, %v7033_v25  ;;  %v6573_v25 = vld [vmem:[#allocation8 + $0x810] ss:$12 sps:$4 sm:$0xff]  }
 0x2ee   :  { %v3271_v1 = vpop.f32.mrf.mxu0  ;;  %4935 = vmatpush1.bf16.msra.mxu1 %v6573_v25 }
 0x2ef   :  { %v3272_v7 = vadd.f32 %v3271_v1, %v7036_v58  ;;  %v6580_v58 = vld [vmem:[#allocation8 + $0x7fc] ss:$12 sps:$4 sm:$0xff]  }
 0x2f0   :  { %v3273_v61 = vpop.f32.mrf.mxu0  ;;  %4936 = vmatprep.subr.bf16.mxu1 %v6580_v58 }
 0x2f1   :  { %v3274_v8 = vadd.f32 %v3273_v61, %v7040_v4  ;;  %v6585_v4 = vld [vmem:[#allocation8 + $0x7e4] ss:$12 sps:$4 sm:$0xff]  }
 0x2f2   :  { %v3275_v37 = vpop.f32.mrf.mxu0  ;;  %4937 = vmatpush1.bf16.msra.mxu1 %v6578_v11 }
 0x2f3   :  { %v3276_v16 = vadd.f32 %v3275_v37, %v7042_v48  ;;  %4938 = vmatprep.subr.bf16.mxu1 %v6585_v4  ;;  %v6590_v48 = vld [vmem:[#allocation8 + $0x7cc] ss:$12 sps:$4 sm:$0xff]   ;;  %v7068_v37 = vld [vmem:[#allocation7 + $0x8] sm:$0xf] }
 0x2f4   :  { %v3508_v40 = vrot.slane %v7068_v37, %v6948_v17 }
 0x2f6   :  { %4939 = vmatpush1.bf16.msra.mxu1 %v6583_v18 }
 0x2f7   :  { %4940 = vmatprep.subr.bf16.mxu1 %v6590_v48 }
 0x2fa   :  { %4941 = vmatpush1.bf16.msra.mxu1 %v6588_v22 }
 0x2fb   :  { %4942 = vmatprep.subr.bf16.mxu1 %v6595_v14 }
 0x2fe   :  { %4943 = vmatpush1.bf16.msra.mxu1 %v6593_v27 }
 0x2ff   :  { %4944 = vmatprep.subr.bf16.mxu1 %v6600_v20 }
 0x302   :  { %4945 = vmatpush1.bf16.msra.mxu1 %v6598_v21 }
 0x303   :  { %4946 = vmatprep.subr.bf16.mxu1 %v6605_v26 }
 0x306   :  { %4947 = vmatpush1.bf16.msra.mxu1 %v6603_v15 }
 0x307   :  { %4948 = vmatprep.subr.bf16.mxu1 %v6610_v35 }
 0x30a   :  { %4949 = vmatpush2.bf16.msra.mxu1 %v6608_v38 }
 0x30b   :  { %4950 = vmatprep.subr.bf16.mxu1 %v6613_v12 }
 0x30c   :  { %v5747_v19 = vpop.f32.mrf.mxu0 }
 0x30d   :  { %v3312_v50 = vpop.f32.mrf.mxu1 }
 0x30e   :  { %v7054_v3 = vadd.f32 %v3312_v50, %v3270_v60  ;;  %v5748_v13 = vpop.f32.mrf.mxu0  ;;  %4951 = vmatpush2.bf16.msra.mxu1 %v6611_v32  ;;  %v6629_v60 = vld [vmem:[#allocation8 + $0x840] ss:$12 sps:$4 sm:$0xff]  }
 0x30f   :  { %v3314_v10 = vpop.f32.mrf.mxu1  ;;  %v5749_v23 = vadd.f32 %v5748_v13, %v5747_v19  ;;  %4952 = vmatprep.subr.bf16.mxu1 %v6616_v42 }
 0x310   :  { %v7056_v24 = vadd.f32 %v3314_v10, %v3272_v7  ;;  %v5750_v54 = vpop.f32.mrf.mxu0 }
 0x311   :  { %v3316_v52 = vpop.f32.mrf.mxu1  ;;  %v3356_v29 = vadd.f32 %v5749_v23, %v7046_v33  ;;  %v6614_v33 = vld [vmem:[#allocation8 + $0x8b8] ss:$12 sps:$4 sm:$0xff]  }
 0x312   :  { %v7058_v0 = vadd.f32 %v3316_v52, %v3274_v8  ;;  %v5751_v31 = vpop.f32.mrf.mxu0  ;;  %4953 = vmatpush2.bf16.msra.mxu1 %v6614_v33  ;;  %v6632_v8 = vld [vmem:[#allocation8 + $0x8f0] ss:$12 sps:$4 sm:$0xff]  }
 0x313   :  { %v3318_v30 = vpop.f32.mrf.mxu1  ;;  %v5752_v34 = vadd.f32 %v5751_v31, %v5750_v54  ;;  %4954 = vmatprep.subr.bf16.mxu1 %v6619_v2 }
 0x314   :  { %v7061_v57 = vadd.f32 %v3318_v30, %v3276_v16  ;;  %v3504_v16 = vrot.slane %v7068_v37, %v6912_v63 }
 0x315   :  { %v3359_v36 = vadd.f32 %v5752_v34, %v7048_v41  ;;  %v6623_v41 = vld [vmem:[#allocation8 + $0x870] ss:$12 sps:$4 sm:$0xff]  }
 0x316   :  { %4955 = vmatpush2.bf16.msra.mxu1 %v6617_v43 }
 0x317   :  { %4956 = vmatprep.subr.bf16.mxu1 %v6622_v46 }
 0x31a   :  { %4957 = vmatpush2.bf16.msra.mxu1 %v6620_v39 }
 0x31b   :  { %4958 = vmatprep.subr.bf16.mxu1 %v6625_v47 }
 0x31e   :  { %4959 = vmatpush2.bf16.msra.mxu1 %v6623_v41 }
 0x31f   :  { %4960 = vmatprep.subr.bf16.mxu1 %v6628_v28 }
 0x322   :  { %4961 = vmatpush2.bf16.msra.mxu1 %v6626_v49 }
 0x323   :  { %4962 = vmatprep.subr.bf16.mxu1 %v6631_v53 }
 0x326   :  { %4963 = vmatpush2.bf16.msra.mxu1 %v6629_v60 }
 0x327   :  { %5797 = vmatprep.subr.bf16.mxu1 %v6632_v8 }
 0x32d   :  { %v5769_v9 = vpop.f32.mrf.mxu1 }
 0x32f   :  { %v5770_v55 = vpop.f32.mrf.mxu1 }
 0x330   :  { %v5771_v56 = vadd.f32 %v5770_v55, %v5769_v9 }
 0x331   :  { %v5772_v59 = vpop.f32.mrf.mxu1 }
 0x332   :  { %v7064_v1 = vadd.f32 %v5771_v56, %v3356_v29 }
 0x333   :  { %v5773_v5 = vpop.f32.mrf.mxu1 }
 0x334   :  { %v5774_v7 = vadd.f32 %v5773_v5, %v5772_v59 }
 0x336   :  { %v7066_v61 = vadd.f32 %v5774_v7, %v3359_v36 }
 0x34c   :  { %v4035_v6 = vpop.f32.mrf.mxu0 }
 0x34d   :  { %v4078_v51 = vpop.f32.mrf.mxu1  ;;  %v4036_v25 = vadd.f32 %v4035_v6, %v3504_v16 }
 0x34e   :  { %v4037_v11 = vpop.f32.mrf.mxu0 }
 0x34f   :  { %v4080_v62 = vpop.f32.mrf.mxu1  ;;  %v4079_v58 = vadd.f32 %v4078_v51, %v4036_v25  ;;  %v4038_v18 = vadd.f32 %v4037_v11, %v3508_v40  ;;  %v6576_v25 = vld [vmem:[#allocation8 + $0x758] ss:$12 sps:$4 sm:$0xff]   ;;  %v6581_v11 = vld [vmem:[#allocation8 + $0x740] ss:$12 sps:$4 sm:$0xff]  }
 0x350   :  { %v4039_v4 = vpop.f32.mrf.mxu0 }
 0x351   :  { %v4082_v22 = vpop.f32.mrf.mxu1  ;;  %v4181_v48 = vmul.f32 0.044715, %v4079_v58  ;;  %v4081_v27 = vadd.f32 %v4080_v62, %v4038_v18  ;;  %v4040_v14 = vadd.f32 %v4039_v4, %v3504_v16  ;;  %v4173_v60 = vmul.f32 0.5, %v4079_v58  ;;  %v6577_v62 = vld [vmem:[#allocation8 + $0x698] ss:$12 sps:$4 sm:$0xff]  }
 0x352   :  { %v4041_v50 = vpop.f32.mrf.mxu0  ;;  %v6582_v18 = vld [vmem:[#allocation8 + $0x680] ss:$12 sps:$4 sm:$0xff]   ;;  %v6586_v4 = vld [vmem:[#allocation8 + $0x728] ss:$12 sps:$4 sm:$0xff]  }
 0x353   :  { %v4189_v19 = vmul.f32 %v4181_v48, %v4079_v58  ;;  %v4182_v20 = vmul.f32 0.044715, %v4081_v27  ;;  %v4083_v10 = vadd.f32 %v4082_v22, %v4040_v14  ;;  %v4042_v21 = vadd.f32 %v4041_v50, %v3508_v40  ;;  %v4084_v13 = vpop.f32.mrf.mxu1  ;;  %v6572_v40 = vld [vmem:[#allocation8 + $0x6b0] ss:$12 sps:$4 sm:$0xff]   ;;  %v6597_v50 = vld [vmem:[#allocation8 + $0x638] ss:$12 sps:$4 sm:$0xff]  }
 0x354   :  { %v4174_v55 = vmul.f32 0.5, %v4081_v27  ;;  %v6591_v22 = vld [vmem:[#allocation8 + $0x710] ss:$12 sps:$4 sm:$0xff]  }
 0x355   :  { %v4197_v23 = vmul.f32 %v4189_v19, %v4079_v58  ;;  %v4190_v52 = vmul.f32 %v4182_v20, %v4081_v27  ;;  %v4185_v54 = vmul.f32 0.044715, %v4083_v10  ;;  %v4085_v26 = vadd.f32 %v4084_v13, %v4042_v21  ;;  %v6592_v48 = vld [vmem:[#allocation8 + $0x650] ss:$12 sps:$4 sm:$0xff]   ;;  %v6601_v20 = vld [vmem:[#allocation8 + $0x6e0] ss:$12 sps:$4 sm:$0xff]  }
 0x356   :  { %v4177_v49 = vmul.f32 0.5, %v4083_v10  ;;  %v3512_v19 = vrot.slane %v7068_v37, %v6927_v44 }
 0x357   :  { %v4205_v29 = vadd.f32 %v4197_v23, %v4079_v58  ;;  %v4198_v30 = vmul.f32 %v4190_v52, %v4081_v27  ;;  %v4193_v15 = vmul.f32 %v4185_v54, %v4083_v10  ;;  %v4186_v31 = vmul.f32 0.044715, %v4085_v26  ;;  %v6587_v58 = vld [vmem:[#allocation8 + $0x668] ss:$12 sps:$4 sm:$0xff]   ;;  %v6602_v23 = vld [vmem:[#allocation8 + $0x620] ss:$12 sps:$4 sm:$0xff]  }
 0x358   :  { %v4178_v56 = vmul.f32 0.5, %v4085_v26  ;;  %v6606_v54 = vld [vmem:[#allocation8 + $0x6c8] ss:$12 sps:$4 sm:$0xff]  }
 0x359   :  { %v4201_v34 = vmul.f32 %v4193_v15, %v4083_v10  ;;  %v4194_v35 = vmul.f32 %v4186_v31, %v4085_v26  ;;  %v4206_v36 = vadd.f32 %v4198_v30, %v4081_v27  ;;  %v4213_v38 = vmul.f32 0.7978846, %v4205_v29  ;;  %v6596_v27 = vld [vmem:[#allocation8 + $0x6f8] ss:$12 sps:$4 sm:$0xff]  }
 0x35b   :  { %v4209_v12 = vadd.f32 %v4201_v34, %v4083_v10  ;;  %v4202_v32 = vmul.f32 %v4194_v35, %v4085_v26  ;;  %v4214_v42 = vmul.f32 0.7978846, %v4206_v36  ;;  %v3516_v10 = vrot.slane %v7068_v37, %v6930_v45  ;;  %v6607_v34 = vld [vmem:[#allocation8 + $0x608] ss:$12 sps:$4 sm:$0xff]  }
 0x35d   :  { %v4217_v33 = vmul.f32 0.7978846, %v4209_v12  ;;  %v4210_v2 = vadd.f32 %v4202_v32, %v4085_v26  ;;  %6680 = vtanh.f32 %v4214_v42 }
 0x35e   :  { %6682 = vtanh.f32 %v4213_v38 }
 0x35f   :  { %6684 = vtanh.f32 %v4217_v33  ;;  %v4218_v43 = vmul.f32 0.7978846, %v4210_v2 }
 0x361   :  { %6686 = vtanh.f32 %v4218_v43 }
 0x36a   :  { %v6681_v46 = vpop.eup %6680 }
 0x36b   :  { %v6683_v39 = vpop.eup %6682  ;;  %v4230_v41 = vadd.f32 1.0, %v6681_v46 }
 0x36c   :  { %v6685_v47 = vpop.eup %6684  ;;  %v4229_v53 = vadd.f32 1.0, %v6683_v39  ;;  %v4164_v14 = vpop.f32.mrf.mxu0 }
 0x36d   :  { %v4233_v28 = vadd.f32 1.0, %v6685_v47  ;;  %v4238_v7 = vmul.f32 %v4230_v41, %v4174_v55 }
 0x36e   :  { %v6687_v9 = vpop.eup %6686  ;;  %v4237_v16 = vmul.f32 %v4229_v53, %v4173_v60  ;;  %v4166_v21 = vpop.f32.mrf.mxu0 }
 0x36f   :  { %v4234_v59 = vadd.f32 1.0, %v6687_v9  ;;  %v4241_v5 = vmul.f32 %v4233_v28, %v4177_v49 }
 0x370   :  { %v4168_v15 = vpop.f32.mrf.mxu0 }
 0x371   :  { %v4242_v8 = vmul.f32 %v4234_v59, %v4178_v56  ;;  %v4245_v6 = vpack.c.bf16 %v4241_v5, %v4237_v16 }
 0x372   :  { %v4170_v33 = vpop.f32.mrf.mxu0 }
 0x373   :  { %v4246_v51 = vpack.c.bf16 %v4242_v8, %v4238_v7 }
 0x375   :  { %4921 = vmatprep.mubr.bf16.mxu0 %v4246_v51 }
 0x376   :  { %4922 = vmatmul.mubr.bf16.vlgmr.msra.gmra.mxu0 %v4245_v6 }
 0x377   :  { %5776 = vmatpush3.bf16.msra.mxu0 %v6572_v40  ;;  %5007 = vmatprep.mubr.bf16.mxu0 %v4246_v51 }
 0x378   :  { %5777 = vmatprep.subr.bf16.mxu0 %v6576_v25 }
 0x37b   :  { %5778 = vmatpush3.bf16.msra.mxu0 %v6577_v62 }
 0x37c   :  { %5779 = vmatprep.subr.bf16.mxu0 %v6581_v11 }
 0x37f   :  { %5780 = vmatpush3.bf16.msra.mxu0 %v6582_v18 }
 0x380   :  { %5781 = vmatprep.subr.bf16.mxu0 %v6586_v4 }
 0x383   :  { %5782 = vmatpush3.bf16.msra.mxu0 %v6587_v58 }
 0x384   :  { %5783 = vmatprep.subr.bf16.mxu0 %v6591_v22 }
 0x387   :  { %5784 = vmatpush3.bf16.msra.mxu0 %v6592_v48 }
 0x388   :  { %5785 = vmatprep.subr.bf16.mxu0 %v6596_v27 }
 0x38b   :  { %5786 = vmatpush3.bf16.msra.mxu0 %v6597_v50 }
 0x38c   :  { %5787 = vmatprep.subr.bf16.mxu0 %v6601_v20 }
 0x38d   :  { %v4121_v13 = vpop.f32.mrf.mxu1 }
 0x38e   :  { %v4122_v52 = vadd.f32 %v4121_v13, %v3512_v19 }
 0x38f   :  { %v4123_v26 = vpop.f32.mrf.mxu1  ;;  %5788 = vmatpush3.bf16.msra.mxu0 %v6602_v23  ;;  %v6634_v23 = vld [vmem:[#allocation8 + $0x8d8] ss:$12 sps:$4 sm:$0xff]  }
 0x390   :  { %v4165_v29 = vadd.f32 %v4164_v14, %v4122_v52  ;;  %v4124_v30 = vadd.f32 %v4123_v26, %v3516_v10  ;;  %5789 = vmatprep.subr.bf16.mxu0 %v6606_v54  ;;  %v6635_v52 = vld [vmem:[#allocation8 + $0x818] ss:$12 sps:$4 sm:$0xff]   ;;  %v6636_v54 = vld [vmem:[#allocation8 + $0x8c0] ss:$12 sps:$4 sm:$0xff]  }
 0x391   :  { %v4125_v31 = vpop.f32.mrf.mxu1  ;;  %v6637_v26 = vld [vmem:[#allocation8 + $0x800] ss:$12 sps:$4 sm:$0xff]  }
 0x392   :  { %v4183_v35 = vmul.f32 0.044715, %v4165_v29  ;;  %v4167_v36 = vadd.f32 %v4166_v21, %v4124_v30  ;;  %v4126_v38 = vadd.f32 %v4125_v31, %v3512_v19  ;;  %v4175_v27 = vmul.f32 0.5, %v4165_v29  ;;  %v6633_v21 = vld [vmem:[#allocation8 + $0x830] ss:$12 sps:$4 sm:$0xff]  }
 0x393   :  { %v4127_v12 = vpop.f32.mrf.mxu1  ;;  %5790 = vmatpush3.bf16.msra.mxu0 %v6607_v34  ;;  %v6638_v30 = vld [vmem:[#allocation8 + $0x8a8] ss:$12 sps:$4 sm:$0xff]   ;;  %v6641_v31 = vld [vmem:[#allocation8 + $0x7d0] ss:$12 sps:$4 sm:$0xff]   ;;  %v6642_v34 = vld [vmem:[#allocation8 + $0x878] ss:$12 sps:$4 sm:$0xff]  }
 0x394   :  { %v4191_v45 = vmul.f32 %v4183_v35, %v4165_v29  ;;  %v4184_v37 = vmul.f32 0.044715, %v4167_v36  ;;  %v4169_v32 = vadd.f32 %v4168_v15, %v4126_v38  ;;  %v4128_v42 = vadd.f32 %v4127_v12, %v3516_v10  ;;  %v6640_v15 = vld [vmem:[#allocation8 + $0x890] ss:$12 sps:$4 sm:$0xff]   ;;  %v6643_v35 = vld [vmem:[#allocation8 + $0x7b8] ss:$12 sps:$4 sm:$0xff]  }
 0x395   :  { %v4176_v58 = vmul.f32 0.5, %v4167_v36  ;;  %v6645_v38 = vld [vmem:[#allocation8 + $0x7a0] ss:$12 sps:$4 sm:$0xff]   ;;  %v6646_v12 = vld [vmem:[#allocation8 + $0x848] ss:$12 sps:$4 sm:$0xff]  }
 0x396   :  { %v4199_v2 = vmul.f32 %v4191_v45, %v4165_v29  ;;  %v4192_v43 = vmul.f32 %v4184_v37, %v4167_v36  ;;  %v4187_v46 = vmul.f32 0.044715, %v4169_v32  ;;  %v4171_v39 = vadd.f32 %v4170_v33, %v4128_v42  ;;  %5008 = vmatmul.mubr.bf16.vlgmr.msra.gmra.mxu0 %v4245_v6  ;;  %v6647_v45 = vld [vmem:[#allocation8 + $0x788] ss:$12 sps:$4 sm:$0xff]   ;;  %v5063_v42 = vld [vmem:[#allocation10] sm:$0x7] }
 0x397   :  { %v4179_v18 = vmul.f32 0.5, %v4169_v32 }
 0x398   :  { %v4207_v47 = vadd.f32 %v4199_v2, %v4165_v29  ;;  %v4195_v41 = vmul.f32 %v4187_v46, %v4169_v32  ;;  %v4188_v28 = vmul.f32 0.044715, %v4171_v39  ;;  %v4200_v9 = vmul.f32 %v4192_v43, %v4167_v36  ;;  %v6639_v29 = vld [vmem:[#allocation8 + $0x7e8] ss:$12 sps:$4 sm:$0xff]  }
 0x399   :  { %v4180_v22 = vmul.f32 0.5, %v4171_v39  ;;  %v5068_v43 = vrot.slane %v5063_v42, %v6912_v63 }
 0x39a   :  { %v4203_v49 = vmul.f32 %v4195_v41, %v4169_v32  ;;  %v4196_v53 = vmul.f32 %v4188_v28, %v4171_v39  ;;  %v4215_v55 = vmul.f32 0.7978846, %v4207_v47  ;;  %v4208_v56 = vadd.f32 %v4200_v9, %v4167_v36  ;;  %v6644_v36 = vld [vmem:[#allocation8 + $0x860] ss:$12 sps:$4 sm:$0xff]  }
 0x39b   :  { %v5072_v28 = vrot.slane %v5063_v42, %v6948_v17 }
 0x39c   :  { %v4211_v59 = vadd.f32 %v4203_v49, %v4169_v32  ;;  %v4204_v60 = vmul.f32 %v4196_v53, %v4171_v39  ;;  %v4216_v5 = vmul.f32 0.7978846, %v4208_v56  ;;  %6688 = vtanh.f32 %v4215_v55 }
 0x39e   :  { %v4212_v7 = vadd.f32 %v4204_v60, %v4171_v39  ;;  %v4219_v8 = vmul.f32 0.7978846, %v4211_v59  ;;  %6690 = vtanh.f32 %v4216_v5 }
 0x3a0   :  { %v4220_v16 = vmul.f32 0.7978846, %v4212_v7  ;;  %6692 = vtanh.f32 %v4219_v8 }
 0x3a2   :  { %6694 = vtanh.f32 %v4220_v16 }
 0x3a9   :  { %v6689_v51 = vpop.eup %6688 }
 0x3aa   :  { %v4231_v4 = vadd.f32 1.0, %v6689_v51 }
 0x3ab   :  { %v6691_v40 = vpop.eup %6690 }
 0x3ac   :  { %v4232_v62 = vadd.f32 1.0, %v6691_v40  ;;  %v4239_v20 = vmul.f32 %v4231_v4, %v4175_v27 }
 0x3ad   :  { %v6693_v25 = vpop.eup %6692 }
 0x3ae   :  { %v4235_v6 = vadd.f32 1.0, %v6693_v25  ;;  %v4240_v50 = vmul.f32 %v4232_v62, %v4176_v58 }
 0x3af   :  { %v6695_v11 = vpop.eup %6694 }
 0x3b0   :  { %v4236_v48 = vadd.f32 1.0, %v6695_v11  ;;  %v4243_v14 = vmul.f32 %v4235_v6, %v4179_v18 }
 0x3b2   :  { %v4244_v19 = vmul.f32 %v4236_v48, %v4180_v22  ;;  %v4247_v13 = vpack.c.bf16 %v4243_v14, %v4239_v20 }
 0x3b4   :  { %v4248_v10 = vpack.c.bf16 %v4244_v19, %v4240_v50 }
 0x3b6   :  { %4964 = vmatprep.mubr.bf16.mxu1 %v4248_v10 }
 0x3b7   :  { %4965 = vmatmul.mubr.bf16.vlgmr.msra.gmra.mxu1 %v4247_v13 }
 0x3b8   :  { %5798 = vmatpush3.bf16.msra.mxu1 %v6633_v21  ;;  %5048 = vmatprep.mubr.bf16.mxu1 %v4248_v10 }
 0x3b9   :  { %5799 = vmatprep.subr.bf16.mxu1 %v6634_v23 }
 0x3bc   :  { %5800 = vmatpush3.bf16.msra.mxu1 %v6635_v52 }
 0x3bd   :  { %5801 = vmatprep.subr.bf16.mxu1 %v6636_v54 }
 0x3c0   :  { %5802 = vmatpush3.bf16.msra.mxu1 %v6637_v26 }
 0x3c1   :  { %5803 = vmatprep.subr.bf16.mxu1 %v6638_v30 }
 0x3c4   :  { %5804 = vmatpush3.bf16.msra.mxu1 %v6639_v29 }
 0x3c5   :  { %5805 = vmatprep.subr.bf16.mxu1 %v6640_v15 }
 0x3c8   :  { %5806 = vmatpush3.bf16.msra.mxu1 %v6641_v31 }
 0x3c9   :  { %5807 = vmatprep.subr.bf16.mxu1 %v6642_v34 }
 0x3cc   :  { %5808 = vmatpush3.bf16.msra.mxu1 %v6643_v35 }
 0x3cd   :  { %5809 = vmatprep.subr.bf16.mxu1 %v6644_v36 }
 0x3d0   :  { %5810 = vmatpush3.bf16.msra.mxu1 %v6645_v38 }
 0x3d1   :  { %5811 = vmatprep.subr.bf16.mxu1 %v6646_v12 }
 0x3d4   :  { %5812 = vmatpush3.bf16.msra.mxu1 %v6647_v45 }
 0x3d7   :  { %5049 = vmatmul.mubr.bf16.vlgmr.msra.gmra.mxu1 %v4247_v13 }
 0x436   :  { %v4923_v37 = vpop.f32.mrf.mxu0 }
 0x438   :  { %v4925_v32 = vpop.f32.mrf.mxu0 }
 0x43a   :  { %v4927_v46 = vpop.f32.mrf.mxu0 }
 0x43c   :  { %v4929_v56 = vpop.f32.mrf.mxu0 }
 0x456   :  { %v5791_v17 = vpop.f32.mrf.mxu0 }
 0x458   :  { %v5792_v16 = vpop.f32.mrf.mxu0 }
 0x459   :  { %v5793_v25 = vadd.f32 %v5792_v16, %v5791_v17 }
 0x45a   :  { %v5794_v51 = vpop.f32.mrf.mxu0 }
 0x45c   :  { %v5795_v6 = vpop.f32.mrf.mxu0 }
 0x45d   :  { %v5796_v58 = vadd.f32 %v5795_v6, %v5794_v51 }
 0x477   :  { %v4966_v33 = vpop.f32.mrf.mxu1 }
 0x478   :  { %v4967_v2 = vadd.f32 %v4966_v33, %v4923_v37 }
 0x479   :  { %v4968_v39 = vpop.f32.mrf.mxu1 }
 0x47a   :  { %v5057_v47 = vadd.f32 %v4967_v2, %v7054_v3  ;;  %v4969_v41 = vadd.f32 %v4968_v39, %v4925_v32 }
 0x47b   :  { %v4970_v9 = vpop.f32.mrf.mxu1 }
 0x47c   :  { %v5080_v49 = vadd.f32 %v5068_v43, %v5057_v47  ;;  %v5058_v53 = vadd.f32 %v4969_v41, %v7056_v24  ;;  %v4971_v55 = vadd.f32 %v4970_v9, %v4927_v46 }
 0x47d   :  { %v4972_v59 = vpop.f32.mrf.mxu1 }
 0x47e   :  { %5086 = vst [vmem:[#allocation11] sm:$0xff] %v5080_v49  ;;  %v5081_v60 = vadd.f32 %v5072_v28, %v5058_v53  ;;  %v5060_v5 = vadd.f32 %v4971_v55, %v7058_v0  ;;  %v4973_v7 = vadd.f32 %v4972_v59, %v4929_v56  ;;  %v5076_v0 = vrot.slane %v5063_v42, %v6927_v44 }
 0x480   :  { %5087 = vst [vmem:[#allocation11 + $0x8] sm:$0xff] %v5081_v60  ;;  %v5083_v63 = vadd.f32 %v5068_v43, %v5060_v5  ;;  %v5061_v8 = vadd.f32 %v4973_v7, %v7061_v57 }
 0x482   :  { %5089 = vst [vmem:[#allocation11 + $0x18] sm:$0xff] %v5083_v63  ;;  %v5084_v3 = vadd.f32 %v5072_v28, %v5061_v8 }
 0x484   :  { %5090 = vst [vmem:[#allocation11 + $0x20] sm:$0xff] %v5084_v3 }
 0x497   :  { %v5813_v40 = vpop.f32.mrf.mxu1 }
 0x499   :  { %v5814_v24 = vpop.f32.mrf.mxu1 }
 0x49a   :  { %v5815_v62 = vadd.f32 %v5814_v24, %v5813_v40 }
 0x49b   :  { %v5816_v11 = vpop.f32.mrf.mxu1 }
 0x49c   :  { %v5051_v18 = vadd.f32 %v5815_v62, %v5793_v25 }
 0x49d   :  { %v5817_v4 = vpop.f32.mrf.mxu1 }
 0x49e   :  { %v5059_v22 = vadd.f32 %v5051_v18, %v7064_v1  ;;  %v5818_v57 = vadd.f32 %v5817_v4, %v5816_v11 }
 0x4a0   :  { %v5082_v48 = vadd.f32 %v5076_v0, %v5059_v22  ;;  %v5054_v27 = vadd.f32 %v5818_v57, %v5796_v58 }
 0x4a2   :  { %5088 = vst [vmem:[#allocation11 + $0x10] sm:$0xff] %v5082_v48  ;;  %v5062_v14 = vadd.f32 %v5054_v27, %v7066_v61 }
 0x4a4   :  { %v5085_v50 = vadd.f32 %v5076_v0, %v5062_v14 }
 0x4a6   :  { %5091 = vst [vmem:[#allocation11 + $0x28] sm:$0xff] %v5085_v50 }
 0x4a7   :  { %6807 = shalt.err (!%p6804_p1)
}
 0x4a8   :  { %5103 = dma.vmem_to_hbm [thread:$0]  %s5098_s4, 768, %s7098_s5, [#allocation4], %s6831_s9, %s6831_s9, %s6832_s10  }
 0x4a9   :  { %6822 = dma.done.wait [#allocation4], 768  }
 0x4aa   :  { %6823 = vsyncadd [#allocation4], 4294966528 }
 0x4ab   :  { %5107 = vsyncpa [#allocation3], 1 }
 0x4ac   :  { %5108 = vsyncpa [#allocation6], 1 }
 0x4ad   :  { %5109 = vsyncpa [#allocation9], 1 }
 0x4ae   :  { %5110 = vsyncpa [#allocation4], 1 }

// kernel: tpu_custom_call.1
= control target key start
LH: loop header
LB: loop body
LE: loop exit
PB: predicated region body
PF: predicated region fallthrough
CT: control target
= control target key end

     0   :  { %8 = vsyncpa [#allocation4], 0  ;;  %s2278_s0 = inlined_call_operand.hbm [shape: bf16[16,384], index: 0, kind: input, shape index: {}]   ;;  %s2279_s1 = inlined_call_operand.hbm [shape: bf16[384,1536], index: 1, kind: input, shape index: {}]   ;;  %s2280_s2 = inlined_call_operand.hbm [shape: f32[1,1536], index: 2, kind: input, shape index: {}]   ;;  %s2281_s3 = inlined_call_operand.hbm [shape: bf16[16,1536], index: 3, kind: output, shape index: {}]  }
   0x1   :  { %9 = vsyncpa [#allocation7], 0 }
   0x2   :  { %11 = vsyncpa [#allocation7 + $0x1], 0 }
   0x3   :  { %12 = vsyncpa [#allocation5], 0 }
   0x4   :  { %14 = vsyncpa [#allocation5 + $0x1], 0  ;;  %s1958_s12 = smov 0   ;;  %s1960_s13 = smov 0  }
   0x5   :  { %s1962_s14 = smov 0   ;;  %s1964_s15 = smov 0  }
   0x6   :  { %s1966_s16 = smov 0   ;;  %s1968_s17 = smov 0  }
   0x7 LB: > { %s35_s18 = sadd.s32 1, %s1919_s16  ;;  %s76_s19 = sadd.s32 1, %s1911_s14  ;;  %s1923_s17 = sphi %s1968_s17, %s20_s17   ;;  %s1919_s16 = sphi %s1966_s16, %s2300_s16   ;;  %s1915_s15 = sphi %s1964_s15, %s2299_s15   ;;  %s1911_s14 = sphi %s1962_s14, %s2298_s14   ;;  %s1907_s13 = sphi %s1960_s13, %s2297_s13   ;;  %s1903_s12 = sphi %s1958_s12, %s2296_s12  }
   0x8   : > { %p37_p0 = scmp.ge.s32.totalorder %s35_s18, 3  ;;  %p83_p1 = scmp.ne.s32.totalorder %s1911_s14, %s1907_s13 }
   0x9   : > { %p84_p2 = scmp.eq.s32.totalorder %s1923_s17, 0  ;;  %p1532_p4 = scmp.lt.s32.totalorder %s1923_s17, 3 }
   0xa   : > { %s2302_s18 = smov (%p37_p0, %s35_s18), 0  ;;  %s186_s21 = sand.u32 1, %s1923_s17  }
   0xb   : > { %p85_p3 = por %p84_p2, %p83_p1  ;;  %s72_s20 = ssub.s32 %s1919_s16, %s2302_s18 }
   0xc   : > { %p74_p5 = scmp.eq.s32.totalorder %s72_s20, 0  ;;  %s188_s22 = sand.u32 1, %s1911_s14  }
   0xd   : > { %s1497_s23 = sshll.u32 %s1919_s16, 8  ;;  %s1504_s25 = smul.u32 768, %s188_s22 }
   0xe   : > { %s2005_s24 = scalar_select %p74_p5, %s1911_s14, %s76_s19  }
   0xf   : > { %s199_s28 = scalar_lea.hbm %s2279_s1, %s1497_s23  ;;  %p2012_p6 = pnand %p1532_p4, %p85_p3 }
  0x10   : > { %s190_s30 = scalar_lea.vmem [#allocation6], %s1504_s25  ;;  %s2016_s5 = scalar_lea.sflag [#allocation7], %s186_s21 }
  0x11   : > { %s200_s4 = sshll.u32 %s190_s30, 4  ;;  %p2283_p7 = pneg %p2012_p6  ;;  %s201_s4 = int_to_ptr.vmem [resolvable:$true] %s200_s4 }
  0x12   : > { %s1770_s6 = scalar_lea.vmem %s201_s4, 12288  ;;  %s1925_s7 = smov [#allocation6]  }
  0x13   : > { %p1771_p8 = scmp.ne.s32.totalorder %s201_s4, %s1770_s6  ;;  %s1775_s8 = sshll.u32 %s1925_s7, 4  ;;  %s1776_s8 = int_to_ptr.vmem [resolvable:$false] %s1775_s8 }
  0x14   : > { %s1777_s9 = scalar_lea.vmem %s1776_s8, 24576  ;;  %p1778_p11 = scmp.lt.s32.totalorder %s201_s4, %s1776_s8 }
  0x15   : > { %p1773_p9 = pnand %p1771_p8, %p2283_p7  ;;  %p1779_p12 = scmp.lt.s32.totalorder %s1777_s9, %s1770_s6 }
  0x17   : > { %p1774_p10 = pneg %p1773_p9  ;;  %p1780_p13 = por %p1779_p12, %p1778_p11 }
  0x19   : > { %p1781_p0 = pnand %p1780_p13, %p1774_p10 }
  0x1b   : > { %1784 = shalt.err (!%p1781_p0)
}
  0x1c   : > { %s1926_s10 = smov 768   ;;  %s1927_s11 = smov 256  }
  0x1d   : > { %s1928_s19 = smov 16   ;;  %s2027_s20 = sadd.s32 4294967295, %s1923_s17  }
  0x1e   : > { %1523 = dma.hbm_to_vmem [thread:$0]  (!%p2012_p6), %s199_s28, 12288, %s201_s4, %s2016_s5, %s1926_s10, %s1927_s11, %s1928_s19  }
  0x1f   : > { %s1376_s21 = sadd.s32 4294967294, %s1923_s17   ;;  %p89_p2 = scmp.ne.s32.totalorder %s1907_s13, %s1903_s12 }
  0x20   : > { %p2282_p3 = scmp.eq.s32.totalorder %s2027_s20, 0  ;;  %p141_p4 = scmp.eq.s32.totalorder %s2027_s20, 2 }
  0x21   : > { %p147_p5 = scmp.eq.s32.totalorder %s1376_s21, 2  ;;  %p1377_p9 = scmp.ge.s32.totalorder %s1923_s17, 1 }
  0x22   : > { %p2036_p8 = por %p2282_p3, %p89_p2  ;;  %p2044_p10 = por %p141_p4, %p83_p1 }
  0x23   : > { %p2048_p11 = por %p147_p5, %p89_p2  ;;  %p154_p12 = scmp.lt.s32.totalorder %s1923_s17, 4 }
  0x24   : > { %s2287_s25 = scalar_select %p2044_p10, 1, 0 }
  0x25   : > { %s2288_s26 = scalar_select %p2048_p11, 1, 0 }
  0x26   : > { %p2053_p13 = pnand %p1377_p9, %p154_p12  ;;  %s1929_s28 = smov [#allocation3]  }
  0x27   : > { %s172_s30 = sshll.u32 %s1929_s28, 4  ;;  %s1382_s4 = sshll.u32 %s188_s22, 2  ;;  %s173_s30 = int_to_ptr.vmem [resolvable:$true] %s172_s30 }
  0x28   : > { %p1516_p0 = pneg %p2053_p13  ;;  %s1498_s6 = sshll.u32 %s1919_s16, 6 }
  0x29   : > { %s2071_s10 = scalar_lea.hbm %s2280_s2, %s1498_s6  ;;  %s214_s11 = scalar_lea.vmem [#allocation8], %s1382_s4 }
  0x2a   : > { %p2064_p1 = pnand %p1516_p0, %p2282_p3  ;;  %s222_s19 = sshll.u32 %s214_s11, 4  ;;  %s223_s19 = int_to_ptr.vmem [resolvable:$true] %s222_s19 }
  0x2b   : > { %s1796_s21 = scalar_lea.vmem %s173_s30, 384  ;;  %p1804_p12 = scmp.lt.s32.totalorder %s173_s30, %s173_s30 }
  0x2c   : > { %p1787_p2 = pneg %p2064_p1  ;;  %p1797_p4 = scmp.ne.s32.totalorder %s173_s30, %s1796_s21 }
  0x2d   : > { %p1805_p0 = scmp.lt.s32.totalorder %s1796_s21, %s1796_s21 }
  0x2e   : > { %p1799_p5 = pnand %p1797_p4, %p1787_p2 }
  0x2f   : > { %p1806_p3 = por %p1805_p0, %p1804_p12 }
  0x30   : > { %p1800_p9 = pneg %p1799_p5 }
  0x32   : > { %p1807_p7 = pnand %p1806_p3, %p1800_p9 }
  0x34   : > { %1810 = shalt.err (!%p1807_p7)
}
  0x35   : > { %s1930_s22 = smov 192   ;;  %s1931_s28 = smov 12  }
  0x36   : > { %1519 = dma.hbm_to_vmem [thread:$0]  (!%p2064_p1), %s2278_s0, 384, %s173_s30, [#allocation4], %s1930_s22, %s1930_s22, %s1931_s28  }
  0x37   : > { %s1824_s8 = scalar_lea.vmem %s223_s19, 64  ;;  %p2291_p10 = pneg %p2012_p6 }
  0x38   : > { %p1825_p11 = scmp.ne.s32.totalorder %s223_s19, %s1824_s8  ;;  %s1932_s9 = smov [#allocation8]  }
  0x39   : > { %s1829_s11 = sshll.u32 %s1932_s9, 4  ;;  %s1830_s11 = int_to_ptr.vmem [resolvable:$false] %s1829_s11 }
  0x3a   : > { %p1827_p2 = pnand %p1825_p11, %p2291_p10  ;;  %s1831_s21 = scalar_lea.vmem %s1830_s11, 128 }
  0x3b   : > { %p1832_p7 = scmp.lt.s32.totalorder %s223_s19, %s1830_s11  ;;  %p1833_p3 = scmp.lt.s32.totalorder %s1831_s21, %s1824_s8 }
  0x3c   : > { %p1828_p4 = pneg %p1827_p2 }
  0x3d   : > { %p1834_p5 = por %p1833_p3, %p1832_p7 }
  0x3f   : > { %p1835_p9 = pnand %p1834_p5, %p1828_p4 }
  0x41   : > { %1838 = shalt.err (!%p1835_p9)
}
  0x42   : > { %1526 = dma.hbm_to_vmem [thread:$0]  (!%p2012_p6), %s2071_s10, 64, %s223_s19, %s2016_s5  }
  0x43   : > { %231 = sbr.rel (%p2053_p13) target bundleno = 424 (0x1a8), region = 32  ;;  %p2292_p10 = scmp.eq.s32.totalorder (!%p2053_p13), %s2027_s20, 0 }
  0x48   : > { %1890 = dma.done.wait (%p2292_p10), [#allocation4], 384   ;;  %p2293_p11 = pmov %p2292_p10 }
  0x49   : > { %s237_s30 = sand.u32 1, %s2027_s20   ;;  %s2095_s7 = sand.u32 1, %s1907_s13  }
  0x4a   : > { %1892 = vsyncadd (%p2293_p11), [#allocation4], 4294966912  ;;  %s1505_s29 = smul.u32 768, %s2095_s7  ;;  %s238_s22 = scalar_lea.sflag [#allocation7], %s237_s30 }
  0x4c   : > { %s2098_s28 = scalar_lea.vmem [#allocation6], %s1505_s29 }
  0x4d   : > { %1894 = dma.done.wait (%p2036_p8), %s238_s22, 12352  }
  0x4e   : > { %1896 = vsyncadd (%p2036_p8), %s238_s22, 4294954944  ;;  %v1933_v0 = vmov 0   ;;  %v1593_v1 = vld [vmem:[%s2098_s28 + $0xe4] ss:$16 sps:$4 sm:$0xff]   ;;  %v1597_v3 = vld [vmem:[%s2098_s28 + $0xe0] ss:$16 sps:$4 sm:$0xff]  }
  0x4f   : > { %977 = vmatprep.mubr.bf16.mxu1 %v1933_v0  ;;  %v1595_v2 = vld [vmem:[%s2098_s28 + $0x2e4] ss:$16 sps:$4 sm:$0xff]   ;;  %902 = vmatprep.subr.bf16.mxu0 %v1593_v1  ;;  %v1598_v4 = vld [vmem:[%s2098_s28 + $0x2e0] ss:$16 sps:$4 sm:$0xff]   ;;  %v1646_v34 = vld [vmem:[%s2098_s28 + $0xec] ss:$16 sps:$4 sm:$0xff]  }
  0x50   : > { %945 = vmatprep.subr.bf16.mxu1 %v1595_v2  ;;  %v1599_v5 = vld [vmem:[%s2098_s28 + $0xc4] ss:$16 sps:$4 sm:$0xff]   ;;  %903 = vmatpush1.bf16.msra.mxu0 %v1597_v3  ;;  %v1603_v7 = vld [vmem:[%s2098_s28 + $0xc0] ss:$16 sps:$4 sm:$0xff]   ;;  %v1644_v36 = vld [vmem:[%s2098_s28 + $0xe8] ss:$16 sps:$4 sm:$0xff]  }
  0x51   : > { %946 = vmatpush1.bf16.msra.mxu1 %v1598_v4  ;;  %v1601_v6 = vld [vmem:[%s2098_s28 + $0x2c4] ss:$16 sps:$4 sm:$0xff]   ;;  %904 = vmatprep.subr.bf16.mxu0 %v1599_v5  ;;  %v1604_v8 = vld [vmem:[%s2098_s28 + $0x2c0] ss:$16 sps:$4 sm:$0xff]   ;;  %v1652_v39 = vld [vmem:[%s2098_s28 + $0xcc] ss:$16 sps:$4 sm:$0xff]  }
  0x52   : > { %947 = vmatprep.subr.bf16.mxu1 %v1601_v6  ;;  %v1605_v9 = vld [vmem:[%s2098_s28 + $0xa4] ss:$16 sps:$4 sm:$0xff]   ;;  %v1609_v11 = vld [vmem:[%s2098_s28 + $0xa0] ss:$16 sps:$4 sm:$0xff]   ;;  %v1650_v40 = vld [vmem:[%s2098_s28 + $0xc8] ss:$16 sps:$4 sm:$0xff]  }
  0x53   : > { %v1607_v10 = vld [vmem:[%s2098_s28 + $0x2a4] ss:$16 sps:$4 sm:$0xff]   ;;  %v1610_v12 = vld [vmem:[%s2098_s28 + $0x2a0] ss:$16 sps:$4 sm:$0xff]   ;;  %v1658_v43 = vld [vmem:[%s2098_s28 + $0xac] ss:$16 sps:$4 sm:$0xff]  }
  0x54   : > { %905 = vmatpush1.bf16.msra.mxu0 %v1603_v7  ;;  %v1611_v13 = vld [vmem:[%s2098_s28 + $0x84] ss:$16 sps:$4 sm:$0xff]   ;;  %v1615_v15 = vld [vmem:[%s2098_s28 + $0x80] ss:$16 sps:$4 sm:$0xff]   ;;  %v1656_v44 = vld [vmem:[%s2098_s28 + $0xa8] ss:$16 sps:$4 sm:$0xff]  }
  0x55   : > { %948 = vmatpush1.bf16.msra.mxu1 %v1604_v8  ;;  %906 = vmatprep.subr.bf16.mxu0 %v1605_v9  ;;  %v1613_v14 = vld [vmem:[%s2098_s28 + $0x284] ss:$16 sps:$4 sm:$0xff]   ;;  %v1616_v16 = vld [vmem:[%s2098_s28 + $0x280] ss:$16 sps:$4 sm:$0xff]   ;;  %v1664_v47 = vld [vmem:[%s2098_s28 + $0x8c] ss:$16 sps:$4 sm:$0xff]  }
  0x56   : > { %949 = vmatprep.subr.bf16.mxu1 %v1607_v10  ;;  %v1617_v17 = vld [vmem:[%s2098_s28 + $0x64] ss:$16 sps:$4 sm:$0xff]   ;;  %v1621_v19 = vld [vmem:[%s2098_s28 + $0x60] ss:$16 sps:$4 sm:$0xff]   ;;  %v1662_v48 = vld [vmem:[%s2098_s28 + $0x88] ss:$16 sps:$4 sm:$0xff]  }
  0x57   : > { %v1619_v18 = vld [vmem:[%s2098_s28 + $0x264] ss:$16 sps:$4 sm:$0xff]   ;;  %v1622_v20 = vld [vmem:[%s2098_s28 + $0x260] ss:$16 sps:$4 sm:$0xff]   ;;  %v1692_v51 = vld [vmem:[#allocation3 + $0x4] ss:$12 sps:$4 sm:$0xff]  }
  0x58   : > { %907 = vmatpush1.bf16.msra.mxu0 %v1609_v11  ;;  %v1623_v21 = vld [vmem:[%s2098_s28 + $0x44] ss:$16 sps:$4 sm:$0xff]   ;;  %v1627_v23 = vld [vmem:[%s2098_s28 + $0x40] ss:$16 sps:$4 sm:$0xff]   ;;  %v1670_v52 = vld [vmem:[%s2098_s28 + $0x6c] ss:$16 sps:$4 sm:$0xff]   ;;  %934 = vmatprep.mubr.bf16.mxu0 %v1692_v51 }
  0x59   : > { %950 = vmatpush1.bf16.msra.mxu1 %v1610_v12  ;;  %908 = vmatprep.subr.bf16.mxu0 %v1611_v13  ;;  %v1625_v22 = vld [vmem:[%s2098_s28 + $0x244] ss:$16 sps:$4 sm:$0xff]   ;;  %v1628_v24 = vld [vmem:[%s2098_s28 + $0x240] ss:$16 sps:$4 sm:$0xff]   ;;  %v1668_v53 = vld [vmem:[%s2098_s28 + $0x68] ss:$16 sps:$4 sm:$0xff]  }
  0x5a   : > { %951 = vmatprep.subr.bf16.mxu1 %v1613_v14  ;;  %v1629_v25 = vld [vmem:[%s2098_s28 + $0x24] ss:$16 sps:$4 sm:$0xff]   ;;  %v1633_v27 = vld [vmem:[%s2098_s28 + $0x20] ss:$16 sps:$4 sm:$0xff]   ;;  %v1676_v56 = vld [vmem:[%s2098_s28 + $0x4c] ss:$16 sps:$4 sm:$0xff]  }
  0x5b   : > { %v1631_v26 = vld [vmem:[%s2098_s28 + $0x224] ss:$16 sps:$4 sm:$0xff]   ;;  %v1634_v28 = vld [vmem:[%s2098_s28 + $0x220] ss:$16 sps:$4 sm:$0xff]   ;;  %v1674_v57 = vld [vmem:[%s2098_s28 + $0x48] ss:$16 sps:$4 sm:$0xff]  }
  0x5c   : > { %909 = vmatpush1.bf16.msra.mxu0 %v1615_v15  ;;  %v1635_v29 = vld [vmem:[%s2098_s28 + $0x4] ss:$16 sps:$4 sm:$0xff]   ;;  %v1639_v31 = vld [vmem:[%s2098_s28] ss:$16 sps:$4 sm:$0xff]   ;;  %v1682_v60 = vld [vmem:[%s2098_s28 + $0x2c] ss:$16 sps:$4 sm:$0xff]  }
  0x5d   : > { %952 = vmatpush1.bf16.msra.mxu1 %v1616_v16  ;;  %910 = vmatprep.subr.bf16.mxu0 %v1617_v17  ;;  %v1637_v30 = vld [vmem:[%s2098_s28 + $0x204] ss:$16 sps:$4 sm:$0xff]   ;;  %v1640_v32 = vld [vmem:[%s2098_s28 + $0x200] ss:$16 sps:$4 sm:$0xff]   ;;  %v1680_v61 = vld [vmem:[%s2098_s28 + $0x28] ss:$16 sps:$4 sm:$0xff]  }
  0x5e   : > { %953 = vmatprep.subr.bf16.mxu1 %v1619_v18  ;;  %v1641_v33 = vld [vmem:[%s2098_s28 + $0x1e4] ss:$16 sps:$4 sm:$0xff]   ;;  %v2139_v35 = vld [vmem:[#allocation3 + $0x8] ss:$12 sps:$4 sm:$0xff]   ;;  %v1686_v2 = vld [vmem:[%s2098_s28 + $0x8] ss:$16 sps:$4 sm:$0xff]  }
  0x5f   : > { %v1647_v37 = vld [vmem:[%s2098_s28 + $0x1e0] ss:$16 sps:$4 sm:$0xff]   ;;  %v1648_v38 = vld [vmem:[%s2098_s28 + $0x1c4] ss:$16 sps:$4 sm:$0xff]   ;;  %v1688_v1 = vld [vmem:[%s2098_s28 + $0xc] ss:$16 sps:$4 sm:$0xff]  }
  0x60   : > { %911 = vmatpush1.bf16.msra.mxu0 %v1621_v19  ;;  %v1653_v41 = vld [vmem:[%s2098_s28 + $0x1c0] ss:$16 sps:$4 sm:$0xff]   ;;  %v1654_v42 = vld [vmem:[%s2098_s28 + $0x1a4] ss:$16 sps:$4 sm:$0xff]   ;;  %v1695_v4 = vld [vmem:[%s2098_s28 + $0x1ec] ss:$16 sps:$4 sm:$0xff]  }
  0x61   : > { %954 = vmatpush1.bf16.msra.mxu1 %v1622_v20  ;;  %912 = vmatprep.subr.bf16.mxu0 %v1623_v21  ;;  %v1659_v45 = vld [vmem:[%s2098_s28 + $0x1a0] ss:$16 sps:$4 sm:$0xff]   ;;  %v1660_v46 = vld [vmem:[%s2098_s28 + $0x184] ss:$16 sps:$4 sm:$0xff]   ;;  %v1698_v5 = vld [vmem:[%s2098_s28 + $0x2ec] ss:$16 sps:$4 sm:$0xff]  }
  0x62   : > { %955 = vmatprep.subr.bf16.mxu1 %v1625_v22  ;;  %v1665_v49 = vld [vmem:[%s2098_s28 + $0x180] ss:$16 sps:$4 sm:$0xff]   ;;  %v1666_v50 = vld [vmem:[%s2098_s28 + $0x164] ss:$16 sps:$4 sm:$0xff]   ;;  %v1693_v7 = vld [vmem:[%s2098_s28 + $0x1e8] ss:$16 sps:$4 sm:$0xff]  }
  0x63   : > { %v1671_v54 = vld [vmem:[%s2098_s28 + $0x160] ss:$16 sps:$4 sm:$0xff]   ;;  %v1672_v55 = vld [vmem:[%s2098_s28 + $0x144] ss:$16 sps:$4 sm:$0xff]   ;;  %v1696_v8 = vld [vmem:[%s2098_s28 + $0x2e8] ss:$16 sps:$4 sm:$0xff]  }
  0x64   : > { %913 = vmatpush1.bf16.msra.mxu0 %v1627_v23  ;;  %v1677_v58 = vld [vmem:[%s2098_s28 + $0x140] ss:$16 sps:$4 sm:$0xff]   ;;  %v1678_v59 = vld [vmem:[%s2098_s28 + $0x124] ss:$16 sps:$4 sm:$0xff]   ;;  %v1701_v9 = vld [vmem:[%s2098_s28 + $0x1cc] ss:$16 sps:$4 sm:$0xff]  }
  0x65   : > { %956 = vmatpush1.bf16.msra.mxu1 %v1628_v24  ;;  %914 = vmatprep.subr.bf16.mxu0 %v1629_v25  ;;  %v1683_v62 = vld [vmem:[%s2098_s28 + $0x120] ss:$16 sps:$4 sm:$0xff]   ;;  %v1684_v63 = vld [vmem:[%s2098_s28 + $0x104] ss:$16 sps:$4 sm:$0xff]   ;;  %v1704_v10 = vld [vmem:[%s2098_s28 + $0x2cc] ss:$16 sps:$4 sm:$0xff]  }
  0x66   : > { %957 = vmatprep.subr.bf16.mxu1 %v1631_v26  ;;  %v1689_v3 = vld [vmem:[%s2098_s28 + $0x100] ss:$16 sps:$4 sm:$0xff]   ;;  %v2174_v6 = vld [vmem:[#allocation3] ss:$12 sps:$4 sm:$0xff]   ;;  %v1707_v13 = vld [vmem:[%s2098_s28 + $0x1ac] ss:$16 sps:$4 sm:$0xff]  }
  0x67   : > { %v1699_v11 = vld [vmem:[%s2098_s28 + $0x1c8] ss:$16 sps:$4 sm:$0xff]   ;;  %v1710_v14 = vld [vmem:[%s2098_s28 + $0x2ac] ss:$16 sps:$4 sm:$0xff]   ;;  %s1387_s5 = sshll.u32 %s2095_s7, 2  ;;  %s1388_s23 = sshll.u32 %s2095_s7, 5 }
  0x68   : > { %915 = vmatpush1.bf16.msra.mxu0 %v1633_v27  ;;  %v1702_v12 = vld [vmem:[%s2098_s28 + $0x2c8] ss:$16 sps:$4 sm:$0xff]   ;;  %v1713_v17 = vld [vmem:[%s2098_s28 + $0x18c] ss:$16 sps:$4 sm:$0xff]   ;;  %s250_s20 = scalar_lea.vmem [#allocation8], %s1387_s5  ;;  %s2218_s27 = scalar_lea.vmem [#allocation9], %s1388_s23 }
  0x69   : > { %958 = vmatpush1.bf16.msra.mxu1 %v1634_v28  ;;  %916 = vmatprep.subr.bf16.mxu0 %v1635_v29  ;;  %v1705_v15 = vld [vmem:[%s2098_s28 + $0x1a8] ss:$16 sps:$4 sm:$0xff]   ;;  %v1716_v18 = vld [vmem:[%s2098_s28 + $0x28c] ss:$16 sps:$4 sm:$0xff]   ;;  %s1503_s10 = sshll.u32 %s1915_s15, 8  ;;  %s1248_s19 = sshll.u32 %s2218_s27, 4  ;;  %s2230_s19 = int_to_ptr.vmem [resolvable:$true] %s1248_s19 }
  0x6a   : > { %959 = vmatprep.subr.bf16.mxu1 %v1637_v30  ;;  %v1708_v16 = vld [vmem:[%s2098_s28 + $0x2a8] ss:$16 sps:$4 sm:$0xff]   ;;  %v1722_v21 = vld [vmem:[%s2098_s28 + $0x26c] ss:$16 sps:$4 sm:$0xff]   ;;  %s2228_s8 = scalar_lea.hbm %s2281_s3, %s1503_s10  ;;  %s1232_s15 = scalar_lea.sflag [#allocation5], %s2095_s7 }
  0x6b   : > { %v1711_v19 = vld [vmem:[%s2098_s28 + $0x188] ss:$16 sps:$4 sm:$0xff]   ;;  %v1725_v24 = vld [vmem:[%s2098_s28 + $0x14c] ss:$16 sps:$4 sm:$0xff]   ;;  %s1839_s9 = scalar_lea.vmem %s2230_s19, 512  ;;  %p2294_p8 = scmp.ne.s32.totalorder %s2287_s25, 0 }
  0x6c   : > { %917 = vmatpush1.bf16.msra.mxu0 %v1639_v31  ;;  %v1714_v20 = vld [vmem:[%s2098_s28 + $0x288] ss:$16 sps:$4 sm:$0xff]   ;;  %v1728_v25 = vld [vmem:[%s2098_s28 + $0x24c] ss:$16 sps:$4 sm:$0xff]   ;;  %p1840_p6 = scmp.ne.s32.totalorder %s2230_s19, %s1839_s9  ;;  %s1934_s11 = smov [#allocation9]  }
  0x6d   : > { %960 = vmatpush1.bf16.msra.mxu1 %v1640_v32  ;;  %918 = vmatprep.subr.bf16.mxu0 %v1641_v33  ;;  %v1717_v22 = vld [vmem:[%s2098_s28 + $0x168] ss:$16 sps:$4 sm:$0xff]   ;;  %v1731_v28 = vld [vmem:[%s2098_s28 + $0x12c] ss:$16 sps:$4 sm:$0xff]   ;;  %s1843_s21 = sshll.u32 %s1934_s11, 4  ;;  %s1844_s21 = int_to_ptr.vmem [resolvable:$false] %s1843_s21 }
  0x6e   : > { %988 = vmatprep.subr.bf16.mxu1 %v1646_v34  ;;  %v1720_v23 = vld [vmem:[%s2098_s28 + $0x268] ss:$16 sps:$4 sm:$0xff]   ;;  %v1734_v29 = vld [vmem:[%s2098_s28 + $0x22c] ss:$16 sps:$4 sm:$0xff]   ;;  %p1841_p13 = pnand %p1840_p6, %p2294_p8  ;;  %s1845_s30 = scalar_lea.vmem %s1844_s21, 1024 }
  0x6f   : > { %v1723_v26 = vld [vmem:[%s2098_s28 + $0x148] ss:$16 sps:$4 sm:$0xff]   ;;  %v1737_v32 = vld [vmem:[%s2098_s28 + $0x10c] ss:$16 sps:$4 sm:$0xff]   ;;  %p1846_p12 = scmp.lt.s32.totalorder %s2230_s19, %s1844_s21  ;;  %p1847_p0 = scmp.lt.s32.totalorder %s1845_s30, %s1839_s9 }
  0x70   : > { %978 = vmatmul.mubr.bf16.vlgmr.msra.gmra.mxu1 %v2139_v35  ;;  %919 = vmatpush2.bf16.msra.mxu0 %v1647_v37  ;;  %v1726_v27 = vld [vmem:[%s2098_s28 + $0x248] ss:$16 sps:$4 sm:$0xff]   ;;  %v1740_v33 = vld [vmem:[%s2098_s28 + $0x20c] ss:$16 sps:$4 sm:$0xff]   ;;  %v1103_v37 = vlaneseq  ;;  %p1842_p1 = pneg %p1841_p13 }
  0x71   : > { %989 = vmatpush1.bf16.msra.mxu1 %v1644_v36  ;;  %920 = vmatprep.subr.bf16.mxu0 %v1648_v38  ;;  %v1729_v30 = vld [vmem:[%s2098_s28 + $0x128] ss:$16 sps:$4 sm:$0xff]   ;;  %p1848_p2 = por %p1847_p0, %p1846_p12 }
  0x72   : > { %990 = vmatprep.subr.bf16.mxu1 %v1652_v39  ;;  %1020 = vmatprep.mubr.bf16.mxu1 %v1692_v51  ;;  %v1732_v31 = vld [vmem:[%s2098_s28 + $0x228] ss:$16 sps:$4 sm:$0xff]   ;;  %v2211_v38 = vshrl.u32 %v1103_v37, 7 }
  0x73   : > { %v1735_v34 = vld [vmem:[%s2098_s28 + $0x108] ss:$16 sps:$4 sm:$0xff]   ;;  %p1849_p4 = pnand %p1848_p2, %p1842_p1 }
  0x74   : > { %921 = vmatpush2.bf16.msra.mxu0 %v1653_v41  ;;  %v1738_v36 = vld [vmem:[%s2098_s28 + $0x208] ss:$16 sps:$4 sm:$0xff]   ;;  %v1101_v41 = vld [vmem:[%s250_s20] sm:$0xf] }
  0x75   : > { %991 = vmatpush1.bf16.msra.mxu1 %v1650_v40  ;;  %922 = vmatprep.subr.bf16.mxu0 %v1654_v42  ;;  %v1105_v40 = vsub.s32 0, %v2211_v38  ;;  %v1109_v42 = vsub.s32 1, %v2211_v38 }
  0x76   : > { %992 = vmatprep.subr.bf16.mxu1 %v1658_v43 }
  0x78   : > { %923 = vmatpush2.bf16.msra.mxu0 %v1659_v45 }
  0x79   : > { %993 = vmatpush1.bf16.msra.mxu1 %v1656_v44  ;;  %924 = vmatprep.subr.bf16.mxu0 %v1660_v46  ;;  %v1106_v44 = vrot.slane %v1101_v41, %v1105_v40 }
  0x7a   : > { %994 = vmatprep.subr.bf16.mxu1 %v1664_v47  ;;  %v1110_v47 = vrot.slane %v1101_v41, %v1109_v42 }
  0x7c   : > { %925 = vmatpush2.bf16.msra.mxu0 %v1665_v49 }
  0x7d   : > { %995 = vmatpush1.bf16.msra.mxu1 %v1662_v48  ;;  %926 = vmatprep.subr.bf16.mxu0 %v1666_v50 }
  0x7e   : > { %996 = vmatprep.subr.bf16.mxu1 %v1670_v52 }
  0x80   : > { %927 = vmatpush2.bf16.msra.mxu0 %v1671_v54 }
  0x81   : > { %997 = vmatpush1.bf16.msra.mxu1 %v1668_v53  ;;  %928 = vmatprep.subr.bf16.mxu0 %v1672_v55 }
  0x82   : > { %998 = vmatprep.subr.bf16.mxu1 %v1676_v56 }
  0x84   : > { %929 = vmatpush2.bf16.msra.mxu0 %v1677_v58 }
  0x85   : > { %999 = vmatpush1.bf16.msra.mxu1 %v1674_v57  ;;  %930 = vmatprep.subr.bf16.mxu0 %v1678_v59 }
  0x86   : > { %1000 = vmatprep.subr.bf16.mxu1 %v1682_v60 }
  0x88   : > { %931 = vmatpush2.bf16.msra.mxu0 %v1683_v62 }
  0x89   : > { %1001 = vmatpush1.bf16.msra.mxu1 %v1680_v61  ;;  %932 = vmatprep.subr.bf16.mxu0 %v1684_v63 }
  0x8a   : > { %1002 = vmatprep.subr.bf16.mxu1 %v1688_v1 }
  0x8c   : > { %933 = vmatpush2.bf16.msra.mxu0 %v1689_v3 }
  0x8d   : > { %1003 = vmatpush1.bf16.msra.mxu1 %v1686_v2  ;;  %1031 = vmatprep.subr.bf16.mxu0 %v1698_v5 }
  0x8e   : > { %1004 = vmatprep.subr.bf16.mxu1 %v1695_v4 }
  0x8f   : > { %935 = vmatmul.mubr.bf16.vlgmr.msra.gmra.mxu0 %v2174_v6 }
  0x90   : > { %1032 = vmatpush1.bf16.msra.mxu0 %v1696_v8  ;;  %1063 = vmatprep.mubr.bf16.mxu0 %v1933_v0  ;;  %v1719_v0 = vld [vmem:[%s2098_s28 + $0x16c] ss:$16 sps:$4 sm:$0xff]  }
  0x91   : > { %1005 = vmatpush2.bf16.msra.mxu1 %v1693_v7  ;;  %1033 = vmatprep.subr.bf16.mxu0 %v1704_v10 }
  0x92   : > { %1006 = vmatprep.subr.bf16.mxu1 %v1701_v9 }
  0x94   : > { %1034 = vmatpush1.bf16.msra.mxu0 %v1702_v12 }
  0x95   : > { %1007 = vmatpush2.bf16.msra.mxu1 %v1699_v11  ;;  %1035 = vmatprep.subr.bf16.mxu0 %v1710_v14 }
  0x96   : > { %1008 = vmatprep.subr.bf16.mxu1 %v1707_v13 }
  0x98   : > { %1036 = vmatpush1.bf16.msra.mxu0 %v1708_v16  ;;  %v1113_v16 = vsub.s32 2, %v2211_v38 }
  0x99   : > { %1009 = vmatpush2.bf16.msra.mxu1 %v1705_v15  ;;  %1037 = vmatprep.subr.bf16.mxu0 %v1716_v18 }
  0x9a   : > { %1010 = vmatprep.subr.bf16.mxu1 %v1713_v17 }
  0x9c   : > { %1038 = vmatpush1.bf16.msra.mxu0 %v1714_v20 }
  0x9d   : > { %1011 = vmatpush2.bf16.msra.mxu1 %v1711_v19  ;;  %1039 = vmatprep.subr.bf16.mxu0 %v1722_v21  ;;  %v1117_v19 = vsub.s32 3, %v2211_v38 }
  0x9e   : > { %1012 = vmatprep.subr.bf16.mxu1 %v1719_v0 }
  0xa0   : > { %1040 = vmatpush1.bf16.msra.mxu0 %v1720_v23  ;;  %v1114_v23 = vrot.slane %v1101_v41, %v1113_v16 }
  0xa1   : > { %1013 = vmatpush2.bf16.msra.mxu1 %v1717_v22  ;;  %1041 = vmatprep.subr.bf16.mxu0 %v1728_v25 }
  0xa2   : > { %1014 = vmatprep.subr.bf16.mxu1 %v1725_v24 }
  0xa4   : > { %1042 = vmatpush1.bf16.msra.mxu0 %v1726_v27 }
  0xa5   : > { %1015 = vmatpush2.bf16.msra.mxu1 %v1723_v26  ;;  %1043 = vmatprep.subr.bf16.mxu0 %v1734_v29 }
  0xa6   : > { %1016 = vmatprep.subr.bf16.mxu1 %v1731_v28 }
  0xa8   : > { %1044 = vmatpush1.bf16.msra.mxu0 %v1732_v31 }
  0xa9   : > { %1017 = vmatpush2.bf16.msra.mxu1 %v1729_v30  ;;  %1045 = vmatprep.subr.bf16.mxu0 %v1740_v33  ;;  %v1118_v30 = vrot.slane %v1101_v41, %v1117_v19 }
  0xaa   : > { %1018 = vmatprep.subr.bf16.mxu1 %v1737_v32 }
  0xac   : > { %1046 = vmatpush1.bf16.msra.mxu0 %v1738_v36 }
  0xad   : > { %1019 = vmatpush2.bf16.msra.mxu1 %v1735_v34 }
  0xaf   : > { %1064 = vmatmul.mubr.bf16.vlgmr.msra.gmra.mxu0 %v2139_v35 }
  0xb0   : > { %1021 = vmatmul.mubr.bf16.vlgmr.msra.gmra.mxu1 %v2174_v6 }
 0x130   : > { %v979_v39 = vpop.f32.mrf.mxu1 }
 0x132   : > { %v981_v43 = vpop.f32.mrf.mxu1 }
 0x134   : > { %v983_v49 = vpop.f32.mrf.mxu1 }
 0x136   : > { %v985_v56 = vpop.f32.mrf.mxu1 }
 0x14f   : > { %v936_v45 = vpop.f32.mrf.mxu0 }
 0x150   : > { %v980_v46 = vadd.f32 %v979_v39, %v936_v45 }
 0x151   : > { %v938_v48 = vpop.f32.mrf.mxu0 }
 0x152   : > { %v1123_v50 = vadd.f32 %v1106_v44, %v980_v46  ;;  %v982_v35 = vadd.f32 %v981_v43, %v938_v48 }
 0x153   : > { %v940_v51 = vpop.f32.mrf.mxu0 }
 0x154   : > { %v1139_v52 = vmul.f32 0.044715, %v1123_v50  ;;  %v1124_v53 = vadd.f32 %v1110_v47, %v982_v35  ;;  %v984_v54 = vadd.f32 %v983_v49, %v940_v51  ;;  %v1131_v0 = vmul.f32 0.5, %v1123_v50 }
 0x155   : > { %v942_v55 = vpop.f32.mrf.mxu0 }
 0x156   : > { %v1147_v57 = vmul.f32 %v1139_v52, %v1123_v50  ;;  %v1140_v58 = vmul.f32 0.044715, %v1124_v53  ;;  %v1127_v59 = vadd.f32 %v1106_v44, %v984_v54  ;;  %v986_v60 = vadd.f32 %v985_v56, %v942_v55 }
 0x157   : > { %v1132_v21 = vmul.f32 0.5, %v1124_v53 }
 0x158   : > { %v1155_v61 = vmul.f32 %v1147_v57, %v1123_v50  ;;  %v1148_v62 = vmul.f32 %v1140_v58, %v1124_v53  ;;  %v1143_v63 = vmul.f32 0.044715, %v1127_v59  ;;  %v1128_v1 = vadd.f32 %v1110_v47, %v986_v60 }
 0x159   : > { %v1135_v39 = vmul.f32 0.5, %v1127_v59 }
 0x15a   : > { %v1163_v2 = vadd.f32 %v1155_v61, %v1123_v50  ;;  %v1156_v3 = vmul.f32 %v1148_v62, %v1124_v53  ;;  %v1151_v4 = vmul.f32 %v1143_v63, %v1127_v59  ;;  %v1144_v5 = vmul.f32 0.044715, %v1128_v1 }
 0x15b   : > { %v1136_v40 = vmul.f32 0.5, %v1128_v1 }
 0x15c   : > { %v1171_v6 = vmul.f32 0.7978846, %v1163_v2  ;;  %v1164_v7 = vadd.f32 %v1156_v3, %v1124_v53  ;;  %v1159_v8 = vmul.f32 %v1151_v4, %v1127_v59  ;;  %v1152_v9 = vmul.f32 %v1144_v5, %v1128_v1 }
 0x15e   : > { %1741 = vtanh.f32 %v1171_v6  ;;  %v1172_v10 = vmul.f32 0.7978846, %v1164_v7  ;;  %v1167_v11 = vadd.f32 %v1159_v8, %v1127_v59  ;;  %v1160_v12 = vmul.f32 %v1152_v9, %v1128_v1 }
 0x160   : > { %1743 = vtanh.f32 %v1172_v10  ;;  %v1175_v13 = vmul.f32 0.7978846, %v1167_v11  ;;  %v1168_v14 = vadd.f32 %v1160_v12, %v1128_v1 }
 0x162   : > { %1745 = vtanh.f32 %v1175_v13  ;;  %v1176_v15 = vmul.f32 0.7978846, %v1168_v14 }
 0x164   : > { %1747 = vtanh.f32 %v1176_v15 }
 0x16b   : > { %v1742_v17 = vpop.eup %1741 }
 0x16c   : > { %v1187_v18 = vadd.f32 1.0, %v1742_v17 }
 0x16d   : > { %v1744_v20 = vpop.eup %1743 }
 0x16e   : > { %v1188_v22 = vadd.f32 1.0, %v1744_v20  ;;  %v1195_v27 = vmul.f32 %v1187_v18, %v1131_v0 }
 0x16f   : > { %v1746_v24 = vpop.eup %1745  ;;  %v1065_v26 = vpop.f32.mrf.mxu0 }
 0x170   : > { %v1022_v25 = vpop.f32.mrf.mxu1  ;;  %v1196_v28 = vmul.f32 %v1188_v22, %v1132_v21  ;;  %v1191_v31 = vadd.f32 1.0, %v1746_v24 }
 0x171   : > { %v1066_v29 = vadd.f32 %v1065_v26, %v1022_v25  ;;  %v1067_v33 = vpop.f32.mrf.mxu0  ;;  %v1748_v34 = vpop.eup %1747 }
 0x172   : > { %v1024_v32 = vpop.f32.mrf.mxu1  ;;  %v1499_v36 = vpack.c.bf16 %v1196_v28, %v1195_v27  ;;  %v1192_v42 = vadd.f32 1.0, %v1748_v34  ;;  %v1199_v47 = vmul.f32 %v1191_v31, %v1135_v39 }
 0x173   : > { %v1125_v37 = vadd.f32 %v1114_v23, %v1066_v29  ;;  %v1068_v38 = vadd.f32 %v1067_v33, %v1024_v32  ;;  %v1069_v44 = vpop.f32.mrf.mxu0 }
 0x174   : > { %v1026_v43 = vpop.f32.mrf.mxu1  ;;  %1227 = vst [vmem:[%s2218_s27] sm:$0xff] %v1499_v36  ;;  %v1200_v48 = vmul.f32 %v1192_v42, %v1136_v40 }
 0x175   : > { %v1141_v45 = vmul.f32 0.044715, %v1125_v37  ;;  %v1126_v46 = vadd.f32 %v1118_v30, %v1068_v38  ;;  %v1070_v41 = vadd.f32 %v1069_v44, %v1026_v43  ;;  %v1071_v50 = vpop.f32.mrf.mxu0  ;;  %v1133_v13 = vmul.f32 0.5, %v1125_v37 }
 0x176   : > { %v1028_v49 = vpop.f32.mrf.mxu1  ;;  %v1501_v53 = vpack.c.bf16 %v1200_v48, %v1199_v47 }
 0x177   : > { %v1149_v35 = vmul.f32 %v1141_v45, %v1125_v37  ;;  %v1142_v51 = vmul.f32 0.044715, %v1126_v46  ;;  %v1129_v52 = vadd.f32 %v1114_v23, %v1070_v41  ;;  %v1072_v54 = vadd.f32 %v1071_v50, %v1028_v49 }
 0x178   : > { %1229 = vst [vmem:[%s2218_s27 + $0x10] sm:$0xff] %v1501_v53  ;;  %v1134_v14 = vmul.f32 0.5, %v1126_v46 }
 0x179   : > { %v1157_v55 = vmul.f32 %v1149_v35, %v1125_v37  ;;  %v1150_v56 = vmul.f32 %v1142_v51, %v1126_v46  ;;  %v1145_v57 = vmul.f32 0.044715, %v1129_v52  ;;  %v1130_v58 = vadd.f32 %v1118_v30, %v1072_v54 }
 0x17a   : > { %v1137_v21 = vmul.f32 0.5, %v1129_v52 }
 0x17b   : > { %v1165_v59 = vadd.f32 %v1157_v55, %v1125_v37  ;;  %v1158_v60 = vmul.f32 %v1150_v56, %v1126_v46  ;;  %v1153_v61 = vmul.f32 %v1145_v57, %v1129_v52  ;;  %v1146_v62 = vmul.f32 0.044715, %v1130_v58 }
 0x17c   : > { %v1138_v22 = vmul.f32 0.5, %v1130_v58 }
 0x17d   : > { %v1173_v63 = vmul.f32 0.7978846, %v1165_v59  ;;  %v1166_v1 = vadd.f32 %v1158_v60, %v1126_v46  ;;  %v1161_v2 = vmul.f32 %v1153_v61, %v1129_v52  ;;  %v1154_v3 = vmul.f32 %v1146_v62, %v1130_v58 }
 0x17f   : > { %1749 = vtanh.f32 %v1173_v63  ;;  %v1174_v4 = vmul.f32 0.7978846, %v1166_v1  ;;  %v1169_v5 = vadd.f32 %v1161_v2, %v1129_v52  ;;  %v1162_v6 = vmul.f32 %v1154_v3, %v1130_v58 }
 0x181   : > { %1751 = vtanh.f32 %v1174_v4  ;;  %v1177_v7 = vmul.f32 0.7978846, %v1169_v5  ;;  %v1170_v8 = vadd.f32 %v1162_v6, %v1130_v58 }
 0x183   : > { %1753 = vtanh.f32 %v1177_v7  ;;  %v1178_v9 = vmul.f32 0.7978846, %v1170_v8 }
 0x185   : > { %1755 = vtanh.f32 %v1178_v9 }
 0x18c   : > { %v1750_v10 = vpop.eup %1749 }
 0x18d   : > { %v1189_v11 = vadd.f32 1.0, %v1750_v10 }
 0x18e   : > { %v1752_v12 = vpop.eup %1751 }
 0x18f   : > { %v1190_v15 = vadd.f32 1.0, %v1752_v12  ;;  %v1197_v17 = vmul.f32 %v1189_v11, %v1133_v13 }
 0x190   : > { %v1754_v16 = vpop.eup %1753 }
 0x191   : > { %v1198_v18 = vmul.f32 %v1190_v15, %v1134_v14  ;;  %v1193_v19 = vadd.f32 1.0, %v1754_v16 }
 0x192   : > { %v1756_v20 = vpop.eup %1755 }
 0x193   : > { %v1500_v0 = vpack.c.bf16 %v1198_v18, %v1197_v17  ;;  %v1194_v23 = vadd.f32 1.0, %v1756_v20  ;;  %v1201_v24 = vmul.f32 %v1193_v19, %v1137_v21 }
 0x195   : > { %1228 = vst [vmem:[%s2218_s27 + $0x8] sm:$0xff] %v1500_v0  ;;  %v1202_v25 = vmul.f32 %v1194_v23, %v1138_v22 }
 0x197   : > { %v1502_v26 = vpack.c.bf16 %v1202_v25, %v1201_v24 }
 0x199   : > { %1230 = vst [vmem:[%s2218_s27 + $0x18] sm:$0xff] %v1502_v26 }
 0x19a   : > { %1852 = shalt.err (!%p1849_p4)
}
 0x19b   : > { %s1853_s29 = scalar_lea.hbm %s2228_s8, 512  ;;  %s1857_s5 = scalar_lea.hbm %s2281_s3, 1536 }
 0x19c   : > { %p1854_p7 = scmp.ne.s32.totalorder %s2228_s8, %s1853_s29  ;;  %p1858_p9 = scmp.lt.s32.totalorder %s2228_s8, %s2281_s3 }
 0x19d   : > { %p1859_p10 = scmp.lt.s32.totalorder %s1857_s5, %s1853_s29 }
 0x19e   : > { %p1855_p3 = pnand %p1854_p7, %p2294_p8 }
 0x19f   : > { %p1860_p11 = por %p1859_p10, %p1858_p9 }
 0x1a0   : > { %p1856_p5 = pneg %p1855_p3 }
 0x1a2   : > { %p1861_p6 = pnand %p1860_p11, %p1856_p5 }
 0x1a4   : > { %1864 = shalt.err (!%p1861_p6)
}
 0x1a5   : > { %s1935_s27 = smov 256   ;;  %s1936_s10 = smov 768  }
 0x1a6   : > { %s1937_s6 = smov 16  }
 0x1a7   : > { %1514 = dma.vmem_to_hbm [thread:$0]  (%p2294_p8), %s2230_s19, 512, %s2228_s8, %s1232_s15, %s1935_s27, %s1936_s10, %s1937_s6  }
 0x1a8 PF: > { %p1534_p13 = scmp.ge.s32.totalorder %s1923_s17, 2  ;;  %s1263_s4 = sand.u32 1, %s1903_s12  }
 0x1a9   : > { %p2295_p1 = scmp.ne.s32.totalorder %s2288_s26, 0  ;;  %s1264_s9 = scalar_lea.sflag [#allocation5], %s1263_s4 }
 0x1ab   : > { %p1528_p12 = pnand %p1534_p13, %p2295_p1 }
 0x1ad   : > { %p1529_p0 = pneg %p1528_p12 }
 0x1af   : > { %1898 = dma.done.wait (%p1529_p0), %s1264_s9, 512  }
 0x1b0   : > { %1900 = vsyncadd (%p1529_p0), %s1264_s9, 4294966784  ;;  %s20_s17 = sadd.s32 1, %s1923_s17   ;;  %s2296_s12 = smov %s1907_s13 }
 0x1b1   : > { %p17_p2 = scmp.ge.s32.totalorder %s20_s17, 5   ;;  %s2297_s13 = smov %s1911_s14 }
 0x1b2   : > { %s2298_s14 = smov %s2005_s24  ;;  %s2299_s15 = smov %s1919_s16 }
 0x1b3   : > { %s2300_s16 = smov %s2302_s18  ;;  %19 = sbr.rel (!%p17_p2) target bundleno = 7 (0x7), region = 102 }
 0x1b8   :  { %1269 = vsyncpa [#allocation4], 1 }
 0x1b9   :  { %1271 = vsyncpa [#allocation4 + $0x1], 1 }
 0x1ba   :  { %1272 = vsyncpa [#allocation7], 1 }
 0x1bb   :  { %1274 = vsyncpa [#allocation7 + $0x1], 1 }
 0x1bc   :  { %1275 = vsyncpa [#allocation5], 1 }
 0x1bd   :  { %1277 = vsyncpa [#allocation5 + $0x1], 1 }

</bundles_post_ra>
